<compile_context>
chip_gen: v6e
topology: v6e:2x2x1
jax: 0.10.0
libtpu: 0.0.40
codegen_flags: <defaults>
</compile_context>

<pallas_src>
import math

import jax
import jax.numpy as jnp
from jax.experimental import pallas as pl
from jax.experimental.pallas import tpu as pltpu


# ------------------------------ configuration ------------------------------
EMBED_DIM = 32          # joint image/text embedding dim
IMAGE_SIZE = 16
PATCH = 8
IN_CH = 3
VISION_WIDTH = 32
VISION_LAYERS = 2
VISION_HEADS = 4
CONTEXT_LEN = 16        # text context length
TEXT_WIDTH = 32         # ctx_dim / transformer width
TEXT_LAYERS = 2
TEXT_HEADS = 4
N_CLS = 3               # number of class names
N_CTX = 4               # args.N_CTX (learned context tokens)
EOT_TOKEN_ID = 49407

# Kernel output is a (B, OUT_LANES) slab so the final store is lane-dense
# (>=128 lanes, unmasked vst); the wrapper slices the real (B, n_cls) logits.
OUT_LANES = 128

# MXU input dtype: float32 matches the PyTorch module bit-for-bit; set to
# jnp.bfloat16 on v6e/v7x for MXU-native inputs (accumulation stays float32).
MATMUL_DTYPE = jnp.float32

# per-block parameter ordering used when flattening params into kernel args
BLOCK_KEYS = ("ln1_g", "ln1_b", "attn_in_w", "attn_in_b", "attn_out_w", "attn_out_b",
              "ln2_g", "ln2_b", "mlp_fc_w", "mlp_fc_b", "mlp_proj_w", "mlp_proj_b")


# ------------------------------ small helpers -------------------------------

def _as2d(a):
    """1-D params (LN scales, biases) -> (1, N) so they broadcast in-kernel."""
    return a.reshape(1, -1) if a.ndim == 1 else a


def _rep_spec(shape):
    """Whole-array block, same block at every grid step (weights / params)."""
    zeros = (0,) * len(shape)
    return pl.BlockSpec(shape, lambda i, _z=zeros: _z)


def _unpack_blocks(refs, start, n_layers):
    blocks = []
    i = start
    for _ in range(n_layers):
        blocks.append(dict(zip(BLOCK_KEYS, refs[i:i + len(BLOCK_KEYS)])))
        i += len(BLOCK_KEYS)
    return blocks, i


# --------------------------- in-kernel math helpers --------------------------

def _mm(a, b):
    """a @ b on the MXU with f32 accumulation (inputs castable to bf16)."""
    return jnp.dot(a.astype(MATMUL_DTYPE), b.astype(MATMUL_DTYPE),
                   preferred_element_type=jnp.float32)


def _mmt(a, b):
    """a @ b.T via dot_general's transposed-RHS contraction (no relayout)."""
    return jax.lax.dot_general(a.astype(MATMUL_DTYPE), b.astype(MATMUL_DTYPE),
                               (((1,), (1,)), ((), ())),
                               preferred_element_type=jnp.float32)


def _layer_norm(x, g, b, eps=1e-5):
    mu = jnp.mean(x, axis=-1, keepdims=True)
    var = jnp.mean(jnp.square(x - mu), axis=-1, keepdims=True)
    return (x - mu) * jax.lax.rsqrt(var + eps) * g + b


def _quick_gelu(x):
    return x * jax.nn.sigmoid(1.702 * x)


def _residual_block(x, blk, mask, n_heads):
    """One CLIP ResidualAttentionBlock on a flattened (n_batch*seq, width) slab.

    `mask` is a (N, N) additive mask that encodes both the per-image/per-class
    block-diagonal structure and (for text) causality, so one matmul per head
    covers the whole batch.  Everything is a value; no scratch refs.
    """
    width = x.shape[-1]
    d_head = width // n_heads
    scale = d_head ** -0.5

    # --- multi-head self-attention (pre-LN) ---
    h = _layer_norm(x, blk["ln1_g"][...], blk["ln1_b"][...])
    qkv = _mm(h, blk["attn_in_w"][...]) + blk["attn_in_b"][...]     # (N, 3*width)

    heads = []
    for hh in range(n_heads):                                       # 4 unrolled iters
        c0 = hh * d_head
        q = qkv[:, c0:c0 + d_head]                                  # value lane-slices
        k = qkv[:, width + c0:width + c0 + d_head]
        v = qkv[:, 2 * width + c0:2 * width + c0 + d_head]
        s = _mmt(q, k) * scale + mask                               # (N, N)
        s = s - jnp.max(s, axis=-1, keepdims=True)
        p = jnp.exp(s)
        p = p / jnp.sum(p, axis=-1, keepdims=True)                  # exact softmax
        heads.append(_mm(p, v))                                     # (N, d_head)
    attn = jnp.concatenate(heads, axis=-1)                          # (N, width)
    x = x + _mm(attn, blk["attn_out_w"][...]) + blk["attn_out_b"][...]

    # --- MLP (pre-LN, QuickGELU) ---
    h2 = _layer_norm(x, blk["ln2_g"][...], blk["ln2_b"][...])
    h2 = _mm(h2, blk["mlp_fc_w"][...]) + blk["mlp_fc_b"][...]
    h2 = _quick_gelu(h2)
    h2 = _mm(h2, blk["mlp_proj_w"][...]) + blk["mlp_proj_b"][...]
    return x + h2


# ------------------------------- fused kernel --------------------------------

def _coop_clip_kernel(*refs):
    (a_v, conv_w, pos_v, ln_pre_g, ln_pre_b) = refs[:5]
    v_blocks, i = _unpack_blocks(refs, 5, VISION_LAYERS)
    (ln_post_g, ln_post_b, vis_proj, cls_sel, mask_v) = refs[i:i + 5]
    i += 5
    (prompts, pos_t) = refs[i:i + 2]
    i += 2
    t_blocks, i = _unpack_blocks(refs, i, TEXT_LAYERS)
    (ln_final_g, ln_final_b, eot_sel, text_proj, mask_t) = refs[i:i + 5]
    i += 5
    scale_ref = refs[i]
    o_ref = refs[i + 1]

    # ---------------- vision tower (whole batch, tokens flattened) -----------
    # patch-embed conv as one matmul (CLS rows of a_v are zero), then
    # [class|positional] embeddings added in a single VPU add.
    xv = _mm(a_v[...], conv_w[...]) + pos_v[...]
    xv = _layer_norm(xv, ln_pre_g[...], ln_pre_b[...])
    mv = mask_v[...]
    for blk in v_blocks:
        xv = _residual_block(xv, blk, mv, VISION_HEADS)
    cls_tok = jnp.dot(cls_sel[...], xv, preferred_element_type=jnp.float32)   # CLS rows
    cls_tok = _layer_norm(cls_tok, ln_post_g[...], ln_post_b[...])
    img = jnp.dot(cls_tok, vis_proj[...], preferred_element_type=jnp.float32)  # (B, E)

    # ---------------- text tower (all classes, tokens flattened) -------------
    xt = prompts[...] + pos_t[...]                       # single positional add
    mt = mask_t[...]
    for blk in t_blocks:
        xt = _residual_block(xt, blk, mt, TEXT_HEADS)
    xt = _layer_norm(xt, ln_final_g[...], ln_final_b[...])
    eot = jnp.dot(eot_sel[...], xt, preferred_element_type=jnp.float32)        # EOT gather
    txt = jnp.dot(eot, text_proj[...], preferred_element_type=jnp.float32)     # (C, E)

    # ---------------- CLIP head: L2-normalize + scaled cosine logits ---------
    img_n = img * jax.lax.rsqrt(jnp.sum(img * img, axis=-1, keepdims=True))
    txt_n = txt * jax.lax.rsqrt(jnp.sum(txt * txt, axis=-1, keepdims=True))
    logits = scale_ref[0] * jax.lax.dot_general(
        img_n, txt_n, (((1,), (1,)), ((), ())), preferred_element_type=jnp.float32)
    pad = jnp.zeros((logits.shape[0], o_ref.shape[1] - logits.shape[1]), jnp.float32)
    o_ref[...] = jnp.concatenate([logits, pad], axis=-1)   # lane-dense (B, 128) store


# ------------------------------ prompt learner -------------------------------

def prompt_learner_forward(pp):
    """class_token_position == 'end': prompts = cat([prefix, ctx, suffix], dim=1)."""
    ctx = pp["ctx"]                                   # generic context (n_ctx, D)
    n_cls = pp["token_prefix"].shape[0]
    ctx = jnp.broadcast_to(ctx[None], (n_cls,) + ctx.shape)
    return jnp.concatenate([pp["token_prefix"], ctx, pp["token_suffix"]], axis=1)


# --------------------------------- COOPCLIP ---------------------------------

def coop_clip_forward(image, params):
    vp, tp, pp = params["visual"], params["text"], params["prompt"]
    B, C, H, W = image.shape
    p = PATCH
    gh, gw = H // p, W // p
    n_patch = gh * gw
    Sv = n_patch + 1
    pdim = C * p * p

    image = image.astype(jnp.float32)

    # ---- pure-layout prep for the vision tower (im2col + structural zeros);
    #      the conv matmul and everything downstream run inside the kernel ----
    patches = image.reshape(B, C, gh, p, gw, p).transpose(0, 2, 4, 1, 3, 5)
    patches = patches.reshape(B, n_patch, pdim)
    a_v = jnp.concatenate([jnp.zeros((B, 1, pdim), jnp.float32), patches], axis=1)
    a_v = a_v.reshape(B * Sv, pdim)                              # CLS rows are zero
    # positional embedding tiled per image; class embedding folded into CLS rows
    pos_v = jnp.tile(vp["pos_emb"].at[0].add(vp["class_emb"]), (B, 1))
    # CLS-row selector and per-image block-diagonal attention mask
    cls_sel = jax.nn.one_hot(jnp.arange(B) * Sv, B * Sv, dtype=jnp.float32)
    rv = jnp.arange(B * Sv)
    mask_v = jnp.where((rv[:, None] // Sv) == (rv[None, :] // Sv),
                       0.0, -1e9).astype(jnp.float32)

    # ---- prompt learner ('end' position) + text-side layout prep ----
    prompts = prompt_learner_forward(pp)                         # (C, L, D)
    Ccls, L, Dt = prompts.shape
    prompts2d = prompts.reshape(Ccls * L, Dt).astype(jnp.float32)
    pos_t = jnp.tile(tp["pos_emb"], (Ccls, 1))
    eot_pos = jnp.argmax(pp["tokenized_prompts"], axis=-1)       # (C,)
    eot_sel = jax.nn.one_hot(jnp.arange(Ccls) * L + eot_pos, Ccls * L,
                             dtype=jnp.float32)
    rt = jnp.arange(Ccls * L)
    same_cls = (rt[:, None] // L) == (rt[None, :] // L)
    causal = rt[None, :] <= rt[:, None]
    mask_t = jnp.where(same_cls & causal, 0.0, -1e9).astype(jnp.float32)

    logit_scale = jnp.exp(params["logit_scale"]).astype(jnp.float32)

    # ---- flatten all parameters into kernel args (order must match kernel) ----
    args = [a_v, vp["conv_w"], pos_v, _as2d(vp["ln_pre_g"]), _as2d(vp["ln_pre_b"])]
    for blk in vp["blocks"]:
        args += [_as2d(blk[k]) for k in BLOCK_KEYS]
    args += [_as2d(vp["ln_post_g"]), _as2d(vp["ln_post_b"]), vp["proj"], cls_sel, mask_v]
    args += [prompts2d, pos_t]
    for blk in tp["blocks"]:
        args += [_as2d(blk[k]) for k in BLOCK_KEYS]
    args += [_as2d(tp["ln_final_g"]), _as2d(tp["ln_final_b"]), eot_sel,
             tp["text_projection"], mask_t]

    in_specs = [_rep_spec(a.shape) for a in args]

    # scalar logit scale lives in SMEM
    args.append(logit_scale.reshape(1))
    in_specs.append(pl.BlockSpec(memory_space=pltpu.MemorySpace.SMEM))

    out = pl.pallas_call(
        _coop_clip_kernel,
        grid=(1,),
        in_specs=in_specs,
        out_specs=pl.BlockSpec((B, OUT_LANES), lambda i: (0, 0)),
        out_shape=jax.ShapeDtypeStruct((B, OUT_LANES), jnp.float32),
        compiler_params=pltpu.CompilerParams(dimension_semantics=("arbitrary",)),
    )(*args)

    logits = out[:, :Ccls]
    return logit_scale, logits


# --------------------------------- init -------------------------------------

def init_params(key):
    keys = iter(jax.random.split(key, 64))

    def nrm(shape, std=0.02):
        return (std * jax.random.normal(next(keys), shape)).astype(jnp.float32)

    def init_block(width):
        return dict(
            ln1_g=jnp.ones((width,), jnp.float32), ln1_b=jnp.zeros((width,), jnp.float32),
            attn_in_w=nrm((width, 3 * width)), attn_in_b=jnp.zeros((3 * width,), jnp.float32),
            attn_out_w=nrm((width, width)), attn_out_b=jnp.zeros((width,), jnp.float32),
            ln2_g=jnp.ones((width,), jnp.float32), ln2_b=jnp.zeros((width,), jnp.float32),
            mlp_fc_w=nrm((width, 4 * width)), mlp_fc_b=jnp.zeros((4 * width,), jnp.float32),
            mlp_proj_w=nrm((4 * width, width)), mlp_proj_b=jnp.zeros((width,), jnp.float32),
        )

    n_patches = (IMAGE_SIZE // PATCH) ** 2
    visual = dict(
        conv_w=nrm((IN_CH * PATCH * PATCH, VISION_WIDTH)),
        class_emb=nrm((VISION_WIDTH,)),
        pos_emb=nrm((n_patches + 1, VISION_WIDTH)),
        ln_pre_g=jnp.ones((VISION_WIDTH,), jnp.float32),
        ln_pre_b=jnp.zeros((VISION_WIDTH,), jnp.float32),
        blocks=[init_block(VISION_WIDTH) for _ in range(VISION_LAYERS)],
        ln_post_g=jnp.ones((VISION_WIDTH,), jnp.float32),
        ln_post_b=jnp.zeros((VISION_WIDTH,), jnp.float32),
        proj=nrm((VISION_WIDTH, EMBED_DIM)),
    )

    text = dict(
        pos_emb=nrm((CONTEXT_LEN, TEXT_WIDTH)),
        blocks=[init_block(TEXT_WIDTH) for _ in range(TEXT_LAYERS)],
        ln_final_g=jnp.ones((TEXT_WIDTH,), jnp.float32),
        ln_final_b=jnp.zeros((TEXT_WIDTH,), jnp.float32),
        text_projection=nrm((TEXT_WIDTH, EMBED_DIM)),
    )

    # TODO(synk): real CoOp derives token_prefix/token_suffix from the CLIP
    # tokenizer + token_embedding lookup; here those frozen buffers are
    # initialized deterministically instead (no tokenizer available in-script).
    n_suffix = CONTEXT_LEN - 1 - N_CTX
    eot_positions = jnp.array([6, 7, 8], dtype=jnp.int32)   # one EOT slot per class
    tokenized = jnp.zeros((N_CLS, CONTEXT_LEN), jnp.int32)
    tokenized = tokenized.at[jnp.arange(N_CLS), eot_positions].set(EOT_TOKEN_ID)
    prompt = dict(
        ctx=nrm((N_CTX, TEXT_WIDTH)),                      # generic context, std=0.02
        token_prefix=nrm((N_CLS, 1, TEXT_WIDTH)),          # SOS embedding buffer
        token_suffix=nrm((N_CLS, n_suffix, TEXT_WIDTH)),   # class+EOS embedding buffer
        tokenized_prompts=tokenized,
    )

    return dict(
        visual=visual,
        text=text,
        prompt=prompt,
        logit_scale=jnp.asarray(math.log(1.0 / 0.07), jnp.float32),
    )


# ----------------------------------- main ------------------------------------

if __name__ == "__main__":
    key = jax.random.PRNGKey(0)
    pkey, ikey = jax.random.split(key)
    params = init_params(pkey)

    # image layout: NCHW, matching the PyTorch module's input convention
    image = jax.random.normal(ikey, (2, IN_CH, IMAGE_SIZE, IMAGE_SIZE), jnp.float32)

    fwd = jax.jit(coop_clip_forward)
    logit_scale, logits = fwd(image, params)
    (logit_scale, logits) = jax.block_until_ready((logit_scale, logits))

    assert logits.shape == (2, N_CLS), logits.shape
    assert logits.dtype == jnp.float32
    assert bool(jnp.all(jnp.isfinite(logits)))
    assert bool(jnp.isfinite(logit_scale))
    print("KERNEL_OK")
</pallas_src>

<mosaic_0001>
module attributes {stable_mosaic.version = 11 : i64} {
  func.func @_coop_clip_kernel(%arg0: i32, %arg1: memref<10x192xf32, #tpu.memory_space<vmem>>, %arg2: memref<192x32xf32, #tpu.memory_space<vmem>>, %arg3: memref<10x32xf32, #tpu.memory_space<vmem>>, %arg4: memref<1x32xf32, #tpu.memory_space<vmem>>, %arg5: memref<1x32xf32, #tpu.memory_space<vmem>>, %arg6: memref<1x32xf32, #tpu.memory_space<vmem>>, %arg7: memref<1x32xf32, #tpu.memory_space<vmem>>, %arg8: memref<32x96xf32, #tpu.memory_space<vmem>>, %arg9: memref<1x96xf32, #tpu.memory_space<vmem>>, %arg10: memref<32x32xf32, #tpu.memory_space<vmem>>, %arg11: memref<1x32xf32, #tpu.memory_space<vmem>>, %arg12: memref<1x32xf32, #tpu.memory_space<vmem>>, %arg13: memref<1x32xf32, #tpu.memory_space<vmem>>, %arg14: memref<32x128xf32, #tpu.memory_space<vmem>>, %arg15: memref<1x128xf32, #tpu.memory_space<vmem>>, %arg16: memref<128x32xf32, #tpu.memory_space<vmem>>, %arg17: memref<1x32xf32, #tpu.memory_space<vmem>>, %arg18: memref<1x32xf32, #tpu.memory_space<vmem>>, %arg19: memref<1x32xf32, #tpu.memory_space<vmem>>, %arg20: memref<32x96xf32, #tpu.memory_space<vmem>>, %arg21: memref<1x96xf32, #tpu.memory_space<vmem>>, %arg22: memref<32x32xf32, #tpu.memory_space<vmem>>, %arg23: memref<1x32xf32, #tpu.memory_space<vmem>>, %arg24: memref<1x32xf32, #tpu.memory_space<vmem>>, %arg25: memref<1x32xf32, #tpu.memory_space<vmem>>, %arg26: memref<32x128xf32, #tpu.memory_space<vmem>>, %arg27: memref<1x128xf32, #tpu.memory_space<vmem>>, %arg28: memref<128x32xf32, #tpu.memory_space<vmem>>, %arg29: memref<1x32xf32, #tpu.memory_space<vmem>>, %arg30: memref<1x32xf32, #tpu.memory_space<vmem>>, %arg31: memref<1x32xf32, #tpu.memory_space<vmem>>, %arg32: memref<32x32xf32, #tpu.memory_space<vmem>>, %arg33: memref<2x10xf32, #tpu.memory_space<vmem>>, %arg34: memref<10x10xf32, #tpu.memory_space<vmem>>, %arg35: memref<48x32xf32, #tpu.memory_space<vmem>>, %arg36: memref<48x32xf32, #tpu.memory_space<vmem>>, %arg37: memref<1x32xf32, #tpu.memory_space<vmem>>, %arg38: memref<1x32xf32, #tpu.memory_space<vmem>>, %arg39: memref<32x96xf32, #tpu.memory_space<vmem>>, %arg40: memref<1x96xf32, #tpu.memory_space<vmem>>, %arg41: memref<32x32xf32, #tpu.memory_space<vmem>>, %arg42: memref<1x32xf32, #tpu.memory_space<vmem>>, %arg43: memref<1x32xf32, #tpu.memory_space<vmem>>, %arg44: memref<1x32xf32, #tpu.memory_space<vmem>>, %arg45: memref<32x128xf32, #tpu.memory_space<vmem>>, %arg46: memref<1x128xf32, #tpu.memory_space<vmem>>, %arg47: memref<128x32xf32, #tpu.memory_space<vmem>>, %arg48: memref<1x32xf32, #tpu.memory_space<vmem>>, %arg49: memref<1x32xf32, #tpu.memory_space<vmem>>, %arg50: memref<1x32xf32, #tpu.memory_space<vmem>>, %arg51: memref<32x96xf32, #tpu.memory_space<vmem>>, %arg52: memref<1x96xf32, #tpu.memory_space<vmem>>, %arg53: memref<32x32xf32, #tpu.memory_space<vmem>>, %arg54: memref<1x32xf32, #tpu.memory_space<vmem>>, %arg55: memref<1x32xf32, #tpu.memory_space<vmem>>, %arg56: memref<1x32xf32, #tpu.memory_space<vmem>>, %arg57: memref<32x128xf32, #tpu.memory_space<vmem>>, %arg58: memref<1x128xf32, #tpu.memory_space<vmem>>, %arg59: memref<128x32xf32, #tpu.memory_space<vmem>>, %arg60: memref<1x32xf32, #tpu.memory_space<vmem>>, %arg61: memref<1x32xf32, #tpu.memory_space<vmem>>, %arg62: memref<1x32xf32, #tpu.memory_space<vmem>>, %arg63: memref<3x48xf32, #tpu.memory_space<vmem>>, %arg64: memref<32x32xf32, #tpu.memory_space<vmem>>, %arg65: memref<48x48xf32, #tpu.memory_space<vmem>>, %arg66: memref<1xf32, #tpu.memory_space<smem>>, %arg67: memref<2x128xf32, #tpu.memory_space<vmem>>) attributes {dimension_semantics = [#tpu.dimension_semantics<arbitrary>], iteration_bounds = array<i64: 1>, scalar_prefetch = 0 : i64, scratch_operands = 0 : i64, tpu.core_type = #tpu.core_type<tc>, window_params = [{pipeline_mode = #tpu.pipeline_mode<synchronous>, transform_indices = @transform_0, window_bounds = array<i64: 10, 192>}, {pipeline_mode = #tpu.pipeline_mode<synchronous>, transform_indices = @transform_1, window_bounds = array<i64: 192, 32>}, {pipeline_mode = #tpu.pipeline_mode<synchronous>, transform_indices = @transform_2, window_bounds = array<i64: 10, 32>}, {pipeline_mode = #tpu.pipeline_mode<synchronous>, transform_indices = @transform_3, window_bounds = array<i64: 1, 32>}, {pipeline_mode = #tpu.pipeline_mode<synchronous>, transform_indices = @transform_4, window_bounds = array<i64: 1, 32>}, {pipeline_mode = #tpu.pipeline_mode<synchronous>, transform_indices = @transform_5, window_bounds = array<i64: 1, 32>}, {pipeline_mode = #tpu.pipeline_mode<synchronous>, transform_indices = @transform_6, window_bounds = array<i64: 1, 32>}, {pipeline_mode = #tpu.pipeline_mode<synchronous>, transform_indices = @transform_7, window_bounds = array<i64: 32, 96>}, {pipeline_mode = #tpu.pipeline_mode<synchronous>, transform_indices = @transform_8, window_bounds = array<i64: 1, 96>}, {pipeline_mode = #tpu.pipeline_mode<synchronous>, transform_indices = @transform_9, window_bounds = array<i64: 32, 32>}, {pipeline_mode = #tpu.pipeline_mode<synchronous>, transform_indices = @transform_10, window_bounds = array<i64: 1, 32>}, {pipeline_mode = #tpu.pipeline_mode<synchronous>, transform_indices = @transform_11, window_bounds = array<i64: 1, 32>}, {pipeline_mode = #tpu.pipeline_mode<synchronous>, transform_indices = @transform_12, window_bounds = array<i64: 1, 32>}, {pipeline_mode = #tpu.pipeline_mode<synchronous>, transform_indices = @transform_13, window_bounds = array<i64: 32, 128>}, {pipeline_mode = #tpu.pipeline_mode<synchronous>, transform_indices = @transform_14, window_bounds = array<i64: 1, 128>}, {pipeline_mode = #tpu.pipeline_mode<synchronous>, transform_indices = @transform_15, window_bounds = array<i64: 128, 32>}, {pipeline_mode = #tpu.pipeline_mode<synchronous>, transform_indices = @transform_16, window_bounds = array<i64: 1, 32>}, {pipeline_mode = #tpu.pipeline_mode<synchronous>, transform_indices = @transform_17, window_bounds = array<i64: 1, 32>}, {pipeline_mode = #tpu.pipeline_mode<synchronous>, transform_indices = @transform_18, window_bounds = array<i64: 1, 32>}, {pipeline_mode = #tpu.pipeline_mode<synchronous>, transform_indices = @transform_19, window_bounds = array<i64: 32, 96>}, {pipeline_mode = #tpu.pipeline_mode<synchronous>, transform_indices = @transform_20, window_bounds = array<i64: 1, 96>}, {pipeline_mode = #tpu.pipeline_mode<synchronous>, transform_indices = @transform_21, window_bounds = array<i64: 32, 32>}, {pipeline_mode = #tpu.pipeline_mode<synchronous>, transform_indices = @transform_22, window_bounds = array<i64: 1, 32>}, {pipeline_mode = #tpu.pipeline_mode<synchronous>, transform_indices = @transform_23, window_bounds = array<i64: 1, 32>}, {pipeline_mode = #tpu.pipeline_mode<synchronous>, transform_indices = @transform_24, window_bounds = array<i64: 1, 32>}, {pipeline_mode = #tpu.pipeline_mode<synchronous>, transform_indices = @transform_25, window_bounds = array<i64: 32, 128>}, {pipeline_mode = #tpu.pipeline_mode<synchronous>, transform_indices = @transform_26, window_bounds = array<i64: 1, 128>}, {pipeline_mode = #tpu.pipeline_mode<synchronous>, transform_indices = @transform_27, window_bounds = array<i64: 128, 32>}, {pipeline_mode = #tpu.pipeline_mode<synchronous>, transform_indices = @transform_28, window_bounds = array<i64: 1, 32>}, {pipeline_mode = #tpu.pipeline_mode<synchronous>, transform_indices = @transform_29, window_bounds = array<i64: 1, 32>}, {pipeline_mode = #tpu.pipeline_mode<synchronous>, transform_indices = @transform_30, window_bounds = array<i64: 1, 32>}, {pipeline_mode = #tpu.pipeline_mode<synchronous>, transform_indices = @transform_31, window_bounds = array<i64: 32, 32>}, {pipeline_mode = #tpu.pipeline_mode<synchronous>, transform_indices = @transform_32, window_bounds = array<i64: 2, 10>}, {pipeline_mode = #tpu.pipeline_mode<synchronous>, transform_indices = @transform_33, window_bounds = array<i64: 10, 10>}, {pipeline_mode = #tpu.pipeline_mode<synchronous>, transform_indices = @transform_34, window_bounds = array<i64: 48, 32>}, {pipeline_mode = #tpu.pipeline_mode<synchronous>, transform_indices = @transform_35, window_bounds = array<i64: 48, 32>}, {pipeline_mode = #tpu.pipeline_mode<synchronous>, transform_indices = @transform_36, window_bounds = array<i64: 1, 32>}, {pipeline_mode = #tpu.pipeline_mode<synchronous>, transform_indices = @transform_37, window_bounds = array<i64: 1, 32>}, {pipeline_mode = #tpu.pipeline_mode<synchronous>, transform_indices = @transform_38, window_bounds = array<i64: 32, 96>}, {pipeline_mode = #tpu.pipeline_mode<synchronous>, transform_indices = @transform_39, window_bounds = array<i64: 1, 96>}, {pipeline_mode = #tpu.pipeline_mode<synchronous>, transform_indices = @transform_40, window_bounds = array<i64: 32, 32>}, {pipeline_mode = #tpu.pipeline_mode<synchronous>, transform_indices = @transform_41, window_bounds = array<i64: 1, 32>}, {pipeline_mode = #tpu.pipeline_mode<synchronous>, transform_indices = @transform_42, window_bounds = array<i64: 1, 32>}, {pipeline_mode = #tpu.pipeline_mode<synchronous>, transform_indices = @transform_43, window_bounds = array<i64: 1, 32>}, {pipeline_mode = #tpu.pipeline_mode<synchronous>, transform_indices = @transform_44, window_bounds = array<i64: 32, 128>}, {pipeline_mode = #tpu.pipeline_mode<synchronous>, transform_indices = @transform_45, window_bounds = array<i64: 1, 128>}, {pipeline_mode = #tpu.pipeline_mode<synchronous>, transform_indices = @transform_46, window_bounds = array<i64: 128, 32>}, {pipeline_mode = #tpu.pipeline_mode<synchronous>, transform_indices = @transform_47, window_bounds = array<i64: 1, 32>}, {pipeline_mode = #tpu.pipeline_mode<synchronous>, transform_indices = @transform_48, window_bounds = array<i64: 1, 32>}, {pipeline_mode = #tpu.pipeline_mode<synchronous>, transform_indices = @transform_49, window_bounds = array<i64: 1, 32>}, {pipeline_mode = #tpu.pipeline_mode<synchronous>, transform_indices = @transform_50, window_bounds = array<i64: 32, 96>}, {pipeline_mode = #tpu.pipeline_mode<synchronous>, transform_indices = @transform_51, window_bounds = array<i64: 1, 96>}, {pipeline_mode = #tpu.pipeline_mode<synchronous>, transform_indices = @transform_52, window_bounds = array<i64: 32, 32>}, {pipeline_mode = #tpu.pipeline_mode<synchronous>, transform_indices = @transform_53, window_bounds = array<i64: 1, 32>}, {pipeline_mode = #tpu.pipeline_mode<synchronous>, transform_indices = @transform_54, window_bounds = array<i64: 1, 32>}, {pipeline_mode = #tpu.pipeline_mode<synchronous>, transform_indices = @transform_55, window_bounds = array<i64: 1, 32>}, {pipeline_mode = #tpu.pipeline_mode<synchronous>, transform_indices = @transform_56, window_bounds = array<i64: 32, 128>}, {pipeline_mode = #tpu.pipeline_mode<synchronous>, transform_indices = @transform_57, window_bounds = array<i64: 1, 128>}, {pipeline_mode = #tpu.pipeline_mode<synchronous>, transform_indices = @transform_58, window_bounds = array<i64: 128, 32>}, {pipeline_mode = #tpu.pipeline_mode<synchronous>, transform_indices = @transform_59, window_bounds = array<i64: 1, 32>}, {pipeline_mode = #tpu.pipeline_mode<synchronous>, transform_indices = @transform_60, window_bounds = array<i64: 1, 32>}, {pipeline_mode = #tpu.pipeline_mode<synchronous>, transform_indices = @transform_61, window_bounds = array<i64: 1, 32>}, {pipeline_mode = #tpu.pipeline_mode<synchronous>, transform_indices = @transform_62, window_bounds = array<i64: 3, 48>}, {pipeline_mode = #tpu.pipeline_mode<synchronous>, transform_indices = @transform_63, window_bounds = array<i64: 32, 32>}, {pipeline_mode = #tpu.pipeline_mode<synchronous>, transform_indices = @transform_64, window_bounds = array<i64: 48, 48>}, {transform_indices = @transform_65, window_bounds = array<i64: 1>}, {pipeline_mode = #tpu.pipeline_mode<synchronous>, transform_indices = @transform_66, window_bounds = array<i64: 2, 128>}]} {
    %c0 = arith.constant 0 : index
    %c0_0 = arith.constant 0 : index
    %0 = vector.load %arg1[%c0, %c0_0] : memref<10x192xf32, #tpu.memory_space<vmem>>, vector<10x192xf32>
    %c0_1 = arith.constant 0 : index
    %c0_2 = arith.constant 0 : index
    %1 = vector.load %arg2[%c0_1, %c0_2] : memref<192x32xf32, #tpu.memory_space<vmem>>, vector<192x32xf32>
    %cst = arith.constant dense<0.000000e+00> : vector<10x32xf32>
    %2 = tpu.matmul %0, %1, %cst {dimension_numbers = #tpu.dot_dimension_numbers<[1], [0], [0], [1], [0, 0, 1, 1], [], []>} : vector<10x192xf32>, vector<192x32xf32>, vector<10x32xf32> -> vector<10x32xf32>
    %c0_3 = arith.constant 0 : index
    %c0_4 = arith.constant 0 : index
    %3 = vector.load %arg3[%c0_3, %c0_4] : memref<10x32xf32, #tpu.memory_space<vmem>>, vector<10x32xf32>
    %4 = arith.addf %2, %3 : vector<10x32xf32>
    %c0_5 = arith.constant 0 : index
    %c0_6 = arith.constant 0 : index
    %5 = vector.load %arg4[%c0_5, %c0_6] : memref<1x32xf32, #tpu.memory_space<vmem>>, vector<1x32xf32>
    %c0_7 = arith.constant 0 : index
    %c0_8 = arith.constant 0 : index
    %6 = vector.load %arg5[%c0_7, %c0_8] : memref<1x32xf32, #tpu.memory_space<vmem>>, vector<1x32xf32>
    %cst_9 = arith.constant dense<0.000000e+00> : vector<10xf32>
    %7 = vector.multi_reduction <add>, %4, %cst_9 [1] : vector<10x32xf32> to vector<10xf32>
    %8 = vector.shape_cast %7 : vector<10xf32> to vector<10x1xf32>
    %cst_10 = arith.constant 3.200000e+01 : f32
    %9 = vector.broadcast %cst_10 : f32 to vector<10x1xf32>
    %10 = arith.divf %8, %9 : vector<10x1xf32>
    %11 = vector.broadcast %10 : vector<10x1xf32> to vector<10x32xf32>
    %12 = arith.subf %4, %11 : vector<10x32xf32>
    %13 = arith.mulf %12, %12 : vector<10x32xf32>
    %cst_11 = arith.constant dense<0.000000e+00> : vector<10xf32>
    %14 = vector.multi_reduction <add>, %13, %cst_11 [1] : vector<10x32xf32> to vector<10xf32>
    %15 = vector.shape_cast %14 : vector<10xf32> to vector<10x1xf32>
    %cst_12 = arith.constant 3.200000e+01 : f32
    %16 = vector.broadcast %cst_12 : f32 to vector<10x1xf32>
    %17 = arith.divf %15, %16 : vector<10x1xf32>
    %18 = vector.broadcast %10 : vector<10x1xf32> to vector<10x32xf32>
    %19 = arith.subf %4, %18 : vector<10x32xf32>
    %cst_13 = arith.constant 9.99999974E-6 : f32
    %20 = vector.broadcast %cst_13 : f32 to vector<10x1xf32>
    %21 = arith.addf %17, %20 : vector<10x1xf32>
    %22 = math.rsqrt %21 : vector<10x1xf32>
    %23 = vector.broadcast %22 : vector<10x1xf32> to vector<10x32xf32>
    %24 = arith.mulf %19, %23 : vector<10x32xf32>
    %25 = vector.broadcast %5 : vector<1x32xf32> to vector<10x32xf32>
    %26 = arith.mulf %24, %25 : vector<10x32xf32>
    %27 = vector.broadcast %6 : vector<1x32xf32> to vector<10x32xf32>
    %28 = arith.addf %26, %27 : vector<10x32xf32>
    %c0_14 = arith.constant 0 : index
    %c0_15 = arith.constant 0 : index
    %29 = vector.load %arg34[%c0_14, %c0_15] : memref<10x10xf32, #tpu.memory_space<vmem>>, vector<10x10xf32>
    %c0_16 = arith.constant 0 : index
    %c0_17 = arith.constant 0 : index
    %30 = vector.load %arg6[%c0_16, %c0_17] : memref<1x32xf32, #tpu.memory_space<vmem>>, vector<1x32xf32>
    %c0_18 = arith.constant 0 : index
    %c0_19 = arith.constant 0 : index
    %31 = vector.load %arg7[%c0_18, %c0_19] : memref<1x32xf32, #tpu.memory_space<vmem>>, vector<1x32xf32>
    %cst_20 = arith.constant dense<0.000000e+00> : vector<10xf32>
    %32 = vector.multi_reduction <add>, %28, %cst_20 [1] : vector<10x32xf32> to vector<10xf32>
    %33 = vector.shape_cast %32 : vector<10xf32> to vector<10x1xf32>
    %cst_21 = arith.constant 3.200000e+01 : f32
    %34 = vector.broadcast %cst_21 : f32 to vector<10x1xf32>
    %35 = arith.divf %33, %34 : vector<10x1xf32>
    %36 = vector.broadcast %35 : vector<10x1xf32> to vector<10x32xf32>
    %37 = arith.subf %28, %36 : vector<10x32xf32>
    %38 = arith.mulf %37, %37 : vector<10x32xf32>
    %cst_22 = arith.constant dense<0.000000e+00> : vector<10xf32>
    %39 = vector.multi_reduction <add>, %38, %cst_22 [1] : vector<10x32xf32> to vector<10xf32>
    %40 = vector.shape_cast %39 : vector<10xf32> to vector<10x1xf32>
    %cst_23 = arith.constant 3.200000e+01 : f32
    %41 = vector.broadcast %cst_23 : f32 to vector<10x1xf32>
    %42 = arith.divf %40, %41 : vector<10x1xf32>
    %43 = vector.broadcast %35 : vector<10x1xf32> to vector<10x32xf32>
    %44 = arith.subf %28, %43 : vector<10x32xf32>
    %cst_24 = arith.constant 9.99999974E-6 : f32
    %45 = vector.broadcast %cst_24 : f32 to vector<10x1xf32>
    %46 = arith.addf %42, %45 : vector<10x1xf32>
    %47 = math.rsqrt %46 : vector<10x1xf32>
    %48 = vector.broadcast %47 : vector<10x1xf32> to vector<10x32xf32>
    %49 = arith.mulf %44, %48 : vector<10x32xf32>
    %50 = vector.broadcast %30 : vector<1x32xf32> to vector<10x32xf32>
    %51 = arith.mulf %49, %50 : vector<10x32xf32>
    %52 = vector.broadcast %31 : vector<1x32xf32> to vector<10x32xf32>
    %53 = arith.addf %51, %52 : vector<10x32xf32>
    %c0_25 = arith.constant 0 : index
    %c0_26 = arith.constant 0 : index
    %54 = vector.load %arg8[%c0_25, %c0_26] : memref<32x96xf32, #tpu.memory_space<vmem>>, vector<32x96xf32>
    %cst_27 = arith.constant dense<0.000000e+00> : vector<10x96xf32>
    %55 = tpu.matmul %53, %54, %cst_27 {dimension_numbers = #tpu.dot_dimension_numbers<[1], [0], [0], [1], [0, 0, 1, 1], [], []>} : vector<10x32xf32>, vector<32x96xf32>, vector<10x96xf32> -> vector<10x96xf32>
    %c0_28 = arith.constant 0 : index
    %c0_29 = arith.constant 0 : index
    %56 = vector.load %arg9[%c0_28, %c0_29] : memref<1x96xf32, #tpu.memory_space<vmem>>, vector<1x96xf32>
    %57 = vector.broadcast %56 : vector<1x96xf32> to vector<10x96xf32>
    %58 = arith.addf %55, %57 : vector<10x96xf32>
    %59 = vector.extract_strided_slice %58 {offsets = [0, 0], sizes = [10, 8], strides = [1, 1]} : vector<10x96xf32> to vector<10x8xf32>
    %60 = vector.extract_strided_slice %58 {offsets = [0, 32], sizes = [10, 8], strides = [1, 1]} : vector<10x96xf32> to vector<10x8xf32>
    %61 = vector.extract_strided_slice %58 {offsets = [0, 64], sizes = [10, 8], strides = [1, 1]} : vector<10x96xf32> to vector<10x8xf32>
    %cst_30 = arith.constant dense<0.000000e+00> : vector<10x10xf32>
    %62 = tpu.matmul %59, %60, %cst_30 {dimension_numbers = #tpu.dot_dimension_numbers<[1], [1], [0], [0], [0, 0, 1, 0], [], []>} : vector<10x8xf32>, vector<10x8xf32>, vector<10x10xf32> -> vector<10x10xf32>
    %cst_31 = arith.constant 0.353553385 : f32
    %63 = vector.broadcast %cst_31 : f32 to vector<10x10xf32>
    %64 = arith.mulf %62, %63 : vector<10x10xf32>
    %65 = arith.addf %64, %29 : vector<10x10xf32>
    %cst_32 = arith.constant dense<0xFF800000> : vector<10xf32>
    %66 = vector.multi_reduction <maximumf>, %65, %cst_32 [1] : vector<10x10xf32> to vector<10xf32>
    %67 = vector.shape_cast %66 : vector<10xf32> to vector<10x1xf32>
    %68 = vector.broadcast %67 : vector<10x1xf32> to vector<10x10xf32>
    %69 = arith.subf %65, %68 : vector<10x10xf32>
    %70 = math.exp %69 : vector<10x10xf32>
    %cst_33 = arith.constant dense<0.000000e+00> : vector<10xf32>
    %71 = vector.multi_reduction <add>, %70, %cst_33 [1] : vector<10x10xf32> to vector<10xf32>
    %72 = vector.shape_cast %71 : vector<10xf32> to vector<10x1xf32>
    %73 = vector.broadcast %72 : vector<10x1xf32> to vector<10x10xf32>
    %74 = arith.divf %70, %73 : vector<10x10xf32>
    %cst_34 = arith.constant dense<0.000000e+00> : vector<10x8xf32>
    %75 = tpu.matmul %74, %61, %cst_34 {dimension_numbers = #tpu.dot_dimension_numbers<[1], [0], [0], [1], [0, 0, 1, 1], [], []>} : vector<10x10xf32>, vector<10x8xf32>, vector<10x8xf32> -> vector<10x8xf32>
    %76 = vector.extract_strided_slice %58 {offsets = [0, 8], sizes = [10, 8], strides = [1, 1]} : vector<10x96xf32> to vector<10x8xf32>
    %77 = vector.extract_strided_slice %58 {offsets = [0, 40], sizes = [10, 8], strides = [1, 1]} : vector<10x96xf32> to vector<10x8xf32>
    %78 = vector.extract_strided_slice %58 {offsets = [0, 72], sizes = [10, 8], strides = [1, 1]} : vector<10x96xf32> to vector<10x8xf32>
    %cst_35 = arith.constant dense<0.000000e+00> : vector<10x10xf32>
    %79 = tpu.matmul %76, %77, %cst_35 {dimension_numbers = #tpu.dot_dimension_numbers<[1], [1], [0], [0], [0, 0, 1, 0], [], []>} : vector<10x8xf32>, vector<10x8xf32>, vector<10x10xf32> -> vector<10x10xf32>
    %cst_36 = arith.constant 0.353553385 : f32
    %80 = vector.broadcast %cst_36 : f32 to vector<10x10xf32>
    %81 = arith.mulf %79, %80 : vector<10x10xf32>
    %82 = arith.addf %81, %29 : vector<10x10xf32>
    %cst_37 = arith.constant dense<0xFF800000> : vector<10xf32>
    %83 = vector.multi_reduction <maximumf>, %82, %cst_37 [1] : vector<10x10xf32> to vector<10xf32>
    %84 = vector.shape_cast %83 : vector<10xf32> to vector<10x1xf32>
    %85 = vector.broadcast %84 : vector<10x1xf32> to vector<10x10xf32>
    %86 = arith.subf %82, %85 : vector<10x10xf32>
    %87 = math.exp %86 : vector<10x10xf32>
    %cst_38 = arith.constant dense<0.000000e+00> : vector<10xf32>
    %88 = vector.multi_reduction <add>, %87, %cst_38 [1] : vector<10x10xf32> to vector<10xf32>
    %89 = vector.shape_cast %88 : vector<10xf32> to vector<10x1xf32>
    %90 = vector.broadcast %89 : vector<10x1xf32> to vector<10x10xf32>
    %91 = arith.divf %87, %90 : vector<10x10xf32>
    %cst_39 = arith.constant dense<0.000000e+00> : vector<10x8xf32>
    %92 = tpu.matmul %91, %78, %cst_39 {dimension_numbers = #tpu.dot_dimension_numbers<[1], [0], [0], [1], [0, 0, 1, 1], [], []>} : vector<10x10xf32>, vector<10x8xf32>, vector<10x8xf32> -> vector<10x8xf32>
    %93 = vector.extract_strided_slice %58 {offsets = [0, 16], sizes = [10, 8], strides = [1, 1]} : vector<10x96xf32> to vector<10x8xf32>
    %94 = vector.extract_strided_slice %58 {offsets = [0, 48], sizes = [10, 8], strides = [1, 1]} : vector<10x96xf32> to vector<10x8xf32>
    %95 = vector.extract_strided_slice %58 {offsets = [0, 80], sizes = [10, 8], strides = [1, 1]} : vector<10x96xf32> to vector<10x8xf32>
    %cst_40 = arith.constant dense<0.000000e+00> : vector<10x10xf32>
    %96 = tpu.matmul %93, %94, %cst_40 {dimension_numbers = #tpu.dot_dimension_numbers<[1], [1], [0], [0], [0, 0, 1, 0], [], []>} : vector<10x8xf32>, vector<10x8xf32>, vector<10x10xf32> -> vector<10x10xf32>
    %cst_41 = arith.constant 0.353553385 : f32
    %97 = vector.broadcast %cst_41 : f32 to vector<10x10xf32>
    %98 = arith.mulf %96, %97 : vector<10x10xf32>
    %99 = arith.addf %98, %29 : vector<10x10xf32>
    %cst_42 = arith.constant dense<0xFF800000> : vector<10xf32>
    %100 = vector.multi_reduction <maximumf>, %99, %cst_42 [1] : vector<10x10xf32> to vector<10xf32>
    %101 = vector.shape_cast %100 : vector<10xf32> to vector<10x1xf32>
    %102 = vector.broadcast %101 : vector<10x1xf32> to vector<10x10xf32>
    %103 = arith.subf %99, %102 : vector<10x10xf32>
    %104 = math.exp %103 : vector<10x10xf32>
    %cst_43 = arith.constant dense<0.000000e+00> : vector<10xf32>
    %105 = vector.multi_reduction <add>, %104, %cst_43 [1] : vector<10x10xf32> to vector<10xf32>
    %106 = vector.shape_cast %105 : vector<10xf32> to vector<10x1xf32>
    %107 = vector.broadcast %106 : vector<10x1xf32> to vector<10x10xf32>
    %108 = arith.divf %104, %107 : vector<10x10xf32>
    %cst_44 = arith.constant dense<0.000000e+00> : vector<10x8xf32>
    %109 = tpu.matmul %108, %95, %cst_44 {dimension_numbers = #tpu.dot_dimension_numbers<[1], [0], [0], [1], [0, 0, 1, 1], [], []>} : vector<10x10xf32>, vector<10x8xf32>, vector<10x8xf32> -> vector<10x8xf32>
    %110 = vector.extract_strided_slice %58 {offsets = [0, 24], sizes = [10, 8], strides = [1, 1]} : vector<10x96xf32> to vector<10x8xf32>
    %111 = vector.extract_strided_slice %58 {offsets = [0, 56], sizes = [10, 8], strides = [1, 1]} : vector<10x96xf32> to vector<10x8xf32>
    %112 = vector.extract_strided_slice %58 {offsets = [0, 88], sizes = [10, 8], strides = [1, 1]} : vector<10x96xf32> to vector<10x8xf32>
    %cst_45 = arith.constant dense<0.000000e+00> : vector<10x10xf32>
    %113 = tpu.matmul %110, %111, %cst_45 {dimension_numbers = #tpu.dot_dimension_numbers<[1], [1], [0], [0], [0, 0, 1, 0], [], []>} : vector<10x8xf32>, vector<10x8xf32>, vector<10x10xf32> -> vector<10x10xf32>
    %cst_46 = arith.constant 0.353553385 : f32
    %114 = vector.broadcast %cst_46 : f32 to vector<10x10xf32>
    %115 = arith.mulf %113, %114 : vector<10x10xf32>
    %116 = arith.addf %115, %29 : vector<10x10xf32>
    %cst_47 = arith.constant dense<0xFF800000> : vector<10xf32>
    %117 = vector.multi_reduction <maximumf>, %116, %cst_47 [1] : vector<10x10xf32> to vector<10xf32>
    %118 = vector.shape_cast %117 : vector<10xf32> to vector<10x1xf32>
    %119 = vector.broadcast %118 : vector<10x1xf32> to vector<10x10xf32>
    %120 = arith.subf %116, %119 : vector<10x10xf32>
    %121 = math.exp %120 : vector<10x10xf32>
    %cst_48 = arith.constant dense<0.000000e+00> : vector<10xf32>
    %122 = vector.multi_reduction <add>, %121, %cst_48 [1] : vector<10x10xf32> to vector<10xf32>
    %123 = vector.shape_cast %122 : vector<10xf32> to vector<10x1xf32>
    %124 = vector.broadcast %123 : vector<10x1xf32> to vector<10x10xf32>
    %125 = arith.divf %121, %124 : vector<10x10xf32>
    %cst_49 = arith.constant dense<0.000000e+00> : vector<10x8xf32>
    %126 = tpu.matmul %125, %112, %cst_49 {dimension_numbers = #tpu.dot_dimension_numbers<[1], [0], [0], [1], [0, 0, 1, 1], [], []>} : vector<10x10xf32>, vector<10x8xf32>, vector<10x8xf32> -> vector<10x8xf32>
    %127 = tpu.concatenate %75, %92, %109, %126 in 1 : vector<10x8xf32>, vector<10x8xf32>, vector<10x8xf32>, vector<10x8xf32> -> vector<10x32xf32>
    %c0_50 = arith.constant 0 : index
    %c0_51 = arith.constant 0 : index
    %128 = vector.load %arg10[%c0_50, %c0_51] : memref<32x32xf32, #tpu.memory_space<vmem>>, vector<32x32xf32>
    %cst_52 = arith.constant dense<0.000000e+00> : vector<10x32xf32>
    %129 = tpu.matmul %127, %128, %cst_52 {dimension_numbers = #tpu.dot_dimension_numbers<[1], [0], [0], [1], [0, 0, 1, 1], [], []>} : vector<10x32xf32>, vector<32x32xf32>, vector<10x32xf32> -> vector<10x32xf32>
    %130 = arith.addf %28, %129 : vector<10x32xf32>
    %c0_53 = arith.constant 0 : index
    %c0_54 = arith.constant 0 : index
    %131 = vector.load %arg11[%c0_53, %c0_54] : memref<1x32xf32, #tpu.memory_space<vmem>>, vector<1x32xf32>
    %132 = vector.broadcast %131 : vector<1x32xf32> to vector<10x32xf32>
    %133 = arith.addf %130, %132 : vector<10x32xf32>
    %c0_55 = arith.constant 0 : index
    %c0_56 = arith.constant 0 : index
    %134 = vector.load %arg12[%c0_55, %c0_56] : memref<1x32xf32, #tpu.memory_space<vmem>>, vector<1x32xf32>
    %c0_57 = arith.constant 0 : index
    %c0_58 = arith.constant 0 : index
    %135 = vector.load %arg13[%c0_57, %c0_58] : memref<1x32xf32, #tpu.memory_space<vmem>>, vector<1x32xf32>
    %cst_59 = arith.constant dense<0.000000e+00> : vector<10xf32>
    %136 = vector.multi_reduction <add>, %133, %cst_59 [1] : vector<10x32xf32> to vector<10xf32>
    %137 = vector.shape_cast %136 : vector<10xf32> to vector<10x1xf32>
    %cst_60 = arith.constant 3.200000e+01 : f32
    %138 = vector.broadcast %cst_60 : f32 to vector<10x1xf32>
    %139 = arith.divf %137, %138 : vector<10x1xf32>
    %140 = vector.broadcast %139 : vector<10x1xf32> to vector<10x32xf32>
    %141 = arith.subf %133, %140 : vector<10x32xf32>
    %142 = arith.mulf %141, %141 : vector<10x32xf32>
    %cst_61 = arith.constant dense<0.000000e+00> : vector<10xf32>
    %143 = vector.multi_reduction <add>, %142, %cst_61 [1] : vector<10x32xf32> to vector<10xf32>
    %144 = vector.shape_cast %143 : vector<10xf32> to vector<10x1xf32>
    %cst_62 = arith.constant 3.200000e+01 : f32
    %145 = vector.broadcast %cst_62 : f32 to vector<10x1xf32>
    %146 = arith.divf %144, %145 : vector<10x1xf32>
    %147 = vector.broadcast %139 : vector<10x1xf32> to vector<10x32xf32>
    %148 = arith.subf %133, %147 : vector<10x32xf32>
    %cst_63 = arith.constant 9.99999974E-6 : f32
    %149 = vector.broadcast %cst_63 : f32 to vector<10x1xf32>
    %150 = arith.addf %146, %149 : vector<10x1xf32>
    %151 = math.rsqrt %150 : vector<10x1xf32>
    %152 = vector.broadcast %151 : vector<10x1xf32> to vector<10x32xf32>
    %153 = arith.mulf %148, %152 : vector<10x32xf32>
    %154 = vector.broadcast %134 : vector<1x32xf32> to vector<10x32xf32>
    %155 = arith.mulf %153, %154 : vector<10x32xf32>
    %156 = vector.broadcast %135 : vector<1x32xf32> to vector<10x32xf32>
    %157 = arith.addf %155, %156 : vector<10x32xf32>
    %c0_64 = arith.constant 0 : index
    %c0_65 = arith.constant 0 : index
    %158 = vector.load %arg14[%c0_64, %c0_65] : memref<32x128xf32, #tpu.memory_space<vmem>>, vector<32x128xf32>
    %cst_66 = arith.constant dense<0.000000e+00> : vector<10x128xf32>
    %159 = tpu.matmul %157, %158, %cst_66 {dimension_numbers = #tpu.dot_dimension_numbers<[1], [0], [0], [1], [0, 0, 1, 1], [], []>} : vector<10x32xf32>, vector<32x128xf32>, vector<10x128xf32> -> vector<10x128xf32>
    %c0_67 = arith.constant 0 : index
    %c0_68 = arith.constant 0 : index
    %160 = vector.load %arg15[%c0_67, %c0_68] : memref<1x128xf32, #tpu.memory_space<vmem>>, vector<1x128xf32>
    %161 = vector.broadcast %160 : vector<1x128xf32> to vector<10x128xf32>
    %162 = arith.addf %159, %161 : vector<10x128xf32>
    %cst_69 = arith.constant 1.702000e+00 : f32
    %163 = vector.broadcast %cst_69 : f32 to vector<10x128xf32>
    %164 = arith.mulf %163, %162 : vector<10x128xf32>
    %165 = arith.negf %164 : vector<10x128xf32>
    %166 = math.exp %165 : vector<10x128xf32>
    %cst_70 = arith.constant 1.000000e+00 : f32
    %167 = vector.broadcast %cst_70 : f32 to vector<10x128xf32>
    %168 = arith.addf %167, %166 : vector<10x128xf32>
    %169 = arith.divf %167, %168 : vector<10x128xf32>
    %170 = arith.mulf %162, %169 : vector<10x128xf32>
    %c0_71 = arith.constant 0 : index
    %c0_72 = arith.constant 0 : index
    %171 = vector.load %arg16[%c0_71, %c0_72] : memref<128x32xf32, #tpu.memory_space<vmem>>, vector<128x32xf32>
    %cst_73 = arith.constant dense<0.000000e+00> : vector<10x32xf32>
    %172 = tpu.matmul %170, %171, %cst_73 {dimension_numbers = #tpu.dot_dimension_numbers<[1], [0], [0], [1], [0, 0, 1, 1], [], []>} : vector<10x128xf32>, vector<128x32xf32>, vector<10x32xf32> -> vector<10x32xf32>
    %c0_74 = arith.constant 0 : index
    %c0_75 = arith.constant 0 : index
    %173 = vector.load %arg17[%c0_74, %c0_75] : memref<1x32xf32, #tpu.memory_space<vmem>>, vector<1x32xf32>
    %174 = vector.broadcast %173 : vector<1x32xf32> to vector<10x32xf32>
    %175 = arith.addf %172, %174 : vector<10x32xf32>
    %176 = arith.addf %133, %175 : vector<10x32xf32>
    %c0_76 = arith.constant 0 : index
    %c0_77 = arith.constant 0 : index
    %177 = vector.load %arg18[%c0_76, %c0_77] : memref<1x32xf32, #tpu.memory_space<vmem>>, vector<1x32xf32>
    %c0_78 = arith.constant 0 : index
    %c0_79 = arith.constant 0 : index
    %178 = vector.load %arg19[%c0_78, %c0_79] : memref<1x32xf32, #tpu.memory_space<vmem>>, vector<1x32xf32>
    %cst_80 = arith.constant dense<0.000000e+00> : vector<10xf32>
    %179 = vector.multi_reduction <add>, %176, %cst_80 [1] : vector<10x32xf32> to vector<10xf32>
    %180 = vector.shape_cast %179 : vector<10xf32> to vector<10x1xf32>
    %cst_81 = arith.constant 3.200000e+01 : f32
    %181 = vector.broadcast %cst_81 : f32 to vector<10x1xf32>
    %182 = arith.divf %180, %181 : vector<10x1xf32>
    %183 = vector.broadcast %182 : vector<10x1xf32> to vector<10x32xf32>
    %184 = arith.subf %176, %183 : vector<10x32xf32>
    %185 = arith.mulf %184, %184 : vector<10x32xf32>
    %cst_82 = arith.constant dense<0.000000e+00> : vector<10xf32>
    %186 = vector.multi_reduction <add>, %185, %cst_82 [1] : vector<10x32xf32> to vector<10xf32>
    %187 = vector.shape_cast %186 : vector<10xf32> to vector<10x1xf32>
    %cst_83 = arith.constant 3.200000e+01 : f32
    %188 = vector.broadcast %cst_83 : f32 to vector<10x1xf32>
    %189 = arith.divf %187, %188 : vector<10x1xf32>
    %190 = vector.broadcast %182 : vector<10x1xf32> to vector<10x32xf32>
    %191 = arith.subf %176, %190 : vector<10x32xf32>
    %cst_84 = arith.constant 9.99999974E-6 : f32
    %192 = vector.broadcast %cst_84 : f32 to vector<10x1xf32>
    %193 = arith.addf %189, %192 : vector<10x1xf32>
    %194 = math.rsqrt %193 : vector<10x1xf32>
    %195 = vector.broadcast %194 : vector<10x1xf32> to vector<10x32xf32>
    %196 = arith.mulf %191, %195 : vector<10x32xf32>
    %197 = vector.broadcast %177 : vector<1x32xf32> to vector<10x32xf32>
    %198 = arith.mulf %196, %197 : vector<10x32xf32>
    %199 = vector.broadcast %178 : vector<1x32xf32> to vector<10x32xf32>
    %200 = arith.addf %198, %199 : vector<10x32xf32>
    %c0_85 = arith.constant 0 : index
    %c0_86 = arith.constant 0 : index
    %201 = vector.load %arg20[%c0_85, %c0_86] : memref<32x96xf32, #tpu.memory_space<vmem>>, vector<32x96xf32>
    %cst_87 = arith.constant dense<0.000000e+00> : vector<10x96xf32>
    %202 = tpu.matmul %200, %201, %cst_87 {dimension_numbers = #tpu.dot_dimension_numbers<[1], [0], [0], [1], [0, 0, 1, 1], [], []>} : vector<10x32xf32>, vector<32x96xf32>, vector<10x96xf32> -> vector<10x96xf32>
    %c0_88 = arith.constant 0 : index
    %c0_89 = arith.constant 0 : index
    %203 = vector.load %arg21[%c0_88, %c0_89] : memref<1x96xf32, #tpu.memory_space<vmem>>, vector<1x96xf32>
    %204 = vector.broadcast %203 : vector<1x96xf32> to vector<10x96xf32>
    %205 = arith.addf %202, %204 : vector<10x96xf32>
    %206 = vector.extract_strided_slice %205 {offsets = [0, 0], sizes = [10, 8], strides = [1, 1]} : vector<10x96xf32> to vector<10x8xf32>
    %207 = vector.extract_strided_slice %205 {offsets = [0, 32], sizes = [10, 8], strides = [1, 1]} : vector<10x96xf32> to vector<10x8xf32>
    %208 = vector.extract_strided_slice %205 {offsets = [0, 64], sizes = [10, 8], strides = [1, 1]} : vector<10x96xf32> to vector<10x8xf32>
    %cst_90 = arith.constant dense<0.000000e+00> : vector<10x10xf32>
    %209 = tpu.matmul %206, %207, %cst_90 {dimension_numbers = #tpu.dot_dimension_numbers<[1], [1], [0], [0], [0, 0, 1, 0], [], []>} : vector<10x8xf32>, vector<10x8xf32>, vector<10x10xf32> -> vector<10x10xf32>
    %cst_91 = arith.constant 0.353553385 : f32
    %210 = vector.broadcast %cst_91 : f32 to vector<10x10xf32>
    %211 = arith.mulf %209, %210 : vector<10x10xf32>
    %212 = arith.addf %211, %29 : vector<10x10xf32>
    %cst_92 = arith.constant dense<0xFF800000> : vector<10xf32>
    %213 = vector.multi_reduction <maximumf>, %212, %cst_92 [1] : vector<10x10xf32> to vector<10xf32>
    %214 = vector.shape_cast %213 : vector<10xf32> to vector<10x1xf32>
    %215 = vector.broadcast %214 : vector<10x1xf32> to vector<10x10xf32>
    %216 = arith.subf %212, %215 : vector<10x10xf32>
    %217 = math.exp %216 : vector<10x10xf32>
    %cst_93 = arith.constant dense<0.000000e+00> : vector<10xf32>
    %218 = vector.multi_reduction <add>, %217, %cst_93 [1] : vector<10x10xf32> to vector<10xf32>
    %219 = vector.shape_cast %218 : vector<10xf32> to vector<10x1xf32>
    %220 = vector.broadcast %219 : vector<10x1xf32> to vector<10x10xf32>
    %221 = arith.divf %217, %220 : vector<10x10xf32>
    %cst_94 = arith.constant dense<0.000000e+00> : vector<10x8xf32>
    %222 = tpu.matmul %221, %208, %cst_94 {dimension_numbers = #tpu.dot_dimension_numbers<[1], [0], [0], [1], [0, 0, 1, 1], [], []>} : vector<10x10xf32>, vector<10x8xf32>, vector<10x8xf32> -> vector<10x8xf32>
    %223 = vector.extract_strided_slice %205 {offsets = [0, 8], sizes = [10, 8], strides = [1, 1]} : vector<10x96xf32> to vector<10x8xf32>
    %224 = vector.extract_strided_slice %205 {offsets = [0, 40], sizes = [10, 8], strides = [1, 1]} : vector<10x96xf32> to vector<10x8xf32>
    %225 = vector.extract_strided_slice %205 {offsets = [0, 72], sizes = [10, 8], strides = [1, 1]} : vector<10x96xf32> to vector<10x8xf32>
    %cst_95 = arith.constant dense<0.000000e+00> : vector<10x10xf32>
    %226 = tpu.matmul %223, %224, %cst_95 {dimension_numbers = #tpu.dot_dimension_numbers<[1], [1], [0], [0], [0, 0, 1, 0], [], []>} : vector<10x8xf32>, vector<10x8xf32>, vector<10x10xf32> -> vector<10x10xf32>
    %cst_96 = arith.constant 0.353553385 : f32
    %227 = vector.broadcast %cst_96 : f32 to vector<10x10xf32>
    %228 = arith.mulf %226, %227 : vector<10x10xf32>
    %229 = arith.addf %228, %29 : vector<10x10xf32>
    %cst_97 = arith.constant dense<0xFF800000> : vector<10xf32>
    %230 = vector.multi_reduction <maximumf>, %229, %cst_97 [1] : vector<10x10xf32> to vector<10xf32>
    %231 = vector.shape_cast %230 : vector<10xf32> to vector<10x1xf32>
    %232 = vector.broadcast %231 : vector<10x1xf32> to vector<10x10xf32>
    %233 = arith.subf %229, %232 : vector<10x10xf32>
    %234 = math.exp %233 : vector<10x10xf32>
    %cst_98 = arith.constant dense<0.000000e+00> : vector<10xf32>
    %235 = vector.multi_reduction <add>, %234, %cst_98 [1] : vector<10x10xf32> to vector<10xf32>
    %236 = vector.shape_cast %235 : vector<10xf32> to vector<10x1xf32>
    %237 = vector.broadcast %236 : vector<10x1xf32> to vector<10x10xf32>
    %238 = arith.divf %234, %237 : vector<10x10xf32>
    %cst_99 = arith.constant dense<0.000000e+00> : vector<10x8xf32>
    %239 = tpu.matmul %238, %225, %cst_99 {dimension_numbers = #tpu.dot_dimension_numbers<[1], [0], [0], [1], [0, 0, 1, 1], [], []>} : vector<10x10xf32>, vector<10x8xf32>, vector<10x8xf32> -> vector<10x8xf32>
    %240 = vector.extract_strided_slice %205 {offsets = [0, 16], sizes = [10, 8], strides = [1, 1]} : vector<10x96xf32> to vector<10x8xf32>
    %241 = vector.extract_strided_slice %205 {offsets = [0, 48], sizes = [10, 8], strides = [1, 1]} : vector<10x96xf32> to vector<10x8xf32>
    %242 = vector.extract_strided_slice %205 {offsets = [0, 80], sizes = [10, 8], strides = [1, 1]} : vector<10x96xf32> to vector<10x8xf32>
    %cst_100 = arith.constant dense<0.000000e+00> : vector<10x10xf32>
    %243 = tpu.matmul %240, %241, %cst_100 {dimension_numbers = #tpu.dot_dimension_numbers<[1], [1], [0], [0], [0, 0, 1, 0], [], []>} : vector<10x8xf32>, vector<10x8xf32>, vector<10x10xf32> -> vector<10x10xf32>
    %cst_101 = arith.constant 0.353553385 : f32
    %244 = vector.broadcast %cst_101 : f32 to vector<10x10xf32>
    %245 = arith.mulf %243, %244 : vector<10x10xf32>
    %246 = arith.addf %245, %29 : vector<10x10xf32>
    %cst_102 = arith.constant dense<0xFF800000> : vector<10xf32>
    %247 = vector.multi_reduction <maximumf>, %246, %cst_102 [1] : vector<10x10xf32> to vector<10xf32>
    %248 = vector.shape_cast %247 : vector<10xf32> to vector<10x1xf32>
    %249 = vector.broadcast %248 : vector<10x1xf32> to vector<10x10xf32>
    %250 = arith.subf %246, %249 : vector<10x10xf32>
    %251 = math.exp %250 : vector<10x10xf32>
    %cst_103 = arith.constant dense<0.000000e+00> : vector<10xf32>
    %252 = vector.multi_reduction <add>, %251, %cst_103 [1] : vector<10x10xf32> to vector<10xf32>
    %253 = vector.shape_cast %252 : vector<10xf32> to vector<10x1xf32>
    %254 = vector.broadcast %253 : vector<10x1xf32> to vector<10x10xf32>
    %255 = arith.divf %251, %254 : vector<10x10xf32>
    %cst_104 = arith.constant dense<0.000000e+00> : vector<10x8xf32>
    %256 = tpu.matmul %255, %242, %cst_104 {dimension_numbers = #tpu.dot_dimension_numbers<[1], [0], [0], [1], [0, 0, 1, 1], [], []>} : vector<10x10xf32>, vector<10x8xf32>, vector<10x8xf32> -> vector<10x8xf32>
    %257 = vector.extract_strided_slice %205 {offsets = [0, 24], sizes = [10, 8], strides = [1, 1]} : vector<10x96xf32> to vector<10x8xf32>
    %258 = vector.extract_strided_slice %205 {offsets = [0, 56], sizes = [10, 8], strides = [1, 1]} : vector<10x96xf32> to vector<10x8xf32>
    %259 = vector.extract_strided_slice %205 {offsets = [0, 88], sizes = [10, 8], strides = [1, 1]} : vector<10x96xf32> to vector<10x8xf32>
    %cst_105 = arith.constant dense<0.000000e+00> : vector<10x10xf32>
    %260 = tpu.matmul %257, %258, %cst_105 {dimension_numbers = #tpu.dot_dimension_numbers<[1], [1], [0], [0], [0, 0, 1, 0], [], []>} : vector<10x8xf32>, vector<10x8xf32>, vector<10x10xf32> -> vector<10x10xf32>
    %cst_106 = arith.constant 0.353553385 : f32
    %261 = vector.broadcast %cst_106 : f32 to vector<10x10xf32>
    %262 = arith.mulf %260, %261 : vector<10x10xf32>
    %263 = arith.addf %262, %29 : vector<10x10xf32>
    %cst_107 = arith.constant dense<0xFF800000> : vector<10xf32>
    %264 = vector.multi_reduction <maximumf>, %263, %cst_107 [1] : vector<10x10xf32> to vector<10xf32>
    %265 = vector.shape_cast %264 : vector<10xf32> to vector<10x1xf32>
    %266 = vector.broadcast %265 : vector<10x1xf32> to vector<10x10xf32>
    %267 = arith.subf %263, %266 : vector<10x10xf32>
    %268 = math.exp %267 : vector<10x10xf32>
    %cst_108 = arith.constant dense<0.000000e+00> : vector<10xf32>
    %269 = vector.multi_reduction <add>, %268, %cst_108 [1] : vector<10x10xf32> to vector<10xf32>
    %270 = vector.shape_cast %269 : vector<10xf32> to vector<10x1xf32>
    %271 = vector.broadcast %270 : vector<10x1xf32> to vector<10x10xf32>
    %272 = arith.divf %268, %271 : vector<10x10xf32>
    %cst_109 = arith.constant dense<0.000000e+00> : vector<10x8xf32>
    %273 = tpu.matmul %272, %259, %cst_109 {dimension_numbers = #tpu.dot_dimension_numbers<[1], [0], [0], [1], [0, 0, 1, 1], [], []>} : vector<10x10xf32>, vector<10x8xf32>, vector<10x8xf32> -> vector<10x8xf32>
    %274 = tpu.concatenate %222, %239, %256, %273 in 1 : vector<10x8xf32>, vector<10x8xf32>, vector<10x8xf32>, vector<10x8xf32> -> vector<10x32xf32>
    %c0_110 = arith.constant 0 : index
    %c0_111 = arith.constant 0 : index
    %275 = vector.load %arg22[%c0_110, %c0_111] : memref<32x32xf32, #tpu.memory_space<vmem>>, vector<32x32xf32>
    %cst_112 = arith.constant dense<0.000000e+00> : vector<10x32xf32>
    %276 = tpu.matmul %274, %275, %cst_112 {dimension_numbers = #tpu.dot_dimension_numbers<[1], [0], [0], [1], [0, 0, 1, 1], [], []>} : vector<10x32xf32>, vector<32x32xf32>, vector<10x32xf32> -> vector<10x32xf32>
    %277 = arith.addf %176, %276 : vector<10x32xf32>
    %c0_113 = arith.constant 0 : index
    %c0_114 = arith.constant 0 : index
    %278 = vector.load %arg23[%c0_113, %c0_114] : memref<1x32xf32, #tpu.memory_space<vmem>>, vector<1x32xf32>
    %279 = vector.broadcast %278 : vector<1x32xf32> to vector<10x32xf32>
    %280 = arith.addf %277, %279 : vector<10x32xf32>
    %c0_115 = arith.constant 0 : index
    %c0_116 = arith.constant 0 : index
    %281 = vector.load %arg24[%c0_115, %c0_116] : memref<1x32xf32, #tpu.memory_space<vmem>>, vector<1x32xf32>
    %c0_117 = arith.constant 0 : index
    %c0_118 = arith.constant 0 : index
    %282 = vector.load %arg25[%c0_117, %c0_118] : memref<1x32xf32, #tpu.memory_space<vmem>>, vector<1x32xf32>
    %cst_119 = arith.constant dense<0.000000e+00> : vector<10xf32>
    %283 = vector.multi_reduction <add>, %280, %cst_119 [1] : vector<10x32xf32> to vector<10xf32>
    %284 = vector.shape_cast %283 : vector<10xf32> to vector<10x1xf32>
    %cst_120 = arith.constant 3.200000e+01 : f32
    %285 = vector.broadcast %cst_120 : f32 to vector<10x1xf32>
    %286 = arith.divf %284, %285 : vector<10x1xf32>
    %287 = vector.broadcast %286 : vector<10x1xf32> to vector<10x32xf32>
    %288 = arith.subf %280, %287 : vector<10x32xf32>
    %289 = arith.mulf %288, %288 : vector<10x32xf32>
    %cst_121 = arith.constant dense<0.000000e+00> : vector<10xf32>
    %290 = vector.multi_reduction <add>, %289, %cst_121 [1] : vector<10x32xf32> to vector<10xf32>
    %291 = vector.shape_cast %290 : vector<10xf32> to vector<10x1xf32>
    %cst_122 = arith.constant 3.200000e+01 : f32
    %292 = vector.broadcast %cst_122 : f32 to vector<10x1xf32>
    %293 = arith.divf %291, %292 : vector<10x1xf32>
    %294 = vector.broadcast %286 : vector<10x1xf32> to vector<10x32xf32>
    %295 = arith.subf %280, %294 : vector<10x32xf32>
    %cst_123 = arith.constant 9.99999974E-6 : f32
    %296 = vector.broadcast %cst_123 : f32 to vector<10x1xf32>
    %297 = arith.addf %293, %296 : vector<10x1xf32>
    %298 = math.rsqrt %297 : vector<10x1xf32>
    %299 = vector.broadcast %298 : vector<10x1xf32> to vector<10x32xf32>
    %300 = arith.mulf %295, %299 : vector<10x32xf32>
    %301 = vector.broadcast %281 : vector<1x32xf32> to vector<10x32xf32>
    %302 = arith.mulf %300, %301 : vector<10x32xf32>
    %303 = vector.broadcast %282 : vector<1x32xf32> to vector<10x32xf32>
    %304 = arith.addf %302, %303 : vector<10x32xf32>
    %c0_124 = arith.constant 0 : index
    %c0_125 = arith.constant 0 : index
    %305 = vector.load %arg26[%c0_124, %c0_125] : memref<32x128xf32, #tpu.memory_space<vmem>>, vector<32x128xf32>
    %cst_126 = arith.constant dense<0.000000e+00> : vector<10x128xf32>
    %306 = tpu.matmul %304, %305, %cst_126 {dimension_numbers = #tpu.dot_dimension_numbers<[1], [0], [0], [1], [0, 0, 1, 1], [], []>} : vector<10x32xf32>, vector<32x128xf32>, vector<10x128xf32> -> vector<10x128xf32>
    %c0_127 = arith.constant 0 : index
    %c0_128 = arith.constant 0 : index
    %307 = vector.load %arg27[%c0_127, %c0_128] : memref<1x128xf32, #tpu.memory_space<vmem>>, vector<1x128xf32>
    %308 = vector.broadcast %307 : vector<1x128xf32> to vector<10x128xf32>
    %309 = arith.addf %306, %308 : vector<10x128xf32>
    %cst_129 = arith.constant 1.702000e+00 : f32
    %310 = vector.broadcast %cst_129 : f32 to vector<10x128xf32>
    %311 = arith.mulf %310, %309 : vector<10x128xf32>
    %312 = arith.negf %311 : vector<10x128xf32>
    %313 = math.exp %312 : vector<10x128xf32>
    %cst_130 = arith.constant 1.000000e+00 : f32
    %314 = vector.broadcast %cst_130 : f32 to vector<10x128xf32>
    %315 = arith.addf %314, %313 : vector<10x128xf32>
    %316 = arith.divf %314, %315 : vector<10x128xf32>
    %317 = arith.mulf %309, %316 : vector<10x128xf32>
    %c0_131 = arith.constant 0 : index
    %c0_132 = arith.constant 0 : index
    %318 = vector.load %arg28[%c0_131, %c0_132] : memref<128x32xf32, #tpu.memory_space<vmem>>, vector<128x32xf32>
    %cst_133 = arith.constant dense<0.000000e+00> : vector<10x32xf32>
    %319 = tpu.matmul %317, %318, %cst_133 {dimension_numbers = #tpu.dot_dimension_numbers<[1], [0], [0], [1], [0, 0, 1, 1], [], []>} : vector<10x128xf32>, vector<128x32xf32>, vector<10x32xf32> -> vector<10x32xf32>
    %c0_134 = arith.constant 0 : index
    %c0_135 = arith.constant 0 : index
    %320 = vector.load %arg29[%c0_134, %c0_135] : memref<1x32xf32, #tpu.memory_space<vmem>>, vector<1x32xf32>
    %321 = vector.broadcast %320 : vector<1x32xf32> to vector<10x32xf32>
    %322 = arith.addf %319, %321 : vector<10x32xf32>
    %323 = arith.addf %280, %322 : vector<10x32xf32>
    %c0_136 = arith.constant 0 : index
    %c0_137 = arith.constant 0 : index
    %324 = vector.load %arg33[%c0_136, %c0_137] : memref<2x10xf32, #tpu.memory_space<vmem>>, vector<2x10xf32>
    %cst_138 = arith.constant dense<0.000000e+00> : vector<2x32xf32>
    %325 = tpu.matmul %324, %323, %cst_138 {dimension_numbers = #tpu.dot_dimension_numbers<[1], [0], [0], [1], [0, 0, 1, 1], [], []>} : vector<2x10xf32>, vector<10x32xf32>, vector<2x32xf32> -> vector<2x32xf32>
    %c0_139 = arith.constant 0 : index
    %c0_140 = arith.constant 0 : index
    %326 = vector.load %arg30[%c0_139, %c0_140] : memref<1x32xf32, #tpu.memory_space<vmem>>, vector<1x32xf32>
    %c0_141 = arith.constant 0 : index
    %c0_142 = arith.constant 0 : index
    %327 = vector.load %arg31[%c0_141, %c0_142] : memref<1x32xf32, #tpu.memory_space<vmem>>, vector<1x32xf32>
    %cst_143 = arith.constant dense<0.000000e+00> : vector<2xf32>
    %328 = vector.multi_reduction <add>, %325, %cst_143 [1] : vector<2x32xf32> to vector<2xf32>
    %329 = vector.shape_cast %328 : vector<2xf32> to vector<2x1xf32>
    %cst_144 = arith.constant 3.200000e+01 : f32
    %330 = vector.broadcast %cst_144 : f32 to vector<2x1xf32>
    %331 = arith.divf %329, %330 : vector<2x1xf32>
    %332 = vector.broadcast %331 : vector<2x1xf32> to vector<2x32xf32>
    %333 = arith.subf %325, %332 : vector<2x32xf32>
    %334 = arith.mulf %333, %333 : vector<2x32xf32>
    %cst_145 = arith.constant dense<0.000000e+00> : vector<2xf32>
    %335 = vector.multi_reduction <add>, %334, %cst_145 [1] : vector<2x32xf32> to vector<2xf32>
    %336 = vector.shape_cast %335 : vector<2xf32> to vector<2x1xf32>
    %cst_146 = arith.constant 3.200000e+01 : f32
    %337 = vector.broadcast %cst_146 : f32 to vector<2x1xf32>
    %338 = arith.divf %336, %337 : vector<2x1xf32>
    %339 = vector.broadcast %331 : vector<2x1xf32> to vector<2x32xf32>
    %340 = arith.subf %325, %339 : vector<2x32xf32>
    %cst_147 = arith.constant 9.99999974E-6 : f32
    %341 = vector.broadcast %cst_147 : f32 to vector<2x1xf32>
    %342 = arith.addf %338, %341 : vector<2x1xf32>
    %343 = math.rsqrt %342 : vector<2x1xf32>
    %344 = vector.broadcast %343 : vector<2x1xf32> to vector<2x32xf32>
    %345 = arith.mulf %340, %344 : vector<2x32xf32>
    %346 = vector.broadcast %326 : vector<1x32xf32> to vector<2x32xf32>
    %347 = arith.mulf %345, %346 : vector<2x32xf32>
    %348 = vector.broadcast %327 : vector<1x32xf32> to vector<2x32xf32>
    %349 = arith.addf %347, %348 : vector<2x32xf32>
    %c0_148 = arith.constant 0 : index
    %c0_149 = arith.constant 0 : index
    %350 = vector.load %arg32[%c0_148, %c0_149] : memref<32x32xf32, #tpu.memory_space<vmem>>, vector<32x32xf32>
    %cst_150 = arith.constant dense<0.000000e+00> : vector<2x32xf32>
    %351 = tpu.matmul %349, %350, %cst_150 {dimension_numbers = #tpu.dot_dimension_numbers<[1], [0], [0], [1], [0, 0, 1, 1], [], []>} : vector<2x32xf32>, vector<32x32xf32>, vector<2x32xf32> -> vector<2x32xf32>
    %c0_151 = arith.constant 0 : index
    %c0_152 = arith.constant 0 : index
    %352 = vector.load %arg35[%c0_151, %c0_152] : memref<48x32xf32, #tpu.memory_space<vmem>>, vector<48x32xf32>
    %c0_153 = arith.constant 0 : index
    %c0_154 = arith.constant 0 : index
    %353 = vector.load %arg36[%c0_153, %c0_154] : memref<48x32xf32, #tpu.memory_space<vmem>>, vector<48x32xf32>
    %354 = arith.addf %352, %353 : vector<48x32xf32>
    %c0_155 = arith.constant 0 : index
    %c0_156 = arith.constant 0 : index
    %355 = vector.load %arg65[%c0_155, %c0_156] : memref<48x48xf32, #tpu.memory_space<vmem>>, vector<48x48xf32>
    %c0_157 = arith.constant 0 : index
    %c0_158 = arith.constant 0 : index
    %356 = vector.load %arg37[%c0_157, %c0_158] : memref<1x32xf32, #tpu.memory_space<vmem>>, vector<1x32xf32>
    %c0_159 = arith.constant 0 : index
    %c0_160 = arith.constant 0 : index
    %357 = vector.load %arg38[%c0_159, %c0_160] : memref<1x32xf32, #tpu.memory_space<vmem>>, vector<1x32xf32>
    %cst_161 = arith.constant dense<0.000000e+00> : vector<48xf32>
    %358 = vector.multi_reduction <add>, %354, %cst_161 [1] : vector<48x32xf32> to vector<48xf32>
    %359 = vector.shape_cast %358 : vector<48xf32> to vector<48x1xf32>
    %cst_162 = arith.constant 3.200000e+01 : f32
    %360 = vector.broadcast %cst_162 : f32 to vector<48x1xf32>
    %361 = arith.divf %359, %360 : vector<48x1xf32>
    %362 = vector.broadcast %361 : vector<48x1xf32> to vector<48x32xf32>
    %363 = arith.subf %354, %362 : vector<48x32xf32>
    %364 = arith.mulf %363, %363 : vector<48x32xf32>
    %cst_163 = arith.constant dense<0.000000e+00> : vector<48xf32>
    %365 = vector.multi_reduction <add>, %364, %cst_163 [1] : vector<48x32xf32> to vector<48xf32>
    %366 = vector.shape_cast %365 : vector<48xf32> to vector<48x1xf32>
    %cst_164 = arith.constant 3.200000e+01 : f32
    %367 = vector.broadcast %cst_164 : f32 to vector<48x1xf32>
    %368 = arith.divf %366, %367 : vector<48x1xf32>
    %369 = vector.broadcast %361 : vector<48x1xf32> to vector<48x32xf32>
    %370 = arith.subf %354, %369 : vector<48x32xf32>
    %cst_165 = arith.constant 9.99999974E-6 : f32
    %371 = vector.broadcast %cst_165 : f32 to vector<48x1xf32>
    %372 = arith.addf %368, %371 : vector<48x1xf32>
    %373 = math.rsqrt %372 : vector<48x1xf32>
    %374 = vector.broadcast %373 : vector<48x1xf32> to vector<48x32xf32>
    %375 = arith.mulf %370, %374 : vector<48x32xf32>
    %376 = vector.broadcast %356 : vector<1x32xf32> to vector<48x32xf32>
    %377 = arith.mulf %375, %376 : vector<48x32xf32>
    %378 = vector.broadcast %357 : vector<1x32xf32> to vector<48x32xf32>
    %379 = arith.addf %377, %378 : vector<48x32xf32>
    %c0_166 = arith.constant 0 : index
    %c0_167 = arith.constant 0 : index
    %380 = vector.load %arg39[%c0_166, %c0_167] : memref<32x96xf32, #tpu.memory_space<vmem>>, vector<32x96xf32>
    %cst_168 = arith.constant dense<0.000000e+00> : vector<48x96xf32>
    %381 = tpu.matmul %379, %380, %cst_168 {dimension_numbers = #tpu.dot_dimension_numbers<[1], [0], [0], [1], [0, 0, 1, 1], [], []>} : vector<48x32xf32>, vector<32x96xf32>, vector<48x96xf32> -> vector<48x96xf32>
    %c0_169 = arith.constant 0 : index
    %c0_170 = arith.constant 0 : index
    %382 = vector.load %arg40[%c0_169, %c0_170] : memref<1x96xf32, #tpu.memory_space<vmem>>, vector<1x96xf32>
    %383 = vector.broadcast %382 : vector<1x96xf32> to vector<48x96xf32>
    %384 = arith.addf %381, %383 : vector<48x96xf32>
    %385 = vector.extract_strided_slice %384 {offsets = [0, 0], sizes = [48, 8], strides = [1, 1]} : vector<48x96xf32> to vector<48x8xf32>
    %386 = vector.extract_strided_slice %384 {offsets = [0, 32], sizes = [48, 8], strides = [1, 1]} : vector<48x96xf32> to vector<48x8xf32>
    %387 = vector.extract_strided_slice %384 {offsets = [0, 64], sizes = [48, 8], strides = [1, 1]} : vector<48x96xf32> to vector<48x8xf32>
    %cst_171 = arith.constant dense<0.000000e+00> : vector<48x48xf32>
    %388 = tpu.matmul %385, %386, %cst_171 {dimension_numbers = #tpu.dot_dimension_numbers<[1], [1], [0], [0], [0, 0, 1, 0], [], []>} : vector<48x8xf32>, vector<48x8xf32>, vector<48x48xf32> -> vector<48x48xf32>
    %cst_172 = arith.constant 0.353553385 : f32
    %389 = vector.broadcast %cst_172 : f32 to vector<48x48xf32>
    %390 = arith.mulf %388, %389 : vector<48x48xf32>
    %391 = arith.addf %390, %355 : vector<48x48xf32>
    %cst_173 = arith.constant dense<0xFF800000> : vector<48xf32>
    %392 = vector.multi_reduction <maximumf>, %391, %cst_173 [1] : vector<48x48xf32> to vector<48xf32>
    %393 = vector.shape_cast %392 : vector<48xf32> to vector<48x1xf32>
    %394 = vector.broadcast %393 : vector<48x1xf32> to vector<48x48xf32>
    %395 = arith.subf %391, %394 : vector<48x48xf32>
    %396 = math.exp %395 : vector<48x48xf32>
    %cst_174 = arith.constant dense<0.000000e+00> : vector<48xf32>
    %397 = vector.multi_reduction <add>, %396, %cst_174 [1] : vector<48x48xf32> to vector<48xf32>
    %398 = vector.shape_cast %397 : vector<48xf32> to vector<48x1xf32>
    %399 = vector.broadcast %398 : vector<48x1xf32> to vector<48x48xf32>
    %400 = arith.divf %396, %399 : vector<48x48xf32>
    %cst_175 = arith.constant dense<0.000000e+00> : vector<48x8xf32>
    %401 = tpu.matmul %400, %387, %cst_175 {dimension_numbers = #tpu.dot_dimension_numbers<[1], [0], [0], [1], [0, 0, 1, 1], [], []>} : vector<48x48xf32>, vector<48x8xf32>, vector<48x8xf32> -> vector<48x8xf32>
    %402 = vector.extract_strided_slice %384 {offsets = [0, 8], sizes = [48, 8], strides = [1, 1]} : vector<48x96xf32> to vector<48x8xf32>
    %403 = vector.extract_strided_slice %384 {offsets = [0, 40], sizes = [48, 8], strides = [1, 1]} : vector<48x96xf32> to vector<48x8xf32>
    %404 = vector.extract_strided_slice %384 {offsets = [0, 72], sizes = [48, 8], strides = [1, 1]} : vector<48x96xf32> to vector<48x8xf32>
    %cst_176 = arith.constant dense<0.000000e+00> : vector<48x48xf32>
    %405 = tpu.matmul %402, %403, %cst_176 {dimension_numbers = #tpu.dot_dimension_numbers<[1], [1], [0], [0], [0, 0, 1, 0], [], []>} : vector<48x8xf32>, vector<48x8xf32>, vector<48x48xf32> -> vector<48x48xf32>
    %cst_177 = arith.constant 0.353553385 : f32
    %406 = vector.broadcast %cst_177 : f32 to vector<48x48xf32>
    %407 = arith.mulf %405, %406 : vector<48x48xf32>
    %408 = arith.addf %407, %355 : vector<48x48xf32>
    %cst_178 = arith.constant dense<0xFF800000> : vector<48xf32>
    %409 = vector.multi_reduction <maximumf>, %408, %cst_178 [1] : vector<48x48xf32> to vector<48xf32>
    %410 = vector.shape_cast %409 : vector<48xf32> to vector<48x1xf32>
    %411 = vector.broadcast %410 : vector<48x1xf32> to vector<48x48xf32>
    %412 = arith.subf %408, %411 : vector<48x48xf32>
    %413 = math.exp %412 : vector<48x48xf32>
    %cst_179 = arith.constant dense<0.000000e+00> : vector<48xf32>
    %414 = vector.multi_reduction <add>, %413, %cst_179 [1] : vector<48x48xf32> to vector<48xf32>
    %415 = vector.shape_cast %414 : vector<48xf32> to vector<48x1xf32>
    %416 = vector.broadcast %415 : vector<48x1xf32> to vector<48x48xf32>
    %417 = arith.divf %413, %416 : vector<48x48xf32>
    %cst_180 = arith.constant dense<0.000000e+00> : vector<48x8xf32>
    %418 = tpu.matmul %417, %404, %cst_180 {dimension_numbers = #tpu.dot_dimension_numbers<[1], [0], [0], [1], [0, 0, 1, 1], [], []>} : vector<48x48xf32>, vector<48x8xf32>, vector<48x8xf32> -> vector<48x8xf32>
    %419 = vector.extract_strided_slice %384 {offsets = [0, 16], sizes = [48, 8], strides = [1, 1]} : vector<48x96xf32> to vector<48x8xf32>
    %420 = vector.extract_strided_slice %384 {offsets = [0, 48], sizes = [48, 8], strides = [1, 1]} : vector<48x96xf32> to vector<48x8xf32>
    %421 = vector.extract_strided_slice %384 {offsets = [0, 80], sizes = [48, 8], strides = [1, 1]} : vector<48x96xf32> to vector<48x8xf32>
    %cst_181 = arith.constant dense<0.000000e+00> : vector<48x48xf32>
    %422 = tpu.matmul %419, %420, %cst_181 {dimension_numbers = #tpu.dot_dimension_numbers<[1], [1], [0], [0], [0, 0, 1, 0], [], []>} : vector<48x8xf32>, vector<48x8xf32>, vector<48x48xf32> -> vector<48x48xf32>
    %cst_182 = arith.constant 0.353553385 : f32
    %423 = vector.broadcast %cst_182 : f32 to vector<48x48xf32>
    %424 = arith.mulf %422, %423 : vector<48x48xf32>
    %425 = arith.addf %424, %355 : vector<48x48xf32>
    %cst_183 = arith.constant dense<0xFF800000> : vector<48xf32>
    %426 = vector.multi_reduction <maximumf>, %425, %cst_183 [1] : vector<48x48xf32> to vector<48xf32>
    %427 = vector.shape_cast %426 : vector<48xf32> to vector<48x1xf32>
    %428 = vector.broadcast %427 : vector<48x1xf32> to vector<48x48xf32>
    %429 = arith.subf %425, %428 : vector<48x48xf32>
    %430 = math.exp %429 : vector<48x48xf32>
    %cst_184 = arith.constant dense<0.000000e+00> : vector<48xf32>
    %431 = vector.multi_reduction <add>, %430, %cst_184 [1] : vector<48x48xf32> to vector<48xf32>
    %432 = vector.shape_cast %431 : vector<48xf32> to vector<48x1xf32>
    %433 = vector.broadcast %432 : vector<48x1xf32> to vector<48x48xf32>
    %434 = arith.divf %430, %433 : vector<48x48xf32>
    %cst_185 = arith.constant dense<0.000000e+00> : vector<48x8xf32>
    %435 = tpu.matmul %434, %421, %cst_185 {dimension_numbers = #tpu.dot_dimension_numbers<[1], [0], [0], [1], [0, 0, 1, 1], [], []>} : vector<48x48xf32>, vector<48x8xf32>, vector<48x8xf32> -> vector<48x8xf32>
    %436 = vector.extract_strided_slice %384 {offsets = [0, 24], sizes = [48, 8], strides = [1, 1]} : vector<48x96xf32> to vector<48x8xf32>
    %437 = vector.extract_strided_slice %384 {offsets = [0, 56], sizes = [48, 8], strides = [1, 1]} : vector<48x96xf32> to vector<48x8xf32>
    %438 = vector.extract_strided_slice %384 {offsets = [0, 88], sizes = [48, 8], strides = [1, 1]} : vector<48x96xf32> to vector<48x8xf32>
    %cst_186 = arith.constant dense<0.000000e+00> : vector<48x48xf32>
    %439 = tpu.matmul %436, %437, %cst_186 {dimension_numbers = #tpu.dot_dimension_numbers<[1], [1], [0], [0], [0, 0, 1, 0], [], []>} : vector<48x8xf32>, vector<48x8xf32>, vector<48x48xf32> -> vector<48x48xf32>
    %cst_187 = arith.constant 0.353553385 : f32
    %440 = vector.broadcast %cst_187 : f32 to vector<48x48xf32>
    %441 = arith.mulf %439, %440 : vector<48x48xf32>
    %442 = arith.addf %441, %355 : vector<48x48xf32>
    %cst_188 = arith.constant dense<0xFF800000> : vector<48xf32>
    %443 = vector.multi_reduction <maximumf>, %442, %cst_188 [1] : vector<48x48xf32> to vector<48xf32>
    %444 = vector.shape_cast %443 : vector<48xf32> to vector<48x1xf32>
    %445 = vector.broadcast %444 : vector<48x1xf32> to vector<48x48xf32>
    %446 = arith.subf %442, %445 : vector<48x48xf32>
    %447 = math.exp %446 : vector<48x48xf32>
    %cst_189 = arith.constant dense<0.000000e+00> : vector<48xf32>
    %448 = vector.multi_reduction <add>, %447, %cst_189 [1] : vector<48x48xf32> to vector<48xf32>
    %449 = vector.shape_cast %448 : vector<48xf32> to vector<48x1xf32>
    %450 = vector.broadcast %449 : vector<48x1xf32> to vector<48x48xf32>
    %451 = arith.divf %447, %450 : vector<48x48xf32>
    %cst_190 = arith.constant dense<0.000000e+00> : vector<48x8xf32>
    %452 = tpu.matmul %451, %438, %cst_190 {dimension_numbers = #tpu.dot_dimension_numbers<[1], [0], [0], [1], [0, 0, 1, 1], [], []>} : vector<48x48xf32>, vector<48x8xf32>, vector<48x8xf32> -> vector<48x8xf32>
    %453 = tpu.concatenate %401, %418, %435, %452 in 1 : vector<48x8xf32>, vector<48x8xf32>, vector<48x8xf32>, vector<48x8xf32> -> vector<48x32xf32>
    %c0_191 = arith.constant 0 : index
    %c0_192 = arith.constant 0 : index
    %454 = vector.load %arg41[%c0_191, %c0_192] : memref<32x32xf32, #tpu.memory_space<vmem>>, vector<32x32xf32>
    %cst_193 = arith.constant dense<0.000000e+00> : vector<48x32xf32>
    %455 = tpu.matmul %453, %454, %cst_193 {dimension_numbers = #tpu.dot_dimension_numbers<[1], [0], [0], [1], [0, 0, 1, 1], [], []>} : vector<48x32xf32>, vector<32x32xf32>, vector<48x32xf32> -> vector<48x32xf32>
    %456 = arith.addf %354, %455 : vector<48x32xf32>
    %c0_194 = arith.constant 0 : index
    %c0_195 = arith.constant 0 : index
    %457 = vector.load %arg42[%c0_194, %c0_195] : memref<1x32xf32, #tpu.memory_space<vmem>>, vector<1x32xf32>
    %458 = vector.broadcast %457 : vector<1x32xf32> to vector<48x32xf32>
    %459 = arith.addf %456, %458 : vector<48x32xf32>
    %c0_196 = arith.constant 0 : index
    %c0_197 = arith.constant 0 : index
    %460 = vector.load %arg43[%c0_196, %c0_197] : memref<1x32xf32, #tpu.memory_space<vmem>>, vector<1x32xf32>
    %c0_198 = arith.constant 0 : index
    %c0_199 = arith.constant 0 : index
    %461 = vector.load %arg44[%c0_198, %c0_199] : memref<1x32xf32, #tpu.memory_space<vmem>>, vector<1x32xf32>
    %cst_200 = arith.constant dense<0.000000e+00> : vector<48xf32>
    %462 = vector.multi_reduction <add>, %459, %cst_200 [1] : vector<48x32xf32> to vector<48xf32>
    %463 = vector.shape_cast %462 : vector<48xf32> to vector<48x1xf32>
    %cst_201 = arith.constant 3.200000e+01 : f32
    %464 = vector.broadcast %cst_201 : f32 to vector<48x1xf32>
    %465 = arith.divf %463, %464 : vector<48x1xf32>
    %466 = vector.broadcast %465 : vector<48x1xf32> to vector<48x32xf32>
    %467 = arith.subf %459, %466 : vector<48x32xf32>
    %468 = arith.mulf %467, %467 : vector<48x32xf32>
    %cst_202 = arith.constant dense<0.000000e+00> : vector<48xf32>
    %469 = vector.multi_reduction <add>, %468, %cst_202 [1] : vector<48x32xf32> to vector<48xf32>
    %470 = vector.shape_cast %469 : vector<48xf32> to vector<48x1xf32>
    %cst_203 = arith.constant 3.200000e+01 : f32
    %471 = vector.broadcast %cst_203 : f32 to vector<48x1xf32>
    %472 = arith.divf %470, %471 : vector<48x1xf32>
    %473 = vector.broadcast %465 : vector<48x1xf32> to vector<48x32xf32>
    %474 = arith.subf %459, %473 : vector<48x32xf32>
    %cst_204 = arith.constant 9.99999974E-6 : f32
    %475 = vector.broadcast %cst_204 : f32 to vector<48x1xf32>
    %476 = arith.addf %472, %475 : vector<48x1xf32>
    %477 = math.rsqrt %476 : vector<48x1xf32>
    %478 = vector.broadcast %477 : vector<48x1xf32> to vector<48x32xf32>
    %479 = arith.mulf %474, %478 : vector<48x32xf32>
    %480 = vector.broadcast %460 : vector<1x32xf32> to vector<48x32xf32>
    %481 = arith.mulf %479, %480 : vector<48x32xf32>
    %482 = vector.broadcast %461 : vector<1x32xf32> to vector<48x32xf32>
    %483 = arith.addf %481, %482 : vector<48x32xf32>
    %c0_205 = arith.constant 0 : index
    %c0_206 = arith.constant 0 : index
    %484 = vector.load %arg45[%c0_205, %c0_206] : memref<32x128xf32, #tpu.memory_space<vmem>>, vector<32x128xf32>
    %cst_207 = arith.constant dense<0.000000e+00> : vector<48x128xf32>
    %485 = tpu.matmul %483, %484, %cst_207 {dimension_numbers = #tpu.dot_dimension_numbers<[1], [0], [0], [1], [0, 0, 1, 1], [], []>} : vector<48x32xf32>, vector<32x128xf32>, vector<48x128xf32> -> vector<48x128xf32>
    %c0_208 = arith.constant 0 : index
    %c0_209 = arith.constant 0 : index
    %486 = vector.load %arg46[%c0_208, %c0_209] : memref<1x128xf32, #tpu.memory_space<vmem>>, vector<1x128xf32>
    %487 = vector.broadcast %486 : vector<1x128xf32> to vector<48x128xf32>
    %488 = arith.addf %485, %487 : vector<48x128xf32>
    %cst_210 = arith.constant 1.702000e+00 : f32
    %489 = vector.broadcast %cst_210 : f32 to vector<48x128xf32>
    %490 = arith.mulf %489, %488 : vector<48x128xf32>
    %491 = arith.negf %490 : vector<48x128xf32>
    %492 = math.exp %491 : vector<48x128xf32>
    %cst_211 = arith.constant 1.000000e+00 : f32
    %493 = vector.broadcast %cst_211 : f32 to vector<48x128xf32>
    %494 = arith.addf %493, %492 : vector<48x128xf32>
    %495 = arith.divf %493, %494 : vector<48x128xf32>
    %496 = arith.mulf %488, %495 : vector<48x128xf32>
    %c0_212 = arith.constant 0 : index
    %c0_213 = arith.constant 0 : index
    %497 = vector.load %arg47[%c0_212, %c0_213] : memref<128x32xf32, #tpu.memory_space<vmem>>, vector<128x32xf32>
    %cst_214 = arith.constant dense<0.000000e+00> : vector<48x32xf32>
    %498 = tpu.matmul %496, %497, %cst_214 {dimension_numbers = #tpu.dot_dimension_numbers<[1], [0], [0], [1], [0, 0, 1, 1], [], []>} : vector<48x128xf32>, vector<128x32xf32>, vector<48x32xf32> -> vector<48x32xf32>
    %c0_215 = arith.constant 0 : index
    %c0_216 = arith.constant 0 : index
    %499 = vector.load %arg48[%c0_215, %c0_216] : memref<1x32xf32, #tpu.memory_space<vmem>>, vector<1x32xf32>
    %500 = vector.broadcast %499 : vector<1x32xf32> to vector<48x32xf32>
    %501 = arith.addf %498, %500 : vector<48x32xf32>
    %502 = arith.addf %459, %501 : vector<48x32xf32>
    %c0_217 = arith.constant 0 : index
    %c0_218 = arith.constant 0 : index
    %503 = vector.load %arg49[%c0_217, %c0_218] : memref<1x32xf32, #tpu.memory_space<vmem>>, vector<1x32xf32>
    %c0_219 = arith.constant 0 : index
    %c0_220 = arith.constant 0 : index
    %504 = vector.load %arg50[%c0_219, %c0_220] : memref<1x32xf32, #tpu.memory_space<vmem>>, vector<1x32xf32>
    %cst_221 = arith.constant dense<0.000000e+00> : vector<48xf32>
    %505 = vector.multi_reduction <add>, %502, %cst_221 [1] : vector<48x32xf32> to vector<48xf32>
    %506 = vector.shape_cast %505 : vector<48xf32> to vector<48x1xf32>
    %cst_222 = arith.constant 3.200000e+01 : f32
    %507 = vector.broadcast %cst_222 : f32 to vector<48x1xf32>
    %508 = arith.divf %506, %507 : vector<48x1xf32>
    %509 = vector.broadcast %508 : vector<48x1xf32> to vector<48x32xf32>
    %510 = arith.subf %502, %509 : vector<48x32xf32>
    %511 = arith.mulf %510, %510 : vector<48x32xf32>
    %cst_223 = arith.constant dense<0.000000e+00> : vector<48xf32>
    %512 = vector.multi_reduction <add>, %511, %cst_223 [1] : vector<48x32xf32> to vector<48xf32>
    %513 = vector.shape_cast %512 : vector<48xf32> to vector<48x1xf32>
    %cst_224 = arith.constant 3.200000e+01 : f32
    %514 = vector.broadcast %cst_224 : f32 to vector<48x1xf32>
    %515 = arith.divf %513, %514 : vector<48x1xf32>
    %516 = vector.broadcast %508 : vector<48x1xf32> to vector<48x32xf32>
    %517 = arith.subf %502, %516 : vector<48x32xf32>
    %cst_225 = arith.constant 9.99999974E-6 : f32
    %518 = vector.broadcast %cst_225 : f32 to vector<48x1xf32>
    %519 = arith.addf %515, %518 : vector<48x1xf32>
    %520 = math.rsqrt %519 : vector<48x1xf32>
    %521 = vector.broadcast %520 : vector<48x1xf32> to vector<48x32xf32>
    %522 = arith.mulf %517, %521 : vector<48x32xf32>
    %523 = vector.broadcast %503 : vector<1x32xf32> to vector<48x32xf32>
    %524 = arith.mulf %522, %523 : vector<48x32xf32>
    %525 = vector.broadcast %504 : vector<1x32xf32> to vector<48x32xf32>
    %526 = arith.addf %524, %525 : vector<48x32xf32>
    %c0_226 = arith.constant 0 : index
    %c0_227 = arith.constant 0 : index
    %527 = vector.load %arg51[%c0_226, %c0_227] : memref<32x96xf32, #tpu.memory_space<vmem>>, vector<32x96xf32>
    %cst_228 = arith.constant dense<0.000000e+00> : vector<48x96xf32>
    %528 = tpu.matmul %526, %527, %cst_228 {dimension_numbers = #tpu.dot_dimension_numbers<[1], [0], [0], [1], [0, 0, 1, 1], [], []>} : vector<48x32xf32>, vector<32x96xf32>, vector<48x96xf32> -> vector<48x96xf32>
    %c0_229 = arith.constant 0 : index
    %c0_230 = arith.constant 0 : index
    %529 = vector.load %arg52[%c0_229, %c0_230] : memref<1x96xf32, #tpu.memory_space<vmem>>, vector<1x96xf32>
    %530 = vector.broadcast %529 : vector<1x96xf32> to vector<48x96xf32>
    %531 = arith.addf %528, %530 : vector<48x96xf32>
    %532 = vector.extract_strided_slice %531 {offsets = [0, 0], sizes = [48, 8], strides = [1, 1]} : vector<48x96xf32> to vector<48x8xf32>
    %533 = vector.extract_strided_slice %531 {offsets = [0, 32], sizes = [48, 8], strides = [1, 1]} : vector<48x96xf32> to vector<48x8xf32>
    %534 = vector.extract_strided_slice %531 {offsets = [0, 64], sizes = [48, 8], strides = [1, 1]} : vector<48x96xf32> to vector<48x8xf32>
    %cst_231 = arith.constant dense<0.000000e+00> : vector<48x48xf32>
    %535 = tpu.matmul %532, %533, %cst_231 {dimension_numbers = #tpu.dot_dimension_numbers<[1], [1], [0], [0], [0, 0, 1, 0], [], []>} : vector<48x8xf32>, vector<48x8xf32>, vector<48x48xf32> -> vector<48x48xf32>
    %cst_232 = arith.constant 0.353553385 : f32
    %536 = vector.broadcast %cst_232 : f32 to vector<48x48xf32>
    %537 = arith.mulf %535, %536 : vector<48x48xf32>
    %538 = arith.addf %537, %355 : vector<48x48xf32>
    %cst_233 = arith.constant dense<0xFF800000> : vector<48xf32>
    %539 = vector.multi_reduction <maximumf>, %538, %cst_233 [1] : vector<48x48xf32> to vector<48xf32>
    %540 = vector.shape_cast %539 : vector<48xf32> to vector<48x1xf32>
    %541 = vector.broadcast %540 : vector<48x1xf32> to vector<48x48xf32>
    %542 = arith.subf %538, %541 : vector<48x48xf32>
    %543 = math.exp %542 : vector<48x48xf32>
    %cst_234 = arith.constant dense<0.000000e+00> : vector<48xf32>
    %544 = vector.multi_reduction <add>, %543, %cst_234 [1] : vector<48x48xf32> to vector<48xf32>
    %545 = vector.shape_cast %544 : vector<48xf32> to vector<48x1xf32>
    %546 = vector.broadcast %545 : vector<48x1xf32> to vector<48x48xf32>
    %547 = arith.divf %543, %546 : vector<48x48xf32>
    %cst_235 = arith.constant dense<0.000000e+00> : vector<48x8xf32>
    %548 = tpu.matmul %547, %534, %cst_235 {dimension_numbers = #tpu.dot_dimension_numbers<[1], [0], [0], [1], [0, 0, 1, 1], [], []>} : vector<48x48xf32>, vector<48x8xf32>, vector<48x8xf32> -> vector<48x8xf32>
    %549 = vector.extract_strided_slice %531 {offsets = [0, 8], sizes = [48, 8], strides = [1, 1]} : vector<48x96xf32> to vector<48x8xf32>
    %550 = vector.extract_strided_slice %531 {offsets = [0, 40], sizes = [48, 8], strides = [1, 1]} : vector<48x96xf32> to vector<48x8xf32>
    %551 = vector.extract_strided_slice %531 {offsets = [0, 72], sizes = [48, 8], strides = [1, 1]} : vector<48x96xf32> to vector<48x8xf32>
    %cst_236 = arith.constant dense<0.000000e+00> : vector<48x48xf32>
    %552 = tpu.matmul %549, %550, %cst_236 {dimension_numbers = #tpu.dot_dimension_numbers<[1], [1], [0], [0], [0, 0, 1, 0], [], []>} : vector<48x8xf32>, vector<48x8xf32>, vector<48x48xf32> -> vector<48x48xf32>
    %cst_237 = arith.constant 0.353553385 : f32
    %553 = vector.broadcast %cst_237 : f32 to vector<48x48xf32>
    %554 = arith.mulf %552, %553 : vector<48x48xf32>
    %555 = arith.addf %554, %355 : vector<48x48xf32>
    %cst_238 = arith.constant dense<0xFF800000> : vector<48xf32>
    %556 = vector.multi_reduction <maximumf>, %555, %cst_238 [1] : vector<48x48xf32> to vector<48xf32>
    %557 = vector.shape_cast %556 : vector<48xf32> to vector<48x1xf32>
    %558 = vector.broadcast %557 : vector<48x1xf32> to vector<48x48xf32>
    %559 = arith.subf %555, %558 : vector<48x48xf32>
    %560 = math.exp %559 : vector<48x48xf32>
    %cst_239 = arith.constant dense<0.000000e+00> : vector<48xf32>
    %561 = vector.multi_reduction <add>, %560, %cst_239 [1] : vector<48x48xf32> to vector<48xf32>
    %562 = vector.shape_cast %561 : vector<48xf32> to vector<48x1xf32>
    %563 = vector.broadcast %562 : vector<48x1xf32> to vector<48x48xf32>
    %564 = arith.divf %560, %563 : vector<48x48xf32>
    %cst_240 = arith.constant dense<0.000000e+00> : vector<48x8xf32>
    %565 = tpu.matmul %564, %551, %cst_240 {dimension_numbers = #tpu.dot_dimension_numbers<[1], [0], [0], [1], [0, 0, 1, 1], [], []>} : vector<48x48xf32>, vector<48x8xf32>, vector<48x8xf32> -> vector<48x8xf32>
    %566 = vector.extract_strided_slice %531 {offsets = [0, 16], sizes = [48, 8], strides = [1, 1]} : vector<48x96xf32> to vector<48x8xf32>
    %567 = vector.extract_strided_slice %531 {offsets = [0, 48], sizes = [48, 8], strides = [1, 1]} : vector<48x96xf32> to vector<48x8xf32>
    %568 = vector.extract_strided_slice %531 {offsets = [0, 80], sizes = [48, 8], strides = [1, 1]} : vector<48x96xf32> to vector<48x8xf32>
    %cst_241 = arith.constant dense<0.000000e+00> : vector<48x48xf32>
    %569 = tpu.matmul %566, %567, %cst_241 {dimension_numbers = #tpu.dot_dimension_numbers<[1], [1], [0], [0], [0, 0, 1, 0], [], []>} : vector<48x8xf32>, vector<48x8xf32>, vector<48x48xf32> -> vector<48x48xf32>
    %cst_242 = arith.constant 0.353553385 : f32
    %570 = vector.broadcast %cst_242 : f32 to vector<48x48xf32>
    %571 = arith.mulf %569, %570 : vector<48x48xf32>
    %572 = arith.addf %571, %355 : vector<48x48xf32>
    %cst_243 = arith.constant dense<0xFF800000> : vector<48xf32>
    %573 = vector.multi_reduction <maximumf>, %572, %cst_243 [1] : vector<48x48xf32> to vector<48xf32>
    %574 = vector.shape_cast %573 : vector<48xf32> to vector<48x1xf32>
    %575 = vector.broadcast %574 : vector<48x1xf32> to vector<48x48xf32>
    %576 = arith.subf %572, %575 : vector<48x48xf32>
    %577 = math.exp %576 : vector<48x48xf32>
    %cst_244 = arith.constant dense<0.000000e+00> : vector<48xf32>
    %578 = vector.multi_reduction <add>, %577, %cst_244 [1] : vector<48x48xf32> to vector<48xf32>
    %579 = vector.shape_cast %578 : vector<48xf32> to vector<48x1xf32>
    %580 = vector.broadcast %579 : vector<48x1xf32> to vector<48x48xf32>
    %581 = arith.divf %577, %580 : vector<48x48xf32>
    %cst_245 = arith.constant dense<0.000000e+00> : vector<48x8xf32>
    %582 = tpu.matmul %581, %568, %cst_245 {dimension_numbers = #tpu.dot_dimension_numbers<[1], [0], [0], [1], [0, 0, 1, 1], [], []>} : vector<48x48xf32>, vector<48x8xf32>, vector<48x8xf32> -> vector<48x8xf32>
    %583 = vector.extract_strided_slice %531 {offsets = [0, 24], sizes = [48, 8], strides = [1, 1]} : vector<48x96xf32> to vector<48x8xf32>
    %584 = vector.extract_strided_slice %531 {offsets = [0, 56], sizes = [48, 8], strides = [1, 1]} : vector<48x96xf32> to vector<48x8xf32>
    %585 = vector.extract_strided_slice %531 {offsets = [0, 88], sizes = [48, 8], strides = [1, 1]} : vector<48x96xf32> to vector<48x8xf32>
    %cst_246 = arith.constant dense<0.000000e+00> : vector<48x48xf32>
    %586 = tpu.matmul %583, %584, %cst_246 {dimension_numbers = #tpu.dot_dimension_numbers<[1], [1], [0], [0], [0, 0, 1, 0], [], []>} : vector<48x8xf32>, vector<48x8xf32>, vector<48x48xf32> -> vector<48x48xf32>
    %cst_247 = arith.constant 0.353553385 : f32
    %587 = vector.broadcast %cst_247 : f32 to vector<48x48xf32>
    %588 = arith.mulf %586, %587 : vector<48x48xf32>
    %589 = arith.addf %588, %355 : vector<48x48xf32>
    %cst_248 = arith.constant dense<0xFF800000> : vector<48xf32>
    %590 = vector.multi_reduction <maximumf>, %589, %cst_248 [1] : vector<48x48xf32> to vector<48xf32>
    %591 = vector.shape_cast %590 : vector<48xf32> to vector<48x1xf32>
    %592 = vector.broadcast %591 : vector<48x1xf32> to vector<48x48xf32>
    %593 = arith.subf %589, %592 : vector<48x48xf32>
    %594 = math.exp %593 : vector<48x48xf32>
    %cst_249 = arith.constant dense<0.000000e+00> : vector<48xf32>
    %595 = vector.multi_reduction <add>, %594, %cst_249 [1] : vector<48x48xf32> to vector<48xf32>
    %596 = vector.shape_cast %595 : vector<48xf32> to vector<48x1xf32>
    %597 = vector.broadcast %596 : vector<48x1xf32> to vector<48x48xf32>
    %598 = arith.divf %594, %597 : vector<48x48xf32>
    %cst_250 = arith.constant dense<0.000000e+00> : vector<48x8xf32>
    %599 = tpu.matmul %598, %585, %cst_250 {dimension_numbers = #tpu.dot_dimension_numbers<[1], [0], [0], [1], [0, 0, 1, 1], [], []>} : vector<48x48xf32>, vector<48x8xf32>, vector<48x8xf32> -> vector<48x8xf32>
    %600 = tpu.concatenate %548, %565, %582, %599 in 1 : vector<48x8xf32>, vector<48x8xf32>, vector<48x8xf32>, vector<48x8xf32> -> vector<48x32xf32>
    %c0_251 = arith.constant 0 : index
    %c0_252 = arith.constant 0 : index
    %601 = vector.load %arg53[%c0_251, %c0_252] : memref<32x32xf32, #tpu.memory_space<vmem>>, vector<32x32xf32>
    %cst_253 = arith.constant dense<0.000000e+00> : vector<48x32xf32>
    %602 = tpu.matmul %600, %601, %cst_253 {dimension_numbers = #tpu.dot_dimension_numbers<[1], [0], [0], [1], [0, 0, 1, 1], [], []>} : vector<48x32xf32>, vector<32x32xf32>, vector<48x32xf32> -> vector<48x32xf32>
    %603 = arith.addf %502, %602 : vector<48x32xf32>
    %c0_254 = arith.constant 0 : index
    %c0_255 = arith.constant 0 : index
    %604 = vector.load %arg54[%c0_254, %c0_255] : memref<1x32xf32, #tpu.memory_space<vmem>>, vector<1x32xf32>
    %605 = vector.broadcast %604 : vector<1x32xf32> to vector<48x32xf32>
    %606 = arith.addf %603, %605 : vector<48x32xf32>
    %c0_256 = arith.constant 0 : index
    %c0_257 = arith.constant 0 : index
    %607 = vector.load %arg55[%c0_256, %c0_257] : memref<1x32xf32, #tpu.memory_space<vmem>>, vector<1x32xf32>
    %c0_258 = arith.constant 0 : index
    %c0_259 = arith.constant 0 : index
    %608 = vector.load %arg56[%c0_258, %c0_259] : memref<1x32xf32, #tpu.memory_space<vmem>>, vector<1x32xf32>
    %cst_260 = arith.constant dense<0.000000e+00> : vector<48xf32>
    %609 = vector.multi_reduction <add>, %606, %cst_260 [1] : vector<48x32xf32> to vector<48xf32>
    %610 = vector.shape_cast %609 : vector<48xf32> to vector<48x1xf32>
    %cst_261 = arith.constant 3.200000e+01 : f32
    %611 = vector.broadcast %cst_261 : f32 to vector<48x1xf32>
    %612 = arith.divf %610, %611 : vector<48x1xf32>
    %613 = vector.broadcast %612 : vector<48x1xf32> to vector<48x32xf32>
    %614 = arith.subf %606, %613 : vector<48x32xf32>
    %615 = arith.mulf %614, %614 : vector<48x32xf32>
    %cst_262 = arith.constant dense<0.000000e+00> : vector<48xf32>
    %616 = vector.multi_reduction <add>, %615, %cst_262 [1] : vector<48x32xf32> to vector<48xf32>
    %617 = vector.shape_cast %616 : vector<48xf32> to vector<48x1xf32>
    %cst_263 = arith.constant 3.200000e+01 : f32
    %618 = vector.broadcast %cst_263 : f32 to vector<48x1xf32>
    %619 = arith.divf %617, %618 : vector<48x1xf32>
    %620 = vector.broadcast %612 : vector<48x1xf32> to vector<48x32xf32>
    %621 = arith.subf %606, %620 : vector<48x32xf32>
    %cst_264 = arith.constant 9.99999974E-6 : f32
    %622 = vector.broadcast %cst_264 : f32 to vector<48x1xf32>
    %623 = arith.addf %619, %622 : vector<48x1xf32>
    %624 = math.rsqrt %623 : vector<48x1xf32>
    %625 = vector.broadcast %624 : vector<48x1xf32> to vector<48x32xf32>
    %626 = arith.mulf %621, %625 : vector<48x32xf32>
    %627 = vector.broadcast %607 : vector<1x32xf32> to vector<48x32xf32>
    %628 = arith.mulf %626, %627 : vector<48x32xf32>
    %629 = vector.broadcast %608 : vector<1x32xf32> to vector<48x32xf32>
    %630 = arith.addf %628, %629 : vector<48x32xf32>
    %c0_265 = arith.constant 0 : index
    %c0_266 = arith.constant 0 : index
    %631 = vector.load %arg57[%c0_265, %c0_266] : memref<32x128xf32, #tpu.memory_space<vmem>>, vector<32x128xf32>
    %cst_267 = arith.constant dense<0.000000e+00> : vector<48x128xf32>
    %632 = tpu.matmul %630, %631, %cst_267 {dimension_numbers = #tpu.dot_dimension_numbers<[1], [0], [0], [1], [0, 0, 1, 1], [], []>} : vector<48x32xf32>, vector<32x128xf32>, vector<48x128xf32> -> vector<48x128xf32>
    %c0_268 = arith.constant 0 : index
    %c0_269 = arith.constant 0 : index
    %633 = vector.load %arg58[%c0_268, %c0_269] : memref<1x128xf32, #tpu.memory_space<vmem>>, vector<1x128xf32>
    %634 = vector.broadcast %633 : vector<1x128xf32> to vector<48x128xf32>
    %635 = arith.addf %632, %634 : vector<48x128xf32>
    %cst_270 = arith.constant 1.702000e+00 : f32
    %636 = vector.broadcast %cst_270 : f32 to vector<48x128xf32>
    %637 = arith.mulf %636, %635 : vector<48x128xf32>
    %638 = arith.negf %637 : vector<48x128xf32>
    %639 = math.exp %638 : vector<48x128xf32>
    %cst_271 = arith.constant 1.000000e+00 : f32
    %640 = vector.broadcast %cst_271 : f32 to vector<48x128xf32>
    %641 = arith.addf %640, %639 : vector<48x128xf32>
    %642 = arith.divf %640, %641 : vector<48x128xf32>
    %643 = arith.mulf %635, %642 : vector<48x128xf32>
    %c0_272 = arith.constant 0 : index
    %c0_273 = arith.constant 0 : index
    %644 = vector.load %arg59[%c0_272, %c0_273] : memref<128x32xf32, #tpu.memory_space<vmem>>, vector<128x32xf32>
    %cst_274 = arith.constant dense<0.000000e+00> : vector<48x32xf32>
    %645 = tpu.matmul %643, %644, %cst_274 {dimension_numbers = #tpu.dot_dimension_numbers<[1], [0], [0], [1], [0, 0, 1, 1], [], []>} : vector<48x128xf32>, vector<128x32xf32>, vector<48x32xf32> -> vector<48x32xf32>
    %c0_275 = arith.constant 0 : index
    %c0_276 = arith.constant 0 : index
    %646 = vector.load %arg60[%c0_275, %c0_276] : memref<1x32xf32, #tpu.memory_space<vmem>>, vector<1x32xf32>
    %647 = vector.broadcast %646 : vector<1x32xf32> to vector<48x32xf32>
    %648 = arith.addf %645, %647 : vector<48x32xf32>
    %649 = arith.addf %606, %648 : vector<48x32xf32>
    %c0_277 = arith.constant 0 : index
    %c0_278 = arith.constant 0 : index
    %650 = vector.load %arg61[%c0_277, %c0_278] : memref<1x32xf32, #tpu.memory_space<vmem>>, vector<1x32xf32>
    %c0_279 = arith.constant 0 : index
    %c0_280 = arith.constant 0 : index
    %651 = vector.load %arg62[%c0_279, %c0_280] : memref<1x32xf32, #tpu.memory_space<vmem>>, vector<1x32xf32>
    %cst_281 = arith.constant dense<0.000000e+00> : vector<48xf32>
    %652 = vector.multi_reduction <add>, %649, %cst_281 [1] : vector<48x32xf32> to vector<48xf32>
    %653 = vector.shape_cast %652 : vector<48xf32> to vector<48x1xf32>
    %cst_282 = arith.constant 3.200000e+01 : f32
    %654 = vector.broadcast %cst_282 : f32 to vector<48x1xf32>
    %655 = arith.divf %653, %654 : vector<48x1xf32>
    %656 = vector.broadcast %655 : vector<48x1xf32> to vector<48x32xf32>
    %657 = arith.subf %649, %656 : vector<48x32xf32>
    %658 = arith.mulf %657, %657 : vector<48x32xf32>
    %cst_283 = arith.constant dense<0.000000e+00> : vector<48xf32>
    %659 = vector.multi_reduction <add>, %658, %cst_283 [1] : vector<48x32xf32> to vector<48xf32>
    %660 = vector.shape_cast %659 : vector<48xf32> to vector<48x1xf32>
    %cst_284 = arith.constant 3.200000e+01 : f32
    %661 = vector.broadcast %cst_284 : f32 to vector<48x1xf32>
    %662 = arith.divf %660, %661 : vector<48x1xf32>
    %663 = vector.broadcast %655 : vector<48x1xf32> to vector<48x32xf32>
    %664 = arith.subf %649, %663 : vector<48x32xf32>
    %cst_285 = arith.constant 9.99999974E-6 : f32
    %665 = vector.broadcast %cst_285 : f32 to vector<48x1xf32>
    %666 = arith.addf %662, %665 : vector<48x1xf32>
    %667 = math.rsqrt %666 : vector<48x1xf32>
    %668 = vector.broadcast %667 : vector<48x1xf32> to vector<48x32xf32>
    %669 = arith.mulf %664, %668 : vector<48x32xf32>
    %670 = vector.broadcast %650 : vector<1x32xf32> to vector<48x32xf32>
    %671 = arith.mulf %669, %670 : vector<48x32xf32>
    %672 = vector.broadcast %651 : vector<1x32xf32> to vector<48x32xf32>
    %673 = arith.addf %671, %672 : vector<48x32xf32>
    %c0_286 = arith.constant 0 : index
    %c0_287 = arith.constant 0 : index
    %674 = vector.load %arg63[%c0_286, %c0_287] : memref<3x48xf32, #tpu.memory_space<vmem>>, vector<3x48xf32>
    %cst_288 = arith.constant dense<0.000000e+00> : vector<3x32xf32>
    %675 = tpu.matmul %674, %673, %cst_288 {dimension_numbers = #tpu.dot_dimension_numbers<[1], [0], [0], [1], [0, 0, 1, 1], [], []>} : vector<3x48xf32>, vector<48x32xf32>, vector<3x32xf32> -> vector<3x32xf32>
    %c0_289 = arith.constant 0 : index
    %c0_290 = arith.constant 0 : index
    %676 = vector.load %arg64[%c0_289, %c0_290] : memref<32x32xf32, #tpu.memory_space<vmem>>, vector<32x32xf32>
    %cst_291 = arith.constant dense<0.000000e+00> : vector<3x32xf32>
    %677 = tpu.matmul %675, %676, %cst_291 {dimension_numbers = #tpu.dot_dimension_numbers<[1], [0], [0], [1], [0, 0, 1, 1], [], []>} : vector<3x32xf32>, vector<32x32xf32>, vector<3x32xf32> -> vector<3x32xf32>
    %678 = arith.mulf %351, %351 : vector<2x32xf32>
    %cst_292 = arith.constant dense<0.000000e+00> : vector<2xf32>
    %679 = vector.multi_reduction <add>, %678, %cst_292 [1] : vector<2x32xf32> to vector<2xf32>
    %680 = vector.shape_cast %679 : vector<2xf32> to vector<2x1xf32>
    %681 = math.rsqrt %680 : vector<2x1xf32>
    %682 = vector.broadcast %681 : vector<2x1xf32> to vector<2x32xf32>
    %683 = arith.mulf %351, %682 : vector<2x32xf32>
    %684 = arith.mulf %677, %677 : vector<3x32xf32>
    %cst_293 = arith.constant dense<0.000000e+00> : vector<3xf32>
    %685 = vector.multi_reduction <add>, %684, %cst_293 [1] : vector<3x32xf32> to vector<3xf32>
    %686 = vector.shape_cast %685 : vector<3xf32> to vector<3x1xf32>
    %687 = math.rsqrt %686 : vector<3x1xf32>
    %688 = vector.broadcast %687 : vector<3x1xf32> to vector<3x32xf32>
    %689 = arith.mulf %677, %688 : vector<3x32xf32>
    %c0_294 = arith.constant 0 : index
    %690 = memref.load %arg66[%c0_294] : memref<1xf32, #tpu.memory_space<smem>>
    %cst_295 = arith.constant dense<0.000000e+00> : vector<2x3xf32>
    %691 = tpu.matmul %683, %689, %cst_295 {dimension_numbers = #tpu.dot_dimension_numbers<[1], [1], [0], [0], [0, 0, 1, 0], [], []>} : vector<2x32xf32>, vector<3x32xf32>, vector<2x3xf32> -> vector<2x3xf32>
    %692 = vector.broadcast %690 : f32 to vector<2x3xf32>
    %693 = arith.mulf %692, %691 : vector<2x3xf32>
    %cst_296 = arith.constant 0.000000e+00 : f32
    %694 = vector.broadcast %cst_296 : f32 to vector<2x125xf32>
    %695 = tpu.concatenate %693, %694 in 1 : vector<2x3xf32>, vector<2x125xf32> -> vector<2x128xf32>
    %c0_297 = arith.constant 0 : index
    %c0_298 = arith.constant 0 : index
    %696 = vector.load %arg67[%c0_297, %c0_298] : memref<2x128xf32, #tpu.memory_space<vmem>>, vector<2x128xf32>
    tpu.vector_store %arg67[%c0_297, %c0_298], %695 {strides = array<i32>} : memref<2x128xf32, #tpu.memory_space<vmem>>, vector<2x128xf32>,
    return
  }
  func.func @transform_0(%arg0: i32) -> (i32, i32) {
    %c0_i32 = arith.constant 0 : i32
    %c0_i32_0 = arith.constant 0 : i32
    %c0_i32_1 = arith.constant 0 : i32
    return %c0_i32, %c0_i32_0 : i32, i32
  }
  func.func @transform_1(%arg0: i32) -> (i32, i32) {
    %c0_i32 = arith.constant 0 : i32
    %c0_i32_0 = arith.constant 0 : i32
    %c0_i32_1 = arith.constant 0 : i32
    return %c0_i32, %c0_i32_0 : i32, i32
  }
  func.func @transform_2(%arg0: i32) -> (i32, i32) {
    %c0_i32 = arith.constant 0 : i32
    %c0_i32_0 = arith.constant 0 : i32
    %c0_i32_1 = arith.constant 0 : i32
    return %c0_i32, %c0_i32_0 : i32, i32
  }
  func.func @transform_3(%arg0: i32) -> (i32, i32) {
    %c0_i32 = arith.constant 0 : i32
    %c0_i32_0 = arith.constant 0 : i32
    %c0_i32_1 = arith.constant 0 : i32
    return %c0_i32, %c0_i32_0 : i32, i32
  }
  func.func @transform_4(%arg0: i32) -> (i32, i32) {
    %c0_i32 = arith.constant 0 : i32
    %c0_i32_0 = arith.constant 0 : i32
    %c0_i32_1 = arith.constant 0 : i32
    return %c0_i32, %c0_i32_0 : i32, i32
  }
  func.func @transform_5(%arg0: i32) -> (i32, i32) {
    %c0_i32 = arith.constant 0 : i32
    %c0_i32_0 = arith.constant 0 : i32
    %c0_i32_1 = arith.constant 0 : i32
    return %c0_i32, %c0_i32_0 : i32, i32
  }
  func.func @transform_6(%arg0: i32) -> (i32, i32) {
    %c0_i32 = arith.constant 0 : i32
    %c0_i32_0 = arith.constant 0 : i32
    %c0_i32_1 = arith.constant 0 : i32
    return %c0_i32, %c0_i32_0 : i32, i32
  }
  func.func @transform_7(%arg0: i32) -> (i32, i32) {
    %c0_i32 = arith.constant 0 : i32
    %c0_i32_0 = arith.constant 0 : i32
    %c0_i32_1 = arith.constant 0 : i32
    return %c0_i32, %c0_i32_0 : i32, i32
  }
  func.func @transform_8(%arg0: i32) -> (i32, i32) {
    %c0_i32 = arith.constant 0 : i32
    %c0_i32_0 = arith.constant 0 : i32
    %c0_i32_1 = arith.constant 0 : i32
    return %c0_i32, %c0_i32_0 : i32, i32
  }
  func.func @transform_9(%arg0: i32) -> (i32, i32) {
    %c0_i32 = arith.constant 0 : i32
    %c0_i32_0 = arith.constant 0 : i32
    %c0_i32_1 = arith.constant 0 : i32
    return %c0_i32, %c0_i32_0 : i32, i32
  }
  func.func @transform_10(%arg0: i32) -> (i32, i32) {
    %c0_i32 = arith.constant 0 : i32
    %c0_i32_0 = arith.constant 0 : i32
    %c0_i32_1 = arith.constant 0 : i32
    return %c0_i32, %c0_i32_0 : i32, i32
  }
  func.func @transform_11(%arg0: i32) -> (i32, i32) {
    %c0_i32 = arith.constant 0 : i32
    %c0_i32_0 = arith.constant 0 : i32
    %c0_i32_1 = arith.constant 0 : i32
    return %c0_i32, %c0_i32_0 : i32, i32
  }
  func.func @transform_12(%arg0: i32) -> (i32, i32) {
    %c0_i32 = arith.constant 0 : i32
    %c0_i32_0 = arith.constant 0 : i32
    %c0_i32_1 = arith.constant 0 : i32
    return %c0_i32, %c0_i32_0 : i32, i32
  }
  func.func @transform_13(%arg0: i32) -> (i32, i32) {
    %c0_i32 = arith.constant 0 : i32
    %c0_i32_0 = arith.constant 0 : i32
    %c0_i32_1 = arith.constant 0 : i32
    return %c0_i32, %c0_i32_0 : i32, i32
  }
  func.func @transform_14(%arg0: i32) -> (i32, i32) {
    %c0_i32 = arith.constant 0 : i32
    %c0_i32_0 = arith.constant 0 : i32
    %c0_i32_1 = arith.constant 0 : i32
    return %c0_i32, %c0_i32_0 : i32, i32
  }
  func.func @transform_15(%arg0: i32) -> (i32, i32) {
    %c0_i32 = arith.constant 0 : i32
    %c0_i32_0 = arith.constant 0 : i32
    %c0_i32_1 = arith.constant 0 : i32
    return %c0_i32, %c0_i32_0 : i32, i32
  }
  func.func @transform_16(%arg0: i32) -> (i32, i32) {
    %c0_i32 = arith.constant 0 : i32
    %c0_i32_0 = arith.constant 0 : i32
    %c0_i32_1 = arith.constant 0 : i32
    return %c0_i32, %c0_i32_0 : i32, i32
  }
  func.func @transform_17(%arg0: i32) -> (i32, i32) {
    %c0_i32 = arith.constant 0 : i32
    %c0_i32_0 = arith.constant 0 : i32
    %c0_i32_1 = arith.constant 0 : i32
    return %c0_i32, %c0_i32_0 : i32, i32
  }
  func.func @transform_18(%arg0: i32) -> (i32, i32) {
    %c0_i32 = arith.constant 0 : i32
    %c0_i32_0 = arith.constant 0 : i32
    %c0_i32_1 = arith.constant 0 : i32
    return %c0_i32, %c0_i32_0 : i32, i32
  }
  func.func @transform_19(%arg0: i32) -> (i32, i32) {
    %c0_i32 = arith.constant 0 : i32
    %c0_i32_0 = arith.constant 0 : i32
    %c0_i32_1 = arith.constant 0 : i32
    return %c0_i32, %c0_i32_0 : i32, i32
  }
  func.func @transform_20(%arg0: i32) -> (i32, i32) {
    %c0_i32 = arith.constant 0 : i32
    %c0_i32_0 = arith.constant 0 : i32
    %c0_i32_1 = arith.constant 0 : i32
    return %c0_i32, %c0_i32_0 : i32, i32
  }
  func.func @transform_21(%arg0: i32) -> (i32, i32) {
    %c0_i32 = arith.constant 0 : i32
    %c0_i32_0 = arith.constant 0 : i32
    %c0_i32_1 = arith.constant 0 : i32
    return %c0_i32, %c0_i32_0 : i32, i32
  }
  func.func @transform_22(%arg0: i32) -> (i32, i32) {
    %c0_i32 = arith.constant 0 : i32
    %c0_i32_0 = arith.constant 0 : i32
    %c0_i32_1 = arith.constant 0 : i32
    return %c0_i32, %c0_i32_0 : i32, i32
  }
  func.func @transform_23(%arg0: i32) -> (i32, i32) {
    %c0_i32 = arith.constant 0 : i32
    %c0_i32_0 = arith.constant 0 : i32
    %c0_i32_1 = arith.constant 0 : i32
    return %c0_i32, %c0_i32_0 : i32, i32
  }
  func.func @transform_24(%arg0: i32) -> (i32, i32) {
    %c0_i32 = arith.constant 0 : i32
    %c0_i32_0 = arith.constant 0 : i32
    %c0_i32_1 = arith.constant 0 : i32
    return %c0_i32, %c0_i32_0 : i32, i32
  }
  func.func @transform_25(%arg0: i32) -> (i32, i32) {
    %c0_i32 = arith.constant 0 : i32
    %c0_i32_0 = arith.constant 0 : i32
    %c0_i32_1 = arith.constant 0 : i32
    return %c0_i32, %c0_i32_0 : i32, i32
  }
  func.func @transform_26(%arg0: i32) -> (i32, i32) {
    %c0_i32 = arith.constant 0 : i32
    %c0_i32_0 = arith.constant 0 : i32
    %c0_i32_1 = arith.constant 0 : i32
    return %c0_i32, %c0_i32_0 : i32, i32
  }
  func.func @transform_27(%arg0: i32) -> (i32, i32) {
    %c0_i32 = arith.constant 0 : i32
    %c0_i32_0 = arith.constant 0 : i32
    %c0_i32_1 = arith.constant 0 : i32
    return %c0_i32, %c0_i32_0 : i32, i32
  }
  func.func @transform_28(%arg0: i32) -> (i32, i32) {
    %c0_i32 = arith.constant 0 : i32
    %c0_i32_0 = arith.constant 0 : i32
    %c0_i32_1 = arith.constant 0 : i32
    return %c0_i32, %c0_i32_0 : i32, i32
  }
  func.func @transform_29(%arg0: i32) -> (i32, i32) {
    %c0_i32 = arith.constant 0 : i32
    %c0_i32_0 = arith.constant 0 : i32
    %c0_i32_1 = arith.constant 0 : i32
    return %c0_i32, %c0_i32_0 : i32, i32
  }
  func.func @transform_30(%arg0: i32) -> (i32, i32) {
    %c0_i32 = arith.constant 0 : i32
    %c0_i32_0 = arith.constant 0 : i32
    %c0_i32_1 = arith.constant 0 : i32
    return %c0_i32, %c0_i32_0 : i32, i32
  }
  func.func @transform_31(%arg0: i32) -> (i32, i32) {
    %c0_i32 = arith.constant 0 : i32
    %c0_i32_0 = arith.constant 0 : i32
    %c0_i32_1 = arith.constant 0 : i32
    return %c0_i32, %c0_i32_0 : i32, i32
  }
  func.func @transform_32(%arg0: i32) -> (i32, i32) {
    %c0_i32 = arith.constant 0 : i32
    %c0_i32_0 = arith.constant 0 : i32
    %c0_i32_1 = arith.constant 0 : i32
    return %c0_i32, %c0_i32_0 : i32, i32
  }
  func.func @transform_33(%arg0: i32) -> (i32, i32) {
    %c0_i32 = arith.constant 0 : i32
    %c0_i32_0 = arith.constant 0 : i32
    %c0_i32_1 = arith.constant 0 : i32
    return %c0_i32, %c0_i32_0 : i32, i32
  }
  func.func @transform_34(%arg0: i32) -> (i32, i32) {
    %c0_i32 = arith.constant 0 : i32
    %c0_i32_0 = arith.constant 0 : i32
    %c0_i32_1 = arith.constant 0 : i32
    return %c0_i32, %c0_i32_0 : i32, i32
  }
  func.func @transform_35(%arg0: i32) -> (i32, i32) {
    %c0_i32 = arith.constant 0 : i32
    %c0_i32_0 = arith.constant 0 : i32
    %c0_i32_1 = arith.constant 0 : i32
    return %c0_i32, %c0_i32_0 : i32, i32
  }
  func.func @transform_36(%arg0: i32) -> (i32, i32) {
    %c0_i32 = arith.constant 0 : i32
    %c0_i32_0 = arith.constant 0 : i32
    %c0_i32_1 = arith.constant 0 : i32
    return %c0_i32, %c0_i32_0 : i32, i32
  }
  func.func @transform_37(%arg0: i32) -> (i32, i32) {
    %c0_i32 = arith.constant 0 : i32
    %c0_i32_0 = arith.constant 0 : i32
    %c0_i32_1 = arith.constant 0 : i32
    return %c0_i32, %c0_i32_0 : i32, i32
  }
  func.func @transform_38(%arg0: i32) -> (i32, i32) {
    %c0_i32 = arith.constant 0 : i32
    %c0_i32_0 = arith.constant 0 : i32
    %c0_i32_1 = arith.constant 0 : i32
    return %c0_i32, %c0_i32_0 : i32, i32
  }
  func.func @transform_39(%arg0: i32) -> (i32, i32) {
    %c0_i32 = arith.constant 0 : i32
    %c0_i32_0 = arith.constant 0 : i32
    %c0_i32_1 = arith.constant 0 : i32
    return %c0_i32, %c0_i32_0 : i32, i32
  }
  func.func @transform_40(%arg0: i32) -> (i32, i32) {
    %c0_i32 = arith.constant 0 : i32
    %c0_i32_0 = arith.constant 0 : i32
    %c0_i32_1 = arith.constant 0 : i32
    return %c0_i32, %c0_i32_0 : i32, i32
  }
  func.func @transform_41(%arg0: i32) -> (i32, i32) {
    %c0_i32 = arith.constant 0 : i32
    %c0_i32_0 = arith.constant 0 : i32
    %c0_i32_1 = arith.constant 0 : i32
    return %c0_i32, %c0_i32_0 : i32, i32
  }
  func.func @transform_42(%arg0: i32) -> (i32, i32) {
    %c0_i32 = arith.constant 0 : i32
    %c0_i32_0 = arith.constant 0 : i32
    %c0_i32_1 = arith.constant 0 : i32
    return %c0_i32, %c0_i32_0 : i32, i32
  }
  func.func @transform_43(%arg0: i32) -> (i32, i32) {
    %c0_i32 = arith.constant 0 : i32
    %c0_i32_0 = arith.constant 0 : i32
    %c0_i32_1 = arith.constant 0 : i32
    return %c0_i32, %c0_i32_0 : i32, i32
  }
  func.func @transform_44(%arg0: i32) -> (i32, i32) {
    %c0_i32 = arith.constant 0 : i32
    %c0_i32_0 = arith.constant 0 : i32
    %c0_i32_1 = arith.constant 0 : i32
    return %c0_i32, %c0_i32_0 : i32, i32
  }
  func.func @transform_45(%arg0: i32) -> (i32, i32) {
    %c0_i32 = arith.constant 0 : i32
    %c0_i32_0 = arith.constant 0 : i32
    %c0_i32_1 = arith.constant 0 : i32
    return %c0_i32, %c0_i32_0 : i32, i32
  }
  func.func @transform_46(%arg0: i32) -> (i32, i32) {
    %c0_i32 = arith.constant 0 : i32
    %c0_i32_0 = arith.constant 0 : i32
    %c0_i32_1 = arith.constant 0 : i32
    return %c0_i32, %c0_i32_0 : i32, i32
  }
  func.func @transform_47(%arg0: i32) -> (i32, i32) {
    %c0_i32 = arith.constant 0 : i32
    %c0_i32_0 = arith.constant 0 : i32
    %c0_i32_1 = arith.constant 0 : i32
    return %c0_i32, %c0_i32_0 : i32, i32
  }
  func.func @transform_48(%arg0: i32) -> (i32, i32) {
    %c0_i32 = arith.constant 0 : i32
    %c0_i32_0 = arith.constant 0 : i32
    %c0_i32_1 = arith.constant 0 : i32
    return %c0_i32, %c0_i32_0 : i32, i32
  }
  func.func @transform_49(%arg0: i32) -> (i32, i32) {
    %c0_i32 = arith.constant 0 : i32
    %c0_i32_0 = arith.constant 0 : i32
    %c0_i32_1 = arith.constant 0 : i32
    return %c0_i32, %c0_i32_0 : i32, i32
  }
  func.func @transform_50(%arg0: i32) -> (i32, i32) {
    %c0_i32 = arith.constant 0 : i32
    %c0_i32_0 = arith.constant 0 : i32
    %c0_i32_1 = arith.constant 0 : i32
    return %c0_i32, %c0_i32_0 : i32, i32
  }
  func.func @transform_51(%arg0: i32) -> (i32, i32) {
    %c0_i32 = arith.constant 0 : i32
    %c0_i32_0 = arith.constant 0 : i32
    %c0_i32_1 = arith.constant 0 : i32
    return %c0_i32, %c0_i32_0 : i32, i32
  }
  func.func @transform_52(%arg0: i32) -> (i32, i32) {
    %c0_i32 = arith.constant 0 : i32
    %c0_i32_0 = arith.constant 0 : i32
    %c0_i32_1 = arith.constant 0 : i32
    return %c0_i32, %c0_i32_0 : i32, i32
  }
  func.func @transform_53(%arg0: i32) -> (i32, i32) {
    %c0_i32 = arith.constant 0 : i32
    %c0_i32_0 = arith.constant 0 : i32
    %c0_i32_1 = arith.constant 0 : i32
    return %c0_i32, %c0_i32_0 : i32, i32
  }
  func.func @transform_54(%arg0: i32) -> (i32, i32) {
    %c0_i32 = arith.constant 0 : i32
    %c0_i32_0 = arith.constant 0 : i32
    %c0_i32_1 = arith.constant 0 : i32
    return %c0_i32, %c0_i32_0 : i32, i32
  }
  func.func @transform_55(%arg0: i32) -> (i32, i32) {
    %c0_i32 = arith.constant 0 : i32
    %c0_i32_0 = arith.constant 0 : i32
    %c0_i32_1 = arith.constant 0 : i32
    return %c0_i32, %c0_i32_0 : i32, i32
  }
  func.func @transform_56(%arg0: i32) -> (i32, i32) {
    %c0_i32 = arith.constant 0 : i32
    %c0_i32_0 = arith.constant 0 : i32
    %c0_i32_1 = arith.constant 0 : i32
    return %c0_i32, %c0_i32_0 : i32, i32
  }
  func.func @transform_57(%arg0: i32) -> (i32, i32) {
    %c0_i32 = arith.constant 0 : i32
    %c0_i32_0 = arith.constant 0 : i32
    %c0_i32_1 = arith.constant 0 : i32
    return %c0_i32, %c0_i32_0 : i32, i32
  }
  func.func @transform_58(%arg0: i32) -> (i32, i32) {
    %c0_i32 = arith.constant 0 : i32
    %c0_i32_0 = arith.constant 0 : i32
    %c0_i32_1 = arith.constant 0 : i32
    return %c0_i32, %c0_i32_0 : i32, i32
  }
  func.func @transform_59(%arg0: i32) -> (i32, i32) {
    %c0_i32 = arith.constant 0 : i32
    %c0_i32_0 = arith.constant 0 : i32
    %c0_i32_1 = arith.constant 0 : i32
    return %c0_i32, %c0_i32_0 : i32, i32
  }
  func.func @transform_60(%arg0: i32) -> (i32, i32) {
    %c0_i32 = arith.constant 0 : i32
    %c0_i32_0 = arith.constant 0 : i32
    %c0_i32_1 = arith.constant 0 : i32
    return %c0_i32, %c0_i32_0 : i32, i32
  }
  func.func @transform_61(%arg0: i32) -> (i32, i32) {
    %c0_i32 = arith.constant 0 : i32
    %c0_i32_0 = arith.constant 0 : i32
    %c0_i32_1 = arith.constant 0 : i32
    return %c0_i32, %c0_i32_0 : i32, i32
  }
  func.func @transform_62(%arg0: i32) -> (i32, i32) {
    %c0_i32 = arith.constant 0 : i32
    %c0_i32_0 = arith.constant 0 : i32
    %c0_i32_1 = arith.constant 0 : i32
    return %c0_i32, %c0_i32_0 : i32, i32
  }
  func.func @transform_63(%arg0: i32) -> (i32, i32) {
    %c0_i32 = arith.constant 0 : i32
    %c0_i32_0 = arith.constant 0 : i32
    %c0_i32_1 = arith.constant 0 : i32
    return %c0_i32, %c0_i32_0 : i32, i32
  }
  func.func @transform_64(%arg0: i32) -> (i32, i32) {
    %c0_i32 = arith.constant 0 : i32
    %c0_i32_0 = arith.constant 0 : i32
    %c0_i32_1 = arith.constant 0 : i32
    return %c0_i32, %c0_i32_0 : i32, i32
  }
  func.func @transform_65(%arg0: i32) -> i32 {
    %c0_i32 = arith.constant 0 : i32
    %c0_i32_0 = arith.constant 0 : i32
    return %c0_i32 : i32
  }
  func.func @transform_66(%arg0: i32) -> (i32, i32) {
    %c0_i32 = arith.constant 0 : i32
    %c0_i32_0 = arith.constant 0 : i32
    %c0_i32_1 = arith.constant 0 : i32
    return %c0_i32, %c0_i32_0 : i32, i32
  }
}

</mosaic_0001>

<bundles_post_ra>
// kernel: tile.14
= control target key start
LH: loop header
LB: loop body
LE: loop exit
PB: predicated region body
PF: predicated region fallthrough
CT: control target
= control target key end

     0   :  { %vm3_vm0 = vcmask 261120   ;;  %s34_s0 = inlined_call_operand.vmem [shape: f32[2,5,32], index: 0, kind: input, shape index: {}]   ;;  %s35_s1 = inlined_call_operand.vmem [shape: f32[10,32], index: 1, kind: output, shape index: {}]  }
   0x1   :  { %v2_v0 = vld [vmem:[%s34_s0] sm:$0x1f]   ;;  %v10_v1 = vld [vmem:[%s34_s0 + $0x8] sm:$0x1f]  }
   0x2   :  { %4 = vst.msk [vmem:[%s35_s1] sm:$0x1f] %vm3_vm0, %v2_v0   ;;  %11 = vst.msk [vmem:[%s35_s1 + $0x5] sm:$0x1f] %vm3_vm0, %v10_v1  }

// kernel: coop_clip_forward.1
= control target key start
LH: loop header
LB: loop body
LE: loop exit
PB: predicated region body
PF: predicated region fallthrough
CT: control target
= control target key end

     0   :  { %s10934_s6 = smov 1   ;;  %s10935_s10 = smov 2   ;;  %s13296_s0 = inlined_call_operand.smem [shape: u32[67], index: -1, kind: input, shape index: {}] }
   0x1   :  { %s11042_s5 = sld [smem:[%s13296_s0]]   ;;  %s10936_s14 = smov 3  }
   0x2   :  { %s11047_s9 = sld [smem:[%s13296_s0 + %s10934_s6]]   ;;  %s10937_s18 = smov 4  }
   0x3   :  { %s11052_s13 = sld [smem:[%s13296_s0 + %s10935_s10]]   ;;  %s10938_s22 = smov 5  }
   0x4   :  { %s11057_s17 = sld [smem:[%s13296_s0 + %s10936_s14]]   ;;  %s10939_s26 = smov 6  }
   0x5   :  { %s11062_s21 = sld [smem:[%s13296_s0 + %s10937_s18]]   ;;  %s10940_s30 = smov 7  }
   0x6   :  { %s11067_s25 = sld [smem:[%s13296_s0 + %s10938_s22]]   ;;  %s10941_s4 = smov 8  }
   0x7   :  { %13320 = sst [smem:[#allocation41_spill]] %s11042_s5  ;;  %s10942_s10 = smov 9  }
   0x8   :  { %13321 = sst [smem:[#allocation42_spill]] %s11047_s9  ;;  %s10943_s15 = smov 10  }
   0x9   :  { %13322 = sst [smem:[#allocation43_spill]] %s11052_s13  ;;  %s10944_s20 = smov 11  }
   0xa   :  { %13323 = sst [smem:[#allocation44_spill]] %s11057_s17  ;;  %s10946_s1 = smov 13  }
   0xb   :  { %13324 = sst [smem:[#allocation45_spill]] %s11062_s21  ;;  %s10947_s7 = smov 14  }
   0xc   :  { %13325 = sst [smem:[#allocation46_spill]] %s11067_s25  ;;  %s10949_s22 = smov 16  }
   0xd   :  { %s11072_s29 = sld [smem:[%s13296_s0 + %s10939_s26]]   ;;  %s10945_s26 = smov 12  }
   0xe   :  { %s11077_s3 = sld [smem:[%s13296_s0 + %s10940_s30]]   ;;  %s10950_s28 = smov 17  }
   0xf   :  { %s11082_s8 = sld [smem:[%s13296_s0 + %s10941_s4]]  }
  0x10   :  { %s11087_s14 = sld [smem:[%s13296_s0 + %s10942_s10]]  }
  0x11   :  { %s11092_s19 = sld [smem:[%s13296_s0 + %s10943_s15]]   ;;  %s10948_s15 = smov 15  }
  0x12   :  { %s11097_s24 = sld [smem:[%s13296_s0 + %s10944_s20]]  }
  0x13   :  { %13326 = sst [smem:[#allocation47_spill]] %s11072_s29 }
  0x14   :  { %13327 = sst [smem:[#allocation48_spill]] %s11077_s3 }
  0x15   :  { %13328 = sst [smem:[#allocation49_spill]] %s11082_s8 }
  0x16   :  { %13329 = sst [smem:[#allocation50_spill]] %s11087_s14 }
  0x17   :  { %13330 = sst [smem:[#allocation51_spill]] %s11092_s19 }
  0x18   :  { %13331 = sst [smem:[#allocation52_spill]] %s11097_s24 }
  0x19   :  { %s11102_s30 = sld [smem:[%s13296_s0 + %s10945_s26]]  }
  0x1a   :  { %s11107_s6 = sld [smem:[%s13296_s0 + %s10946_s1]]  }
  0x1b   :  { %s11112_s12 = sld [smem:[%s13296_s0 + %s10947_s7]]   ;;  %s10951_s7 = smov 18  }
  0x1c   :  { %s11117_s20 = sld [smem:[%s13296_s0 + %s10948_s15]]   ;;  %s10952_s15 = smov 19  }
  0x1d   :  { %s11122_s27 = sld [smem:[%s13296_s0 + %s10949_s22]]   ;;  %s10953_s22 = smov 20  }
  0x1e   :  { %s11127_s4 = sld [smem:[%s13296_s0 + %s10950_s28]]   ;;  %s10954_s28 = smov 21  }
  0x1f   :  { %13332 = sst [smem:[#allocation53_spill]] %s11102_s30 }
  0x20   :  { %13333 = sst [smem:[#allocation54_spill]] %s11107_s6 }
  0x21   :  { %13334 = sst [smem:[#allocation55_spill]] %s11112_s12 }
  0x22   :  { %13335 = sst [smem:[#allocation56_spill]] %s11117_s20 }
  0x23   :  { %13336 = sst [smem:[#allocation57_spill]] %s11122_s27 }
  0x24   :  { %13337 = sst [smem:[#allocation58_spill]] %s11127_s4 }
  0x25   :  { %s11132_s12 = sld [smem:[%s13296_s0 + %s10951_s7]]   ;;  %s10955_s7 = smov 22  }
  0x26   :  { %s11137_s20 = sld [smem:[%s13296_s0 + %s10952_s15]]   ;;  %s10956_s15 = smov 23  }
  0x27   :  { %s11142_s27 = sld [smem:[%s13296_s0 + %s10953_s22]]   ;;  %s10957_s22 = smov 24  }
  0x28   :  { %s11147_s4 = sld [smem:[%s13296_s0 + %s10954_s28]]   ;;  %s10958_s28 = smov 25  }
  0x2b   :  { %13338 = sst [smem:[#allocation59_spill]] %s11132_s12 }
  0x2c   :  { %13339 = sst [smem:[#allocation60_spill]] %s11137_s20 }
  0x2d   :  { %13340 = sst [smem:[#allocation61_spill]] %s11142_s27 }
  0x2e   :  { %13341 = sst [smem:[#allocation62_spill]] %s11147_s4 }
  0x2f   :  { %s11152_s12 = sld [smem:[%s13296_s0 + %s10955_s7]]   ;;  %s10959_s7 = smov 26  }
  0x30   :  { %s11157_s20 = sld [smem:[%s13296_s0 + %s10956_s15]]   ;;  %s10960_s15 = smov 27  }
  0x31   :  { %s11162_s27 = sld [smem:[%s13296_s0 + %s10957_s22]]   ;;  %s10961_s22 = smov 28  }
  0x32   :  { %s11167_s4 = sld [smem:[%s13296_s0 + %s10958_s28]]   ;;  %s10962_s28 = smov 29  }
  0x35   :  { %13342 = sst [smem:[#allocation63_spill]] %s11152_s12 }
  0x36   :  { %13343 = sst [smem:[#allocation64_spill]] %s11157_s20 }
  0x37   :  { %13344 = sst [smem:[#allocation65_spill]] %s11162_s27 }
  0x38   :  { %13345 = sst [smem:[#allocation66_spill]] %s11167_s4 }
  0x39   :  { %s11172_s12 = sld [smem:[%s13296_s0 + %s10959_s7]]   ;;  %s10963_s7 = smov 30  }
  0x3a   :  { %s11177_s20 = sld [smem:[%s13296_s0 + %s10960_s15]]   ;;  %s10964_s15 = smov 31  }
  0x3b   :  { %s11182_s27 = sld [smem:[%s13296_s0 + %s10961_s22]]   ;;  %s10965_s22 = smov 32  }
  0x3c   :  { %s11187_s4 = sld [smem:[%s13296_s0 + %s10962_s28]]   ;;  %s10966_s28 = smov 33  }
  0x3f   :  { %13346 = sst [smem:[#allocation67_spill]] %s11172_s12 }
  0x40   :  { %13347 = sst [smem:[#allocation68_spill]] %s11177_s20 }
  0x41   :  { %13348 = sst [smem:[#allocation69_spill]] %s11182_s27 }
  0x42   :  { %13349 = sst [smem:[#allocation70_spill]] %s11187_s4 }
  0x43   :  { %s11192_s12 = sld [smem:[%s13296_s0 + %s10963_s7]]   ;;  %s10967_s7 = smov 34  }
  0x44   :  { %s11197_s20 = sld [smem:[%s13296_s0 + %s10964_s15]]   ;;  %s10968_s15 = smov 35  }
  0x45   :  { %s11202_s27 = sld [smem:[%s13296_s0 + %s10965_s22]]   ;;  %s10969_s22 = smov 36  }
  0x46   :  { %s11207_s4 = sld [smem:[%s13296_s0 + %s10966_s28]]   ;;  %s10970_s28 = smov 37  }
  0x47   :  { %s11227_s30 = sld [smem:[%s13296_s0 + %s10970_s28]]   ;;  %s10974_s28 = smov 41  }
  0x48   :  { %s11247_s24 = sld [smem:[%s13296_s0 + %s10974_s28]]   ;;  %s10978_s28 = smov 45  }
  0x49   :  { %13350 = sst [smem:[#allocation71_spill]] %s11192_s12 }
  0x4a   :  { %13351 = sst [smem:[#allocation72_spill]] %s11197_s20 }
  0x4b   :  { %13352 = sst [smem:[#allocation73_spill]] %s11202_s27 }
  0x4c   :  { %13353 = sst [smem:[#allocation74_spill]] %s11207_s4 }
  0x4d   :  { %s11212_s12 = sld [smem:[%s13296_s0 + %s10967_s7]]   ;;  %s10971_s7 = smov 38  }
  0x4e   :  { %s11217_s20 = sld [smem:[%s13296_s0 + %s10968_s15]]   ;;  %s10972_s15 = smov 39  }
  0x4f   :  { %s11222_s27 = sld [smem:[%s13296_s0 + %s10969_s22]]   ;;  %s10973_s22 = smov 40  }
  0x50   :  { %s11267_s19 = sld [smem:[%s13296_s0 + %s10978_s28]]   ;;  %s10982_s28 = smov 49  }
  0x51   :  { %s11287_s8 = sld [smem:[%s13296_s0 + %s10982_s28]]   ;;  %s10986_s28 = smov 53  }
  0x52   :  { %s11307_s3 = sld [smem:[%s13296_s0 + %s10986_s28]]   ;;  %s10990_s28 = smov 57  }
  0x53   :  { %13354 = sst [smem:[#allocation75_spill]] %s11212_s12 }
  0x54   :  { %13355 = sst [smem:[#allocation76_spill]] %s11217_s20 }
  0x55   :  { %13356 = sst [smem:[#allocation77_spill]] %s11222_s27 }
  0x56   :  { %s11232_s12 = sld [smem:[%s13296_s0 + %s10971_s7]]   ;;  %s10975_s7 = smov 42  }
  0x57   :  { %s11237_s20 = sld [smem:[%s13296_s0 + %s10972_s15]]   ;;  %s10976_s15 = smov 43  }
  0x58   :  { %s11242_s27 = sld [smem:[%s13296_s0 + %s10973_s22]]   ;;  %s10977_s22 = smov 44  }
  0x59   :  { %s11257_s6 = sld [smem:[%s13296_s0 + %s10976_s15]]   ;;  %s10980_s15 = smov 47  }
  0x5a   :  { %s11277_s4 = sld [smem:[%s13296_s0 + %s10980_s15]]   ;;  %s10984_s15 = smov 51  }
  0x5b   :  { %s11297_s29 = sld [smem:[%s13296_s0 + %s10984_s15]]   ;;  %s10988_s15 = smov 55  }
  0x5c   :  { %13357 = sst [smem:[#allocation78_spill]] %s11232_s12 }
  0x5d   :  { %s11252_s12 = sld [smem:[%s13296_s0 + %s10975_s7]]   ;;  %s10979_s7 = smov 46  }
  0x5e   :  { %13358 = sst [smem:[#allocation79_spill]] %s11242_s27 }
  0x5f   :  { %s11262_s27 = sld [smem:[%s13296_s0 + %s10977_s22]]   ;;  %s10981_s22 = smov 48  }
  0x60   :  { %s11272_s14 = sld [smem:[%s13296_s0 + %s10979_s7]]   ;;  %s10983_s7 = smov 50  }
  0x61   :  { %s11317_s21 = sld [smem:[%s13296_s0 + %s10988_s15]]   ;;  %s10992_s15 = smov 59  }
  0x62   :  { %s11327_s17 = sld [smem:[%s13296_s0 + %s10990_s28]]   ;;  %s10994_s28 = smov 61  }
  0x63   :  { %s11337_s5 = sld [smem:[%s13296_s0 + %s10992_s15]]   ;;  %s10996_s15 = smov 63  }
  0x64   :  { %s11347_s9 = sld [smem:[%s13296_s0 + %s10994_s28]]   ;;  %s10998_s28 = smov 65  }
  0x65   :  { %13359 = sst [smem:[#allocation80_spill]] %s11262_s27 }
  0x66   :  { %13360 = sst [smem:[#allocation81_spill]] %s11272_s14 }
  0x67   :  { %s11282_s27 = sld [smem:[%s13296_s0 + %s10981_s22]]   ;;  %s10985_s22 = smov 52  }
  0x68   :  { %s11292_s14 = sld [smem:[%s13296_s0 + %s10983_s7]]   ;;  %s10987_s7 = smov 54  }
  0x69   :  { %s11302_s25 = sld [smem:[%s13296_s0 + %s10985_s22]]   ;;  %s10989_s22 = smov 56  }
  0x6a   :  { %13363 = sst [smem:[#allocation84_spill]] %s11317_s21 }
  0x6b   :  { %13366 = sst [smem:[#allocation87_spill]] %s11337_s5 }
  0x6c   :  { %13367 = sst [smem:[#allocation88_spill]] %s11347_s9 }
  0x6d   :  { %s11357_s5 = sld [smem:[%s13296_s0 + %s10996_s15]]  }
  0x6e   :  { %13361 = sst [smem:[#allocation82_spill]] %s11292_s14 }
  0x6f   :  { %13362 = sst [smem:[#allocation83_spill]] %s11302_s25 }
  0x70   :  { %s11312_s14 = sld [smem:[%s13296_s0 + %s10987_s7]]   ;;  %s10991_s7 = smov 58  }
  0x71   :  { %s11322_s25 = sld [smem:[%s13296_s0 + %s10989_s22]]   ;;  %s10993_s22 = smov 60  }
  0x72   :  { %s11332_s13 = sld [smem:[%s13296_s0 + %s10991_s7]]   ;;  %s10995_s7 = smov 62  }
  0x73   :  { %s11367_s9 = sld [smem:[%s13296_s0 + %s10998_s28]]  }
  0x77   :  { %13364 = sst [smem:[#allocation85_spill]] %s11322_s25 }
  0x78   :  { %13365 = sst [smem:[#allocation86_spill]] %s11332_s13 }
  0x79   :  { %s11342_s25 = sld [smem:[%s13296_s0 + %s10993_s22]]   ;;  %s10997_s22 = smov 64  }
  0x7a   :  { %s11352_s13 = sld [smem:[%s13296_s0 + %s10995_s7]]   ;;  %s10999_s7 = smov 66  }
  0x7b   :  { %s11362_s21 = sld [smem:[%s13296_s0 + %s10997_s22]]  }
  0x80   :  { %13368 = sst [smem:[#allocation89_spill]] %s11352_s13 }
  0x81   :  { %s11372_s13 = sld [smem:[%s13296_s0 + %s10999_s7]]  }
  0x82   :  { %139 = vsyncpa [#allocation4], 0 }
  0x83   :  { %140 = vsyncpa [#allocation7], 0 }
  0x84   :  { %141 = vsyncpa [#allocation10], 0 }
  0x85   :  { %142 = vsyncpa [#allocation13], 0 }
  0x86   :  { %143 = vsyncpa [#allocation16], 0 }
  0x87   :  { %144 = vsyncpa [#allocation19], 0 }
  0x88   :  { %145 = vsyncpa [#allocation22], 0 }
  0x89   :  { %146 = vsyncpa [#allocation25], 0 }
  0x8a   :  { %147 = vsyncpa [#allocation28], 0 }
  0x8b   :  { %148 = vsyncpa [#allocation5], 0  ;;  %s11000_s15 = smov [#allocation6]   ;;  %s11001_s18 = smov [#allocation9]  }
  0x8c   :  { %s241_s16 = sshll.u32 %s11000_s15, 4  ;;  %s263_s22 = sshll.u32 %s11001_s18, 4  ;;  %s242_s16 = int_to_ptr.vmem [resolvable:$true] %s241_s16  ;;  %s264_s22 = int_to_ptr.vmem [resolvable:$true] %s263_s22 }
  0x8d   :  { %s10562_s23 = scalar_lea.vmem %s242_s16, 16  ;;  %s10566_s0 = scalar_lea.vmem %s242_s16, 32 }
  0x8e   :  { %p10563_p0 = scmp.ne.s32.totalorder %s242_s16, %s10562_s23  ;;  %p10567_p1 = scmp.lt.s32.totalorder %s242_s16, %s242_s16 }
  0x8f   :  { %p10568_p2 = scmp.lt.s32.totalorder %s10566_s0, %s10562_s23 }
  0x91   :  { %p10569_p3 = por %p10568_p2, %p10567_p1 }
  0x93   :  { %p10570_p4 = pnand %p10569_p3, %p10563_p0 }
  0x95   :  { %10573 = shalt.err (!%p10570_p4)
}
  0x96   :  { %244 = dma.hbm_to_vmem [thread:$0]  %s11237_s20, 16, %s242_s16, [#allocation7]  }
  0x97   :  { %s10582_s26 = scalar_lea.vmem %s264_s22, 16  ;;  %s10586_s28 = scalar_lea.vmem %s264_s22, 32 }
  0x98   :  { %p10583_p5 = scmp.ne.s32.totalorder %s264_s22, %s10582_s26  ;;  %p10587_p6 = scmp.lt.s32.totalorder %s264_s22, %s264_s22 }
  0x99   :  { %p10588_p7 = scmp.lt.s32.totalorder %s10586_s28, %s10582_s26 }
  0x9b   :  { %p10589_p8 = por %p10588_p7, %p10587_p6 }
  0x9d   :  { %p10590_p9 = pnand %p10589_p8, %p10583_p5 }
  0x9f   :  { %10593 = shalt.err (!%p10590_p9)
}
  0xa0   :  { %266 = dma.hbm_to_vmem [thread:$0]  %s11252_s12, 16, %s264_s22, [#allocation10]  }
  0xa1   :  { %s11002_s1 = smov [#allocation12]   ;;  %s11003_s7 = smov [#allocation15]  }
  0xa2   :  { %s285_s2 = sshll.u32 %s11002_s1, 4  ;;  %s307_s10 = sshll.u32 %s11003_s7, 4  ;;  %s286_s2 = int_to_ptr.vmem [resolvable:$true] %s285_s2  ;;  %s308_s10 = int_to_ptr.vmem [resolvable:$true] %s307_s10 }
  0xa3   :  { %s10602_s11 = scalar_lea.vmem %s286_s2, 16  ;;  %s10606_s15 = scalar_lea.vmem %s286_s2, 32 }
  0xa4   :  { %p10603_p10 = scmp.ne.s32.totalorder %s286_s2, %s10602_s11  ;;  %p10607_p11 = scmp.lt.s32.totalorder %s286_s2, %s286_s2 }
  0xa5   :  { %p10608_p12 = scmp.lt.s32.totalorder %s10606_s15, %s10602_s11 }
  0xa7   :  { %p10609_p13 = por %p10608_p12, %p10607_p11 }
  0xa9   :  { %p10610_p0 = pnand %p10609_p13, %p10603_p10 }
  0xab   :  { %10613 = shalt.err (!%p10610_p0)
}
  0xac   :  { %288 = dma.hbm_to_vmem [thread:$0]  %s11267_s19, 16, %s286_s2, [#allocation13]  }
  0xad   :  { %s10622_s20 = scalar_lea.vmem %s308_s10, 16  ;;  %s10626_s16 = scalar_lea.vmem %s308_s10, 32 }
  0xae   :  { %p10623_p1 = scmp.ne.s32.totalorder %s308_s10, %s10622_s20  ;;  %p10627_p2 = scmp.lt.s32.totalorder %s308_s10, %s308_s10 }
  0xaf   :  { %p10628_p3 = scmp.lt.s32.totalorder %s10626_s16, %s10622_s20 }
  0xb1   :  { %p10629_p4 = por %p10628_p3, %p10627_p2 }
  0xb3   :  { %p10630_p5 = pnand %p10629_p4, %p10623_p1 }
  0xb5   :  { %10633 = shalt.err (!%p10630_p5)
}
  0xb6   :  { %310 = dma.hbm_to_vmem [thread:$0]  %s11282_s27, 16, %s308_s10, [#allocation16]  }
  0xb7   :  { %s11004_s12 = smov [#allocation18]   ;;  %s11005_s22 = smov [#allocation21]  }
  0xb8   :  { %s329_s18 = sshll.u32 %s11004_s12, 4  ;;  %s351_s23 = sshll.u32 %s11005_s22, 4  ;;  %s330_s18 = int_to_ptr.vmem [resolvable:$true] %s329_s18  ;;  %s352_s23 = int_to_ptr.vmem [resolvable:$true] %s351_s23 }
  0xb9   :  { %s10642_s0 = scalar_lea.vmem %s330_s18, 16  ;;  %s10646_s26 = scalar_lea.vmem %s330_s18, 32 }
  0xba   :  { %p10643_p6 = scmp.ne.s32.totalorder %s330_s18, %s10642_s0  ;;  %p10647_p7 = scmp.lt.s32.totalorder %s330_s18, %s330_s18 }
  0xbb   :  { %p10648_p8 = scmp.lt.s32.totalorder %s10646_s26, %s10642_s0 }
  0xbd   :  { %p10649_p9 = por %p10648_p8, %p10647_p7 }
  0xbf   :  { %p10650_p10 = pnand %p10649_p9, %p10643_p6 }
  0xc1   :  { %10653 = shalt.err (!%p10650_p10)
}
  0xc2   :  { %332 = dma.hbm_to_vmem [thread:$0]  %s11297_s29, 16, %s330_s18, [#allocation19]  }
  0xc3   :  { %s10662_s19 = scalar_lea.vmem %s352_s23, 16  ;;  %s10666_s28 = scalar_lea.vmem %s352_s23, 32 }
  0xc4   :  { %p10663_p11 = scmp.ne.s32.totalorder %s352_s23, %s10662_s19  ;;  %p10667_p12 = scmp.lt.s32.totalorder %s352_s23, %s352_s23 }
  0xc5   :  { %p10668_p13 = scmp.lt.s32.totalorder %s10666_s28, %s10662_s19 }
  0xc7   :  { %p10669_p0 = por %p10668_p13, %p10667_p12 }
  0xc9   :  { %p10670_p1 = pnand %p10669_p0, %p10663_p11 }
  0xcb   :  { %10673 = shalt.err (!%p10670_p1)
}
  0xcc   :  { %354 = dma.hbm_to_vmem [thread:$0]  %s11312_s14, 16, %s352_s23, [#allocation22]  }
  0xcd   :  { %s11006_s27 = smov [#allocation24]   ;;  %s11007_s2 = smov [#allocation27]  }
  0xce   :  { %s373_s1 = sshll.u32 %s11006_s27, 4  ;;  %s395_s7 = sshll.u32 %s11007_s2, 4  ;;  %s374_s1 = int_to_ptr.vmem [resolvable:$true] %s373_s1  ;;  %s396_s7 = int_to_ptr.vmem [resolvable:$true] %s395_s7 }
  0xcf   :  { %s10682_s10 = scalar_lea.vmem %s374_s1, 16  ;;  %s10686_s11 = scalar_lea.vmem %s374_s1, 32 }
  0xd0   :  { %p10683_p2 = scmp.ne.s32.totalorder %s374_s1, %s10682_s10  ;;  %p10687_p3 = scmp.lt.s32.totalorder %s374_s1, %s374_s1 }
  0xd1   :  { %p10688_p4 = scmp.lt.s32.totalorder %s10686_s11, %s10682_s10 }
  0xd3   :  { %p10689_p5 = por %p10688_p4, %p10687_p3 }
  0xd5   :  { %p10690_p6 = pnand %p10689_p5, %p10683_p2 }
  0xd7   :  { %10693 = shalt.err (!%p10690_p6)
}
  0xd8   :  { %376 = dma.hbm_to_vmem [thread:$0]  %s11327_s17, 16, %s374_s1, [#allocation25]  }
  0xd9   :  { %s10702_s29 = scalar_lea.vmem %s396_s7, 16  ;;  %s10706_s15 = scalar_lea.vmem %s396_s7, 32 }
  0xda   :  { %p10703_p7 = scmp.ne.s32.totalorder %s396_s7, %s10702_s29  ;;  %p10707_p8 = scmp.lt.s32.totalorder %s396_s7, %s396_s7 }
  0xdb   :  { %p10708_p9 = scmp.lt.s32.totalorder %s10706_s15, %s10702_s29 }
  0xdd   :  { %p10709_p10 = por %p10708_p9, %p10707_p8 }
  0xdf   :  { %p10710_p11 = pnand %p10709_p10, %p10703_p7 }
  0xe1   :  { %10713 = shalt.err (!%p10710_p11)
}
  0xe2   :  { %398 = dma.hbm_to_vmem [thread:$0]  %s11342_s25, 16, %s396_s7, [#allocation28]  }
  0xe3   :  { %s11008_s14 = smov [#allocation3]   ;;  %s11009_s16 = smov [#allocation8]  }
  0xe4   :  { %s229_s20 = sshll.u32 %s11008_s14, 4  ;;  %s253_s12 = sshll.u32 %s11009_s16, 4  ;;  %s230_s20 = int_to_ptr.vmem [resolvable:$true] %s229_s20  ;;  %s254_s12 = int_to_ptr.vmem [resolvable:$true] %s253_s12 }
  0xe5   :  { %s10722_s18 = scalar_lea.vmem %s230_s20, 16  ;;  %s10726_s22 = scalar_lea.vmem %s230_s20, 32 }
  0xe6   :  { %p10723_p12 = scmp.ne.s32.totalorder %s230_s20, %s10722_s18  ;;  %p10727_p13 = scmp.lt.s32.totalorder %s230_s20, %s230_s20 }
  0xe7   :  { %p10728_p0 = scmp.lt.s32.totalorder %s10726_s22, %s10722_s18 }
  0xe9   :  { %p10729_p1 = por %p10728_p0, %p10727_p13 }
  0xeb   :  { %p10730_p2 = pnand %p10729_p1, %p10723_p12 }
  0xed   :  { %10733 = shalt.err (!%p10730_p2)
}
  0xee   :  { %232 = dma.hbm_to_vmem [thread:$0]  %s11227_s30, 16, %s230_s20, [#allocation4]  }
  0xef   :  { %s10742_s17 = scalar_lea.vmem %s254_s12, 16  ;;  %s10746_s23 = scalar_lea.vmem %s254_s12, 32 }
  0xf0   :  { %p10743_p3 = scmp.ne.s32.totalorder %s254_s12, %s10742_s17  ;;  %p10747_p4 = scmp.lt.s32.totalorder %s254_s12, %s254_s12 }
  0xf1   :  { %p10748_p5 = scmp.lt.s32.totalorder %s10746_s23, %s10742_s17 }
  0xf3   :  { %p10749_p6 = por %p10748_p5, %p10747_p4 }
  0xf5   :  { %p10750_p7 = pnand %p10749_p6, %p10743_p3 }
  0xf7   :  { %10753 = shalt.err (!%p10750_p7)
}
  0xf8   :  { %256 = dma.hbm_to_vmem [thread:$0]  %s11247_s24, 16, %s254_s12, [#allocation7]  }
  0xf9   :  { %s11010_s25 = smov [#allocation11]   ;;  %s11011_s26 = smov [#allocation14]  }
  0xfa   :  { %s273_s0 = sshll.u32 %s11010_s25, 4  ;;  %s297_s19 = sshll.u32 %s11011_s26, 4  ;;  %s274_s0 = int_to_ptr.vmem [resolvable:$true] %s273_s0  ;;  %s298_s19 = int_to_ptr.vmem [resolvable:$true] %s297_s19 }
  0xfb   :  { %s10762_s28 = scalar_lea.vmem %s274_s0, 16  ;;  %s10766_s27 = scalar_lea.vmem %s274_s0, 32 }
  0xfc   :  { %p10763_p8 = scmp.ne.s32.totalorder %s274_s0, %s10762_s28  ;;  %p10767_p9 = scmp.lt.s32.totalorder %s274_s0, %s274_s0 }
  0xfd   :  { %p10768_p10 = scmp.lt.s32.totalorder %s10766_s27, %s10762_s28 }
  0xff   :  { %p10769_p11 = por %p10768_p10, %p10767_p9 }
 0x101   :  { %p10770_p12 = pnand %p10769_p11, %p10763_p8 }
 0x103   :  { %10773 = shalt.err (!%p10770_p12)
}
 0x104   :  { %276 = dma.hbm_to_vmem [thread:$0]  %s11257_s6, 16, %s274_s0, [#allocation10]  }
 0x105   :  { %s10782_s30 = scalar_lea.vmem %s298_s19, 16  ;;  %s10786_s1 = scalar_lea.vmem %s298_s19, 32 }
 0x106   :  { %p10783_p13 = scmp.ne.s32.totalorder %s298_s19, %s10782_s30  ;;  %p10787_p0 = scmp.lt.s32.totalorder %s298_s19, %s298_s19 }
 0x107   :  { %p10788_p1 = scmp.lt.s32.totalorder %s10786_s1, %s10782_s30 }
 0x109   :  { %p10789_p2 = por %p10788_p1, %p10787_p0 }
 0x10b   :  { %p10790_p3 = pnand %p10789_p2, %p10783_p13 }
 0x10d   :  { %10793 = shalt.err (!%p10790_p3)
}
 0x10e   :  { %300 = dma.hbm_to_vmem [thread:$0]  %s11277_s4, 16, %s298_s19, [#allocation13]  }
 0x10f   :  { %s11012_s24 = smov [#allocation17]   ;;  %s11013_s7 = smov [#allocation20]  }
 0x110   :  { %s317_s2 = sshll.u32 %s11012_s24, 4  ;;  %s341_s10 = sshll.u32 %s11013_s7, 4  ;;  %s318_s2 = int_to_ptr.vmem [resolvable:$true] %s317_s2  ;;  %s342_s10 = int_to_ptr.vmem [resolvable:$true] %s341_s10 }
 0x111   :  { %s10802_s11 = scalar_lea.vmem %s318_s2, 16  ;;  %s10806_s29 = scalar_lea.vmem %s318_s2, 32 }
 0x112   :  { %p10803_p4 = scmp.ne.s32.totalorder %s318_s2, %s10802_s11  ;;  %p10807_p5 = scmp.lt.s32.totalorder %s318_s2, %s318_s2 }
 0x113   :  { %p10808_p6 = scmp.lt.s32.totalorder %s10806_s29, %s10802_s11 }
 0x115   :  { %p10809_p7 = por %p10808_p6, %p10807_p5 }
 0x117   :  { %p10810_p8 = pnand %p10809_p7, %p10803_p4 }
 0x119   :  { %10813 = shalt.err (!%p10810_p8)
}
 0x11a   :  { %320 = dma.hbm_to_vmem [thread:$0]  %s11287_s8, 16, %s318_s2, [#allocation16]  }
 0x11b   :  { %s10822_s6 = scalar_lea.vmem %s342_s10, 16  ;;  %s10826_s15 = scalar_lea.vmem %s342_s10, 32 }
 0x11c   :  { %p10823_p9 = scmp.ne.s32.totalorder %s342_s10, %s10822_s6  ;;  %p10827_p10 = scmp.lt.s32.totalorder %s342_s10, %s342_s10 }
 0x11d   :  { %p10828_p11 = scmp.lt.s32.totalorder %s10826_s15, %s10822_s6 }
 0x11f   :  { %p10829_p12 = por %p10828_p11, %p10827_p10 }
 0x121   :  { %p10830_p13 = pnand %p10829_p12, %p10823_p9 }
 0x123   :  { %10833 = shalt.err (!%p10830_p13)
}
 0x124   :  { %344 = dma.hbm_to_vmem [thread:$0]  %s11307_s3, 16, %s342_s10, [#allocation19]  }
 0x125   :  { %s11014_s4 = smov [#allocation23]   ;;  %s11015_s20 = smov [#allocation26]  }
 0x126   :  { %s361_s14 = sshll.u32 %s11014_s4, 4  ;;  %s385_s16 = sshll.u32 %s11015_s20, 4  ;;  %s362_s14 = int_to_ptr.vmem [resolvable:$true] %s361_s14  ;;  %s386_s16 = int_to_ptr.vmem [resolvable:$true] %s385_s16 }
 0x127   :  { %s10842_s12 = scalar_lea.vmem %s362_s14, 16  ;;  %s10846_s18 = scalar_lea.vmem %s362_s14, 32 }
 0x128   :  { %p10843_p0 = scmp.ne.s32.totalorder %s362_s14, %s10842_s12  ;;  %p10847_p1 = scmp.lt.s32.totalorder %s362_s14, %s362_s14 }
 0x129   :  { %p10848_p2 = scmp.lt.s32.totalorder %s10846_s18, %s10842_s12 }
 0x12b   :  { %p10849_p3 = por %p10848_p2, %p10847_p1 }
 0x12d   :  { %p10850_p4 = pnand %p10849_p3, %p10843_p0 }
 0x12f   :  { %10853 = shalt.err (!%p10850_p4)
}
 0x130   :  { %s13369_s8 = sld [smem:[#allocation84_spill]]  ;;  %s10862_s22 = scalar_lea.vmem %s386_s16, 16 }
 0x131   :  { %p10863_p5 = scmp.ne.s32.totalorder %s386_s16, %s10862_s22  ;;  %s10866_s17 = scalar_lea.vmem %s386_s16, 32 }
 0x132   :  { %p10867_p6 = scmp.lt.s32.totalorder %s386_s16, %s386_s16  ;;  %p10868_p7 = scmp.lt.s32.totalorder %s10866_s17, %s10862_s22 }
 0x134   :  { %p10869_p8 = por %p10868_p7, %p10867_p6 }
 0x136   :  { %364 = dma.hbm_to_vmem [thread:$0]  %s13369_s8, 16, %s362_s14, [#allocation22]  }
 0x137   :  { %p10870_p9 = pnand %p10869_p8, %p10863_p5 }
 0x139   :  { %10873 = shalt.err (!%p10870_p9)
}
 0x13a   :  { %s13370_s3 = sld [smem:[#allocation87_spill]]  ;;  %s11016_s23 = smov [#allocation29]  }
 0x13b   :  { %s405_s25 = sshll.u32 %s11016_s23, 4  ;;  %s406_s25 = int_to_ptr.vmem [resolvable:$true] %s405_s25 }
 0x13c   :  { %s10882_s0 = scalar_lea.vmem %s406_s25, 16  ;;  %s10886_s26 = scalar_lea.vmem %s406_s25, 32 }
 0x13d   :  { %p10883_p10 = scmp.ne.s32.totalorder %s406_s25, %s10882_s0  ;;  %p10887_p11 = scmp.lt.s32.totalorder %s406_s25, %s406_s25 }
 0x13e   :  { %p10888_p12 = scmp.lt.s32.totalorder %s10886_s26, %s10882_s0 }
 0x140   :  { %388 = dma.hbm_to_vmem [thread:$0]  %s13370_s3, 16, %s386_s16, [#allocation25]  }
 0x141   :  { %p10889_p13 = por %p10888_p12, %p10887_p11 }
 0x143   :  { %p10890_p0 = pnand %p10889_p13, %p10883_p10 }
 0x145   :  { %10893 = shalt.err (!%p10890_p0)
}
 0x146   :  { %s13371_s19 = sld [smem:[#allocation88_spill]] }
 0x14c   :  { %408 = dma.hbm_to_vmem [thread:$0]  %s13371_s19, 16, %s406_s25, [#allocation28]  }
 0x14d   :  { %10914 = dma.done.wait [#allocation4], 16  }
 0x14e   :  { %10915 = vsyncadd [#allocation4], 4294967280 }
 0x14f   :  { %10916 = dma.done.wait [#allocation7], 32  }
 0x150   :  { %10917 = vsyncadd [#allocation7], 4294967264 }
 0x151   :  { %10918 = dma.done.wait [#allocation10], 32  }
 0x152   :  { %10919 = vsyncadd [#allocation10], 4294967264 }
 0x153   :  { %10920 = dma.done.wait [#allocation13], 32  }
 0x154   :  { %10921 = vsyncadd [#allocation13], 4294967264 }
 0x155   :  { %10922 = dma.done.wait [#allocation16], 32  }
 0x156   :  { %10923 = vsyncadd [#allocation16], 4294967264 }
 0x157   :  { %10924 = dma.done.wait [#allocation19], 32  }
 0x158   :  { %10925 = vsyncadd [#allocation19], 4294967264 }
 0x159   :  { %10926 = dma.done.wait [#allocation22], 32  }
 0x15a   :  { %10927 = vsyncadd [#allocation22], 4294967264 }
 0x15b   :  { %10928 = dma.done.wait [#allocation25], 32  }
 0x15c   :  { %10929 = vsyncadd [#allocation25], 4294967264 }
 0x15d   :  { %10930 = dma.done.wait [#allocation28], 32  }
 0x15e   :  { %10931 = vsyncadd [#allocation28], 4294967264  ;;  %s13372_s28 = sld [smem:[#allocation42_spill]]  ;;  %v11017_v0 = vmov 0.0   ;;  %vm498_vm0 = vcmask 523264   ;;  %vm582_vm1 = vcmask 261120  }
 0x15f   :  { %505 = vmatprep.subr.mxu0 %v11017_v0  ;;  %s13373_s27 = sld [smem:[#allocation41_spill]]  ;;  %vm586_vm2 = vcmask 254976   ;;  %vm771_vm3 = vcmask 64512   ;;  %s11018_s6 = smov 96   ;;  %vm863_vm4 = vcmask 74752   ;;  %vm859_vm5 = vcmask 80896  }
 0x160   :  { %s13374_s30 = sld [smem:[#allocation43_spill]]  ;;  %s11019_s15 = smov 64   ;;  %vm894_vm6 = vcmask 1041408   ;;  %vm1613_vm7 = vcmask 130048   ;;  %vm1616_vm8 = vcmask 195584   ;;  %vm11032_vm9 = vmmov 0  }
 0x161   :  { %s13375_s1 = sld [smem:[#allocation44_spill]]  ;;  %s11020_s4 = smov 88   ;;  %vm3883_vm10 = vcmask 392192   ;;  %vm8281_vm11 = vcmask 256000   ;;  %vm8366_vm12 = vcmask 23552  }
 0x162   :  { %s13376_s24 = sld [smem:[#allocation45_spill]]  ;;  %s11021_s14 = smov 120  }
 0x163   :  { %s13377_s2 = sld [smem:[#allocation48_spill]]  ;;  %s11022_s20 = smov 56  }
 0x164   :  { %v487_v1 = vld [vmem:[%s13372_s28 + $0x78] sm:$0xff]  ;;  %v486_v2 = vld [vmem:[%s13372_s28 + $0x70] sm:$0xff]  ;;  %v485_v3 = vld [vmem:[%s13372_s28 + $0x68] sm:$0xff]  ;;  %s13378_s7 = sld [smem:[#allocation46_spill]]  ;;  %s11023_s16 = smov 80  }
 0x165   :  { %506 = vmatpush1.msra.mxu0 %v487_v1  ;;  %v484_v4 = vld [vmem:[%s13372_s28 + $0x60] sm:$0xff]  ;;  %v483_v5 = vld [vmem:[%s13372_s28 + $0x58] sm:$0xff]  ;;  %v482_v6 = vld [vmem:[%s13372_s28 + $0x50] sm:$0xff]  ;;  %s13379_s10 = sld [smem:[#allocation47_spill]]  ;;  %s11024_s12 = smov 112  }
 0x166   :  { %507 = vmatprep.subr.mxu0 %v11017_v0  ;;  %v469_v7 = vld [vmem:[%s13373_s27 + $0x8] sm:$0xff]  ;;  %v480_v9 = vld [vmem:[%s13372_s28 + $0x40] sm:$0xff]  ;;  %v479_v10 = vld [vmem:[%s13372_s28 + $0x38] sm:$0xff]  ;;  %s13380_s11 = sld [smem:[#allocation49_spill]]  ;;  %s11025_s18 = smov 48  }
 0x167   :  { %508 = vmatpush1.msra.mxu0 %v486_v2  ;;  %8458 = vmatprep.mubr.msk.f32.mxu0 %vm498_vm0, %v469_v7  ;;  %v481_v8 = vld [vmem:[%s13372_s28 + $0x48] sm:$0xff]  ;;  %v478_v11 = vld [vmem:[%s13372_s28 + $0x30] sm:$0xff]  ;;  %v476_v13 = vld [vmem:[%s13372_s28 + $0x20] sm:$0xff]  ;;  %s13381_s29 = sld [smem:[#allocation74_spill]]  ;;  %s11026_s8 = smov 72  }
 0x168   :  { %509 = vmatprep.subr.mxu0 %v11017_v0  ;;  %v477_v12 = vld [vmem:[%s13372_s28 + $0x28] sm:$0xff]  ;;  %v475_v14 = vld [vmem:[%s13372_s28 + $0x18] sm:$0xff]  ;;  %v474_v15 = vld [vmem:[%s13372_s28 + $0x10] sm:$0xff]  ;;  %s11027_s22 = smov 104   ;;  %s11028_s17 = smov 40  }
 0x169   :  { %510 = vmatpush1.msra.mxu0 %v485_v3  ;;  %v473_v16 = vld [vmem:[%s13372_s28 + $0x8] sm:$0xff]  ;;  %v472_v17 = vld [vmem:[%s13372_s28] sm:$0xff]  ;;  %v495_v18 = vld [vmem:[%s13372_s28 + $0xb8] sm:$0xff]  ;;  %s11029_s3 = smov 8   ;;  %s11030_s23 = smov 16  }
 0x16a   :  { %511 = vmatprep.subr.mxu0 %v11017_v0  ;;  %v494_v19 = vld [vmem:[%s13372_s28 + $0xb0] sm:$0xff]  ;;  %v493_v20 = vld [vmem:[%s13372_s28 + $0xa8] sm:$0xff]  ;;  %v492_v21 = vld [vmem:[%s13372_s28 + $0xa0] sm:$0xff]  ;;  %s13382_s25 = sld [smem:[#allocation50_spill]]  ;;  %s11031_s0 = smov 24  }
 0x16b   :  { %512 = vmatpush1.msra.mxu0 %v484_v4  ;;  %v491_v22 = vld [vmem:[%s13372_s28 + $0x98] sm:$0xff]  ;;  %v490_v23 = vld [vmem:[%s13372_s28 + $0x90] sm:$0xff]  ;;  %v489_v24 = vld [vmem:[%s13372_s28 + $0x88] sm:$0xff]  ;;  %s13383_s26 = sld [smem:[#allocation51_spill]] }
 0x16c   :  { %513 = vmatprep.subr.mxu0 %v11017_v0  ;;  %v488_v25 = vld [vmem:[%s13372_s28 + $0x80] sm:$0xff]  ;;  %v471_v27 = vld [vmem:[%s13373_s27 + $0x18] sm:$0x3]  ;;  %v470_v28 = vld [vmem:[%s13373_s27 + $0x10] sm:$0x3]  ;;  %s13384_s19 = sld [smem:[#allocation54_spill]] }
 0x16d   :  { %514 = vmatpush1.msra.mxu0 %v483_v5  ;;  %v468_v26 = vld [vmem:[%s13373_s27] sm:$0xff]  ;;  %v497_v33 = vld [vmem:[%s13374_s30 + $0x8] sm:$0x3]  ;;  %s13385_s28 = sld [smem:[#allocation52_spill]] }
 0x16e   :  { %515 = vmatprep.subr.mxu0 %v11017_v0  ;;  %v496_v29 = vld [vmem:[%s13374_s30] sm:$0xff]  ;;  %s13386_s27 = sld [smem:[#allocation53_spill]] }
 0x16f   :  { %516 = vmatpush1.msra.mxu0 %v482_v6  ;;  %v8460_v56 = vld [vmem:[%s13375_s1] ss:$0 sm:$0xff]  ;;  %s13387_s30 = sld [smem:[#allocation56_spill]] }
 0x170   :  { %517 = vmatprep.subr.mxu0 %v11017_v0  ;;  %v8461_v58 = vld [vmem:[%s13376_s24] ss:$0 sm:$0xff]  ;;  %s13388_s1 = sld [smem:[#allocation55_spill]] }
 0x171   :  { %518 = vmatpush1.msra.mxu0 %v481_v8  ;;  %s13389_s24 = sld [smem:[#allocation57_spill]] }
 0x172   :  { %519 = vmatprep.subr.mxu0 %v11017_v0 }
 0x173   :  { %520 = vmatpush1.msra.mxu0 %v480_v9 }
 0x174   :  { %521 = vmatprep.subr.mxu0 %v11017_v0 }
 0x175   :  { %522 = vmatpush1.msra.mxu0 %v479_v10 }
 0x176   :  { %523 = vmatprep.subr.mxu0 %v11017_v0 }
 0x177   :  { %524 = vmatpush1.msra.mxu0 %v478_v11 }
 0x178   :  { %525 = vmatprep.subr.mxu0 %v11017_v0 }
 0x179   :  { %526 = vmatpush1.msra.mxu0 %v477_v12 }
 0x17a   :  { %527 = vmatprep.subr.mxu0 %v11017_v0 }
 0x17b   :  { %528 = vmatpush1.msra.mxu0 %v476_v13 }
 0x17c   :  { %529 = vmatprep.subr.mxu0 %v11017_v0 }
 0x17d   :  { %530 = vmatpush1.msra.mxu0 %v475_v14  ;;  %v676_v14 = vld [vmem:[%s13377_s2 + $0x18] sm:$0xff] }
 0x17e   :  { %531 = vmatprep.subr.mxu0 %v11017_v0  ;;  %9223 = vmatprep.subr.mxu1 %v676_v14 }
 0x17f   :  { %532 = vmatpush1.msra.mxu0 %v474_v15  ;;  %v675_v15 = vld [vmem:[%s13377_s2 + $0x10] sm:$0xff]  ;;  %9224 = vmatpush3.msra.mxu1 %v676_v14 }
 0x180   :  { %533 = vmatprep.subr.mxu0 %v11017_v0  ;;  %9225 = vmatprep.subr.mxu1 %v675_v15 }
 0x181   :  { %534 = vmatpush1.msra.mxu0 %v473_v16  ;;  %v674_v16 = vld [vmem:[%s13377_s2 + $0x8] sm:$0xff]  ;;  %9226 = vmatpush3.msra.mxu1 %v675_v15 }
 0x182   :  { %535 = vmatprep.subr.mxu0 %v11017_v0  ;;  %9227 = vmatprep.subr.mxu1 %v674_v16 }
 0x183   :  { %536 = vmatpush1.msra.mxu0 %v472_v17  ;;  %9228 = vmatpush3.msra.mxu1 %v674_v16  ;;  %v673_v17 = vld [vmem:[%s13377_s2] sm:$0xff]  ;;  %s13390_s2 = sld [smem:[#allocation60_spill]] }
 0x184   :  { %553 = vmatprep.subr.mxu0 %v11017_v0  ;;  %9229 = vmatprep.subr.mxu1 %v673_v17 }
 0x185   :  { %554 = vmatpush2.msra.mxu0 %v495_v18  ;;  %9230 = vmatpush3.msra.mxu1 %v673_v17 }
 0x186   :  { %555 = vmatprep.subr.mxu0 %v11017_v0 }
 0x187   :  { %556 = vmatpush2.msra.mxu0 %v494_v19 }
 0x188   :  { %557 = vmatprep.subr.mxu0 %v11017_v0 }
 0x189   :  { %558 = vmatpush2.msra.mxu0 %v493_v20 }
 0x18a   :  { %559 = vmatprep.subr.mxu0 %v11017_v0 }
 0x18b   :  { %560 = vmatpush2.msra.mxu0 %v492_v21 }
 0x18c   :  { %561 = vmatprep.subr.mxu0 %v11017_v0 }
 0x18d   :  { %562 = vmatpush2.msra.mxu0 %v491_v22 }
 0x18e   :  { %563 = vmatprep.subr.mxu0 %v11017_v0 }
 0x18f   :  { %564 = vmatpush2.msra.mxu0 %v490_v23 }
 0x190   :  { %565 = vmatprep.subr.mxu0 %v11017_v0 }
 0x191   :  { %566 = vmatpush2.msra.mxu0 %v489_v24 }
 0x192   :  { %567 = vmatprep.subr.mxu0 %v11017_v0 }
 0x193   :  { %568 = vmatpush2.msra.mxu0 %v488_v25  ;;  %v8462_v25 = vld [vmem:[%s13378_s7] ss:$0 sm:$0xff]  ;;  %s13391_s7 = sld [smem:[#allocation58_spill]] }
 0x194   :  { %570 = vmatmul.mubr.f32.vlgmr.msra.gmra.mxu0 %v468_v26 }
 0x195   :  { %8459 = vmatprep.mubr.msk.f32.mxu0 %vm498_vm0, %v471_v27  ;;  %v8463_v27 = vld [vmem:[%s13379_s10] ss:$0 sm:$0xff]  ;;  %s13392_s10 = sld [smem:[#allocation59_spill]] }
 0x198   :  { %575 = vmatmul.mubr.f32.gmra.mxu0 %v470_v28 }
 0x254   :  { %v571_v30 = vpop.f32.mrf.mxu0 }
 0x255   :  { %v572_v31 = vadd.f32 %v571_v30, %v496_v29 }
 0x256   :  { %v573_v32 = vpop.f32.mrf.mxu0 }
 0x257   :  { %v583_v34 = vsel %vm582_vm1, %v572_v31, 0.0 }
 0x258   :  { %v576_v35 = vpop.f32.mrf.mxu0  ;;  %584 = vadd.xlane.f32.xlu0 %v583_v34  ;;  %v8464_v34 = vld [vmem:[%s13380_s11] ss:$0 sm:$0xff]  ;;  %s13393_s11 = sld [smem:[#allocation61_spill]] }
 0x259   :  { %v577_v36 = vadd.f32 %v576_v35, %v497_v33 }
 0x25a   :  { %v578_v37 = vpop.f32.mrf.mxu0 }
 0x25b   :  { %v587_v38 = vsel %vm586_vm2, %v577_v36, 0.0 }
 0x25c   :  { %588 = vadd.xlane.f32.xlu0 %v587_v38 }
 0x2e1   :  { %v585_v39 = vpop.xlane.xlu0 %584 }
 0x2e2   :  { %v591_v40 = vmul.f32 0.03125, %v585_v39 }
 0x2e4   :  { %v593_v41 = vsub.f32 %v572_v31, %v591_v40 }
 0x2e5   :  { %v589_v42 = vpop.xlane.xlu0 %588 }
 0x2e6   :  { %v592_v43 = vmul.f32 0.03125, %v589_v42  ;;  %v595_v44 = vmul.f32 %v593_v41, %v593_v41  ;;  %v11491_v42 = vld [vmem:[%s13381_s29 + $0x8] sm:$0x3] }
 0x2e8   :  { %v594_v45 = vsub.f32 %v577_v36, %v592_v43  ;;  %v597_v46 = vsel %vm582_vm1, %v595_v44, 0.0 }
 0x2e9   :  { %598 = vadd.xlane.f32.xlu1 %v597_v46 }
 0x2ea   :  { %v596_v47 = vmul.f32 %v594_v45, %v594_v45 }
 0x2ec   :  { %v600_v48 = vsel %vm586_vm2, %v596_v47, 0.0 }
 0x2ed   :  { %601 = vadd.xlane.f32.xlu1 %v600_v48 }
 0x372   :  { %v599_v49 = vpop.xlane.xlu1 %598 }
 0x373   :  { %v603_v50 = vmul.f32 0.03125, %v599_v49 }
 0x375   :  { %v605_v51 = vadd.f32 1e-05, %v603_v50 }
 0x376   :  { %v602_v52 = vpop.xlane.xlu1 %601 }
 0x377   :  { %10140 = vrsqrt.f32 %v605_v51  ;;  %v604_v53 = vmul.f32 0.03125, %v602_v52 }
 0x379   :  { %v606_v54 = vadd.f32 1e-05, %v604_v53 }
 0x37b   :  { %10142 = vrsqrt.f32 %v606_v54 }
 0x384   :  { %v10141_v55 = vpop.eup %10140 }
 0x385   :  { %v609_v57 = vmul.f32 %v10141_v55, %v593_v41 }
 0x387   :  { %v617_v59 = vmul.f32 %v8460_v56, %v609_v57 }
 0x388   :  { %v10143_v60 = vpop.eup %10142 }
 0x389   :  { %v11453_v61 = vadd.f32 %v8461_v58, %v617_v59  ;;  %v610_v62 = vmul.f32 %v10143_v60, %v594_v45  ;;  %v11494_v45 = vld [vmem:[%s13381_s29] sm:$0xff] }
 0x38b   :  { %v631_v63 = vsel %vm582_vm1, %v11453_v61, 0.0  ;;  %v618_v1 = vmul.f32 %v8460_v56, %v610_v62 }
 0x38c   :  { %632 = vadd.xlane.f32.xlu0 %v631_v63 }
 0x38d   :  { %v11457_v2 = vadd.f32 %v8461_v58, %v618_v1 }
 0x38f   :  { %v634_v3 = vsel %vm586_vm2, %v11457_v2, 0.0 }
 0x390   :  { %635 = vadd.xlane.f32.xlu1 %v634_v3 }
 0x415   :  { %v633_v4 = vpop.xlane.xlu0 %632 }
 0x416   :  { %v637_v5 = vmul.f32 0.03125, %v633_v4 }
 0x418   :  { %v639_v6 = vsub.f32 %v11453_v61, %v637_v5 }
 0x419   :  { %v636_v7 = vpop.xlane.xlu1 %635 }
 0x41a   :  { %v638_v8 = vmul.f32 0.03125, %v636_v7  ;;  %v641_v9 = vmul.f32 %v639_v6, %v639_v6 }
 0x41c   :  { %v640_v10 = vsub.f32 %v11457_v2, %v638_v8  ;;  %v643_v11 = vsel %vm582_vm1, %v641_v9, 0.0 }
 0x41d   :  { %644 = vadd.xlane.f32.xlu0 %v643_v11 }
 0x41e   :  { %v642_v12 = vmul.f32 %v640_v10, %v640_v10 }
 0x420   :  { %v646_v13 = vsel %vm586_vm2, %v642_v12, 0.0 }
 0x421   :  { %647 = vadd.xlane.f32.xlu1 %v646_v13 }
 0x4a6   :  { %v645_v18 = vpop.xlane.xlu0 %644 }
 0x4a7   :  { %v649_v19 = vmul.f32 0.03125, %v645_v18 }
 0x4a9   :  { %v651_v20 = vadd.f32 1e-05, %v649_v19 }
 0x4aa   :  { %v648_v21 = vpop.xlane.xlu1 %647 }
 0x4ab   :  { %10144 = vrsqrt.f32 %v651_v20  ;;  %v650_v22 = vmul.f32 0.03125, %v648_v21 }
 0x4ad   :  { %v652_v23 = vadd.f32 1e-05, %v650_v22 }
 0x4af   :  { %10146 = vrsqrt.f32 %v652_v23 }
 0x4b8   :  { %v10145_v24 = vpop.eup %10144 }
 0x4b9   :  { %v655_v26 = vmul.f32 %v10145_v24, %v639_v6 }
 0x4bb   :  { %v663_v28 = vmul.f32 %v8462_v25, %v655_v26 }
 0x4bc   :  { %v10147_v29 = vpop.eup %10146 }
 0x4bd   :  { %v656_v30 = vmul.f32 %v10147_v29, %v640_v10  ;;  %v671_v31 = vadd.f32 %v8463_v27, %v663_v28 }
 0x4bf   :  { %v664_v32 = vmul.f32 %v8462_v25, %v656_v30  ;;  %9231 = vmatprep.mubr.msk.f32.mxu1 %vm582_vm1, %v671_v31 }
 0x4c1   :  { %v672_v33 = vadd.f32 %v8463_v27, %v664_v32 }
 0x4c3   :  { %9232 = vmatmul.mubr.msk.f32.vlgmr.msra.gmra.mxu1 %vm582_vm1, %v672_v33 }
 0x583   :  { %v9233_v35 = vpop.f32.mrf.mxu1 }
 0x584   :  { %v11474_v36 = vadd.f32 %v9233_v35, %v8464_v34 }
 0x585   :  { %v756_v37 = vpop.f32.mrf.mxu1 }
 0x586   :  { %v11476_v38 = vadd.f32 %v8464_v34, %v756_v37  ;;  %769 = vrot.lane.b32.xlu0 %v11474_v36, %s11018_s6 }
 0x588   :  { %767 = vrot.lane.b32.xlu1 %v11476_v38, %s11018_s6  ;;  %9238 = vmatprep.mubr.msk.f32.mxu1 %vm771_vm3, %v11476_v38 }
 0x5f8   :  { %v770_v39 = vpop.permute.xlu0 %769 }
 0x5f9   :  { %9234 = vmatprep.subr.msk.mxu1 %vm771_vm3, %v770_v39 }
 0x5fa   :  { %9235 = vmatpush3.xpose.msk.msra.mxu1 %vm771_vm3, %v770_v39  ;;  %v768_v40 = vpop.permute.xlu1 %767 }
 0x5fb   :  { %9236 = vmatprep.subr.msk.mxu1 %vm771_vm3, %v768_v40 }
 0x5fe   :  { %9237 = vmatpush3.xpose.msk.msra.mxu1 %vm771_vm3, %v768_v40 }
 0x601   :  { %9239 = vmatmul.mubr.msk.f32.vlgmr.msra.gmra.mxu1 %vm771_vm3, %v11474_v36 }
 0x6c1   :  { %v9240_v41 = vpop.f32.mrf.mxu1 }
 0x6c2   :  { %v856_v43 = vmul.f32 0.35355338, %v9240_v41 }
 0x6c3   :  { %v846_v44 = vpop.f32.mrf.mxu1 }
 0x6c4   :  { %v855_v46 = vmul.f32 0.35355338, %v846_v44  ;;  %v858_v47 = vadd.f32 %v856_v43, %v11491_v42 }
 0x6c6   :  { %v864_v48 = vsel %vm863_vm4, %v858_v47, -inf  ;;  %v857_v49 = vadd.f32 %v855_v46, %v11494_v45 }
 0x6c7   :  { %865 = vmax.xlane.f32.xlu0 %v864_v48 }
 0x6c8   :  { %v860_v50 = vsel %vm859_vm5, %v857_v49, -inf }
 0x6c9   :  { %861 = vmax.xlane.f32.xlu1 %v860_v50 }
 0x750   :  { %v866_v51 = vpop.xlane.xlu0 %865 }
 0x751   :  { %v868_v52 = vsub.f32 %v858_v47, %v866_v51 }
 0x752   :  { %v862_v53 = vpop.xlane.xlu1 %861 }
 0x753   :  { %v871_v54 = vmul.f32 1.442695, %v868_v52  ;;  %v867_v55 = vsub.f32 %v857_v49, %v862_v53 }
 0x755   :  { %10148 = vpow2.f32 %v871_v54  ;;  %v869_v56 = vmul.f32 1.442695, %v867_v55 }
 0x757   :  { %10150 = vpow2.f32 %v869_v56 }
 0x762   :  { %v10149_v57 = vpop.eup %10148 }
 0x763   :  { %v876_v58 = vsel %vm863_vm4, %v10149_v57, 0.0 }
 0x764   :  { %v10151_v59 = vpop.eup %10150  ;;  %877 = vadd.xlane.f32.xlu1 %v876_v58 }
 0x765   :  { %v873_v60 = vsel %vm859_vm5, %v10151_v59, 0.0 }
 0x766   :  { %874 = vadd.xlane.f32.xlu0 %v873_v60 }
 0x775   :  { %883 = vrot.lane.b32.xlu1 %v11476_v38, %s11019_s15 }
 0x779   :  { %978 = vrot.lane.b32.xlu1 %v11474_v36, %s11020_s4 }
 0x77c   :  { %885 = vrot.lane.b32.xlu0 %v11474_v36, %s11019_s15 }
 0x77d   :  { %976 = vrot.lane.b32.xlu1 %v11476_v38, %s11020_s4 }
 0x780   :  { %972 = vrot.lane.b32.xlu0 %v11476_v38, %s11021_s14 }
 0x781   :  { %974 = vrot.lane.b32.xlu1 %v11474_v36, %s11021_s14 }
 0x7ed   :  { %v878_v62 = vpop.xlane.xlu1 %877 }
 0x7ee   :  { %10152 = vrcp.f32 %v878_v62 }
 0x7ef   :  { %v875_v63 = vpop.xlane.xlu0 %874 }
 0x7f0   :  { %10154 = vrcp.f32 %v875_v63 }
 0x7f1   :  { %v884_v1 = vpop.permute.xlu1 %883 }
 0x7f3   :  { %v886_v3 = vpop.permute.xlu0 %885 }
 0x7f4   :  { %9241 = vmatprep.subr.msk.mxu1 %vm894_vm6, %v886_v3 }
 0x7f5   :  { %9242 = vmatpush3.msk.msra.mxu1 %vm894_vm6, %v886_v3  ;;  %v979_v4 = vpop.permute.xlu1 %978 }
 0x7f6   :  { %9243 = vmatprep.subr.mxu1 %v884_v1 }
 0x7f7   :  { %9244 = vmatpush3.msra.mxu1 %v884_v1  ;;  %v973_v9 = vpop.permute.xlu0 %972 }
 0x7f8   :  { %9248 = vmatprep.subr.msk.mxu1 %vm771_vm3, %v979_v4 }
 0x7f9   :  { %v977_v10 = vpop.permute.xlu1 %976 }
 0x7fb   :  { %v10153_v5 = vpop.eup %10152 }
 0x7fc   :  { %v882_v8 = vmul.f32 %v10153_v5, %v10149_v57 }
 0x7fd   :  { %v10155_v6 = vpop.eup %10154  ;;  %v975_v11 = vpop.permute.xlu1 %974 }
 0x7fe   :  { %v880_v7 = vmul.f32 %v10155_v6, %v10151_v59 }
 0x800   :  { %9245 = vmatprep.mubr.msk.f32.mxu1 %vm859_vm5, %v880_v7 }
 0x801   :  { %9246 = vmatmul.mubr.msk.f32.vlgmr.msra.gmra.mxu1 %vm859_vm5, %v882_v8 }
 0x802   :  { %9249 = vmatpush3.xpose.msk.msra.mxu1 %vm771_vm3, %v979_v4  ;;  %9252 = vmatprep.mubr.msk.f32.mxu1 %vm771_vm3, %v973_v9 }
 0x803   :  { %9250 = vmatprep.subr.msk.mxu1 %vm771_vm3, %v977_v10 }
 0x806   :  { %9251 = vmatpush3.xpose.msk.msra.mxu1 %vm771_vm3, %v977_v10 }
 0x809   :  { %9253 = vmatmul.mubr.msk.f32.vlgmr.msra.gmra.mxu1 %vm771_vm3, %v975_v11 }
 0x8c1   :  { %v11524_v12 = vpop.f32.mrf.mxu1 }
 0x8c3   :  { %v11526_v13 = vpop.f32.mrf.mxu1 }
 0x8c9   :  { %v9254_v14 = vpop.f32.mrf.mxu1 }
 0x8ca   :  { %v1064_v15 = vmul.f32 0.35355338, %v9254_v14 }
 0x8cb   :  { %v1054_v16 = vpop.f32.mrf.mxu1 }
 0x8cc   :  { %v1063_v17 = vmul.f32 0.35355338, %v1054_v16  ;;  %v1066_v18 = vadd.f32 %v1064_v15, %v11491_v42 }
 0x8ce   :  { %v1070_v19 = vsel %vm863_vm4, %v1066_v18, -inf  ;;  %v1065_v20 = vadd.f32 %v1063_v17, %v11494_v45 }
 0x8cf   :  { %1071 = vmax.xlane.f32.xlu1 %v1070_v19 }
 0x8d0   :  { %v1067_v21 = vsel %vm859_vm5, %v1065_v20, -inf }
 0x8d1   :  { %1068 = vmax.xlane.f32.xlu0 %v1067_v21 }
 0x8e0   :  { %1089 = vrot.lane.b32.xlu1 %v11476_v38, %s11022_s20 }
 0x8e4   :  { %1183 = vrot.lane.b32.xlu1 %v11474_v36, %s11023_s16 }
 0x8e8   :  { %1181 = vrot.lane.b32.xlu1 %v11476_v38, %s11023_s16 }
 0x8ec   :  { %1179 = vrot.lane.b32.xlu1 %v11474_v36, %s11024_s12 }
 0x958   :  { %v1072_v22 = vpop.xlane.xlu1 %1071 }
 0x959   :  { %v1074_v23 = vsub.f32 %v1066_v18, %v1072_v22 }
 0x95a   :  { %v1069_v24 = vpop.xlane.xlu0 %1068 }
 0x95b   :  { %v1077_v25 = vmul.f32 1.442695, %v1074_v23  ;;  %v1073_v26 = vsub.f32 %v1065_v20, %v1069_v24 }
 0x95c   :  { %v1090_v34 = vpop.permute.xlu1 %1089 }
 0x95d   :  { %10156 = vpow2.f32 %v1077_v25  ;;  %v1075_v27 = vmul.f32 1.442695, %v1073_v26 }
 0x95f   :  { %10158 = vpow2.f32 %v1075_v27 }
 0x960   :  { %v1184_v37 = vpop.permute.xlu1 %1183 }
 0x964   :  { %v1182_v46 = vpop.permute.xlu1 %1181 }
 0x968   :  { %v1180_v47 = vpop.permute.xlu1 %1179 }
 0x96a   :  { %v10157_v28 = vpop.eup %10156 }
 0x96b   :  { %v1082_v29 = vsel %vm863_vm4, %v10157_v28, 0.0 }
 0x96c   :  { %v10159_v30 = vpop.eup %10158  ;;  %1083 = vadd.xlane.f32.xlu0 %v1082_v29 }
 0x96d   :  { %v1079_v31 = vsel %vm859_vm5, %v10159_v30, 0.0 }
 0x970   :  { %1080 = vadd.xlane.f32.xlu0 %v1079_v31 }
 0x986   :  { %1091 = vrot.lane.b32.xlu0 %v11474_v36, %s11022_s20 }
 0x98a   :  { %1177 = vrot.lane.b32.xlu0 %v11476_v38, %s11024_s12 }
 0x9f5   :  { %v1084_v32 = vpop.xlane.xlu0 %1083 }
 0x9f6   :  { %10160 = vrcp.f32 %v1084_v32 }
 0x9f9   :  { %v1081_v33 = vpop.xlane.xlu0 %1080 }
 0x9fa   :  { %10162 = vrcp.f32 %v1081_v33 }
 0x9fd   :  { %v1092_v35 = vpop.permute.xlu0 %1091 }
 0x9fe   :  { %9255 = vmatprep.subr.msk.mxu1 %vm894_vm6, %v1092_v35 }
 0x9ff   :  { %9256 = vmatpush3.msk.msra.mxu1 %vm894_vm6, %v1092_v35 }
 0xa00   :  { %9257 = vmatprep.subr.mxu1 %v1090_v34 }
 0xa01   :  { %9258 = vmatpush3.msra.mxu1 %v1090_v34  ;;  %v1178_v44 = vpop.permute.xlu0 %1177 }
 0xa02   :  { %9262 = vmatprep.subr.msk.mxu1 %vm771_vm3, %v1184_v37 }
 0xa03   :  { %v10161_v39 = vpop.eup %10160 }
 0xa04   :  { %v1088_v43 = vmul.f32 %v10161_v39, %v10157_v28 }
 0xa07   :  { %v10163_v40 = vpop.eup %10162 }
 0xa08   :  { %v1086_v41 = vmul.f32 %v10163_v40, %v10159_v30 }
 0xa0a   :  { %9259 = vmatprep.mubr.msk.f32.mxu1 %vm859_vm5, %v1086_v41 }
 0xa0b   :  { %9260 = vmatmul.mubr.msk.f32.vlgmr.msra.gmra.mxu1 %vm859_vm5, %v1088_v43 }
 0xa0c   :  { %9263 = vmatpush3.xpose.msk.msra.mxu1 %vm771_vm3, %v1184_v37  ;;  %9266 = vmatprep.mubr.msk.f32.mxu1 %vm771_vm3, %v1178_v44 }
 0xa0d   :  { %9264 = vmatprep.subr.msk.mxu1 %vm771_vm3, %v1182_v46 }
 0xa10   :  { %9265 = vmatpush3.xpose.msk.msra.mxu1 %vm771_vm3, %v1182_v46 }
 0xa13   :  { %9267 = vmatmul.mubr.msk.f32.vlgmr.msra.gmra.mxu1 %vm771_vm3, %v1180_v47 }
 0xacb   :  { %v11556_v48 = vpop.f32.mrf.mxu1 }
 0xacd   :  { %v11558_v49 = vpop.f32.mrf.mxu1 }
 0xad3   :  { %v9268_v50 = vpop.f32.mrf.mxu1 }
 0xad4   :  { %v1269_v51 = vmul.f32 0.35355338, %v9268_v50 }
 0xad5   :  { %v1259_v52 = vpop.f32.mrf.mxu1 }
 0xad6   :  { %v1268_v53 = vmul.f32 0.35355338, %v1259_v52  ;;  %v1271_v54 = vadd.f32 %v1269_v51, %v11491_v42  ;;  %v1622_v51 = vld [vmem:[%s13382_s25 + $0x18] sm:$0xff]  ;;  %v1621_v52 = vld [vmem:[%s13382_s25 + $0x10] sm:$0xff] }
 0xad8   :  { %v1275_v55 = vsel %vm863_vm4, %v1271_v54, -inf  ;;  %v1270_v56 = vadd.f32 %v1268_v53, %v11494_v45  ;;  %v1620_v53 = vld [vmem:[%s13382_s25 + $0x8] sm:$0xff] }
 0xad9   :  { %1276 = vmax.xlane.f32.xlu1 %v1275_v55 }
 0xada   :  { %v1272_v57 = vsel %vm859_vm5, %v1270_v56, -inf }
 0xadb   :  { %1273 = vmax.xlane.f32.xlu0 %v1272_v57 }
 0xaea   :  { %1294 = vrot.lane.b32.xlu1 %v11476_v38, %s11025_s18 }
 0xaee   :  { %1388 = vrot.lane.b32.xlu1 %v11474_v36, %s11026_s8 }
 0xaf2   :  { %1386 = vrot.lane.b32.xlu1 %v11476_v38, %s11026_s8 }
 0xaf6   :  { %1384 = vrot.lane.b32.xlu1 %v11474_v36, %s11027_s22 }
 0xb62   :  { %v1277_v58 = vpop.xlane.xlu1 %1276 }
 0xb63   :  { %v1279_v59 = vsub.f32 %v1271_v54, %v1277_v58  ;;  %v1619_v54 = vld [vmem:[%s13382_s25] sm:$0xff]  ;;  %s13395_s25 = sld [smem:[#allocation63_spill]] }
 0xb64   :  { %v1274_v60 = vpop.xlane.xlu0 %1273 }
 0xb65   :  { %v1282_v62 = vmul.f32 1.442695, %v1279_v59  ;;  %v1278_v63 = vsub.f32 %v1270_v56, %v1274_v60 }
 0xb66   :  { %v1295_v9 = vpop.permute.xlu1 %1294 }
 0xb67   :  { %10164 = vpow2.f32 %v1282_v62  ;;  %v1280_v1 = vmul.f32 1.442695, %v1278_v63 }
 0xb69   :  { %10166 = vpow2.f32 %v1280_v1 }
 0xb6a   :  { %v1389_v11 = vpop.permute.xlu1 %1388 }
 0xb6e   :  { %v1387_v19 = vpop.permute.xlu1 %1386 }
 0xb72   :  { %v1385_v20 = vpop.permute.xlu1 %1384 }
 0xb74   :  { %v10165_v3 = vpop.eup %10164 }
 0xb75   :  { %v1287_v4 = vsel %vm863_vm4, %v10165_v3, 0.0 }
 0xb76   :  { %v10167_v5 = vpop.eup %10166  ;;  %1288 = vadd.xlane.f32.xlu0 %v1287_v4 }
 0xb77   :  { %v1284_v6 = vsel %vm859_vm5, %v10167_v5, 0.0 }
 0xb7a   :  { %1285 = vadd.xlane.f32.xlu0 %v1284_v6 }
 0xb90   :  { %1296 = vrot.lane.b32.xlu0 %v11474_v36, %s11025_s18 }
 0xb94   :  { %1382 = vrot.lane.b32.xlu0 %v11476_v38, %s11027_s22 }
 0xbff   :  { %v1289_v7 = vpop.xlane.xlu0 %1288 }
 0xc00   :  { %10168 = vrcp.f32 %v1289_v7 }
 0xc03   :  { %v1286_v8 = vpop.xlane.xlu0 %1285 }
 0xc04   :  { %10170 = vrcp.f32 %v1286_v8 }
 0xc07   :  { %v1297_v10 = vpop.permute.xlu0 %1296 }
 0xc08   :  { %9269 = vmatprep.subr.msk.mxu1 %vm894_vm6, %v1297_v10 }
 0xc09   :  { %9270 = vmatpush3.msk.msra.mxu1 %vm894_vm6, %v1297_v10 }
 0xc0a   :  { %9271 = vmatprep.subr.mxu1 %v1295_v9 }
 0xc0b   :  { %9272 = vmatpush3.msra.mxu1 %v1295_v9  ;;  %v1383_v18 = vpop.permute.xlu0 %1382 }
 0xc0c   :  { %9276 = vmatprep.subr.msk.mxu1 %vm771_vm3, %v1389_v11 }
 0xc0d   :  { %v10169_v14 = vpop.eup %10168 }
 0xc0e   :  { %v1293_v17 = vmul.f32 %v10169_v14, %v10165_v3 }
 0xc11   :  { %v10171_v15 = vpop.eup %10170 }
 0xc12   :  { %v1291_v16 = vmul.f32 %v10171_v15, %v10167_v5 }
 0xc14   :  { %9273 = vmatprep.mubr.msk.f32.mxu1 %vm859_vm5, %v1291_v16 }
 0xc15   :  { %9274 = vmatmul.mubr.msk.f32.vlgmr.msra.gmra.mxu1 %vm859_vm5, %v1293_v17 }
 0xc16   :  { %9277 = vmatpush3.xpose.msk.msra.mxu1 %vm771_vm3, %v1389_v11  ;;  %9280 = vmatprep.mubr.msk.f32.mxu1 %vm771_vm3, %v1383_v18 }
 0xc17   :  { %9278 = vmatprep.subr.msk.mxu1 %vm771_vm3, %v1387_v19 }
 0xc1a   :  { %9279 = vmatpush3.xpose.msk.msra.mxu1 %vm771_vm3, %v1387_v19 }
 0xc1b   :  { %9290 = vmatprep.subr.mxu1 %v1622_v51 }
 0xc1d   :  { %9281 = vmatmul.mubr.msk.f32.vlgmr.msra.gmra.mxu1 %vm771_vm3, %v1385_v20 }
 0xc1e   :  { %9291 = vmatpush3.msra.mxu1 %v1622_v51  ;;  %v1878_v51 = vld [vmem:[%s13387_s30 + $0x58] sm:$0xff] }
 0xc1f   :  { %9292 = vmatprep.subr.mxu1 %v1621_v52 }
 0xc20   :  { %9293 = vmatpush3.msra.mxu1 %v1621_v52  ;;  %v1877_v52 = vld [vmem:[%s13387_s30 + $0x50] sm:$0xff] }
 0xc21   :  { %9294 = vmatprep.subr.mxu1 %v1620_v53 }
 0xc22   :  { %9295 = vmatpush3.msra.mxu1 %v1620_v53  ;;  %v1876_v53 = vld [vmem:[%s13387_s30 + $0x48] sm:$0xff] }
 0xc23   :  { %9296 = vmatprep.subr.mxu1 %v1619_v54 }
 0xc24   :  { %9297 = vmatpush3.msra.mxu1 %v1619_v54  ;;  %v1875_v54 = vld [vmem:[%s13387_s30 + $0x40] sm:$0xff] }
 0xcd5   :  { %v9275_v21 = vpop.f32.mrf.mxu1 }
 0xcd7   :  { %v1373_v22 = vpop.f32.mrf.mxu1 }
 0xcdd   :  { %v9282_v23 = vpop.f32.mrf.mxu1 }
 0xcde   :  { %v1474_v24 = vmul.f32 0.35355338, %v9282_v23 }
 0xcdf   :  { %v1464_v25 = vpop.f32.mrf.mxu1 }
 0xce0   :  { %v1473_v26 = vmul.f32 0.35355338, %v1464_v25  ;;  %v1476_v27 = vadd.f32 %v1474_v24, %v11491_v42  ;;  %v1762_v25 = vld [vmem:[%s13384_s19 + $0x18] sm:$0xff] }
 0xce2   :  { %v1480_v28 = vsel %vm863_vm4, %v1476_v27, -inf  ;;  %v1475_v29 = vadd.f32 %v1473_v26, %v11494_v45  ;;  %v1761_v26 = vld [vmem:[%s13384_s19 + $0x10] sm:$0xff] }
 0xce3   :  { %1481 = vmax.xlane.f32.xlu1 %v1480_v28  ;;  %v1759_v28 = vld [vmem:[%s13384_s19] sm:$0xff] }
 0xce4   :  { %v1477_v30 = vsel %vm859_vm5, %v1475_v29, -inf }
 0xce5   :  { %1478 = vmax.xlane.f32.xlu0 %v1477_v30 }
 0xcf4   :  { %1499 = vrot.lane.b32.xlu1 %v11476_v38, %s11028_s17 }
 0xcf8   :  { %1589 = vrot.lane.b32.xlu1 %v11558_v49, %s11029_s3 }
 0xcfc   :  { %1591 = vrot.lane.b32.xlu1 %v11556_v48, %s11029_s3 }
 0xd00   :  { %1599 = vrot.lane.b32.xlu1 %v9275_v21, %s11030_s23 }
 0xd6c   :  { %v1482_v31 = vpop.xlane.xlu1 %1481 }
 0xd6d   :  { %v1484_v32 = vsub.f32 %v1476_v27, %v1482_v31  ;;  %v1760_v27 = vld [vmem:[%s13384_s19 + $0x8] sm:$0xff]  ;;  %s13397_s19 = sld [smem:[#allocation64_spill]] }
 0xd6e   :  { %v1479_v33 = vpop.xlane.xlu0 %1478 }
 0xd6f   :  { %v1487_v34 = vmul.f32 1.442695, %v1484_v32  ;;  %v1483_v35 = vsub.f32 %v1475_v29, %v1479_v33 }
 0xd70   :  { %v1500_v47 = vpop.permute.xlu1 %1499 }
 0xd71   :  { %10172 = vpow2.f32 %v1487_v34  ;;  %v1485_v37 = vmul.f32 1.442695, %v1483_v35 }
 0xd73   :  { %10174 = vpow2.f32 %v1485_v37  ;;  %v8498_v37 = vld [vmem:[%s13385_s28] ss:$0 sm:$0xff]  ;;  %s13398_s28 = sld [smem:[#allocation65_spill]] }
 0xd74   :  { %v1590_v57 = vpop.permute.xlu1 %1589 }
 0xd75   :  { %v1611_v62 = vsel %vm771_vm3, %v11526_v13, %v1590_v57  ;;  %v8497_v13 = vld [vmem:[%s13383_s26] ss:$0 sm:$0xff]  ;;  %v1872_v57 = vld [vmem:[%s13387_s30 + $0x28] sm:$0xff]  ;;  %s13396_s26 = sld [smem:[#allocation66_spill]] }
 0xd78   :  { %v1592_v58 = vpop.permute.xlu1 %1591 }
 0xd79   :  { %v1612_v1 = vsel %vm771_vm3, %v11524_v12, %v1592_v58  ;;  %v1871_v58 = vld [vmem:[%s13387_s30 + $0x20] sm:$0xff] }
 0xd7c   :  { %v1600_v59 = vpop.permute.xlu1 %1599 }
 0xd7d   :  { %v1615_v5 = vsel %vm1613_vm7, %v1612_v1, %v1600_v59  ;;  %v1870_v59 = vld [vmem:[%s13387_s30 + $0x18] sm:$0xff]  ;;  %v8500_v1 = vld [vmem:[%s13388_s1] ss:$0 sm:$0xff]  ;;  %s13401_s1 = sld [smem:[#allocation75_spill]] }
 0xd7e   :  { %v10173_v39 = vpop.eup %10172 }
 0xd7f   :  { %v1492_v38 = vsel %vm863_vm4, %v10173_v39, 0.0 }
 0xd80   :  { %v10175_v40 = vpop.eup %10174  ;;  %1493 = vadd.xlane.f32.xlu0 %v1492_v38  ;;  %v8499_v38 = vld [vmem:[%s13386_s27] ss:$0 sm:$0xff]  ;;  %s13399_s27 = sld [smem:[#allocation68_spill]] }
 0xd81   :  { %v1489_v41 = vsel %vm859_vm5, %v10175_v40, 0.0 }
 0xd84   :  { %1490 = vadd.xlane.f32.xlu0 %v1489_v41 }
 0xd9a   :  { %1501 = vrot.lane.b32.xlu0 %v11474_v36, %s11028_s17 }
 0xd9e   :  { %1597 = vrot.lane.b32.xlu0 %v1373_v22, %s11030_s23 }
 0xe09   :  { %v1494_v43 = vpop.xlane.xlu0 %1493 }
 0xe0a   :  { %10176 = vrcp.f32 %v1494_v43 }
 0xe0d   :  { %v1491_v44 = vpop.xlane.xlu0 %1490 }
 0xe0e   :  { %10178 = vrcp.f32 %v1491_v44 }
 0xe11   :  { %v1502_v46 = vpop.permute.xlu0 %1501 }
 0xe12   :  { %9283 = vmatprep.subr.msk.mxu0 %vm894_vm6, %v1502_v46 }
 0xe13   :  { %9284 = vmatpush3.msk.msra.mxu0 %vm894_vm6, %v1502_v46 }
 0xe14   :  { %9285 = vmatprep.subr.mxu0 %v1500_v47 }
 0xe15   :  { %9286 = vmatpush3.msra.mxu0 %v1500_v47  ;;  %v1598_v60 = vpop.permute.xlu0 %1597 }
 0xe16   :  { %v1614_v3 = vsel %vm1613_vm7, %v1611_v62, %v1598_v60  ;;  %9301 = vmatprep.subr.mxu0 %v1762_v25  ;;  %v1869_v60 = vld [vmem:[%s13387_s30 + $0x10] sm:$0xff]  ;;  %v1868_v62 = vld [vmem:[%s13387_s30 + $0x8] sm:$0xff] }
 0xe17   :  { %v10177_v48 = vpop.eup %10176 }
 0xe18   :  { %v1498_v50 = vmul.f32 %v10177_v48, %v10173_v39  ;;  %v1882_v48 = vld [vmem:[%s13387_s30 + $0x78] sm:$0xff] }
 0xe19   :  { %9312 = vmatprep.subr.mxu1 %v1882_v48 }
 0xe1b   :  { %v10179_v36 = vpop.eup %10178 }
 0xe1c   :  { %v1496_v49 = vmul.f32 %v10179_v36, %v10175_v40  ;;  %v1881_v36 = vld [vmem:[%s13387_s30 + $0x70] sm:$0xff] }
 0xe1e   :  { %9287 = vmatprep.mubr.msk.f32.mxu0 %vm859_vm5, %v1496_v49  ;;  %v1880_v49 = vld [vmem:[%s13387_s30 + $0x68] sm:$0xff] }
 0xe1f   :  { %9288 = vmatmul.mubr.msk.f32.vlgmr.msra.gmra.mxu0 %vm859_vm5, %v1498_v50  ;;  %v1879_v50 = vld [vmem:[%s13387_s30 + $0x60] sm:$0xff] }
 0xe20   :  { %9302 = vmatpush3.msra.mxu0 %v1762_v25 }
 0xe21   :  { %9303 = vmatprep.subr.mxu0 %v1761_v26 }
 0xe22   :  { %9304 = vmatpush3.msra.mxu0 %v1761_v26 }
 0xe23   :  { %9305 = vmatprep.subr.mxu0 %v1760_v27 }
 0xe24   :  { %9306 = vmatpush3.msra.mxu0 %v1760_v27 }
 0xe25   :  { %9307 = vmatprep.subr.mxu0 %v1759_v28 }
 0xe26   :  { %9308 = vmatpush3.msra.mxu0 %v1759_v28 }
 0xedf   :  { %v9289_v55 = vpop.f32.mrf.mxu0 }
 0xee0   :  { %1607 = vrot.lane.b32.xlu1 %v9289_v55, %s11031_s0  ;;  %v1874_v55 = vld [vmem:[%s13387_s30 + $0x38] sm:$0xff] }
 0xee1   :  { %v1578_v56 = vpop.f32.mrf.mxu0 }
 0xee2   :  { %1605 = vrot.lane.b32.xlu0 %v1578_v56, %s11031_s0  ;;  %v1873_v56 = vld [vmem:[%s13387_s30 + $0x30] sm:$0xff] }
 0xf52   :  { %v1608_v63 = vpop.permute.xlu1 %1607 }
 0xf53   :  { %v1618_v7 = vsel %vm1616_vm8, %v1615_v5, %v1608_v63  ;;  %v1867_v63 = vld [vmem:[%s13387_s30] sm:$0xff]  ;;  %s13400_s30 = sld [smem:[#allocation67_spill]] }
 0xf54   :  { %v1606_v4 = vpop.permute.xlu0 %1605 }
 0xf55   :  { %v1617_v6 = vsel %vm1616_vm8, %v1614_v3, %v1606_v4 }
 0xf56   :  { %9298 = vmatprep.mubr.msk.f32.mxu1 %vm582_vm1, %v1617_v6 }
 0xf57   :  { %9299 = vmatmul.mubr.msk.f32.vlgmr.msra.gmra.mxu1 %vm582_vm1, %v1618_v7 }
 0xf58   :  { %9313 = vmatpush3.msra.mxu1 %v1882_v48 }
 0xf59   :  { %9314 = vmatprep.subr.mxu1 %v1881_v36 }
 0xf5a   :  { %9315 = vmatpush3.msra.mxu1 %v1881_v36 }
 0xf5b   :  { %9316 = vmatprep.subr.mxu1 %v1880_v49 }
 0xf5c   :  { %9317 = vmatpush3.msra.mxu1 %v1880_v49  ;;  %v8506_v49 = vld [vmem:[%s13391_s7] ss:$0 sm:$0xff]  ;;  %s13404_s7 = sld [smem:[#allocation73_spill]] }
 0xf5d   :  { %9318 = vmatprep.subr.mxu1 %v1879_v50 }
 0xf5e   :  { %9319 = vmatpush3.msra.mxu1 %v1879_v50 }
 0xf5f   :  { %9320 = vmatprep.subr.mxu1 %v1878_v51 }
 0xf60   :  { %9321 = vmatpush3.msra.mxu1 %v1878_v51 }
 0xf61   :  { %9322 = vmatprep.subr.mxu1 %v1877_v52 }
 0xf62   :  { %9323 = vmatpush3.msra.mxu1 %v1877_v52 }
 0xf63   :  { %9324 = vmatprep.subr.mxu1 %v1876_v53 }
 0xf64   :  { %9325 = vmatpush3.msra.mxu1 %v1876_v53 }
 0xf65   :  { %9326 = vmatprep.subr.mxu1 %v1875_v54 }
 0xf66   :  { %9327 = vmatpush3.msra.mxu1 %v1875_v54  ;;  %v8507_v54 = vld [vmem:[%s13392_s10] ss:$0 sm:$0xff]  ;;  %s13405_s10 = sld [smem:[#allocation72_spill]] }
 0xf67   :  { %9328 = vmatprep.subr.mxu1 %v1874_v55 }
 0xf68   :  { %9329 = vmatpush3.msra.mxu1 %v1874_v55 }
 0xf69   :  { %9330 = vmatprep.subr.mxu1 %v1873_v56 }
 0xf6a   :  { %9331 = vmatpush3.msra.mxu1 %v1873_v56 }
 0xf6b   :  { %9332 = vmatprep.subr.mxu1 %v1872_v57 }
 0xf6c   :  { %9333 = vmatpush3.msra.mxu1 %v1872_v57 }
 0xf6d   :  { %9334 = vmatprep.subr.mxu1 %v1871_v58 }
 0xf6e   :  { %9335 = vmatpush3.msra.mxu1 %v1871_v58  ;;  %v8508_v58 = vld [vmem:[%s13393_s11] ss:$0 sm:$0xff]  ;;  %s13406_s11 = sld [smem:[#allocation78_spill]] }
 0xf6f   :  { %9336 = vmatprep.subr.mxu1 %v1870_v59 }
 0xf70   :  { %9337 = vmatpush3.msra.mxu1 %v1870_v59 }
 0xf71   :  { %9338 = vmatprep.subr.mxu1 %v1869_v60 }
 0xf72   :  { %9339 = vmatpush3.msra.mxu1 %v1869_v60 }
 0xf73   :  { %9340 = vmatprep.subr.mxu1 %v1868_v62 }
 0xf74   :  { %9341 = vmatpush3.msra.mxu1 %v1868_v62 }
 0xf75   :  { %9342 = vmatprep.subr.mxu1 %v1867_v63 }
 0xf76   :  { %9343 = vmatpush3.msra.mxu1 %v1867_v63 }
0x1017   :  { %v9300_v8 = vpop.f32.mrf.mxu1 }
0x1018   :  { %v1705_v9 = vadd.f32 %v9300_v8, %v11457_v2 }
0x1019   :  { %v1695_v10 = vpop.f32.mrf.mxu1 }
0x101a   :  { %v11626_v11 = vadd.f32 %v8497_v13, %v1705_v9  ;;  %v1704_v12 = vadd.f32 %v1695_v10, %v11453_v61 }
0x101c   :  { %v11629_v14 = vadd.f32 %v8497_v13, %v1704_v12  ;;  %v1720_v15 = vsel %vm586_vm2, %v11626_v11, 0.0 }
0x101d   :  { %1721 = vadd.xlane.f32.xlu1 %v1720_v15 }
0x101e   :  { %v1717_v16 = vsel %vm582_vm1, %v11629_v14, 0.0 }
0x101f   :  { %1718 = vadd.xlane.f32.xlu0 %v1717_v16 }
0x10a6   :  { %v1722_v17 = vpop.xlane.xlu1 %1721 }
0x10a7   :  { %v1724_v2 = vmul.f32 0.03125, %v1722_v17 }
0x10a8   :  { %v1719_v18 = vpop.xlane.xlu0 %1718 }
0x10a9   :  { %v1723_v19 = vmul.f32 0.03125, %v1719_v18  ;;  %v1726_v20 = vsub.f32 %v11626_v11, %v1724_v2 }
0x10ab   :  { %v1725_v61 = vsub.f32 %v11629_v14, %v1723_v19  ;;  %v1728_v23 = vmul.f32 %v1726_v20, %v1726_v20 }
0x10ad   :  { %v1727_v21 = vmul.f32 %v1725_v61, %v1725_v61  ;;  %v1732_v24 = vsel %vm586_vm2, %v1728_v23, 0.0 }
0x10af   :  { %v1729_v22 = vsel %vm582_vm1, %v1727_v21, 0.0 }
0x10b0   :  { %1730 = vadd.xlane.f32.xlu0 %v1729_v22 }
0x10b4   :  { %1733 = vadd.xlane.f32.xlu0 %v1732_v24 }
0x1139   :  { %v1731_v29 = vpop.xlane.xlu0 %1730 }
0x113a   :  { %v1735_v30 = vmul.f32 0.03125, %v1731_v29 }
0x113c   :  { %v1737_v31 = vadd.f32 1e-05, %v1735_v30 }
0x113d   :  { %v1734_v32 = vpop.xlane.xlu0 %1733 }
0x113e   :  { %10180 = vrsqrt.f32 %v1737_v31  ;;  %v1736_v33 = vmul.f32 0.03125, %v1734_v32 }
0x1140   :  { %v1738_v34 = vadd.f32 1e-05, %v1736_v33 }
0x1142   :  { %10182 = vrsqrt.f32 %v1738_v34 }
0x114b   :  { %v10181_v35 = vpop.eup %10180 }
0x114c   :  { %v1741_v39 = vmul.f32 %v10181_v35, %v1725_v61 }
0x114e   :  { %v1749_v40 = vmul.f32 %v8498_v37, %v1741_v39  ;;  %v2013_v39 = vld [vmem:[%s13390_s2 + $0x10] sm:$0xff] }
0x114f   :  { %v10183_v41 = vpop.eup %10182 }
0x1150   :  { %v1742_v43 = vmul.f32 %v10183_v41, %v1726_v20  ;;  %v1757_v44 = vadd.f32 %v8499_v38, %v1749_v40  ;;  %v8505_v20 = vld [vmem:[%s13389_s24] ss:$0 sm:$0xff]  ;;  %s13402_s24 = sld [smem:[#allocation76_spill]] }
0x1151   :  { %v2011_v40 = vld [vmem:[%s13390_s2] sm:$0xff] }
0x1152   :  { %v1750_v46 = vmul.f32 %v8498_v37, %v1742_v43  ;;  %9309 = vmatprep.mubr.msk.f32.mxu0 %vm582_vm1, %v1757_v44  ;;  %v2014_v37 = vld [vmem:[%s13390_s2 + $0x18] sm:$0xff] }
0x1153   :  { %9347 = vmatprep.subr.mxu0 %v2014_v37 }
0x1154   :  { %v1758_v47 = vadd.f32 %v8499_v38, %v1750_v46  ;;  %v2012_v38 = vld [vmem:[%s13390_s2 + $0x8] sm:$0xff]  ;;  %s13403_s2 = sld [smem:[#allocation69_spill]] }
0x1156   :  { %9310 = vmatmul.mubr.msk.f32.vlgmr.msra.gmra.mxu0 %vm582_vm1, %v1758_v47 }
0x1157   :  { %9348 = vmatpush3.msra.mxu0 %v2014_v37 }
0x1158   :  { %9349 = vmatprep.subr.mxu0 %v2013_v39 }
0x1159   :  { %9350 = vmatpush3.msra.mxu0 %v2013_v39 }
0x115a   :  { %9351 = vmatprep.subr.mxu0 %v2012_v38 }
0x115b   :  { %9352 = vmatpush3.msra.mxu0 %v2012_v38 }
0x115c   :  { %9353 = vmatprep.subr.mxu0 %v2011_v40 }
0x115d   :  { %9354 = vmatpush3.msra.mxu0 %v2011_v40 }
0x1216   :  { %v9311_v3 = vpop.f32.mrf.mxu0 }
0x1217   :  { %v1848_v4 = vadd.f32 %v9311_v3, %v8500_v1 }
0x1218   :  { %v1842_v5 = vpop.f32.mrf.mxu0 }
0x1219   :  { %v8504_v6 = vmul.f32 -1.702, %v1848_v4  ;;  %v1843_v7 = vadd.f32 %v8500_v1, %v1842_v5 }
0x121b   :  { %v1857_v8 = vmul.f32 1.442695, %v8504_v6  ;;  %v8503_v13 = vmul.f32 -1.702, %v1843_v7 }
0x121d   :  { %10184 = vpow2.f32 %v1857_v8  ;;  %v1855_v9 = vmul.f32 1.442695, %v8503_v13 }
0x121f   :  { %10186 = vpow2.f32 %v1855_v9 }
0x122a   :  { %v10185_v10 = vpop.eup %10184 }
0x122b   :  { %v1860_v12 = vadd.f32 1.0, %v10185_v10 }
0x122c   :  { %v10187_v15 = vpop.eup %10186 }
0x122d   :  { %v1859_v16 = vadd.f32 1.0, %v10187_v15  ;;  %10188 = vrcp.f32 %v1860_v12 }
0x122f   :  { %10190 = vrcp.f32 %v1859_v16 }
0x123a   :  { %v10189_v17 = vpop.eup %10188 }
0x123b   :  { %v1866_v19 = vmul.f32 %v10189_v17, %v1848_v4 }
0x123c   :  { %v10191_v2 = vpop.eup %10190 }
0x123d   :  { %v1865_v18 = vmul.f32 %v10191_v2, %v1843_v7 }
0x123f   :  { %9344 = vmatprep.mubr.f32.mxu1 %v1865_v18 }
0x1240   :  { %9345 = vmatmul.mubr.f32.vlgmr.msra.gmra.mxu1 %v1866_v19 }
0x1300   :  { %v9346_v61 = vpop.f32.mrf.mxu1 }
0x1301   :  { %v1962_v21 = vadd.f32 %v9346_v61, %v8505_v20 }
0x1302   :  { %v1956_v22 = vpop.f32.mrf.mxu1 }
0x1303   :  { %v11666_v23 = vadd.f32 %v1962_v21, %v11626_v11  ;;  %v1957_v24 = vadd.f32 %v8505_v20, %v1956_v22 }
0x1305   :  { %v11669_v25 = vadd.f32 %v1957_v24, %v11629_v14  ;;  %v1972_v26 = vsel %vm586_vm2, %v11666_v23, 0.0 }
0x1306   :  { %1973 = vadd.xlane.f32.xlu1 %v1972_v26 }
0x1307   :  { %v1969_v27 = vsel %vm582_vm1, %v11669_v25, 0.0 }
0x1308   :  { %1970 = vadd.xlane.f32.xlu0 %v1969_v27 }
0x138f   :  { %v1974_v28 = vpop.xlane.xlu1 %1973 }
0x1390   :  { %v1976_v29 = vmul.f32 0.03125, %v1974_v28 }
0x1391   :  { %v1971_v30 = vpop.xlane.xlu0 %1970 }
0x1392   :  { %v1978_v11 = vsub.f32 %v11666_v23, %v1976_v29  ;;  %v1975_v31 = vmul.f32 0.03125, %v1971_v30 }
0x1394   :  { %v1977_v14 = vsub.f32 %v11669_v25, %v1975_v31  ;;  %v1980_v32 = vmul.f32 %v1978_v11, %v1978_v11 }
0x1396   :  { %v1984_v33 = vsel %vm586_vm2, %v1980_v32, 0.0  ;;  %v1979_v34 = vmul.f32 %v1977_v14, %v1977_v14 }
0x1397   :  { %1985 = vadd.xlane.f32.xlu1 %v1984_v33 }
0x1398   :  { %v1981_v35 = vsel %vm582_vm1, %v1979_v34, 0.0 }
0x1399   :  { %1982 = vadd.xlane.f32.xlu0 %v1981_v35 }
0x1420   :  { %v1986_v41 = vpop.xlane.xlu1 %1985 }
0x1421   :  { %v1988_v43 = vmul.f32 0.03125, %v1986_v41 }
0x1422   :  { %v1983_v44 = vpop.xlane.xlu0 %1982 }
0x1423   :  { %v1990_v46 = vadd.f32 1e-05, %v1988_v43  ;;  %v1987_v47 = vmul.f32 0.03125, %v1983_v44 }
0x1425   :  { %10192 = vrsqrt.f32 %v1990_v46  ;;  %v1989_v48 = vadd.f32 1e-05, %v1987_v47 }
0x1427   :  { %10194 = vrsqrt.f32 %v1989_v48  ;;  %v11751_v48 = vld [vmem:[%s13381_s29 + $0x8] sm:$0x3] }
0x1432   :  { %v10193_v36 = vpop.eup %10192 }
0x1433   :  { %v1994_v50 = vmul.f32 %v10193_v36, %v1978_v11 }
0x1434   :  { %v10195_v51 = vpop.eup %10194 }
0x1435   :  { %v1993_v52 = vmul.f32 %v10195_v51, %v1977_v14  ;;  %v2002_v53 = vmul.f32 %v8506_v49, %v1994_v50  ;;  %v11756_v50 = vld [vmem:[%s13381_s29] sm:$0xff]  ;;  %s13394_s29 = sld [smem:[#allocation62_spill]] }
0x1437   :  { %v2001_v55 = vmul.f32 %v8506_v49, %v1993_v52  ;;  %v2010_v57 = vadd.f32 %v8507_v54, %v2002_v53 }
0x1439   :  { %v2009_v56 = vadd.f32 %v8507_v54, %v2001_v55 }
0x143b   :  { %9355 = vmatprep.mubr.msk.f32.mxu0 %vm582_vm1, %v2009_v56 }
0x143c   :  { %9356 = vmatmul.mubr.msk.f32.vlgmr.msra.gmra.mxu0 %vm582_vm1, %v2010_v57 }
0x14fc   :  { %v9357_v59 = vpop.f32.mrf.mxu0 }
0x14fd   :  { %v11688_v60 = vadd.f32 %v9357_v59, %v8508_v58 }
0x14fe   :  { %v2094_v62 = vpop.f32.mrf.mxu0 }
0x14ff   :  { %v11690_v63 = vadd.f32 %v8508_v58, %v2094_v62  ;;  %2107 = vrot.lane.b32.xlu0 %v11688_v60, %s11018_s6 }
0x1501   :  { %2105 = vrot.lane.b32.xlu1 %v11690_v63, %s11018_s6  ;;  %9362 = vmatprep.mubr.msk.f32.mxu0 %vm771_vm3, %v11690_v63 }
0x1571   :  { %v2108_v1 = vpop.permute.xlu0 %2107 }
0x1572   :  { %9358 = vmatprep.subr.msk.mxu0 %vm771_vm3, %v2108_v1 }
0x1573   :  { %9359 = vmatpush3.xpose.msk.msra.mxu0 %vm771_vm3, %v2108_v1  ;;  %v2106_v3 = vpop.permute.xlu1 %2105 }
0x1574   :  { %9360 = vmatprep.subr.msk.mxu0 %vm771_vm3, %v2106_v3 }
0x1577   :  { %9361 = vmatpush3.xpose.msk.msra.mxu0 %vm771_vm3, %v2106_v3 }
0x157a   :  { %9363 = vmatmul.mubr.msk.f32.vlgmr.msra.gmra.mxu0 %vm771_vm3, %v11688_v60 }
0x163a   :  { %v9364_v4 = vpop.f32.mrf.mxu0 }
0x163b   :  { %v2193_v5 = vmul.f32 0.35355338, %v9364_v4 }
0x163c   :  { %v2183_v6 = vpop.f32.mrf.mxu0 }
0x163d   :  { %v2192_v7 = vmul.f32 0.35355338, %v2183_v6  ;;  %v2195_v8 = vadd.f32 %v2193_v5, %v11491_v42 }
0x163f   :  { %v2199_v13 = vsel %vm863_vm4, %v2195_v8, -inf  ;;  %v2194_v9 = vadd.f32 %v2192_v7, %v11494_v45 }
0x1640   :  { %2200 = vmax.xlane.f32.xlu0 %v2199_v13 }
0x1641   :  { %v2196_v10 = vsel %vm859_vm5, %v2194_v9, -inf }
0x1642   :  { %2197 = vmax.xlane.f32.xlu1 %v2196_v10 }
0x1653   :  { %2218 = vrot.lane.b32.xlu1 %v11690_v63, %s11019_s15 }
0x1656   :  { %2220 = vrot.lane.b32.xlu0 %v11688_v60, %s11019_s15 }
0x1657   :  { %2312 = vrot.lane.b32.xlu1 %v11688_v60, %s11020_s4 }
0x165b   :  { %2310 = vrot.lane.b32.xlu1 %v11690_v63, %s11020_s4 }
0x16c9   :  { %v2201_v42 = vpop.xlane.xlu0 %2200 }
0x16ca   :  { %v2203_v12 = vsub.f32 %v2195_v8, %v2201_v42 }
0x16cb   :  { %v2198_v15 = vpop.xlane.xlu1 %2197 }
0x16cc   :  { %v2206_v45 = vmul.f32 1.442695, %v2203_v12  ;;  %v2202_v16 = vsub.f32 %v2194_v9, %v2198_v15 }
0x16cd   :  { %v2221_v17 = vpop.permute.xlu0 %2220 }
0x16ce   :  { %10196 = vpow2.f32 %v2206_v45  ;;  %v2204_v2 = vmul.f32 1.442695, %v2202_v16  ;;  %9365 = vmatprep.subr.msk.mxu0 %vm894_vm6, %v2221_v17 }
0x16cf   :  { %9366 = vmatpush3.msk.msra.mxu0 %vm894_vm6, %v2221_v17  ;;  %v2219_v18 = vpop.permute.xlu1 %2218 }
0x16d0   :  { %10198 = vpow2.f32 %v2204_v2  ;;  %9367 = vmatprep.subr.mxu0 %v2219_v18 }
0x16d1   :  { %9368 = vmatpush3.msra.mxu0 %v2219_v18 }
0x16d3   :  { %v2313_v19 = vpop.permute.xlu1 %2312 }
0x16d4   :  { %9372 = vmatprep.subr.msk.mxu0 %vm771_vm3, %v2313_v19 }
0x16d7   :  { %v2311_v24 = vpop.permute.xlu1 %2310 }
0x16db   :  { %v10197_v20 = vpop.eup %10196 }
0x16dc   :  { %v2211_v61 = vsel %vm863_vm4, %v10197_v20, 0.0 }
0x16dd   :  { %v10199_v21 = vpop.eup %10198  ;;  %2212 = vadd.xlane.f32.xlu1 %v2211_v61 }
0x16de   :  { %v2208_v22 = vsel %vm859_vm5, %v10199_v21, 0.0 }
0x16df   :  { %2209 = vadd.xlane.f32.xlu0 %v2208_v22 }
0x16ee   :  { %2306 = vrot.lane.b32.xlu1 %v11690_v63, %s11021_s14 }
0x16f2   :  { %2515 = vrot.lane.b32.xlu1 %v11690_v63, %s11023_s16 }
0x16f5   :  { %2517 = vrot.lane.b32.xlu0 %v11688_v60, %s11023_s16 }
0x16f6   :  { %2513 = vrot.lane.b32.xlu1 %v11688_v60, %s11024_s12 }
0x16f9   :  { %2308 = vrot.lane.b32.xlu0 %v11688_v60, %s11021_s14 }
0x16fd   :  { %2511 = vrot.lane.b32.xlu0 %v11690_v63, %s11024_s12 }
0x1766   :  { %v2213_v26 = vpop.xlane.xlu1 %2212 }
0x1767   :  { %10200 = vrcp.f32 %v2213_v26 }
0x1768   :  { %v2210_v27 = vpop.xlane.xlu0 %2209 }
0x1769   :  { %10202 = vrcp.f32 %v2210_v27 }
0x176a   :  { %v2307_v28 = vpop.permute.xlu1 %2306 }
0x176c   :  { %v2518_v29 = vpop.permute.xlu0 %2517 }
0x176d   :  { %9386 = vmatprep.subr.msk.mxu1 %vm771_vm3, %v2518_v29 }
0x176e   :  { %9387 = vmatpush3.xpose.msk.msra.mxu1 %vm771_vm3, %v2518_v29  ;;  %v2516_v30 = vpop.permute.xlu1 %2515 }
0x176f   :  { %9388 = vmatprep.subr.msk.mxu1 %vm771_vm3, %v2516_v30 }
0x1770   :  { %v2309_v11 = vpop.permute.xlu0 %2308 }
0x1772   :  { %9389 = vmatpush3.xpose.msk.msra.mxu1 %vm771_vm3, %v2516_v30  ;;  %v2514_v32 = vpop.permute.xlu1 %2513 }
0x1774   :  { %v2512_v31 = vpop.permute.xlu0 %2511  ;;  %v10201_v14 = vpop.eup %10200 }
0x1775   :  { %9390 = vmatprep.mubr.msk.f32.mxu1 %vm771_vm3, %v2512_v31  ;;  %v2217_v35 = vmul.f32 %v10201_v14, %v10197_v20 }
0x1776   :  { %v10203_v33 = vpop.eup %10202  ;;  %9391 = vmatmul.mubr.msk.f32.vlgmr.msra.gmra.mxu1 %vm771_vm3, %v2514_v32 }
0x1777   :  { %v2215_v34 = vmul.f32 %v10203_v33, %v10199_v21 }
0x1779   :  { %9369 = vmatprep.mubr.msk.f32.mxu0 %vm859_vm5, %v2215_v34 }
0x177a   :  { %9370 = vmatmul.mubr.msk.f32.vlgmr.msra.gmra.mxu0 %vm859_vm5, %v2217_v35 }
0x177b   :  { %9373 = vmatpush3.xpose.msk.msra.mxu0 %vm771_vm3, %v2313_v19  ;;  %9376 = vmatprep.mubr.msk.f32.mxu0 %vm771_vm3, %v2307_v28 }
0x177c   :  { %9374 = vmatprep.subr.msk.mxu0 %vm771_vm3, %v2311_v24 }
0x177f   :  { %9375 = vmatpush3.xpose.msk.msra.mxu0 %vm771_vm3, %v2311_v24 }
0x1782   :  { %9377 = vmatmul.mubr.msk.f32.vlgmr.msra.gmra.mxu0 %vm771_vm3, %v2309_v11 }
0x1836   :  { %v9392_v39 = vpop.f32.mrf.mxu1 }
0x1837   :  { %v2603_v52 = vmul.f32 0.35355338, %v9392_v39 }
0x1838   :  { %v2593_v40 = vpop.f32.mrf.mxu1 }
0x1839   :  { %v2602_v46 = vmul.f32 0.35355338, %v2593_v40  ;;  %v2605_v56 = vadd.f32 %v11751_v48, %v2603_v52 }
0x183a   :  { %v11746_v37 = vpop.f32.mrf.mxu0 }
0x183b   :  { %v2604_v54 = vadd.f32 %v11756_v50, %v2602_v46  ;;  %v2609_v57 = vsel %vm863_vm4, %v2605_v56, -inf }
0x183c   :  { %v11748_v38 = vpop.f32.mrf.mxu0 }
0x183d   :  { %v2606_v55 = vsel %vm859_vm5, %v2604_v54, -inf }
0x1842   :  { %v9378_v41 = vpop.f32.mrf.mxu0 }
0x1843   :  { %v2398_v43 = vmul.f32 0.35355338, %v9378_v41 }
0x1844   :  { %v2388_v44 = vpop.f32.mrf.mxu0 }
0x1845   :  { %v2397_v47 = vmul.f32 0.35355338, %v2388_v44  ;;  %v2400_v36 = vadd.f32 %v11751_v48, %v2398_v43 }
0x1847   :  { %v2404_v49 = vsel %vm863_vm4, %v2400_v36, -inf  ;;  %v2399_v51 = vadd.f32 %v11756_v50, %v2397_v47 }
0x1848   :  { %2405 = vmax.xlane.f32.xlu1 %v2404_v49 }
0x1849   :  { %v2401_v53 = vsel %vm859_vm5, %v2399_v51, -inf }
0x184a   :  { %2402 = vmax.xlane.f32.xlu0 %v2401_v53 }
0x184e   :  { %2607 = vmax.xlane.f32.xlu0 %v2606_v55 }
0x1852   :  { %2610 = vmax.xlane.f32.xlu0 %v2609_v57 }
0x18d1   :  { %v2406_v62 = vpop.xlane.xlu1 %2405 }
0x18d2   :  { %v2408_v4 = vsub.f32 %v2400_v36, %v2406_v62 }
0x18d3   :  { %v2403_v58 = vpop.xlane.xlu0 %2402 }
0x18d4   :  { %v2407_v59 = vsub.f32 %v2399_v51, %v2403_v58  ;;  %v2411_v13 = vmul.f32 1.442695, %v2408_v4 }
0x18d6   :  { %v2409_v5 = vmul.f32 1.442695, %v2407_v59 }
0x18d7   :  { %v2608_v1 = vpop.xlane.xlu0 %2607 }
0x18d8   :  { %v2612_v3 = vsub.f32 %v2604_v54, %v2608_v1 }
0x18da   :  { %v2614_v6 = vmul.f32 1.442695, %v2612_v3 }
0x18db   :  { %v2611_v7 = vpop.xlane.xlu0 %2610 }
0x18dc   :  { %10204 = vpow2.f32 %v2614_v6  ;;  %v2613_v8 = vsub.f32 %v2605_v56, %v2611_v7 }
0x18dd   :  { %10206 = vpow2.f32 %v2409_v5 }
0x18de   :  { %v2616_v9 = vmul.f32 1.442695, %v2613_v8 }
0x18e0   :  { %10208 = vpow2.f32 %v2616_v9  ;;  %v2954_v9 = vld [vmem:[%s13394_s29 + $0x18] sm:$0xff] }
0x18e1   :  { %10210 = vpow2.f32 %v2411_v13 }
0x18e9   :  { %v10205_v10 = vpop.eup %10204 }
0x18ea   :  { %v2618_v42 = vsel %vm859_vm5, %v10205_v10, 0.0  ;;  %v10207_v12 = vpop.eup %10206 }
0x18eb   :  { %2619 = vadd.xlane.f32.xlu0 %v2618_v42  ;;  %v2413_v45 = vsel %vm859_vm5, %v10207_v12, 0.0  ;;  %v2952_v42 = vld [vmem:[%s13394_s29 + $0x8] sm:$0xff] }
0x18ed   :  { %v10209_v15 = vpop.eup %10208 }
0x18ee   :  { %v2621_v16 = vsel %vm863_vm4, %v10209_v15, 0.0  ;;  %v10211_v17 = vpop.eup %10210 }
0x18ef   :  { %2414 = vadd.xlane.f32.xlu0 %v2413_v45  ;;  %2622 = vadd.xlane.f32.xlu1 %v2621_v16  ;;  %v2416_v2 = vsel %vm863_vm4, %v10211_v17, 0.0 }
0x18f3   :  { %2417 = vadd.xlane.f32.xlu1 %v2416_v2 }
0x1904   :  { %2423 = vrot.lane.b32.xlu1 %v11690_v63, %s11022_s20 }
0x1905   :  { %2425 = vrot.lane.b32.xlu0 %v11688_v60, %s11022_s20 }
0x1908   :  { %2630 = vrot.lane.b32.xlu1 %v11688_v60, %s11025_s18 }
0x1909   :  { %2722 = vrot.lane.b32.xlu0 %v11688_v60, %s11026_s8 }
0x190c   :  { %2628 = vrot.lane.b32.xlu1 %v11690_v63, %s11025_s18 }
0x190d   :  { %2716 = vrot.lane.b32.xlu0 %v11690_v63, %s11027_s22 }
0x1910   :  { %2720 = vrot.lane.b32.xlu1 %v11690_v63, %s11026_s8 }
0x1914   :  { %2718 = vrot.lane.b32.xlu1 %v11688_v60, %s11027_s22 }
0x1974   :  { %v2620_v18 = vpop.xlane.xlu0 %2619 }
0x1978   :  { %v2415_v19 = vpop.xlane.xlu0 %2414  ;;  %v2623_v20 = vpop.xlane.xlu1 %2622 }
0x1979   :  { %10212 = vrcp.f32 %v2415_v19 }
0x197a   :  { %10214 = vrcp.f32 %v2620_v18 }
0x197c   :  { %v2426_v61 = vpop.permute.xlu0 %2425  ;;  %v2418_v21 = vpop.xlane.xlu1 %2417 }
0x197d   :  { %10216 = vrcp.f32 %v2418_v21  ;;  %9379 = vmatprep.subr.msk.mxu0 %vm894_vm6, %v2426_v61 }
0x197e   :  { %9380 = vmatpush3.msk.msra.mxu0 %vm894_vm6, %v2426_v61  ;;  %10218 = vrcp.f32 %v2623_v20 }
0x1980   :  { %v2424_v22 = vpop.permute.xlu1 %2423  ;;  %v2723_v30 = vpop.permute.xlu0 %2722 }
0x1981   :  { %9381 = vmatprep.subr.mxu0 %v2424_v22 }
0x1982   :  { %9382 = vmatpush3.msra.mxu0 %v2424_v22 }
0x1984   :  { %v2631_v24 = vpop.permute.xlu1 %2630  ;;  %v2717_v34 = vpop.permute.xlu0 %2716 }
0x1985   :  { %9393 = vmatprep.subr.msk.mxu0 %vm894_vm6, %v2631_v24 }
0x1986   :  { %v10213_v26 = vpop.eup %10212 }
0x1987   :  { %v2420_v27 = vmul.f32 %v10213_v26, %v10207_v12  ;;  %v10215_v28 = vpop.eup %10214  ;;  %v2951_v12 = vld [vmem:[%s13394_s29] sm:$0xff] }
0x1988   :  { %v2629_v14 = vpop.permute.xlu1 %2628  ;;  %v2625_v32 = vmul.f32 %v10215_v28, %v10205_v10  ;;  %v2953_v10 = vld [vmem:[%s13394_s29 + $0x10] sm:$0xff]  ;;  %s13407_s29 = sld [smem:[#allocation77_spill]] }
0x1989   :  { %9383 = vmatprep.mubr.msk.f32.mxu0 %vm859_vm5, %v2420_v27 }
0x198a   :  { %v10217_v29 = vpop.eup %10216 }
0x198b   :  { %v2422_v11 = vmul.f32 %v10217_v29, %v10211_v17  ;;  %v10219_v31 = vpop.eup %10218  ;;  %v8541_v29 = vld [vmem:[%s13395_s25] ss:$0 sm:$0xff]  ;;  %s13408_s25 = sld [smem:[#allocation70_spill]] }
0x198c   :  { %v2627_v33 = vmul.f32 %v10219_v31, %v10209_v15  ;;  %v2721_v35 = vpop.permute.xlu1 %2720 }
0x198d   :  { %9384 = vmatmul.mubr.msk.f32.vlgmr.msra.gmra.mxu0 %vm859_vm5, %v2422_v11 }
0x198e   :  { %9394 = vmatpush3.msk.msra.mxu0 %vm894_vm6, %v2631_v24  ;;  %9397 = vmatprep.mubr.msk.f32.mxu0 %vm859_vm5, %v2625_v32 }
0x198f   :  { %9395 = vmatprep.subr.mxu0 %v2629_v14 }
0x1990   :  { %9396 = vmatpush3.msra.mxu0 %v2629_v14  ;;  %v2719_v39 = vpop.permute.xlu1 %2718 }
0x1991   :  { %9400 = vmatprep.subr.msk.mxu0 %vm771_vm3, %v2723_v30  ;;  %9398 = vmatmul.mubr.msk.f32.vlgmr.msra.gmra.mxu0 %vm859_vm5, %v2627_v33 }
0x1992   :  { %9401 = vmatpush3.xpose.msk.msra.mxu0 %vm771_vm3, %v2723_v30  ;;  %9404 = vmatprep.mubr.msk.f32.mxu0 %vm771_vm3, %v2717_v34 }
0x1993   :  { %9402 = vmatprep.subr.msk.mxu0 %vm771_vm3, %v2721_v35 }
0x1996   :  { %9403 = vmatpush3.xpose.msk.msra.mxu0 %vm771_vm3, %v2721_v35 }
0x1999   :  { %9405 = vmatmul.mubr.msk.f32.vlgmr.msra.gmra.mxu0 %vm771_vm3, %v2719_v39 }
0x1a4d   :  { %v9385_v40 = vpop.f32.mrf.mxu0 }
0x1a4f   :  { %v2502_v41 = vpop.f32.mrf.mxu0 }
0x1a51   :  { %v9399_v43 = vpop.f32.mrf.mxu0 }
0x1a53   :  { %v2707_v44 = vpop.f32.mrf.mxu0 }
0x1a59   :  { %v9406_v46 = vpop.f32.mrf.mxu0 }
0x1a5a   :  { %v2808_v47 = vmul.f32 0.35355338, %v9406_v46  ;;  %v3094_v46 = vld [vmem:[%s13396_s26 + $0x18] sm:$0xff] }
0x1a5b   :  { %v2798_v36 = vpop.f32.mrf.mxu0  ;;  %9425 = vmatprep.subr.mxu0 %v3094_v46 }
0x1a5c   :  { %v2807_v49 = vmul.f32 0.35355338, %v2798_v36  ;;  %v2810_v51 = vadd.f32 %v11751_v48, %v2808_v47  ;;  %v3093_v47 = vld [vmem:[%s13396_s26 + $0x10] sm:$0xff]  ;;  %9426 = vmatpush3.msra.mxu0 %v3094_v46  ;;  %v3092_v36 = vld [vmem:[%s13396_s26 + $0x8] sm:$0xff] }
0x1a5d   :  { %9427 = vmatprep.subr.mxu0 %v3093_v47 }
0x1a5e   :  { %v2814_v52 = vsel %vm863_vm4, %v2810_v51, -inf  ;;  %v2809_v53 = vadd.f32 %v11756_v50, %v2807_v49  ;;  %9428 = vmatpush3.msra.mxu0 %v3093_v47  ;;  %v3091_v49 = vld [vmem:[%s13396_s26] sm:$0xff]  ;;  %s13409_s26 = sld [smem:[#allocation71_spill]] }
0x1a5f   :  { %2815 = vmax.xlane.f32.xlu1 %v2814_v52  ;;  %9429 = vmatprep.subr.mxu0 %v3092_v36 }
0x1a60   :  { %v2811_v54 = vsel %vm859_vm5, %v2809_v53, -inf  ;;  %9430 = vmatpush3.msra.mxu0 %v3092_v36 }
0x1a61   :  { %2812 = vmax.xlane.f32.xlu0 %v2811_v54  ;;  %9431 = vmatprep.subr.mxu0 %v3091_v49 }
0x1a62   :  { %9432 = vmatpush3.msra.mxu0 %v3091_v49 }
0x1a63   :  { %9471 = vmatprep.subr.mxu0 %v11017_v0 }
0x1a70   :  { %2833 = vrot.lane.b32.xlu1 %v11690_v63, %s11028_s17 }
0x1a74   :  { %2923 = vrot.lane.b32.xlu1 %v2502_v41, %s11029_s3 }
0x1a78   :  { %2925 = vrot.lane.b32.xlu1 %v9385_v40, %s11029_s3 }
0x1a7c   :  { %2933 = vrot.lane.b32.xlu1 %v9399_v43, %s11030_s23 }
0x1ae8   :  { %v2816_v55 = vpop.xlane.xlu1 %2815 }
0x1ae9   :  { %v2818_v56 = vsub.f32 %v2810_v51, %v2816_v55 }
0x1aea   :  { %v2813_v48 = vpop.xlane.xlu0 %2812 }
0x1aeb   :  { %v2821_v57 = vmul.f32 1.442695, %v2818_v56  ;;  %v2817_v58 = vsub.f32 %v2809_v53, %v2813_v48 }
0x1aec   :  { %v2834_v6 = vpop.permute.xlu1 %2833 }
0x1aed   :  { %10220 = vpow2.f32 %v2821_v57  ;;  %v2819_v50 = vmul.f32 1.442695, %v2817_v58  ;;  %v8542_v57 = vld [vmem:[%s13397_s19] ss:$0 sm:$0xff]  ;;  %s13410_s19 = sld [smem:[#allocation79_spill]] }
0x1aef   :  { %10222 = vpow2.f32 %v2819_v50  ;;  %v8543_v50 = vld [vmem:[%s13398_s28] ss:$0 sm:$0xff]  ;;  %s13411_s28 = sld [smem:[#allocation80_spill]] }
0x1af0   :  { %v2924_v16 = vpop.permute.xlu1 %2923 }
0x1af1   :  { %v2945_v19 = vsel %vm771_vm3, %v11748_v38, %v2924_v16  ;;  %v3202_v16 = vld [vmem:[%s13399_s27 + $0x18] sm:$0xff] }
0x1af4   :  { %v2926_v17 = vpop.permute.xlu1 %2925 }
0x1af5   :  { %v2946_v61 = vsel %vm771_vm3, %v11746_v37, %v2926_v17  ;;  %v3201_v17 = vld [vmem:[%s13399_s27 + $0x10] sm:$0xff] }
0x1af8   :  { %v2934_v2 = vpop.permute.xlu1 %2933 }
0x1af9   :  { %v2948_v24 = vsel %vm1613_vm7, %v2946_v61, %v2934_v2  ;;  %v3200_v2 = vld [vmem:[%s13399_s27 + $0x8] sm:$0xff] }
0x1afa   :  { %v10221_v59 = vpop.eup %10220 }
0x1afb   :  { %v2826_v62 = vsel %vm863_vm4, %v10221_v59, 0.0 }
0x1afc   :  { %v10223_v1 = vpop.eup %10222  ;;  %2827 = vadd.xlane.f32.xlu0 %v2826_v62 }
0x1afd   :  { %v2823_v63 = vsel %vm859_vm5, %v10223_v1, 0.0 }
0x1b00   :  { %2824 = vadd.xlane.f32.xlu0 %v2823_v63 }
0x1b16   :  { %2835 = vrot.lane.b32.xlu0 %v11688_v60, %s11028_s17 }
0x1b1a   :  { %2931 = vrot.lane.b32.xlu0 %v2707_v44, %s11030_s23 }
0x1b85   :  { %v2828_v3 = vpop.xlane.xlu0 %2827 }
0x1b86   :  { %10224 = vrcp.f32 %v2828_v3 }
0x1b89   :  { %v2825_v4 = vpop.xlane.xlu0 %2824 }
0x1b8a   :  { %10226 = vrcp.f32 %v2825_v4 }
0x1b8d   :  { %v2836_v5 = vpop.permute.xlu0 %2835 }
0x1b8e   :  { %9407 = vmatprep.subr.msk.mxu1 %vm894_vm6, %v2836_v5 }
0x1b8f   :  { %9408 = vmatpush3.msk.msra.mxu1 %vm894_vm6, %v2836_v5  ;;  %v3214_v5 = vld [vmem:[%s13399_s27 + $0x78] sm:$0xff] }
0x1b90   :  { %9409 = vmatprep.subr.mxu1 %v2834_v6 }
0x1b91   :  { %9410 = vmatpush3.msra.mxu1 %v2834_v6  ;;  %v2932_v18 = vpop.permute.xlu0 %2931  ;;  %v3213_v6 = vld [vmem:[%s13399_s27 + $0x70] sm:$0xff] }
0x1b92   :  { %9414 = vmatprep.subr.mxu1 %v2954_v9  ;;  %v2947_v21 = vsel %vm1613_vm7, %v2945_v19, %v2932_v18  ;;  %v3199_v18 = vld [vmem:[%s13399_s27] sm:$0xff] }
0x1b93   :  { %v10225_v7 = vpop.eup %10224  ;;  %v8544_v19 = vld [vmem:[%s13400_s30] ss:$0 sm:$0xff]  ;;  %s13413_s30 = sld [smem:[#allocation82_spill]] }
0x1b94   :  { %v2832_v13 = vmul.f32 %v10225_v7, %v10221_v59  ;;  %v3212_v7 = vld [vmem:[%s13399_s27 + $0x68] sm:$0xff] }
0x1b97   :  { %v10227_v60 = vpop.eup %10226 }
0x1b98   :  { %v2830_v8 = vmul.f32 %v10227_v60, %v10223_v1  ;;  %v3211_v60 = vld [vmem:[%s13399_s27 + $0x60] sm:$0xff] }
0x1b9a   :  { %9411 = vmatprep.mubr.msk.f32.mxu1 %vm859_vm5, %v2830_v8  ;;  %v3210_v8 = vld [vmem:[%s13399_s27 + $0x58] sm:$0xff] }
0x1b9b   :  { %9412 = vmatmul.mubr.msk.f32.vlgmr.msra.gmra.mxu1 %vm859_vm5, %v2832_v13  ;;  %v3209_v13 = vld [vmem:[%s13399_s27 + $0x50] sm:$0xff] }
0x1b9c   :  { %9415 = vmatpush3.msra.mxu1 %v2954_v9  ;;  %v3208_v9 = vld [vmem:[%s13399_s27 + $0x48] sm:$0xff] }
0x1b9d   :  { %9416 = vmatprep.subr.mxu1 %v2953_v10 }
0x1b9e   :  { %9417 = vmatpush3.msra.mxu1 %v2953_v10  ;;  %v3207_v10 = vld [vmem:[%s13399_s27 + $0x40] sm:$0xff] }
0x1b9f   :  { %9418 = vmatprep.subr.mxu1 %v2952_v42 }
0x1ba0   :  { %9419 = vmatpush3.msra.mxu1 %v2952_v42  ;;  %v3206_v42 = vld [vmem:[%s13399_s27 + $0x38] sm:$0xff] }
0x1ba1   :  { %9420 = vmatprep.subr.mxu1 %v2951_v12 }
0x1ba2   :  { %9421 = vmatpush3.msra.mxu1 %v2951_v12  ;;  %v3205_v12 = vld [vmem:[%s13399_s27 + $0x30] sm:$0xff] }
0x1ba3   :  { %9436 = vmatprep.subr.mxu1 %v3214_v5 }
0x1c5b   :  { %v9413_v15 = vpop.f32.mrf.mxu1 }
0x1c5c   :  { %2941 = vrot.lane.b32.xlu1 %v9413_v15, %s11031_s0  ;;  %v3204_v15 = vld [vmem:[%s13399_s27 + $0x28] sm:$0xff] }
0x1c5d   :  { %v2912_v45 = vpop.f32.mrf.mxu1 }
0x1c5e   :  { %2939 = vrot.lane.b32.xlu0 %v2912_v45, %s11031_s0  ;;  %v3203_v45 = vld [vmem:[%s13399_s27 + $0x20] sm:$0xff]  ;;  %s13412_s27 = sld [smem:[#allocation81_spill]] }
0x1cce   :  { %v2942_v20 = vpop.permute.xlu1 %2941 }
0x1ccf   :  { %v2950_v27 = vsel %vm1616_vm8, %v2948_v24, %v2942_v20 }
0x1cd0   :  { %v2940_v22 = vpop.permute.xlu0 %2939 }
0x1cd1   :  { %v2949_v26 = vsel %vm1616_vm8, %v2947_v21, %v2940_v22 }
0x1cd2   :  { %9422 = vmatprep.mubr.msk.f32.mxu1 %vm582_vm1, %v2949_v26 }
0x1cd3   :  { %9423 = vmatmul.mubr.msk.f32.vlgmr.msra.gmra.mxu1 %vm582_vm1, %v2950_v27 }
0x1cd4   :  { %9437 = vmatpush3.msra.mxu1 %v3214_v5 }
0x1cd5   :  { %9438 = vmatprep.subr.mxu1 %v3213_v6 }
0x1cd6   :  { %9439 = vmatpush3.msra.mxu1 %v3213_v6 }
0x1cd7   :  { %9440 = vmatprep.subr.mxu1 %v3212_v7 }
0x1cd8   :  { %9441 = vmatpush3.msra.mxu1 %v3212_v7 }
0x1cd9   :  { %9442 = vmatprep.subr.mxu1 %v3211_v60 }
0x1cda   :  { %9443 = vmatpush3.msra.mxu1 %v3211_v60  ;;  %v3487_v60 = vld [vmem:[%s13401_s1 + $0x28] sm:$0xff] }
0x1cdb   :  { %9444 = vmatprep.subr.mxu1 %v3210_v8 }
0x1cdc   :  { %9445 = vmatpush3.msra.mxu1 %v3210_v8  ;;  %v3493_v8 = vld [vmem:[%s13402_s24 + $0x28] sm:$0xff] }
0x1cdd   :  { %9446 = vmatprep.subr.mxu1 %v3209_v13 }
0x1cde   :  { %9447 = vmatpush3.msra.mxu1 %v3209_v13 }
0x1cdf   :  { %9448 = vmatprep.subr.mxu1 %v3208_v9 }
0x1ce0   :  { %9449 = vmatpush3.msra.mxu1 %v3208_v9 }
0x1ce1   :  { %9450 = vmatprep.subr.mxu1 %v3207_v10 }
0x1ce2   :  { %9451 = vmatpush3.msra.mxu1 %v3207_v10 }
0x1ce3   :  { %9452 = vmatprep.subr.mxu1 %v3206_v42 }
0x1ce4   :  { %9453 = vmatpush3.msra.mxu1 %v3206_v42  ;;  %v11921_v42 = vadd.f32 %v3493_v8, %v3487_v60 }
0x1ce5   :  { %9454 = vmatprep.subr.mxu1 %v3205_v12 }
0x1ce6   :  { %9455 = vmatpush3.msra.mxu1 %v3205_v12 }
0x1ce7   :  { %9456 = vmatprep.subr.mxu1 %v3204_v15 }
0x1ce8   :  { %9457 = vmatpush3.msra.mxu1 %v3204_v15 }
0x1ce9   :  { %9458 = vmatprep.subr.mxu1 %v3203_v45 }
0x1cea   :  { %9459 = vmatpush3.msra.mxu1 %v3203_v45  ;;  %v3523_v45 = vsel %vm582_vm1, %v11921_v42, 0.0 }
0x1ceb   :  { %9460 = vmatprep.subr.mxu1 %v3202_v16 }
0x1cec   :  { %9461 = vmatpush3.msra.mxu1 %v3202_v16 }
0x1ced   :  { %9462 = vmatprep.subr.mxu1 %v3201_v17 }
0x1cee   :  { %9463 = vmatpush3.msra.mxu1 %v3201_v17 }
0x1cef   :  { %9464 = vmatprep.subr.mxu1 %v3200_v2 }
0x1cf0   :  { %9465 = vmatpush3.msra.mxu1 %v3200_v2 }
0x1cf1   :  { %9466 = vmatprep.subr.mxu1 %v3199_v18 }
0x1cf2   :  { %9467 = vmatpush3.msra.mxu1 %v3199_v18 }
0x1d93   :  { %v9424_v28 = vpop.f32.mrf.mxu1 }
0x1d94   :  { %v3037_v38 = vadd.f32 %v9424_v28, %v11666_v23 }
0x1d95   :  { %v3027_v30 = vpop.f32.mrf.mxu1 }
0x1d96   :  { %v11834_v11 = vadd.f32 %v8541_v29, %v3037_v38  ;;  %v3036_v37 = vadd.f32 %v3027_v30, %v11669_v25 }
0x1d98   :  { %v11837_v31 = vadd.f32 %v8541_v29, %v3036_v37  ;;  %v3052_v14 = vsel %vm586_vm2, %v11834_v11, 0.0 }
0x1d99   :  { %3053 = vadd.xlane.f32.xlu1 %v3052_v14 }
0x1d9a   :  { %v3049_v32 = vsel %vm582_vm1, %v11837_v31, 0.0 }
0x1d9b   :  { %3050 = vadd.xlane.f32.xlu0 %v3049_v32 }
0x1e22   :  { %v3054_v33 = vpop.xlane.xlu1 %3053 }
0x1e23   :  { %v3056_v23 = vmul.f32 0.03125, %v3054_v33 }
0x1e24   :  { %v3051_v34 = vpop.xlane.xlu0 %3050 }
0x1e25   :  { %v3055_v35 = vmul.f32 0.03125, %v3051_v34  ;;  %v3058_v39 = vsub.f32 %v11834_v11, %v3056_v23  ;;  %v3482_v34 = vld [vmem:[%s13401_s1] sm:$0xff] }
0x1e27   :  { %v3057_v25 = vsub.f32 %v11837_v31, %v3055_v35  ;;  %v3060_v43 = vmul.f32 %v3058_v39, %v3058_v39  ;;  %v3488_v35 = vld [vmem:[%s13402_s24] sm:$0xff] }
0x1e29   :  { %v3059_v40 = vmul.f32 %v3057_v25, %v3057_v25  ;;  %v3064_v44 = vsel %vm586_vm2, %v3060_v43, 0.0  ;;  %v3486_v43 = vld [vmem:[%s13401_s1 + $0x20] sm:$0xff] }
0x1e2b   :  { %v3061_v41 = vsel %vm582_vm1, %v3059_v40, 0.0  ;;  %v3490_v40 = vld [vmem:[%s13402_s24 + $0x10] sm:$0xff] }
0x1e2c   :  { %3062 = vadd.xlane.f32.xlu0 %v3061_v41 }
0x1e30   :  { %3065 = vadd.xlane.f32.xlu0 %v3064_v44  ;;  %v3492_v44 = vld [vmem:[%s13402_s24 + $0x20] sm:$0xff] }
0x1e31   :  { %v11889_v36 = vadd.f32 %v3492_v44, %v3486_v43 }
0x1e33   :  { %v3520_v49 = vsel %vm582_vm1, %v11889_v36, 0.0 }
0x1eb5   :  { %v3063_v51 = vpop.xlane.xlu0 %3062 }
0x1eb6   :  { %v3067_v52 = vmul.f32 0.03125, %v3063_v51  ;;  %v8549_v51 = vld [vmem:[%s13403_s2] ss:$0 sm:$0xff] }
0x1eb8   :  { %v3069_v53 = vadd.f32 1e-05, %v3067_v52 }
0x1eb9   :  { %v3066_v54 = vpop.xlane.xlu0 %3065 }
0x1eba   :  { %10228 = vrsqrt.f32 %v3069_v53  ;;  %v3068_v55 = vmul.f32 0.03125, %v3066_v54 }
0x1ebc   :  { %v3070_v56 = vadd.f32 1e-05, %v3068_v55 }
0x1ebe   :  { %10230 = vrsqrt.f32 %v3070_v56 }
0x1ec7   :  { %v10229_v48 = vpop.eup %10228 }
0x1ec8   :  { %v3073_v58 = vmul.f32 %v10229_v48, %v3057_v25  ;;  %v11878_v25 = vadd.f32 %v3488_v35, %v3482_v34 }
0x1eca   :  { %v3081_v59 = vmul.f32 %v8542_v57, %v3073_v58  ;;  %v3508_v46 = vsel %vm582_vm1, %v11878_v25, 0.0  ;;  %v3489_v58 = vld [vmem:[%s13402_s24 + $0x8] sm:$0xff] }
0x1ecb   :  { %v10231_v62 = vpop.eup %10230  ;;  %3509 = vadd.xlane.f32.xlu1 %v3508_v46 }
0x1ecc   :  { %v3074_v1 = vmul.f32 %v10231_v62, %v3058_v39  ;;  %v3089_v63 = vadd.f32 %v8543_v50, %v3081_v59  ;;  %v3484_v39 = vld [vmem:[%s13401_s1 + $0x10] sm:$0xff]  ;;  %v3485_v62 = vld [vmem:[%s13401_s1 + $0x18] sm:$0xff] }
0x1ecd   :  { %v11881_v41 = vadd.f32 %v3490_v40, %v3484_v39 }
0x1ece   :  { %v3082_v3 = vmul.f32 %v8542_v57, %v3074_v1  ;;  %9433 = vmatprep.mubr.msk.f32.mxu0 %vm582_vm1, %v3089_v63  ;;  %v3299_v57 = vld [vmem:[%s13404_s7] sm:$0x3]  ;;  %v3491_v1 = vld [vmem:[%s13402_s24 + $0x18] sm:$0xff] }
0x1ecf   :  { %v3514_v47 = vsel %vm582_vm1, %v11881_v41, 0.0  ;;  %v11912_v7 = vadd.f32 %v3491_v1, %v3485_v62 }
0x1ed0   :  { %v3090_v4 = vadd.f32 %v8543_v50, %v3082_v3  ;;  %3515 = vadd.xlane.f32.xlu1 %v3514_v47  ;;  %v3408_v47 = vld [vmem:[%s13405_s10 + $0x18] sm:$0xff] }
0x1ed1   :  { %v3517_v9 = vsel %vm582_vm1, %v11912_v7, 0.0 }
0x1ed2   :  { %9434 = vmatmul.mubr.msk.f32.vlgmr.msra.gmra.mxu0 %vm582_vm1, %v3090_v4 }
0x1ed3   :  { %9475 = vmatprep.mubr.msk.f32.mxu0 %vm11032_vm9, %v11017_v0 }
0x1ed4   :  { %3521 = vadd.xlane.f32.xlu1 %v3520_v49  ;;  %v3407_v49 = vld [vmem:[%s13405_s10 + $0x10] sm:$0xff] }
0x1f54   :  { %v3510_v50 = vpop.xlane.xlu1 %3509 }
0x1f55   :  { %v3526_v6 = vmul.f32 0.03125, %v3510_v50 }
0x1f57   :  { %v11917_v13 = vsub.f32 %v11878_v25, %v3526_v6 }
0x1f59   :  { %v3516_v4 = vpop.xlane.xlu1 %3515  ;;  %v3538_v17 = vmul.f32 %v11917_v13, %v11917_v13 }
0x1f5a   :  { %v3528_v10 = vmul.f32 0.03125, %v3516_v4 }
0x1f5b   :  { %v3544_v18 = vsel %vm582_vm1, %v3538_v17, 0.0  ;;  %v8555_v17 = vld [vmem:[%s13407_s29] ss:$0 sm:$0xff] }
0x1f5c   :  { %v11924_v15 = vsub.f32 %v11881_v41, %v3528_v10 }
0x1f5d   :  { %v3522_v12 = vpop.xlane.xlu1 %3521 }
0x1f5e   :  { %v3530_v16 = vmul.f32 0.03125, %v3522_v12 }
0x1f60   :  { %v11931_v2 = vsub.f32 %v11889_v36, %v3530_v16 }
0x1f92   :  { %v9435_v20 = vpop.f32.mrf.mxu0 }
0x1f93   :  { %v3180_v61 = vadd.f32 %v9435_v20, %v8544_v19 }
0x1f94   :  { %v3174_v21 = vpop.f32.mrf.mxu0 }
0x1f95   :  { %v8548_v22 = vmul.f32 -1.702, %v3180_v61  ;;  %v3175_v24 = vadd.f32 %v8544_v19, %v3174_v21  ;;  %v3540_v19 = vmul.f32 %v11924_v15, %v11924_v15 }
0x1f97   :  { %v3189_v26 = vmul.f32 1.442695, %v8548_v22  ;;  %v8547_v27 = vmul.f32 -1.702, %v3175_v24  ;;  %v3550_v20 = vsel %vm582_vm1, %v3540_v19, 0.0 }
0x1f98   :  { %v8552_v19 = vld [vmem:[%s13408_s25] ss:$0 sm:$0xff] }
0x1f99   :  { %10232 = vpow2.f32 %v3189_v26  ;;  %v3187_v28 = vmul.f32 1.442695, %v8547_v27 }
0x1f9b   :  { %10234 = vpow2.f32 %v3187_v28 }
0x1fa6   :  { %v10233_v29 = vpop.eup %10232 }
0x1fa7   :  { %v3192_v38 = vadd.f32 1.0, %v10233_v29 }
0x1fa8   :  { %v10235_v30 = vpop.eup %10234 }
0x1fa9   :  { %v3191_v37 = vadd.f32 1.0, %v10235_v30  ;;  %10236 = vrcp.f32 %v3192_v38 }
0x1fab   :  { %10238 = vrcp.f32 %v3191_v37 }
0x1fb6   :  { %v10237_v14 = vpop.eup %10236 }
0x1fb7   :  { %v3198_v23 = vmul.f32 %v10237_v14, %v3180_v61  ;;  %v3542_v61 = vmul.f32 %v11931_v2, %v11931_v2 }
0x1fb8   :  { %v10239_v32 = vpop.eup %10238 }
0x1fb9   :  { %v3197_v33 = vmul.f32 %v10239_v32, %v3175_v24  ;;  %v3556_v21 = vsel %vm582_vm1, %v3542_v61, 0.0  ;;  %v8553_v61 = vld [vmem:[%s13409_s26] ss:$0 sm:$0xff] }
0x1fbb   :  { %9468 = vmatprep.mubr.f32.mxu1 %v3197_v33 }
0x1fbc   :  { %9469 = vmatmul.mubr.f32.vlgmr.msra.gmra.mxu1 %v3198_v23 }
0x207c   :  { %v9470_v52 = vpop.f32.mrf.mxu1 }
0x207d   :  { %v3294_v53 = vadd.f32 %v9470_v52, %v8549_v51  ;;  %v3405_v52 = vld [vmem:[%s13405_s10] sm:$0xff] }
0x207e   :  { %v3288_v54 = vpop.f32.mrf.mxu1 }
0x207f   :  { %v3298_v55 = vadd.f32 %v3294_v53, %v11834_v11  ;;  %v3289_v56 = vadd.f32 %v8549_v51, %v3288_v54  ;;  %v3483_v11 = vld [vmem:[%s13401_s1 + $0x8] sm:$0xff]  ;;  %v3613_v53 = vld [vmem:[%s13406_s11 + $0x18] sm:$0xff] }
0x2080   :  { %v11905_v59 = vadd.f32 %v3489_v58, %v3483_v11  ;;  %v3406_v51 = vld [vmem:[%s13405_s10 + $0x8] sm:$0xff] }
0x2081   :  { %v3297_v48 = vadd.f32 %v3289_v56, %v11837_v31  ;;  %9472 = vmatpush3.msk.msra.mxu0 %vm894_vm6, %v3298_v55 }
0x2082   :  { %9473 = vmatprep.subr.mxu0 %v11017_v0  ;;  %v3511_v5 = vsel %vm582_vm1, %v11905_v59, 0.0 }
0x2083   :  { %9474 = vmatpush3.msra.mxu0 %v3297_v48 }
0x2084   :  { %9476 = vmatmul.mubr.msk.f32.vlgmr.msra.gmra.mxu0 %vm859_vm5, %v3299_v57  ;;  %9478 = vmatprep.subr.mxu0 %v11017_v0 }
0x2085   :  { %9486 = vmatprep.mubr.msk.f32.mxu0 %vm11032_vm9, %v11017_v0  ;;  %9479 = vmatpush3.msra.mxu0 %v3408_v47 }
0x2086   :  { %9480 = vmatprep.subr.mxu0 %v11017_v0 }
0x2087   :  { %9481 = vmatpush3.msra.mxu0 %v3407_v49 }
0x2088   :  { %9482 = vmatprep.subr.mxu0 %v11017_v0 }
0x2089   :  { %9483 = vmatpush3.msra.mxu0 %v3406_v51 }
0x208a   :  { %9484 = vmatprep.subr.mxu0 %v11017_v0 }
0x208b   :  { %9485 = vmatpush3.msra.mxu0 %v3405_v52 }
0x208c   :  { %9489 = vmatprep.subr.mxu0 %v3613_v53 }
0x2144   :  { %v3372_v31 = vpop.f32.mrf.mxu0 }
0x2145   :  { %v3378_v63 = vsel %vm586_vm2, %v3372_v31, 0.0 }
0x2146   :  { %3379 = vadd.xlane.f32.xlu0 %v3378_v63  ;;  %v9477_v3 = vpop.f32.mrf.mxu0 }
0x214a   :  { %3512 = vadd.xlane.f32.xlu0 %v3511_v5 }
0x214e   :  { %3518 = vadd.xlane.f32.xlu0 %v3517_v9 }
0x2152   :  { %3524 = vadd.xlane.f32.xlu0 %v3523_v45 }
0x2156   :  { %3545 = vadd.xlane.f32.xlu0 %v3544_v18 }
0x215a   :  { %3551 = vadd.xlane.f32.xlu0 %v3550_v20 }
0x215e   :  { %3557 = vadd.xlane.f32.xlu0 %v3556_v21 }
0x21cf   :  { %v3380_v22 = vpop.xlane.xlu0 %3379 }
0x21d0   :  { %v3381_v24 = vmul.f32 0.03125, %v3380_v22 }
0x21d2   :  { %v11940_v26 = vsub.f32 %v3372_v31, %v3381_v24 }
0x21d3   :  { %v3513_v27 = vpop.xlane.xlu0 %3512 }
0x21d4   :  { %v3527_v28 = vmul.f32 0.03125, %v3513_v27  ;;  %v3383_v29 = vmul.f32 %v11940_v26, %v11940_v26  ;;  %v8556_v27 = vld [vmem:[#allocation3] ss:$0 sm:$0xff] }
0x21d6   :  { %v11945_v38 = vsub.f32 %v11905_v59, %v3527_v28  ;;  %v3384_v30 = vsel %vm586_vm2, %v3383_v29, 0.0 }
0x21d7   :  { %3385 = vadd.xlane.f32.xlu1 %v3384_v30  ;;  %v3519_v37 = vpop.xlane.xlu0 %3518 }
0x21d8   :  { %v3529_v14 = vmul.f32 0.03125, %v3519_v37  ;;  %v3539_v32 = vmul.f32 %v11945_v38, %v11945_v38  ;;  %v3612_v37 = vld [vmem:[%s13406_s11 + $0x10] sm:$0xff] }
0x21da   :  { %v11951_v33 = vsub.f32 %v11912_v7, %v3529_v14  ;;  %v3547_v23 = vsel %vm582_vm1, %v3539_v32, 0.0 }
0x21db   :  { %3548 = vadd.xlane.f32.xlu1 %v3547_v23  ;;  %v3525_v34 = vpop.xlane.xlu0 %3524 }
0x21dc   :  { %v3531_v35 = vmul.f32 0.03125, %v3525_v34  ;;  %v3541_v39 = vmul.f32 %v11951_v33, %v11951_v33 }
0x21de   :  { %v11957_v40 = vsub.f32 %v11921_v42, %v3531_v35  ;;  %v3553_v43 = vsel %vm582_vm1, %v3541_v39, 0.0  ;;  %v3610_v39 = vld [vmem:[%s13406_s11] sm:$0xff] }
0x21df   :  { %3554 = vadd.xlane.f32.xlu1 %v3553_v43  ;;  %v3546_v54 = vpop.xlane.xlu0 %3545 }
0x21e0   :  { %v3543_v44 = vmul.f32 %v11957_v40, %v11957_v40  ;;  %v3562_v55 = vmul.f32 0.03125, %v3546_v54 }
0x21e2   :  { %v3559_v46 = vsel %vm582_vm1, %v3543_v44, 0.0  ;;  %v3568_v48 = vadd.f32 1e-05, %v3562_v55 }
0x21e3   :  { %3560 = vadd.xlane.f32.xlu1 %v3559_v46  ;;  %v3552_v56 = vpop.xlane.xlu0 %3551 }
0x21e4   :  { %10240 = vrsqrt.f32 %v3568_v48  ;;  %v3564_v57 = vmul.f32 0.03125, %v3552_v56  ;;  %v8557_v56 = vld [vmem:[#allocation6] ss:$0 sm:$0xff] }
0x21e6   :  { %v3570_v62 = vadd.f32 1e-05, %v3564_v57 }
0x21e7   :  { %v3558_v58 = vpop.xlane.xlu0 %3557 }
0x21e8   :  { %v3566_v1 = vmul.f32 0.03125, %v3558_v58 }
0x21ea   :  { %v3572_v5 = vadd.f32 1e-05, %v3566_v1 }
0x21f1   :  { %v10241_v10 = vpop.eup %10240 }
0x21f2   :  { %v3580_v16 = vmul.f32 %v10241_v10, %v11917_v13 }
0x21f4   :  { %v3592_v21 = vmul.f32 %v8555_v17, %v3580_v16 }
0x21f6   :  { %v3604_v14 = vadd.f32 %v8556_v27, %v3592_v21 }
0x2260   :  { %v3386_v11 = vpop.xlane.xlu1 %3385 }
0x2261   :  { %v3387_v50 = vmul.f32 0.03125, %v3386_v11 }
0x2263   :  { %v3388_v31 = vadd.f32 1e-05, %v3387_v50 }
0x2264   :  { %v3549_v63 = vpop.xlane.xlu1 %3548 }
0x2265   :  { %10242 = vrsqrt.f32 %v3388_v31  ;;  %v3563_v3 = vmul.f32 0.03125, %v3549_v63 }
0x2266   :  { %10244 = vrsqrt.f32 %v3570_v62 }
0x2267   :  { %v3569_v4 = vadd.f32 1e-05, %v3563_v3 }
0x2268   :  { %v3555_v6 = vpop.xlane.xlu1 %3554 }
0x2269   :  { %10246 = vrsqrt.f32 %v3569_v4  ;;  %v3565_v60 = vmul.f32 0.03125, %v3555_v6 }
0x226a   :  { %10248 = vrsqrt.f32 %v3572_v5 }
0x226b   :  { %v3571_v8 = vadd.f32 1e-05, %v3565_v60 }
0x226c   :  { %v3561_v9 = vpop.xlane.xlu1 %3560 }
0x226d   :  { %10250 = vrsqrt.f32 %v3571_v8  ;;  %v3567_v12 = vmul.f32 0.03125, %v3561_v9 }
0x226f   :  { %v3573_v45 = vadd.f32 1e-05, %v3567_v12 }
0x2271   :  { %10252 = vrsqrt.f32 %v3573_v45 }
0x2272   :  { %v10243_v18 = vpop.eup %10242 }
0x2273   :  { %v3390_v20 = vmul.f32 %v10243_v18, %v11940_v26  ;;  %v10245_v22 = vpop.eup %10244  ;;  %v3611_v26 = vld [vmem:[%s13406_s11 + $0x8] sm:$0xff] }
0x2274   :  { %v3582_v13 = vmul.f32 %v10245_v22, %v11924_v15 }
0x2275   :  { %v3397_v24 = vmul.f32 %v8552_v19, %v3390_v20 }
0x2276   :  { %v10247_v28 = vpop.eup %10246  ;;  %v3594_v43 = vmul.f32 %v8555_v17, %v3582_v13 }
0x2277   :  { %v3404_v29 = vadd.f32 %v8553_v61, %v3397_v24  ;;  %v3581_v30 = vmul.f32 %v10247_v28, %v11945_v38  ;;  %v10249_v32 = vpop.eup %10248  ;;  %v12062_v61 = vld [vmem:[%s11362_s21 + $0x8] sm:$0xff]  ;;  %v12065_v24 = vld [vmem:[%s11362_s21] sm:$0xff] }
0x2278   :  { %v3584_v38 = vmul.f32 %v10249_v32, %v11931_v2  ;;  %v3606_v49 = vadd.f32 %v8556_v27, %v3594_v43  ;;  %v12079_v43 = vld [vmem:[%s11362_s21 + $0x28] sm:$0xff] }
0x2279   :  { %9487 = vmatmul.mubr.msk.f32.vlgmr.msra.gmra.mxu0 %vm582_vm1, %v3404_v29  ;;  %v3593_v34 = vmul.f32 %v8555_v17, %v3581_v30  ;;  %v12069_v30 = vld [vmem:[%s11362_s21 + $0x18] sm:$0xff] }
0x227a   :  { %v10251_v23 = vpop.eup %10250  ;;  %9490 = vmatpush3.msra.mxu0 %v3613_v53  ;;  %9497 = vmatprep.mubr.msk.f32.mxu0 %vm582_vm1, %v3604_v14  ;;  %v3596_v51 = vmul.f32 %v8555_v17, %v3584_v38 }
0x227b   :  { %9491 = vmatprep.subr.mxu0 %v3612_v37  ;;  %v3583_v35 = vmul.f32 %v10251_v23, %v11951_v33  ;;  %v3605_v15 = vadd.f32 %v8556_v27, %v3593_v34 }
0x227c   :  { %9492 = vmatpush3.msra.mxu0 %v3612_v37  ;;  %v3608_v53 = vadd.f32 %v8556_v27, %v3596_v51 }
0x227d   :  { %9493 = vmatprep.subr.mxu0 %v3611_v26  ;;  %v3595_v46 = vmul.f32 %v8555_v17, %v3583_v35 }
0x227e   :  { %v10253_v44 = vpop.eup %10252  ;;  %9494 = vmatpush3.msra.mxu0 %v3611_v26 }
0x227f   :  { %9495 = vmatprep.subr.mxu0 %v3610_v39  ;;  %v3585_v47 = vmul.f32 %v10253_v44, %v11957_v40  ;;  %v3607_v33 = vadd.f32 %v8556_v27, %v3595_v46 }
0x2280   :  { %9496 = vmatpush3.msra.mxu0 %v3610_v39  ;;  %v12076_v39 = vld [vmem:[%s11362_s21 + $0x10] sm:$0xff] }
0x2281   :  { %9498 = vmatmul.mubr.msk.f32.vlgmr.msra.gmra.mxu0 %vm582_vm1, %v3605_v15  ;;  %v3597_v52 = vmul.f32 %v8555_v17, %v3585_v47 }
0x2282   :  { %9500 = vmatprep.mubr.msk.f32.mxu0 %vm582_vm1, %v3606_v49 }
0x2283   :  { %v3609_v2 = vadd.f32 %v8556_v27, %v3597_v52 }
0x2285   :  { %9501 = vmatmul.mubr.msk.f32.gmra.mxu0 %vm582_vm1, %v3607_v33  ;;  %v12085_v33 = vld [vmem:[%s11362_s21 + $0x20] sm:$0xff] }
0x2286   :  { %9503 = vmatprep.mubr.msk.f32.mxu0 %vm582_vm1, %v3608_v53 }
0x2289   :  { %9504 = vmatmul.mubr.msk.f32.gmra.mxu0 %vm582_vm1, %v3609_v2 }
0x2339   :  { %v11991_v54 = vpop.f32.mrf.mxu0 }
0x233b   :  { %v9488_v40 = vpop.f32.mrf.mxu0 }
0x2341   :  { %v9499_v55 = vpop.f32.mrf.mxu0 }
0x2342   :  { %v12003_v63 = vadd.f32 %v9499_v55, %v8557_v56 }
0x2343   :  { %v3705_v48 = vpop.f32.mrf.mxu0 }
0x2344   :  { %v11993_v57 = vadd.f32 %v8557_v56, %v3705_v48 }
0x2345   :  { %v9502_v11 = vpop.f32.mrf.mxu0 }
0x2346   :  { %9518 = vmatprep.mubr.msk.f32.mxu0 %vm771_vm3, %v11993_v57  ;;  %v12007_v3 = vadd.f32 %v9502_v11, %v8557_v56 }
0x2347   :  { %v3715_v58 = vpop.f32.mrf.mxu0 }
0x2348   :  { %v12013_v4 = vadd.f32 %v8557_v56, %v3715_v58 }
0x2349   :  { %v9505_v50 = vpop.f32.mrf.mxu0 }
0x234a   :  { %v11997_v31 = vadd.f32 %v9505_v50, %v8557_v56 }
0x234b   :  { %v3725_v62 = vpop.f32.mrf.mxu0 }
0x234c   :  { %v11999_v1 = vadd.f32 %v8557_v56, %v3725_v62  ;;  %3750 = vrot.lane.b32.xlu0 %v11997_v31, %s11018_s6 }
0x234e   :  { %3748 = vrot.lane.b32.xlu1 %v11999_v1, %s11018_s6 }
0x2350   :  { %3742 = vrot.lane.b32.xlu0 %v12003_v63, %s11018_s6 }
0x2352   :  { %3746 = vrot.lane.b32.xlu1 %v12007_v3, %s11018_s6 }
0x2354   :  { %3960 = vrot.lane.b32.xlu0 %v11997_v31, %s11019_s15 }
0x2356   :  { %3744 = vrot.lane.b32.xlu1 %v12013_v4, %s11018_s6 }
0x2358   :  { %3956 = vrot.lane.b32.xlu0 %v12007_v3, %s11019_s15 }
0x235a   :  { %3740 = vrot.lane.b32.xlu1 %v11993_v57, %s11018_s6 }
0x235c   :  { %4103 = vrot.lane.b32.xlu0 %v11997_v31, %s11020_s4 }
0x235e   :  { %3954 = vrot.lane.b32.xlu1 %v12013_v4, %s11019_s15 }
0x2362   :  { %3952 = vrot.lane.b32.xlu1 %v12003_v63, %s11019_s15 }
0x2366   :  { %3950 = vrot.lane.b32.xlu1 %v11993_v57, %s11019_s15 }
0x236a   :  { %3958 = vrot.lane.b32.xlu1 %v11999_v1, %s11019_s15 }
0x236e   :  { %4101 = vrot.lane.b32.xlu1 %v11999_v1, %s11020_s4 }
0x23be   :  { %v3751_v5 = vpop.permute.xlu0 %3750 }
0x23bf   :  { %9506 = vmatprep.subr.msk.mxu0 %vm771_vm3, %v3751_v5 }
0x23c0   :  { %9507 = vmatpush3.xpose.msk.msra.mxu0 %vm771_vm3, %v3751_v5  ;;  %v3749_v6 = vpop.permute.xlu1 %3748 }
0x23c1   :  { %9508 = vmatprep.subr.msk.mxu0 %vm771_vm3, %v3749_v6 }
0x23c2   :  { %v3743_v60 = vpop.permute.xlu0 %3742 }
0x23c4   :  { %9509 = vmatpush3.xpose.msk.msra.mxu0 %vm771_vm3, %v3749_v6  ;;  %v3747_v8 = vpop.permute.xlu1 %3746 }
0x23c5   :  { %9510 = vmatprep.subr.msk.mxu0 %vm771_vm3, %v3747_v8 }
0x23c6   :  { %v3961_v9 = vpop.permute.xlu0 %3960 }
0x23c7   :  { %9527 = vmatprep.subr.mxu1 %v3961_v9 }
0x23c8   :  { %9511 = vmatpush3.xpose.msk.msra.mxu0 %vm771_vm3, %v3747_v8  ;;  %9528 = vmatpush3.msra.mxu1 %v3961_v9  ;;  %v3745_v10 = vpop.permute.xlu1 %3744 }
0x23c9   :  { %9512 = vmatprep.subr.msk.mxu0 %vm771_vm3, %v3745_v10 }
0x23ca   :  { %v3957_v19 = vpop.permute.xlu0 %3956 }
0x23cc   :  { %9513 = vmatpush3.xpose.msk.msra.mxu0 %vm771_vm3, %v3745_v10  ;;  %v3741_v12 = vpop.permute.xlu1 %3740 }
0x23cd   :  { %9514 = vmatprep.subr.msk.mxu0 %vm771_vm3, %v3743_v60 }
0x23ce   :  { %v12057_v20 = vpop.permute.xlu0 %4103 }
0x23d0   :  { %9515 = vmatpush3.xpose.msk.msra.mxu0 %vm771_vm3, %v3743_v60  ;;  %v3955_v45 = vpop.permute.xlu1 %3954 }
0x23d1   :  { %9516 = vmatprep.subr.msk.mxu0 %vm771_vm3, %v3741_v12 }
0x23d4   :  { %9517 = vmatpush3.xpose.msk.msra.mxu0 %vm771_vm3, %v3741_v12  ;;  %v3953_v16 = vpop.permute.xlu1 %3952 }
0x23d7   :  { %9519 = vmatmul.mubr.msk.f32.vlgmr.msra.gmra.mxu0 %vm771_vm3, %v12003_v63 }
0x23d8   :  { %v3951_v17 = vpop.permute.xlu1 %3950  ;;  %9521 = vmatprep.mubr.msk.f32.mxu0 %vm771_vm3, %v12013_v4 }
0x23db   :  { %9522 = vmatmul.mubr.msk.f32.gmra.mxu0 %vm771_vm3, %v12007_v3 }
0x23dc   :  { %v3959_v18 = vpop.permute.xlu1 %3958  ;;  %9524 = vmatprep.mubr.msk.f32.mxu0 %vm771_vm3, %v11999_v1 }
0x23dd   :  { %9529 = vmatprep.subr.mxu1 %v3959_v18 }
0x23de   :  { %9530 = vmatpush3.msra.mxu1 %v3959_v18 }
0x23df   :  { %9525 = vmatmul.mubr.msk.f32.gmra.mxu0 %vm771_vm3, %v11997_v31  ;;  %9531 = vmatprep.subr.mxu1 %v3957_v19 }
0x23e0   :  { %9532 = vmatpush3.msra.mxu1 %v3957_v19  ;;  %v12095_v55 = vpop.permute.xlu1 %4101 }
0x23e1   :  { %9533 = vmatprep.subr.mxu1 %v3955_v45 }
0x23e2   :  { %9534 = vmatpush3.msra.mxu1 %v3955_v45 }
0x23e3   :  { %9535 = vmatprep.subr.mxu1 %v3953_v16 }
0x23e4   :  { %9536 = vmatpush3.msra.mxu1 %v3953_v16 }
0x23e5   :  { %9537 = vmatprep.subr.mxu1 %v3951_v17 }
0x23e6   :  { %9538 = vmatpush3.msra.mxu1 %v3951_v17 }
0x23e7   :  { %9548 = vmatprep.subr.msk.mxu1 %vm771_vm3, %v12057_v20 }
0x2497   :  { %v9520_v21 = vpop.f32.mrf.mxu0 }
0x2498   :  { %v3872_v22 = vmul.f32 0.35355338, %v9520_v21 }
0x2499   :  { %v3842_v27 = vpop.f32.mrf.mxu0 }
0x249a   :  { %v3878_v28 = vadd.f32 %v3872_v22, %v12062_v61  ;;  %v3871_v29 = vmul.f32 0.35355338, %v3842_v27 }
0x249b   :  { %v9523_v37 = vpop.f32.mrf.mxu0 }
0x249c   :  { %v3877_v14 = vadd.f32 %v3871_v29, %v12065_v24  ;;  %v3874_v13 = vmul.f32 0.35355338, %v9523_v37  ;;  %v3887_v32 = vsel %vm3883_vm10, %v3878_v28, -inf }
0x249d   :  { %3888 = vmax.xlane.f32.xlu1 %v3887_v32  ;;  %v3852_v23 = vpop.f32.mrf.mxu0 }
0x249e   :  { %v3880_v26 = vadd.f32 %v3874_v13, %v12069_v30  ;;  %v3873_v34 = vmul.f32 0.35355338, %v3852_v23  ;;  %v3884_v35 = vsel %vm3883_vm10, %v3877_v14, -inf }
0x249f   :  { %3885 = vmax.xlane.f32.xlu0 %v3884_v35  ;;  %v9526_v38 = vpop.f32.mrf.mxu0 }
0x24a0   :  { %v3876_v44 = vmul.f32 0.35355338, %v9526_v38  ;;  %v3879_v46 = vadd.f32 %v3873_v34, %v12076_v39  ;;  %v3893_v51 = vsel %vm3883_vm10, %v3880_v26, -inf }
0x24a1   :  { %v3862_v15 = vpop.f32.mrf.mxu0 }
0x24a2   :  { %v3882_v47 = vadd.f32 %v3876_v44, %v12079_v43  ;;  %v3875_v49 = vmul.f32 0.35355338, %v3862_v15  ;;  %v3890_v2 = vsel %vm3883_vm10, %v3879_v46, -inf }
0x24a3   :  { %3894 = vmax.xlane.f32.xlu0 %v3893_v51 }
0x24a4   :  { %v3899_v52 = vsel %vm3883_vm10, %v3882_v47, -inf  ;;  %v3881_v53 = vadd.f32 %v3875_v49, %v12085_v33 }
0x24a5   :  { %3900 = vmax.xlane.f32.xlu1 %v3899_v52 }
0x24a6   :  { %v3896_v40 = vsel %vm3883_vm10, %v3881_v53, -inf }
0x24a7   :  { %3891 = vmax.xlane.f32.xlu0 %v3890_v2 }
0x24ab   :  { %3897 = vmax.xlane.f32.xlu0 %v3896_v40 }
0x24b6   :  { %4097 = vrot.lane.b32.xlu1 %v12013_v4, %s11020_s4 }
0x24c1   :  { %4099 = vrot.lane.b32.xlu0 %v12007_v3, %s11020_s4 }
0x2526   :  { %v3889_v56 = vpop.xlane.xlu1 %3888 }
0x2527   :  { %v3903_v48 = vsub.f32 %v3878_v28, %v3889_v56 }
0x2528   :  { %v3886_v11 = vpop.xlane.xlu0 %3885 }
0x2529   :  { %v3910_v58 = vmul.f32 1.442695, %v3903_v48  ;;  %v3902_v50 = vsub.f32 %v3877_v14, %v3886_v11 }
0x252b   :  { %10254 = vpow2.f32 %v3910_v58  ;;  %v3908_v62 = vmul.f32 1.442695, %v3902_v50 }
0x252c   :  { %v3895_v5 = vpop.xlane.xlu0 %3894 }
0x252d   :  { %10256 = vpow2.f32 %v3908_v62  ;;  %v3905_v6 = vsub.f32 %v3880_v26, %v3895_v5 }
0x252e   :  { %v3901_v29 = vpop.xlane.xlu1 %3900 }
0x252f   :  { %v3914_v60 = vmul.f32 1.442695, %v3905_v6  ;;  %v3907_v37 = vsub.f32 %v3882_v47, %v3901_v29 }
0x2530   :  { %v3892_v8 = vpop.xlane.xlu0 %3891 }
0x2531   :  { %10258 = vpow2.f32 %v3914_v60  ;;  %v3904_v9 = vsub.f32 %v3879_v46, %v3892_v8  ;;  %v3918_v13 = vmul.f32 1.442695, %v3907_v37 }
0x2532   :  { %v4098_v35 = vpop.permute.xlu1 %4097 }
0x2533   :  { %v3912_v10 = vmul.f32 1.442695, %v3904_v9 }
0x2534   :  { %v3898_v27 = vpop.xlane.xlu0 %3897 }
0x2535   :  { %10260 = vpow2.f32 %v3912_v10  ;;  %v3906_v28 = vsub.f32 %v3881_v53, %v3898_v27 }
0x2537   :  { %v3916_v14 = vmul.f32 1.442695, %v3906_v28 }
0x2538   :  { %v10255_v12 = vpop.eup %10254  ;;  %v4100_v38 = vpop.permute.xlu0 %4099 }
0x2539   :  { %v3923_v45 = vsel %vm3883_vm10, %v10255_v12, 0.0  ;;  %10262 = vpow2.f32 %v3916_v14 }
0x253a   :  { %v10257_v16 = vpop.eup %10256  ;;  %3924 = vadd.xlane.f32.xlu1 %v3923_v45  ;;  %10264 = vpow2.f32 %v3918_v13 }
0x253b   :  { %v3920_v17 = vsel %vm3883_vm10, %v10257_v16, 0.0 }
0x253c   :  { %3921 = vadd.xlane.f32.xlu0 %v3920_v17 }
0x253e   :  { %v10259_v18 = vpop.eup %10258 }
0x253f   :  { %v3929_v19 = vsel %vm3883_vm10, %v10259_v18, 0.0 }
0x2540   :  { %3930 = vadd.xlane.f32.xlu1 %v3929_v19 }
0x2542   :  { %v10261_v21 = vpop.eup %10260 }
0x2543   :  { %v3926_v22 = vsel %vm3883_vm10, %v10261_v21, 0.0 }
0x2544   :  { %3927 = vadd.xlane.f32.xlu0 %v3926_v22 }
0x2546   :  { %v12105_v32 = vpop.eup %10262 }
0x2547   :  { %v3932_v23 = vsel %vm3883_vm10, %v12105_v32, 0.0  ;;  %v12109_v26 = vpop.eup %10264 }
0x2548   :  { %v3935_v34 = vsel %vm3883_vm10, %v12109_v26, 0.0 }
0x2551   :  { %4093 = vrot.lane.b32.xlu1 %v11993_v57, %s11020_s4 }
0x255a   :  { %4095 = vrot.lane.b32.xlu0 %v12003_v63, %s11020_s4 }
0x2575   :  { %3933 = vadd.xlane.f32.xlu1 %v3932_v23 }
0x2579   :  { %3936 = vadd.xlane.f32.xlu0 %v3935_v34 }
0x2586   :  { %4083 = vrot.lane.b32.xlu1 %v12003_v63, %s11021_s14 }
0x258a   :  { %4087 = vrot.lane.b32.xlu1 %v12007_v3, %s11021_s14 }
0x258e   :  { %4091 = vrot.lane.b32.xlu1 %v11997_v31, %s11021_s14 }
0x258f   :  { %4081 = vrot.lane.b32.xlu0 %v11993_v57, %s11021_s14 }
0x2592   :  { %4310 = vrot.lane.b32.xlu1 %v11999_v1, %s11022_s20 }
0x2593   :  { %4085 = vrot.lane.b32.xlu0 %v12013_v4, %s11021_s14 }
0x2596   :  { %4306 = vrot.lane.b32.xlu1 %v12013_v4, %s11022_s20 }
0x2597   :  { %4089 = vrot.lane.b32.xlu0 %v11999_v1, %s11021_s14 }
0x259a   :  { %4304 = vrot.lane.b32.xlu1 %v12003_v63, %s11022_s20 }
0x259b   :  { %4312 = vrot.lane.b32.xlu0 %v11997_v31, %s11022_s20 }
0x259e   :  { %4302 = vrot.lane.b32.xlu1 %v11993_v57, %s11022_s20 }
0x259f   :  { %4308 = vrot.lane.b32.xlu0 %v12007_v3, %s11022_s20 }
0x25a2   :  { %4453 = vrot.lane.b32.xlu1 %v11999_v1, %s11023_s16 }
0x25a3   :  { %4455 = vrot.lane.b32.xlu0 %v11997_v31, %s11023_s16 }
0x25c3   :  { %v3925_v44 = vpop.xlane.xlu1 %3924 }
0x25c4   :  { %10266 = vrcp.f32 %v3925_v44 }
0x25c5   :  { %v3922_v15 = vpop.xlane.xlu0 %3921 }
0x25c6   :  { %10268 = vrcp.f32 %v3922_v15 }
0x25c9   :  { %v3931_v46 = vpop.xlane.xlu1 %3930 }
0x25ca   :  { %10270 = vrcp.f32 %v3931_v46 }
0x25cd   :  { %v3928_v47 = vpop.xlane.xlu0 %3927  ;;  %v4094_v11 = vpop.permute.xlu1 %4093 }
0x25ce   :  { %10272 = vrcp.f32 %v3928_v47 }
0x25d1   :  { %v10267_v49 = vpop.eup %10266 }
0x25d2   :  { %v3941_v53 = vmul.f32 %v10267_v49, %v10255_v12 }
0x25d3   :  { %v10269_v51 = vpop.eup %10268 }
0x25d4   :  { %v3939_v52 = vmul.f32 %v10269_v51, %v10257_v16 }
0x25d6   :  { %9539 = vmatprep.mubr.msk.f32.mxu1 %vm3883_vm10, %v3939_v52 }
0x25d7   :  { %9540 = vmatmul.mubr.msk.f32.vlgmr.msra.gmra.mxu1 %vm3883_vm10, %v3941_v53  ;;  %v10271_v2 = vpop.eup %10270 }
0x25d8   :  { %9549 = vmatpush3.xpose.msk.msra.mxu1 %vm771_vm3, %v12057_v20  ;;  %v3945_v48 = vmul.f32 %v10271_v2, %v10259_v18  ;;  %v4096_v20 = vpop.permute.xlu0 %4095 }
0x25d9   :  { %9550 = vmatprep.subr.msk.mxu1 %vm771_vm3, %v12095_v55 }
0x25db   :  { %v10273_v40 = vpop.eup %10272 }
0x25dc   :  { %9551 = vmatpush3.xpose.msk.msra.mxu1 %vm771_vm3, %v12095_v55  ;;  %v3943_v56 = vmul.f32 %v10273_v40, %v10261_v21 }
0x25dd   :  { %9552 = vmatprep.subr.msk.mxu1 %vm771_vm3, %v4100_v38 }
0x25de   :  { %9542 = vmatprep.mubr.msk.f32.mxu1 %vm3883_vm10, %v3943_v56 }
0x25df   :  { %9543 = vmatmul.mubr.msk.f32.gmra.mxu1 %vm3883_vm10, %v3945_v48 }
0x25e0   :  { %9553 = vmatpush3.xpose.msk.msra.mxu1 %vm771_vm3, %v4100_v38 }
0x25e1   :  { %9554 = vmatprep.subr.msk.mxu1 %vm771_vm3, %v4098_v35 }
0x25e4   :  { %9555 = vmatpush3.xpose.msk.msra.mxu1 %vm771_vm3, %v4098_v35 }
0x25e5   :  { %9556 = vmatprep.subr.msk.mxu1 %vm771_vm3, %v4096_v20 }
0x25e8   :  { %9557 = vmatpush3.xpose.msk.msra.mxu1 %vm771_vm3, %v4096_v20 }
0x25e9   :  { %9558 = vmatprep.subr.msk.mxu1 %vm771_vm3, %v4094_v11 }
0x25ec   :  { %9559 = vmatpush3.xpose.msk.msra.mxu1 %vm771_vm3, %v4094_v11 }
0x25fe   :  { %v3934_v55 = vpop.xlane.xlu1 %3933 }
0x25ff   :  { %10274 = vrcp.f32 %v3934_v55 }
0x2602   :  { %v4084_v58 = vpop.permute.xlu1 %4083  ;;  %v3937_v50 = vpop.xlane.xlu0 %3936 }
0x2603   :  { %10276 = vrcp.f32 %v3937_v50 }
0x2606   :  { %v4088_v62 = vpop.permute.xlu1 %4087  ;;  %v4082_v5 = vpop.permute.xlu0 %4081 }
0x260a   :  { %v4092_v6 = vpop.permute.xlu1 %4091  ;;  %v4086_v60 = vpop.permute.xlu0 %4085 }
0x260c   :  { %v10275_v8 = vpop.eup %10274 }
0x260d   :  { %v3947_v9 = vmul.f32 %v10275_v8, %v12105_v32 }
0x260e   :  { %v4311_v10 = vpop.permute.xlu1 %4310  ;;  %v4090_v12 = vpop.permute.xlu0 %4089 }
0x260f   :  { %9545 = vmatprep.mubr.msk.f32.mxu1 %vm3883_vm10, %v3947_v9 }
0x2610   :  { %v10277_v45 = vpop.eup %10276 }
0x2611   :  { %v3949_v16 = vmul.f32 %v10277_v45, %v12109_v26 }
0x2612   :  { %v4307_v17 = vpop.permute.xlu1 %4306  ;;  %v4313_v18 = vpop.permute.xlu0 %4312 }
0x2613   :  { %9546 = vmatmul.mubr.msk.f32.gmra.mxu1 %vm3883_vm10, %v3949_v16  ;;  %9569 = vmatprep.subr.mxu0 %v4313_v18 }
0x2614   :  { %9560 = vmatprep.mubr.msk.f32.mxu1 %vm771_vm3, %v4082_v5  ;;  %9570 = vmatpush3.msra.mxu0 %v4313_v18 }
0x2615   :  { %9571 = vmatprep.subr.mxu0 %v4311_v10 }
0x2616   :  { %v4305_v19 = vpop.permute.xlu1 %4304  ;;  %9572 = vmatpush3.msra.mxu0 %v4311_v10  ;;  %v4309_v21 = vpop.permute.xlu0 %4308 }
0x2617   :  { %9561 = vmatmul.mubr.msk.f32.vlgmr.msra.gmra.mxu1 %vm771_vm3, %v4084_v58  ;;  %9573 = vmatprep.subr.mxu0 %v4309_v21 }
0x2618   :  { %9563 = vmatprep.mubr.msk.f32.mxu1 %vm771_vm3, %v4086_v60  ;;  %9574 = vmatpush3.msra.mxu0 %v4309_v21 }
0x2619   :  { %9575 = vmatprep.subr.mxu0 %v4307_v17 }
0x261a   :  { %9576 = vmatpush3.msra.mxu0 %v4307_v17  ;;  %v4303_v22 = vpop.permute.xlu1 %4302  ;;  %v12168_v27 = vpop.permute.xlu0 %4455 }
0x261b   :  { %9564 = vmatmul.mubr.msk.f32.gmra.mxu1 %vm771_vm3, %v4088_v62  ;;  %9577 = vmatprep.subr.mxu0 %v4305_v19 }
0x261c   :  { %9566 = vmatprep.mubr.msk.f32.mxu1 %vm771_vm3, %v4090_v12  ;;  %9578 = vmatpush3.msra.mxu0 %v4305_v19 }
0x261d   :  { %9579 = vmatprep.subr.mxu0 %v4303_v22 }
0x261e   :  { %9580 = vmatpush3.msra.mxu0 %v4303_v22 }
0x261f   :  { %9567 = vmatmul.mubr.msk.f32.gmra.mxu1 %vm771_vm3, %v4092_v6  ;;  %9590 = vmatprep.subr.msk.mxu0 %vm771_vm3, %v12168_v27  ;;  %v12201_v6 = vpop.permute.xlu1 %4453 }
0x2697   :  { %v12173_v28 = vpop.f32.mrf.mxu1 }
0x2699   :  { %v12175_v29 = vpop.f32.mrf.mxu1 }
0x269f   :  { %v12177_v37 = vpop.f32.mrf.mxu1 }
0x26a1   :  { %v12179_v14 = vpop.f32.mrf.mxu1 }
0x26d3   :  { %v12181_v13 = vpop.f32.mrf.mxu1 }
0x26d5   :  { %v12183_v32 = vpop.f32.mrf.mxu1 }
0x26d7   :  { %v9562_v23 = vpop.f32.mrf.mxu1 }
0x26d8   :  { %v4225_v26 = vmul.f32 0.35355338, %v9562_v23 }
0x26d9   :  { %v4195_v34 = vpop.f32.mrf.mxu1 }
0x26da   :  { %v4231_v35 = vadd.f32 %v4225_v26, %v12062_v61  ;;  %v4224_v38 = vmul.f32 0.35355338, %v4195_v34 }
0x26db   :  { %v9565_v44 = vpop.f32.mrf.mxu1 }
0x26dc   :  { %v4230_v15 = vadd.f32 %v4224_v38, %v12065_v24  ;;  %v4227_v46 = vmul.f32 0.35355338, %v9565_v44  ;;  %v4239_v47 = vsel %vm3883_vm10, %v4231_v35, -inf }
0x26dd   :  { %4240 = vmax.xlane.f32.xlu1 %v4239_v47  ;;  %v4205_v49 = vpop.f32.mrf.mxu1 }
0x26de   :  { %v4233_v51 = vadd.f32 %v4227_v46, %v12069_v30  ;;  %v4226_v52 = vmul.f32 0.35355338, %v4205_v49  ;;  %v4236_v53 = vsel %vm3883_vm10, %v4230_v15, -inf }
0x26df   :  { %4237 = vmax.xlane.f32.xlu0 %v4236_v53  ;;  %v9568_v2 = vpop.f32.mrf.mxu1 }
0x26e0   :  { %v4229_v40 = vmul.f32 0.35355338, %v9568_v2  ;;  %v4232_v48 = vadd.f32 %v4226_v52, %v12076_v39  ;;  %v4245_v55 = vsel %vm3883_vm10, %v4233_v51, -inf }
0x26e1   :  { %v4215_v56 = vpop.f32.mrf.mxu1 }
0x26e2   :  { %v4235_v20 = vadd.f32 %v4229_v40, %v12079_v43  ;;  %v4228_v11 = vmul.f32 0.35355338, %v4215_v56  ;;  %v4242_v62 = vsel %vm3883_vm10, %v4232_v48, -inf }
0x26e3   :  { %4246 = vmax.xlane.f32.xlu0 %v4245_v55 }
0x26e4   :  { %v4251_v58 = vsel %vm3883_vm10, %v4235_v20, -inf  ;;  %v4234_v50 = vadd.f32 %v4228_v11, %v12085_v33 }
0x26e5   :  { %4252 = vmax.xlane.f32.xlu1 %v4251_v58 }
0x26e6   :  { %v4248_v5 = vsel %vm3883_vm10, %v4234_v50, -inf }
0x26e7   :  { %4243 = vmax.xlane.f32.xlu0 %v4242_v62 }
0x26eb   :  { %4249 = vmax.xlane.f32.xlu0 %v4248_v5 }
0x26f6   :  { %4449 = vrot.lane.b32.xlu1 %v12013_v4, %s11023_s16 }
0x2701   :  { %4451 = vrot.lane.b32.xlu0 %v12007_v3, %s11023_s16 }
0x2766   :  { %v4241_v60 = vpop.xlane.xlu1 %4240 }
0x2767   :  { %v4255_v8 = vsub.f32 %v4231_v35, %v4241_v60 }
0x2768   :  { %v4238_v9 = vpop.xlane.xlu0 %4237 }
0x2769   :  { %v4262_v10 = vmul.f32 1.442695, %v4255_v8  ;;  %v4254_v12 = vsub.f32 %v4230_v15, %v4238_v9 }
0x276b   :  { %10278 = vpow2.f32 %v4262_v10  ;;  %v4260_v45 = vmul.f32 1.442695, %v4254_v12 }
0x276c   :  { %v4247_v16 = vpop.xlane.xlu0 %4246 }
0x276d   :  { %10280 = vpow2.f32 %v4260_v45  ;;  %v4257_v17 = vsub.f32 %v4233_v51, %v4247_v16 }
0x276e   :  { %v4253_v51 = vpop.xlane.xlu1 %4252 }
0x276f   :  { %v4266_v18 = vmul.f32 1.442695, %v4257_v17  ;;  %v4259_v52 = vsub.f32 %v4235_v20, %v4253_v51 }
0x2770   :  { %v4244_v19 = vpop.xlane.xlu0 %4243 }
0x2771   :  { %10282 = vpow2.f32 %v4266_v18  ;;  %v4256_v21 = vsub.f32 %v4232_v48, %v4244_v19  ;;  %v4270_v2 = vmul.f32 1.442695, %v4259_v52 }
0x2772   :  { %v4450_v20 = vpop.permute.xlu1 %4449 }
0x2773   :  { %v4264_v22 = vmul.f32 1.442695, %v4256_v21 }
0x2774   :  { %v4250_v47 = vpop.xlane.xlu0 %4249 }
0x2775   :  { %10284 = vpow2.f32 %v4264_v22  ;;  %v4258_v49 = vsub.f32 %v4234_v50, %v4250_v47 }
0x2777   :  { %v4268_v53 = vmul.f32 1.442695, %v4258_v49 }
0x2778   :  { %v10279_v23 = vpop.eup %10278  ;;  %v4452_v55 = vpop.permute.xlu0 %4451 }
0x2779   :  { %v4275_v26 = vsel %vm3883_vm10, %v10279_v23, 0.0  ;;  %10286 = vpow2.f32 %v4268_v53 }
0x277a   :  { %v10281_v34 = vpop.eup %10280  ;;  %4276 = vadd.xlane.f32.xlu1 %v4275_v26  ;;  %10288 = vpow2.f32 %v4270_v2 }
0x277b   :  { %v4272_v35 = vsel %vm3883_vm10, %v10281_v34, 0.0 }
0x277c   :  { %4273 = vadd.xlane.f32.xlu0 %v4272_v35 }
0x277e   :  { %v10283_v38 = vpop.eup %10282 }
0x277f   :  { %v4281_v44 = vsel %vm3883_vm10, %v10283_v38, 0.0 }
0x2780   :  { %4282 = vadd.xlane.f32.xlu1 %v4281_v44 }
0x2782   :  { %v10285_v15 = vpop.eup %10284 }
0x2783   :  { %v4278_v46 = vsel %vm3883_vm10, %v10285_v15, 0.0 }
0x2784   :  { %4279 = vadd.xlane.f32.xlu0 %v4278_v46 }
0x2786   :  { %v12211_v40 = vpop.eup %10286 }
0x2787   :  { %v4284_v56 = vsel %vm3883_vm10, %v12211_v40, 0.0  ;;  %v12215_v48 = vpop.eup %10288 }
0x2788   :  { %v4287_v11 = vsel %vm3883_vm10, %v12215_v48, 0.0 }
0x2791   :  { %4445 = vrot.lane.b32.xlu1 %v11993_v57, %s11023_s16 }
0x279a   :  { %4447 = vrot.lane.b32.xlu0 %v12003_v63, %s11023_s16 }
0x27b5   :  { %4285 = vadd.xlane.f32.xlu1 %v4284_v56 }
0x27b9   :  { %4288 = vadd.xlane.f32.xlu0 %v4287_v11 }
0x27c6   :  { %4435 = vrot.lane.b32.xlu1 %v12003_v63, %s11024_s12 }
0x27ca   :  { %4439 = vrot.lane.b32.xlu1 %v12007_v3, %s11024_s12 }
0x27ce   :  { %4443 = vrot.lane.b32.xlu1 %v11997_v31, %s11024_s12 }
0x27cf   :  { %4433 = vrot.lane.b32.xlu0 %v11993_v57, %s11024_s12 }
0x27d2   :  { %4662 = vrot.lane.b32.xlu1 %v11999_v1, %s11025_s18 }
0x27d3   :  { %4437 = vrot.lane.b32.xlu0 %v12013_v4, %s11024_s12 }
0x27d6   :  { %4658 = vrot.lane.b32.xlu1 %v12013_v4, %s11025_s18 }
0x27d7   :  { %4441 = vrot.lane.b32.xlu0 %v11999_v1, %s11024_s12 }
0x27da   :  { %4656 = vrot.lane.b32.xlu1 %v12003_v63, %s11025_s18 }
0x27db   :  { %4664 = vrot.lane.b32.xlu0 %v11997_v31, %s11025_s18 }
0x27de   :  { %4654 = vrot.lane.b32.xlu1 %v11993_v57, %s11025_s18 }
0x27df   :  { %4660 = vrot.lane.b32.xlu0 %v12007_v3, %s11025_s18 }
0x27e2   :  { %4805 = vrot.lane.b32.xlu1 %v11999_v1, %s11026_s8 }
0x27e3   :  { %4807 = vrot.lane.b32.xlu0 %v11997_v31, %s11026_s8 }
0x2803   :  { %v4277_v58 = vpop.xlane.xlu1 %4276 }
0x2804   :  { %10290 = vrcp.f32 %v4277_v58 }
0x2805   :  { %v4274_v50 = vpop.xlane.xlu0 %4273 }
0x2806   :  { %10292 = vrcp.f32 %v4274_v50 }
0x2809   :  { %v4283_v62 = vpop.xlane.xlu1 %4282 }
0x280a   :  { %10294 = vrcp.f32 %v4283_v62 }
0x280d   :  { %v4280_v5 = vpop.xlane.xlu0 %4279  ;;  %v4446_v18 = vpop.permute.xlu1 %4445 }
0x280e   :  { %10296 = vrcp.f32 %v4280_v5 }
0x2811   :  { %v10291_v60 = vpop.eup %10290 }
0x2812   :  { %v4293_v10 = vmul.f32 %v10291_v60, %v10279_v23 }
0x2813   :  { %v10293_v8 = vpop.eup %10292 }
0x2814   :  { %v4291_v9 = vmul.f32 %v10293_v8, %v10281_v34 }
0x2816   :  { %9581 = vmatprep.mubr.msk.f32.mxu0 %vm3883_vm10, %v4291_v9 }
0x2817   :  { %9582 = vmatmul.mubr.msk.f32.vlgmr.msra.gmra.mxu0 %vm3883_vm10, %v4293_v10  ;;  %v10295_v12 = vpop.eup %10294 }
0x2818   :  { %9591 = vmatpush3.xpose.msk.msra.mxu0 %vm771_vm3, %v12168_v27  ;;  %v4297_v17 = vmul.f32 %v10295_v12, %v10283_v38  ;;  %v4448_v27 = vpop.permute.xlu0 %4447 }
0x2819   :  { %9592 = vmatprep.subr.msk.mxu0 %vm771_vm3, %v12201_v6 }
0x281b   :  { %v10297_v45 = vpop.eup %10296 }
0x281c   :  { %9593 = vmatpush3.xpose.msk.msra.mxu0 %vm771_vm3, %v12201_v6  ;;  %v4295_v16 = vmul.f32 %v10297_v45, %v10285_v15 }
0x281d   :  { %9594 = vmatprep.subr.msk.mxu0 %vm771_vm3, %v4452_v55 }
0x281e   :  { %9584 = vmatprep.mubr.msk.f32.mxu0 %vm3883_vm10, %v4295_v16 }
0x281f   :  { %9585 = vmatmul.mubr.msk.f32.gmra.mxu0 %vm3883_vm10, %v4297_v17 }
0x2820   :  { %9595 = vmatpush3.xpose.msk.msra.mxu0 %vm771_vm3, %v4452_v55 }
0x2821   :  { %9596 = vmatprep.subr.msk.mxu0 %vm771_vm3, %v4450_v20 }
0x2824   :  { %9597 = vmatpush3.xpose.msk.msra.mxu0 %vm771_vm3, %v4450_v20 }
0x2825   :  { %9598 = vmatprep.subr.msk.mxu0 %vm771_vm3, %v4448_v27 }
0x2828   :  { %9599 = vmatpush3.xpose.msk.msra.mxu0 %vm771_vm3, %v4448_v27 }
0x2829   :  { %9600 = vmatprep.subr.msk.mxu0 %vm771_vm3, %v4446_v18 }
0x282c   :  { %9601 = vmatpush3.xpose.msk.msra.mxu0 %vm771_vm3, %v4446_v18 }
0x283e   :  { %v4286_v6 = vpop.xlane.xlu1 %4285 }
0x283f   :  { %10298 = vrcp.f32 %v4286_v6 }
0x2842   :  { %v4436_v19 = vpop.permute.xlu1 %4435  ;;  %v4289_v21 = vpop.xlane.xlu0 %4288 }
0x2843   :  { %10300 = vrcp.f32 %v4289_v21 }
0x2846   :  { %v4440_v22 = vpop.permute.xlu1 %4439  ;;  %v4434_v23 = vpop.permute.xlu0 %4433 }
0x284a   :  { %v4444_v26 = vpop.permute.xlu1 %4443  ;;  %v4438_v34 = vpop.permute.xlu0 %4437 }
0x284c   :  { %v10299_v35 = vpop.eup %10298 }
0x284d   :  { %v4299_v38 = vmul.f32 %v10299_v35, %v12211_v40 }
0x284e   :  { %v4663_v44 = vpop.permute.xlu1 %4662  ;;  %v4442_v15 = vpop.permute.xlu0 %4441 }
0x284f   :  { %9587 = vmatprep.mubr.msk.f32.mxu0 %vm3883_vm10, %v4299_v38 }
0x2850   :  { %v10301_v46 = vpop.eup %10300 }
0x2851   :  { %v4301_v47 = vmul.f32 %v10301_v46, %v12215_v48 }
0x2852   :  { %v4659_v49 = vpop.permute.xlu1 %4658  ;;  %v4665_v51 = vpop.permute.xlu0 %4664 }
0x2853   :  { %9588 = vmatmul.mubr.msk.f32.gmra.mxu0 %vm3883_vm10, %v4301_v47  ;;  %9611 = vmatprep.subr.mxu1 %v4665_v51 }
0x2854   :  { %9602 = vmatprep.mubr.msk.f32.mxu0 %vm771_vm3, %v4434_v23  ;;  %9612 = vmatpush3.msra.mxu1 %v4665_v51 }
0x2855   :  { %9613 = vmatprep.subr.mxu1 %v4663_v44 }
0x2856   :  { %v4657_v52 = vpop.permute.xlu1 %4656  ;;  %9614 = vmatpush3.msra.mxu1 %v4663_v44  ;;  %v4661_v53 = vpop.permute.xlu0 %4660 }
0x2857   :  { %9603 = vmatmul.mubr.msk.f32.vlgmr.msra.gmra.mxu0 %vm771_vm3, %v4436_v19  ;;  %9615 = vmatprep.subr.mxu1 %v4661_v53 }
0x2858   :  { %9605 = vmatprep.mubr.msk.f32.mxu0 %vm771_vm3, %v4438_v34  ;;  %9616 = vmatpush3.msra.mxu1 %v4661_v53 }
0x2859   :  { %9617 = vmatprep.subr.mxu1 %v4659_v49 }
0x285a   :  { %9618 = vmatpush3.msra.mxu1 %v4659_v49  ;;  %v4655_v2 = vpop.permute.xlu1 %4654  ;;  %v12274_v40 = vpop.permute.xlu0 %4807 }
0x285b   :  { %9606 = vmatmul.mubr.msk.f32.gmra.mxu0 %vm771_vm3, %v4440_v22  ;;  %9619 = vmatprep.subr.mxu1 %v4657_v52 }
0x285c   :  { %9608 = vmatprep.mubr.msk.f32.mxu0 %vm771_vm3, %v4442_v15  ;;  %9620 = vmatpush3.msra.mxu1 %v4657_v52 }
0x285d   :  { %9621 = vmatprep.subr.mxu1 %v4655_v2 }
0x285e   :  { %9622 = vmatpush3.msra.mxu1 %v4655_v2  ;;  %v12307_v46 = vpop.permute.xlu1 %4805 }
0x285f   :  { %9609 = vmatmul.mubr.msk.f32.gmra.mxu0 %vm771_vm3, %v4444_v26  ;;  %9632 = vmatprep.subr.msk.mxu1 %vm771_vm3, %v12274_v40 }
0x28d7   :  { %v12279_v56 = vpop.f32.mrf.mxu0 }
0x28d9   :  { %v12281_v48 = vpop.f32.mrf.mxu0 }
0x28df   :  { %v12283_v11 = vpop.f32.mrf.mxu0 }
0x28e1   :  { %v12285_v20 = vpop.f32.mrf.mxu0 }
0x2913   :  { %v12287_v55 = vpop.f32.mrf.mxu0 }
0x2915   :  { %v12289_v58 = vpop.f32.mrf.mxu0 }
0x2917   :  { %v9604_v50 = vpop.f32.mrf.mxu0 }
0x2918   :  { %v4577_v62 = vmul.f32 0.35355338, %v9604_v50 }
0x2919   :  { %v4547_v5 = vpop.f32.mrf.mxu0 }
0x291a   :  { %v4583_v60 = vadd.f32 %v4577_v62, %v12062_v61  ;;  %v4576_v8 = vmul.f32 0.35355338, %v4547_v5 }
0x291b   :  { %v9607_v9 = vpop.f32.mrf.mxu0 }
0x291c   :  { %v4582_v10 = vadd.f32 %v4576_v8, %v12065_v24  ;;  %v4579_v12 = vmul.f32 0.35355338, %v9607_v9  ;;  %v4591_v45 = vsel %vm3883_vm10, %v4583_v60, -inf }
0x291d   :  { %4592 = vmax.xlane.f32.xlu1 %v4591_v45  ;;  %v4557_v16 = vpop.f32.mrf.mxu0 }
0x291e   :  { %v4585_v17 = vadd.f32 %v4579_v12, %v12069_v30  ;;  %v4578_v27 = vmul.f32 0.35355338, %v4557_v16  ;;  %v4588_v18 = vsel %vm3883_vm10, %v4582_v10, -inf }
0x291f   :  { %4589 = vmax.xlane.f32.xlu0 %v4588_v18  ;;  %v9610_v6 = vpop.f32.mrf.mxu0 }
0x2920   :  { %v4581_v19 = vmul.f32 0.35355338, %v9610_v6  ;;  %v4584_v22 = vadd.f32 %v4578_v27, %v12076_v39  ;;  %v4597_v34 = vsel %vm3883_vm10, %v4585_v17, -inf }
0x2921   :  { %v4567_v21 = vpop.f32.mrf.mxu0 }
0x2922   :  { %v4587_v23 = vadd.f32 %v4581_v19, %v12079_v43  ;;  %v4580_v26 = vmul.f32 0.35355338, %v4567_v21  ;;  %v4594_v44 = vsel %vm3883_vm10, %v4584_v22, -inf }
0x2923   :  { %4598 = vmax.xlane.f32.xlu0 %v4597_v34 }
0x2924   :  { %v4603_v35 = vsel %vm3883_vm10, %v4587_v23, -inf  ;;  %v4586_v38 = vadd.f32 %v4580_v26, %v12085_v33 }
0x2925   :  { %4604 = vmax.xlane.f32.xlu1 %v4603_v35 }
0x2926   :  { %v4600_v15 = vsel %vm3883_vm10, %v4586_v38, -inf }
0x2927   :  { %4595 = vmax.xlane.f32.xlu0 %v4594_v44 }
0x292b   :  { %4601 = vmax.xlane.f32.xlu0 %v4600_v15 }
0x2936   :  { %4801 = vrot.lane.b32.xlu1 %v12013_v4, %s11026_s8 }
0x2941   :  { %4803 = vrot.lane.b32.xlu0 %v12007_v3, %s11026_s8 }
0x29a6   :  { %v4593_v47 = vpop.xlane.xlu1 %4592 }
0x29a7   :  { %v4607_v49 = vsub.f32 %v4583_v60, %v4593_v47 }
0x29a8   :  { %v4590_v51 = vpop.xlane.xlu0 %4589 }
0x29a9   :  { %v4614_v52 = vmul.f32 1.442695, %v4607_v49  ;;  %v4606_v53 = vsub.f32 %v4582_v10, %v4590_v51 }
0x29ab   :  { %10302 = vpow2.f32 %v4614_v52  ;;  %v4612_v2 = vmul.f32 1.442695, %v4606_v53 }
0x29ac   :  { %v4599_v50 = vpop.xlane.xlu0 %4598 }
0x29ad   :  { %10304 = vpow2.f32 %v4612_v2  ;;  %v4609_v62 = vsub.f32 %v4585_v17, %v4599_v50 }
0x29af   :  { %v4618_v5 = vmul.f32 1.442695, %v4609_v62 }
0x29b0   :  { %v4596_v8 = vpop.xlane.xlu0 %4595 }
0x29b1   :  { %10306 = vpow2.f32 %v4618_v5  ;;  %v4608_v9 = vsub.f32 %v4584_v22, %v4596_v8  ;;  %v4605_v22 = vpop.xlane.xlu1 %4604 }
0x29b2   :  { %v4611_v26 = vsub.f32 %v4587_v23, %v4605_v22 }
0x29b3   :  { %v4616_v12 = vmul.f32 1.442695, %v4608_v9 }
0x29b4   :  { %v4602_v19 = vpop.xlane.xlu0 %4601  ;;  %v4622_v35 = vmul.f32 1.442695, %v4611_v26 }
0x29b5   :  { %10308 = vpow2.f32 %v4616_v12  ;;  %v4610_v21 = vsub.f32 %v4586_v38, %v4602_v19  ;;  %v4802_v23 = vpop.permute.xlu1 %4801 }
0x29b7   :  { %v4620_v34 = vmul.f32 1.442695, %v4610_v21 }
0x29b8   :  { %v10303_v45 = vpop.eup %10302  ;;  %v4804_v38 = vpop.permute.xlu0 %4803 }
0x29b9   :  { %v4627_v16 = vsel %vm3883_vm10, %v10303_v45, 0.0  ;;  %10310 = vpow2.f32 %v4620_v34 }
0x29ba   :  { %v10305_v27 = vpop.eup %10304  ;;  %4628 = vadd.xlane.f32.xlu1 %v4627_v16  ;;  %10312 = vpow2.f32 %v4622_v35 }
0x29bb   :  { %v4624_v60 = vsel %vm3883_vm10, %v10305_v27, 0.0 }
0x29bc   :  { %4625 = vadd.xlane.f32.xlu0 %v4624_v60 }
0x29be   :  { %v10307_v10 = vpop.eup %10306 }
0x29bf   :  { %v4633_v18 = vsel %vm3883_vm10, %v10307_v10, 0.0 }
0x29c0   :  { %4634 = vadd.xlane.f32.xlu1 %v4633_v18 }
0x29c2   :  { %v10309_v6 = vpop.eup %10308 }
0x29c3   :  { %v4630_v17 = vsel %vm3883_vm10, %v10309_v6, 0.0 }
0x29c4   :  { %4631 = vadd.xlane.f32.xlu0 %v4630_v17 }
0x29c6   :  { %v10311_v44 = vpop.eup %10310 }
0x29c7   :  { %v4636_v15 = vsel %vm3883_vm10, %v10311_v44, 0.0  ;;  %v10313_v47 = vpop.eup %10312 }
0x29c8   :  { %v4639_v49 = vsel %vm3883_vm10, %v10313_v47, 0.0 }
0x29d1   :  { %4797 = vrot.lane.b32.xlu1 %v11993_v57, %s11026_s8 }
0x29da   :  { %4799 = vrot.lane.b32.xlu0 %v12003_v63, %s11026_s8 }
0x29f5   :  { %4637 = vadd.xlane.f32.xlu1 %v4636_v15 }
0x29f9   :  { %4640 = vadd.xlane.f32.xlu0 %v4639_v49 }
0x2a06   :  { %4787 = vrot.lane.b32.xlu1 %v12003_v63, %s11027_s22 }
0x2a0a   :  { %4791 = vrot.lane.b32.xlu1 %v12007_v3, %s11027_s22 }
0x2a0e   :  { %4795 = vrot.lane.b32.xlu1 %v11997_v31, %s11027_s22 }
0x2a0f   :  { %4785 = vrot.lane.b32.xlu0 %v11993_v57, %s11027_s22 }
0x2a13   :  { %4789 = vrot.lane.b32.xlu0 %v12013_v4, %s11027_s22 }
0x2a17   :  { %4793 = vrot.lane.b32.xlu0 %v11999_v1, %s11027_s22 }
0x2a43   :  { %v4629_v51 = vpop.xlane.xlu1 %4628 }
0x2a44   :  { %10314 = vrcp.f32 %v4629_v51 }
0x2a45   :  { %v4626_v52 = vpop.xlane.xlu0 %4625 }
0x2a46   :  { %10316 = vrcp.f32 %v4626_v52 }
0x2a49   :  { %v4635_v53 = vpop.xlane.xlu1 %4634 }
0x2a4a   :  { %10318 = vrcp.f32 %v4635_v53 }
0x2a4d   :  { %v4632_v2 = vpop.xlane.xlu0 %4631 }
0x2a4e   :  { %10320 = vrcp.f32 %v4632_v2 }
0x2a51   :  { %v10315_v50 = vpop.eup %10314 }
0x2a52   :  { %v4645_v8 = vmul.f32 %v10315_v50, %v10303_v45  ;;  %v4798_v45 = vpop.permute.xlu1 %4797 }
0x2a53   :  { %v10317_v62 = vpop.eup %10316 }
0x2a54   :  { %v4643_v5 = vmul.f32 %v10317_v62, %v10305_v27 }
0x2a56   :  { %9623 = vmatprep.mubr.msk.f32.mxu1 %vm3883_vm10, %v4643_v5 }
0x2a57   :  { %9624 = vmatmul.mubr.msk.f32.vlgmr.msra.gmra.mxu1 %vm3883_vm10, %v4645_v8  ;;  %v10319_v9 = vpop.eup %10318 }
0x2a58   :  { %9633 = vmatpush3.xpose.msk.msra.mxu1 %vm771_vm3, %v12274_v40  ;;  %v4649_v27 = vmul.f32 %v10319_v9, %v10307_v10  ;;  %v4800_v40 = vpop.permute.xlu0 %4799 }
0x2a59   :  { %9634 = vmatprep.subr.msk.mxu1 %vm771_vm3, %v12307_v46 }
0x2a5b   :  { %v10321_v12 = vpop.eup %10320 }
0x2a5c   :  { %9635 = vmatpush3.xpose.msk.msra.mxu1 %vm771_vm3, %v12307_v46  ;;  %v4647_v16 = vmul.f32 %v10321_v12, %v10309_v6 }
0x2a5d   :  { %9636 = vmatprep.subr.msk.mxu1 %vm771_vm3, %v4804_v38 }
0x2a5e   :  { %9626 = vmatprep.mubr.msk.f32.mxu1 %vm3883_vm10, %v4647_v16 }
0x2a5f   :  { %9627 = vmatmul.mubr.msk.f32.gmra.mxu1 %vm3883_vm10, %v4649_v27 }
0x2a60   :  { %9637 = vmatpush3.xpose.msk.msra.mxu1 %vm771_vm3, %v4804_v38 }
0x2a61   :  { %9638 = vmatprep.subr.msk.mxu1 %vm771_vm3, %v4802_v23 }
0x2a64   :  { %9639 = vmatpush3.xpose.msk.msra.mxu1 %vm771_vm3, %v4802_v23 }
0x2a65   :  { %9640 = vmatprep.subr.msk.mxu1 %vm771_vm3, %v4800_v40 }
0x2a68   :  { %9641 = vmatpush3.xpose.msk.msra.mxu1 %vm771_vm3, %v4800_v40 }
0x2a69   :  { %9642 = vmatprep.subr.msk.mxu1 %vm771_vm3, %v4798_v45 }
0x2a6c   :  { %9643 = vmatpush3.xpose.msk.msra.mxu1 %vm771_vm3, %v4798_v45 }
0x2a7e   :  { %v4638_v46 = vpop.xlane.xlu1 %4637 }
0x2a7f   :  { %10322 = vrcp.f32 %v4638_v46 }
0x2a82   :  { %v4641_v60 = vpop.xlane.xlu0 %4640  ;;  %v4788_v21 = vpop.permute.xlu1 %4787 }
0x2a83   :  { %10324 = vrcp.f32 %v4641_v60 }
0x2a86   :  { %v4786_v6 = vpop.permute.xlu0 %4785  ;;  %v4792_v26 = vpop.permute.xlu1 %4791 }
0x2a8a   :  { %v4790_v22 = vpop.permute.xlu0 %4789  ;;  %v4796_v35 = vpop.permute.xlu1 %4795 }
0x2a8c   :  { %v10323_v10 = vpop.eup %10322 }
0x2a8d   :  { %v4651_v18 = vmul.f32 %v10323_v10, %v10311_v44 }
0x2a8e   :  { %v4794_v34 = vpop.permute.xlu0 %4793 }
0x2a8f   :  { %9629 = vmatprep.mubr.msk.f32.mxu1 %vm3883_vm10, %v4651_v18 }
0x2a90   :  { %v10325_v17 = vpop.eup %10324 }
0x2a91   :  { %v4653_v19 = vmul.f32 %v10325_v17, %v10313_v47 }
0x2a93   :  { %9630 = vmatmul.mubr.msk.f32.gmra.mxu1 %vm3883_vm10, %v4653_v19 }
0x2a94   :  { %9644 = vmatprep.mubr.msk.f32.mxu1 %vm771_vm3, %v4786_v6 }
0x2a97   :  { %9645 = vmatmul.mubr.msk.f32.vlgmr.msra.gmra.mxu1 %vm771_vm3, %v4788_v21 }
0x2a98   :  { %9647 = vmatprep.mubr.msk.f32.mxu1 %vm771_vm3, %v4790_v22 }
0x2a9b   :  { %9648 = vmatmul.mubr.msk.f32.gmra.mxu1 %vm771_vm3, %v4792_v26 }
0x2a9c   :  { %9650 = vmatprep.mubr.msk.f32.mxu1 %vm771_vm3, %v4794_v34 }
0x2a9f   :  { %9651 = vmatmul.mubr.msk.f32.gmra.mxu1 %vm771_vm3, %v4796_v35 }
0x2b17   :  { %v12357_v44 = vpop.f32.mrf.mxu1 }
0x2b19   :  { %v12359_v15 = vpop.f32.mrf.mxu1 }
0x2b1f   :  { %v12361_v47 = vpop.f32.mrf.mxu1 }
0x2b21   :  { %v12363_v49 = vpop.f32.mrf.mxu1 }
0x2b53   :  { %v12365_v23 = vpop.f32.mrf.mxu1 }
0x2b55   :  { %v12367_v38 = vpop.f32.mrf.mxu1 }
0x2b57   :  { %v9646_v51 = vpop.f32.mrf.mxu1 }
0x2b58   :  { %v4929_v52 = vmul.f32 0.35355338, %v9646_v51 }
0x2b59   :  { %v4899_v53 = vpop.f32.mrf.mxu1 }
0x2b5a   :  { %v4935_v2 = vadd.f32 %v4929_v52, %v12062_v61  ;;  %v4928_v50 = vmul.f32 0.35355338, %v4899_v53 }
0x2b5b   :  { %v9649_v62 = vpop.f32.mrf.mxu1 }
0x2b5c   :  { %v4934_v5 = vadd.f32 %v4928_v50, %v12065_v24  ;;  %v4931_v8 = vmul.f32 0.35355338, %v9649_v62  ;;  %v4943_v9 = vsel %vm3883_vm10, %v4935_v2, -inf }
0x2b5d   :  { %4944 = vmax.xlane.f32.xlu1 %v4943_v9  ;;  %v4909_v12 = vpop.f32.mrf.mxu1 }
0x2b5e   :  { %v4937_v16 = vadd.f32 %v4931_v8, %v12069_v30  ;;  %v4930_v27 = vmul.f32 0.35355338, %v4909_v12  ;;  %v4940_v40 = vsel %vm3883_vm10, %v4934_v5, -inf }
0x2b5f   :  { %4941 = vmax.xlane.f32.xlu0 %v4940_v40  ;;  %v9652_v45 = vpop.f32.mrf.mxu1 }
0x2b60   :  { %v4933_v46 = vmul.f32 0.35355338, %v9652_v45  ;;  %v4936_v61 = vadd.f32 %v4930_v27, %v12076_v39  ;;  %v4949_v24 = vsel %vm3883_vm10, %v4937_v16, -inf }
0x2b61   :  { %v4919_v60 = vpop.f32.mrf.mxu1 }
0x2b62   :  { %v4939_v10 = vadd.f32 %v4933_v46, %v12079_v43  ;;  %v4932_v18 = vmul.f32 0.35355338, %v4919_v60  ;;  %v4946_v17 = vsel %vm3883_vm10, %v4936_v61, -inf }
0x2b63   :  { %4950 = vmax.xlane.f32.xlu0 %v4949_v24 }
0x2b64   :  { %v4955_v6 = vsel %vm3883_vm10, %v4939_v10, -inf  ;;  %v4938_v30 = vadd.f32 %v4932_v18, %v12085_v33 }
0x2b65   :  { %4956 = vmax.xlane.f32.xlu1 %v4955_v6 }
0x2b66   :  { %v4952_v19 = vsel %vm3883_vm10, %v4938_v30, -inf }
0x2b67   :  { %4947 = vmax.xlane.f32.xlu0 %v4946_v17 }
0x2b6b   :  { %4953 = vmax.xlane.f32.xlu0 %v4952_v19 }
0x2b76   :  { %5014 = vrot.lane.b32.xlu1 %v11999_v1, %s11028_s17 }
0x2b7a   :  { %5012 = vrot.lane.b32.xlu1 %v12007_v3, %s11028_s17 }
0x2b7e   :  { %5010 = vrot.lane.b32.xlu1 %v12013_v4, %s11028_s17 }
0x2b81   :  { %5016 = vrot.lane.b32.xlu0 %v11997_v31, %s11028_s17 }
0x2be6   :  { %v4945_v39 = vpop.xlane.xlu1 %4944 }
0x2be7   :  { %v4959_v43 = vsub.f32 %v4935_v2, %v4945_v39 }
0x2be8   :  { %v4942_v33 = vpop.xlane.xlu0 %4941 }
0x2be9   :  { %v4966_v21 = vmul.f32 1.442695, %v4959_v43  ;;  %v4958_v22 = vsub.f32 %v4934_v5, %v4942_v33 }
0x2beb   :  { %10326 = vpow2.f32 %v4966_v21  ;;  %v4964_v26 = vmul.f32 1.442695, %v4958_v22  ;;  %v5230_v22 = vld [vmem:[%s13410_s19 + $0x18] sm:$0xff] }
0x2bec   :  { %v4951_v34 = vpop.xlane.xlu0 %4950 }
0x2bed   :  { %10328 = vpow2.f32 %v4964_v26  ;;  %v4961_v35 = vsub.f32 %v4937_v16, %v4951_v34  ;;  %v5229_v26 = vld [vmem:[%s13410_s19 + $0x10] sm:$0xff]  ;;  %v5228_v34 = vld [vmem:[%s13410_s19 + $0x8] sm:$0xff] }
0x2bee   :  { %v4957_v1 = vpop.xlane.xlu1 %4956 }
0x2bef   :  { %v4970_v51 = vmul.f32 1.442695, %v4961_v35  ;;  %v4963_v52 = vsub.f32 %v4939_v10, %v4957_v1  ;;  %v5227_v35 = vld [vmem:[%s13410_s19] sm:$0xff] }
0x2bf0   :  { %v4948_v3 = vpop.xlane.xlu0 %4947 }
0x2bf1   :  { %10330 = vpow2.f32 %v4970_v51  ;;  %v4974_v53 = vmul.f32 1.442695, %v4963_v52  ;;  %v4960_v4 = vsub.f32 %v4936_v61, %v4948_v3 }
0x2bf2   :  { %v5015_v50 = vpop.permute.xlu1 %5014 }
0x2bf3   :  { %10332 = vpow2.f32 %v4974_v53  ;;  %v4968_v31 = vmul.f32 1.442695, %v4960_v4 }
0x2bf4   :  { %v4954_v62 = vpop.xlane.xlu0 %4953 }
0x2bf5   :  { %10334 = vpow2.f32 %v4968_v31  ;;  %v4962_v2 = vsub.f32 %v4938_v30, %v4954_v62 }
0x2bf6   :  { %v5013_v9 = vpop.permute.xlu1 %5012 }
0x2bf7   :  { %v4972_v8 = vmul.f32 1.442695, %v4962_v2 }
0x2bf8   :  { %v12389_v5 = vpop.eup %10326  ;;  %v5017_v12 = vpop.permute.xlu0 %5016 }
0x2bf9   :  { %10336 = vpow2.f32 %v4972_v8  ;;  %9653 = vmatprep.subr.mxu0 %v5017_v12  ;;  %v4979_v16 = vsel %vm3883_vm10, %v12389_v5, 0.0 }
0x2bfa   :  { %v10329_v27 = vpop.eup %10328  ;;  %4980 = vadd.xlane.f32.xlu1 %v4979_v16  ;;  %9654 = vmatpush3.msra.mxu0 %v5017_v12  ;;  %v5011_v46 = vpop.permute.xlu1 %5010 }
0x2bfb   :  { %9655 = vmatprep.subr.mxu0 %v5015_v50  ;;  %v4976_v40 = vsel %vm3883_vm10, %v10329_v27, 0.0 }
0x2bfc   :  { %4977 = vadd.xlane.f32.xlu0 %v4976_v40  ;;  %9656 = vmatpush3.msra.mxu0 %v5015_v50 }
0x2bfd   :  { %9657 = vmatprep.subr.mxu0 %v5013_v9 }
0x2bfe   :  { %v10331_v45 = vpop.eup %10330  ;;  %9658 = vmatpush3.msra.mxu0 %v5013_v9 }
0x2bff   :  { %9659 = vmatprep.subr.mxu0 %v5011_v46  ;;  %v4985_v60 = vsel %vm3883_vm10, %v10331_v45, 0.0 }
0x2c00   :  { %v10333_v61 = vpop.eup %10332  ;;  %4986 = vadd.xlane.f32.xlu1 %v4985_v60  ;;  %9660 = vmatpush3.msra.mxu0 %v5011_v46 }
0x2c01   :  { %v4991_v18 = vsel %vm3883_vm10, %v10333_v61, 0.0 }
0x2c02   :  { %v10335_v10 = vpop.eup %10334 }
0x2c03   :  { %v4982_v24 = vsel %vm3883_vm10, %v10335_v10, 0.0 }
0x2c04   :  { %4992 = vadd.xlane.f32.xlu1 %v4991_v18  ;;  %4983 = vadd.xlane.f32.xlu0 %v4982_v24 }
0x2c06   :  { %v10337_v6 = vpop.eup %10336 }
0x2c07   :  { %v4988_v30 = vsel %vm3883_vm10, %v10337_v6, 0.0 }
0x2c08   :  { %4989 = vadd.xlane.f32.xlu0 %v4988_v30 }
0x2c15   :  { %5006 = vrot.lane.b32.xlu1 %v11993_v57, %s11028_s17 }
0x2c19   :  { %5145 = vrot.lane.b32.xlu1 %v12279_v56, %s11029_s3 }
0x2c1d   :  { %5169 = vrot.lane.b32.xlu1 %v12357_v44, %s11030_s23 }
0x2c1e   :  { %5008 = vrot.lane.b32.xlu0 %v12003_v63, %s11028_s17 }
0x2c21   :  { %5149 = vrot.lane.b32.xlu1 %v12283_v11, %s11029_s3 }
0x2c22   :  { %5143 = vrot.lane.b32.xlu0 %v12281_v48, %s11029_s3 }
0x2c25   :  { %5173 = vrot.lane.b32.xlu1 %v12361_v47, %s11030_s23 }
0x2c26   :  { %5167 = vrot.lane.b32.xlu0 %v12359_v15, %s11030_s23 }
0x2c29   :  { %5153 = vrot.lane.b32.xlu1 %v12287_v55, %s11029_s3 }
0x2c2a   :  { %5147 = vrot.lane.b32.xlu0 %v12285_v20, %s11029_s3 }
0x2c2d   :  { %5177 = vrot.lane.b32.xlu1 %v12365_v23, %s11030_s23 }
0x2c2e   :  { %5171 = vrot.lane.b32.xlu0 %v12363_v49, %s11030_s23 }
0x2c32   :  { %5151 = vrot.lane.b32.xlu0 %v12289_v58, %s11029_s3 }
0x2c36   :  { %5175 = vrot.lane.b32.xlu0 %v12367_v38, %s11030_s23 }
0x2c83   :  { %v4981_v57 = vpop.xlane.xlu1 %4980 }
0x2c85   :  { %v4978_v63 = vpop.xlane.xlu0 %4977 }
0x2c86   :  { %10338 = vrcp.f32 %v4978_v63 }
0x2c87   :  { %10340 = vrcp.f32 %v4981_v57 }
0x2c89   :  { %v4987_v56 = vpop.xlane.xlu1 %4986 }
0x2c8a   :  { %10342 = vrcp.f32 %v4987_v56 }
0x2c8d   :  { %v4984_v48 = vpop.xlane.xlu0 %4983  ;;  %v4993_v11 = vpop.xlane.xlu1 %4992 }
0x2c8e   :  { %10344 = vrcp.f32 %v4984_v48 }
0x2c8f   :  { %10346 = vrcp.f32 %v4993_v11 }
0x2c91   :  { %v4990_v20 = vpop.xlane.xlu0 %4989  ;;  %v5007_v58 = vpop.permute.xlu1 %5006 }
0x2c92   :  { %10348 = vrcp.f32 %v4990_v20 }
0x2c93   :  { %v10339_v55 = vpop.eup %10338 }
0x2c94   :  { %v4995_v44 = vmul.f32 %v10339_v55, %v10329_v27  ;;  %v10341_v15 = vpop.eup %10340 }
0x2c95   :  { %v5009_v47 = vpop.permute.xlu0 %5008  ;;  %v4997_v49 = vmul.f32 %v10341_v15, %v12389_v5  ;;  %v5146_v50 = vpop.permute.xlu1 %5145 }
0x2c96   :  { %9661 = vmatprep.subr.mxu0 %v5009_v47  ;;  %9665 = vmatprep.mubr.msk.f32.mxu0 %vm3883_vm10, %v4995_v44 }
0x2c97   :  { %9662 = vmatpush3.msra.mxu0 %v5009_v47  ;;  %v10343_v23 = vpop.eup %10342 }
0x2c98   :  { %9663 = vmatprep.subr.mxu0 %v5007_v58  ;;  %v5001_v39 = vmul.f32 %v10343_v23, %v10331_v45  ;;  %v8642_v23 = vld [vmem:[#allocation8] ss:$0 sm:$0xff] }
0x2c99   :  { %9664 = vmatpush3.msra.mxu0 %v5007_v58  ;;  %v5144_v31 = vpop.permute.xlu0 %5143  ;;  %v5170_v62 = vpop.permute.xlu1 %5169 }
0x2c9a   :  { %9666 = vmatmul.mubr.msk.f32.vlgmr.msra.gmra.mxu0 %vm3883_vm10, %v4997_v49  ;;  %9674 = vmatprep.subr.mxu0 %v5230_v22  ;;  %v5209_v60 = vsel %vm771_vm3, %v12175_v29, %v5144_v31 }
0x2c9b   :  { %v10345_v38 = vpop.eup %10344  ;;  %9675 = vmatpush3.msra.mxu0 %v5230_v22 }
0x2c9c   :  { %v4999_v17 = vmul.f32 %v10345_v38, %v10335_v10  ;;  %v10347_v19 = vpop.eup %10346  ;;  %9676 = vmatprep.subr.mxu0 %v5229_v26 }
0x2c9d   :  { %v5005_v21 = vmul.f32 %v10347_v19, %v10333_v61  ;;  %9677 = vmatpush3.msra.mxu0 %v5229_v26  ;;  %v5168_v2 = vpop.permute.xlu0 %5167  ;;  %v5150_v8 = vpop.permute.xlu1 %5149  ;;  %v5210_v61 = vsel %vm771_vm3, %v12173_v28, %v5146_v50 }
0x2c9e   :  { %9668 = vmatprep.mubr.msk.f32.mxu0 %vm3883_vm10, %v4999_v17  ;;  %9678 = vmatprep.subr.mxu0 %v5228_v34  ;;  %v5215_v10 = vsel %vm1613_vm7, %v5209_v60, %v5168_v2  ;;  %v5216_v24 = vsel %vm1613_vm7, %v5210_v61, %v5170_v62  ;;  %v5212_v28 = vsel %vm771_vm3, %v12177_v37, %v5150_v8 }
0x2c9f   :  { %v10349_v43 = vpop.eup %10348  ;;  %9669 = vmatmul.mubr.msk.f32.gmra.mxu0 %vm3883_vm10, %v5001_v39 }
0x2ca0   :  { %v5003_v33 = vmul.f32 %v10349_v43, %v10337_v6  ;;  %9679 = vmatpush3.msra.mxu0 %v5228_v34 }
0x2ca1   :  { %9680 = vmatprep.subr.mxu0 %v5227_v35  ;;  %v5148_v5 = vpop.permute.xlu0 %5147  ;;  %v5174_v9 = vpop.permute.xlu1 %5173 }
0x2ca2   :  { %9671 = vmatprep.mubr.msk.f32.mxu0 %vm3883_vm10, %v5003_v33  ;;  %9681 = vmatpush3.msra.mxu0 %v5227_v35  ;;  %v5211_v29 = vsel %vm771_vm3, %v12179_v14, %v5148_v5  ;;  %v5218_v48 = vsel %vm1613_vm7, %v5212_v28, %v5174_v9 }
0x2ca3   :  { %9672 = vmatmul.mubr.msk.f32.gmra.mxu0 %vm3883_vm10, %v5005_v21 }
0x2ca5   :  { %v5172_v12 = vpop.permute.xlu0 %5171  ;;  %v5154_v16 = vpop.permute.xlu1 %5153 }
0x2ca6   :  { %v5217_v63 = vsel %vm1613_vm7, %v5211_v29, %v5172_v12  ;;  %v5214_v37 = vsel %vm771_vm3, %v12181_v13, %v5154_v16 }
0x2ca9   :  { %v5152_v27 = vpop.permute.xlu0 %5151  ;;  %v5178_v40 = vpop.permute.xlu1 %5177 }
0x2caa   :  { %v5213_v55 = vsel %vm771_vm3, %v12183_v32, %v5152_v27  ;;  %v5220_v47 = vsel %vm1613_vm7, %v5214_v37, %v5178_v40  ;;  %v5469_v37 = vld [vmem:[%s13411_s28 + $0x10] sm:$0xff] }
0x2cad   :  { %v5176_v45 = vpop.permute.xlu0 %5175 }
0x2cae   :  { %v5219_v14 = vsel %vm1613_vm7, %v5213_v55, %v5176_v45 }
0x2d5a   :  { %v9667_v1 = vpop.f32.mrf.mxu0 }
0x2d5b   :  { %5193 = vrot.lane.b32.xlu1 %v9667_v1, %s11031_s0 }
0x2d5c   :  { %v5108_v51 = vpop.f32.mrf.mxu0 }
0x2d5d   :  { %5191 = vrot.lane.b32.xlu0 %v5108_v51, %s11031_s0 }
0x2d5f   :  { %v9670_v52 = vpop.f32.mrf.mxu0 }
0x2d60   :  { %5197 = vrot.lane.b32.xlu1 %v9670_v52, %s11031_s0 }
0x2d61   :  { %v5118_v3 = vpop.f32.mrf.mxu0 }
0x2d62   :  { %5195 = vrot.lane.b32.xlu0 %v5118_v3, %s11031_s0 }
0x2d63   :  { %v9673_v53 = vpop.f32.mrf.mxu0 }
0x2d64   :  { %5201 = vrot.lane.b32.xlu1 %v9673_v53, %s11031_s0 }
0x2d65   :  { %v5128_v4 = vpop.f32.mrf.mxu0 }
0x2d66   :  { %5199 = vrot.lane.b32.xlu0 %v5128_v4, %s11031_s0 }
0x2dcd   :  { %v5194_v46 = vpop.permute.xlu1 %5193 }
0x2dce   :  { %v5222_v30 = vsel %vm1616_vm8, %v5216_v24, %v5194_v46 }
0x2dcf   :  { %v5192_v18 = vpop.permute.xlu0 %5191 }
0x2dd0   :  { %v5221_v6 = vsel %vm1616_vm8, %v5215_v10, %v5192_v18 }
0x2dd1   :  { %9682 = vmatprep.mubr.msk.f32.mxu0 %vm582_vm1, %v5221_v6 }
0x2dd2   :  { %9683 = vmatmul.mubr.msk.f32.vlgmr.msra.gmra.mxu0 %vm582_vm1, %v5222_v30  ;;  %v5198_v57 = vpop.permute.xlu1 %5197 }
0x2dd3   :  { %v5224_v20 = vsel %vm1616_vm8, %v5218_v48, %v5198_v57 }
0x2dd4   :  { %v5196_v56 = vpop.permute.xlu0 %5195 }
0x2dd5   :  { %v5223_v11 = vsel %vm1616_vm8, %v5217_v63, %v5196_v56 }
0x2dd6   :  { %9685 = vmatprep.mubr.msk.f32.mxu0 %vm582_vm1, %v5223_v11  ;;  %v5202_v44 = vpop.permute.xlu1 %5201 }
0x2dd7   :  { %9686 = vmatmul.mubr.msk.f32.gmra.mxu0 %vm582_vm1, %v5224_v20  ;;  %v5226_v49 = vsel %vm1616_vm8, %v5220_v47, %v5202_v44  ;;  %v5470_v44 = vld [vmem:[%s13411_s28 + $0x18] sm:$0xff] }
0x2dd8   :  { %v5200_v15 = vpop.permute.xlu0 %5199  ;;  %9691 = vmatprep.subr.mxu1 %v5470_v44 }
0x2dd9   :  { %v5225_v58 = vsel %vm1616_vm8, %v5219_v14, %v5200_v15  ;;  %9692 = vmatpush3.msra.mxu1 %v5470_v44  ;;  %v5468_v14 = vld [vmem:[%s13411_s28 + $0x8] sm:$0xff]  ;;  %v5467_v15 = vld [vmem:[%s13411_s28] sm:$0xff]  ;;  %v5646_v44 = vld [vmem:[%s13412_s27 + $0x38] sm:$0xff] }
0x2dda   :  { %9688 = vmatprep.mubr.msk.f32.mxu0 %vm582_vm1, %v5225_v58  ;;  %9693 = vmatprep.subr.mxu1 %v5469_v37 }
0x2ddb   :  { %9689 = vmatmul.mubr.msk.f32.gmra.mxu0 %vm582_vm1, %v5226_v49  ;;  %9694 = vmatpush3.msra.mxu1 %v5469_v37  ;;  %v5645_v37 = vld [vmem:[%s13412_s27 + $0x30] sm:$0xff] }
0x2ddc   :  { %9695 = vmatprep.subr.mxu1 %v5468_v14 }
0x2ddd   :  { %9696 = vmatpush3.msra.mxu1 %v5468_v14  ;;  %v5644_v14 = vld [vmem:[%s13412_s27 + $0x28] sm:$0xff] }
0x2dde   :  { %9697 = vmatprep.subr.mxu1 %v5467_v15 }
0x2ddf   :  { %9698 = vmatpush3.msra.mxu1 %v5467_v15  ;;  %v5643_v15 = vld [vmem:[%s13412_s27 + $0x20] sm:$0xff] }
0x2e92   :  { %v9684_v32 = vpop.f32.mrf.mxu0 }
0x2e93   :  { %v5345_v38 = vadd.f32 %v9684_v32, %v11905_v59 }
0x2e94   :  { %v5315_v17 = vpop.f32.mrf.mxu0 }
0x2e95   :  { %v12474_v19 = vadd.f32 %v8642_v23, %v5345_v38  ;;  %v5344_v13 = vadd.f32 %v5315_v17, %v11878_v25 }
0x2e97   :  { %v12477_v39 = vadd.f32 %v8642_v23, %v5344_v13  ;;  %v5368_v43 = vsel %vm582_vm1, %v12474_v19, 0.0  ;;  %v9687_v33 = vpop.f32.mrf.mxu0 }
0x2e98   :  { %5369 = vadd.xlane.f32.xlu1 %v5368_v43  ;;  %v5347_v21 = vadd.f32 %v9687_v33, %v11912_v7 }
0x2e99   :  { %v5365_v22 = vsel %vm582_vm1, %v12477_v39, 0.0  ;;  %v5325_v26 = vpop.f32.mrf.mxu0 }
0x2e9a   :  { %5366 = vadd.xlane.f32.xlu0 %v5365_v22  ;;  %v12484_v59 = vadd.f32 %v8642_v23, %v5347_v21  ;;  %v5346_v34 = vadd.f32 %v5325_v26, %v11881_v41 }
0x2e9b   :  { %v9690_v35 = vpop.f32.mrf.mxu0 }
0x2e9c   :  { %v12487_v25 = vadd.f32 %v8642_v23, %v5346_v34  ;;  %v5349_v1 = vadd.f32 %v9690_v35, %v11921_v42  ;;  %v5374_v51 = vsel %vm582_vm1, %v12484_v59, 0.0 }
0x2e9d   :  { %v5335_v52 = vpop.f32.mrf.mxu0 }
0x2e9e   :  { %5375 = vadd.xlane.f32.xlu0 %v5374_v51  ;;  %v12492_v7 = vadd.f32 %v8642_v23, %v5349_v1  ;;  %v5348_v3 = vadd.f32 %v5335_v52, %v11889_v36  ;;  %v5371_v41 = vsel %vm582_vm1, %v12487_v25, 0.0 }
0x2ea0   :  { %v12495_v53 = vadd.f32 %v8642_v23, %v5348_v3  ;;  %v5380_v4 = vsel %vm582_vm1, %v12492_v7, 0.0 }
0x2ea1   :  { %5381 = vadd.xlane.f32.xlu1 %v5380_v4 }
0x2ea2   :  { %5372 = vadd.xlane.f32.xlu0 %v5371_v41  ;;  %v5377_v42 = vsel %vm582_vm1, %v12495_v53, 0.0  ;;  %v8643_v41 = vld [vmem:[#allocation9] ss:$0 sm:$0xff] }
0x2ea6   :  { %5378 = vadd.xlane.f32.xlu0 %v5377_v42 }
0x2f21   :  { %v5370_v50 = vpop.xlane.xlu1 %5369 }
0x2f22   :  { %v5384_v31 = vmul.f32 0.03125, %v5370_v50 }
0x2f23   :  { %v5367_v62 = vpop.xlane.xlu0 %5366 }
0x2f24   :  { %v12504_v2 = vsub.f32 %v12474_v19, %v5384_v31  ;;  %v5383_v36 = vmul.f32 0.03125, %v5367_v62  ;;  %v8644_v62 = vld [vmem:[#allocation11] ss:$0 sm:$0xff] }
0x2f26   :  { %v12507_v8 = vsub.f32 %v12477_v39, %v5383_v36  ;;  %v5396_v5 = vmul.f32 %v12504_v2, %v12504_v2 }
0x2f27   :  { %v5376_v9 = vpop.xlane.xlu0 %5375 }
0x2f28   :  { %v5386_v12 = vmul.f32 0.03125, %v5376_v9  ;;  %v5404_v16 = vsel %vm582_vm1, %v5396_v5, 0.0  ;;  %v5395_v27 = vmul.f32 %v12507_v8, %v12507_v8 }
0x2f29   :  { %5405 = vadd.xlane.f32.xlu1 %v5404_v16 }
0x2f2a   :  { %v12515_v40 = vsub.f32 %v12484_v59, %v5386_v12  ;;  %v5401_v45 = vsel %vm582_vm1, %v5395_v27, 0.0  ;;  %v5382_v46 = vpop.xlane.xlu1 %5381 }
0x2f2b   :  { %5402 = vadd.xlane.f32.xlu0 %v5401_v45  ;;  %v5373_v60 = vpop.xlane.xlu0 %5372  ;;  %v5388_v61 = vmul.f32 0.03125, %v5382_v46 }
0x2f2c   :  { %v5385_v10 = vmul.f32 0.03125, %v5373_v60  ;;  %v5398_v18 = vmul.f32 %v12515_v40, %v12515_v40 }
0x2f2d   :  { %v12521_v24 = vsub.f32 %v12492_v7, %v5388_v61 }
0x2f2e   :  { %v12524_v6 = vsub.f32 %v12487_v25, %v5385_v10  ;;  %v5410_v30 = vsel %vm582_vm1, %v5398_v18, 0.0 }
0x2f2f   :  { %5411 = vadd.xlane.f32.xlu1 %v5410_v30  ;;  %v5379_v57 = vpop.xlane.xlu0 %5378  ;;  %v5400_v28 = vmul.f32 %v12521_v24, %v12521_v24 }
0x2f30   :  { %v5387_v29 = vmul.f32 0.03125, %v5379_v57  ;;  %v5397_v63 = vmul.f32 %v12524_v6, %v12524_v6 }
0x2f31   :  { %v5416_v48 = vsel %vm582_vm1, %v5400_v28, 0.0  ;;  %v5653_v28 = vld [vmem:[%s13412_s27 + $0x70] sm:$0xff] }
0x2f32   :  { %v12532_v56 = vsub.f32 %v12495_v53, %v5387_v29  ;;  %v5407_v11 = vsel %vm582_vm1, %v5397_v63, 0.0  ;;  %v5654_v29 = vld [vmem:[%s13412_s27 + $0x78] sm:$0xff]  ;;  %v5652_v63 = vld [vmem:[%s13412_s27 + $0x68] sm:$0xff] }
0x2f33   :  { %5417 = vadd.xlane.f32.xlu1 %v5416_v48  ;;  %5408 = vadd.xlane.f32.xlu0 %v5407_v11  ;;  %v5650_v48 = vld [vmem:[%s13412_s27 + $0x58] sm:$0xff]  ;;  %v5649_v11 = vld [vmem:[%s13412_s27 + $0x50] sm:$0xff] }
0x2f34   :  { %v5399_v20 = vmul.f32 %v12532_v56, %v12532_v56  ;;  %9708 = vmatprep.subr.mxu0 %v5654_v29 }
0x2f35   :  { %9709 = vmatpush3.msra.mxu0 %v5654_v29 }
0x2f36   :  { %v5413_v55 = vsel %vm582_vm1, %v5399_v20, 0.0  ;;  %9710 = vmatprep.subr.mxu0 %v5653_v28  ;;  %v5648_v20 = vld [vmem:[%s13412_s27 + $0x48] sm:$0xff] }
0x2f37   :  { %5414 = vadd.xlane.f32.xlu0 %v5413_v55  ;;  %9711 = vmatpush3.msra.mxu0 %v5653_v28  ;;  %v5647_v55 = vld [vmem:[%s13412_s27 + $0x40] sm:$0xff] }
0x2f38   :  { %9712 = vmatprep.subr.mxu0 %v5652_v63 }
0x2f39   :  { %9713 = vmatpush3.msra.mxu0 %v5652_v63 }
0x2fb2   :  { %v5406_v47 = vpop.xlane.xlu1 %5405 }
0x2fb3   :  { %v5420_v58 = vmul.f32 0.03125, %v5406_v47  ;;  %v5642_v47 = vld [vmem:[%s13412_s27 + $0x18] sm:$0xff] }
0x2fb4   :  { %v5403_v49 = vpop.xlane.xlu0 %5402 }
0x2fb5   :  { %v5426_v32 = vadd.f32 1e-05, %v5420_v58  ;;  %v5419_v23 = vmul.f32 0.03125, %v5403_v49  ;;  %v5641_v58 = vld [vmem:[%s13412_s27 + $0x10] sm:$0xff]  ;;  %v5640_v49 = vld [vmem:[%s13412_s27 + $0x8] sm:$0xff] }
0x2fb7   :  { %10350 = vrsqrt.f32 %v5426_v32  ;;  %v5425_v38 = vadd.f32 1e-05, %v5419_v23  ;;  %v5639_v32 = vld [vmem:[%s13412_s27] sm:$0xff]  ;;  %v8645_v23 = vld [vmem:[#allocation12] ss:$0 sm:$0xff] }
0x2fb8   :  { %v5412_v17 = vpop.xlane.xlu1 %5411 }
0x2fb9   :  { %10352 = vrsqrt.f32 %v5425_v38  ;;  %v5422_v13 = vmul.f32 0.03125, %v5412_v17 }
0x2fbb   :  { %v5428_v43 = vadd.f32 1e-05, %v5422_v13 }
0x2fbc   :  { %v5418_v33 = vpop.xlane.xlu1 %5417  ;;  %v5409_v21 = vpop.xlane.xlu0 %5408 }
0x2fbd   :  { %10354 = vrsqrt.f32 %v5428_v43  ;;  %v5424_v22 = vmul.f32 0.03125, %v5418_v33  ;;  %v5421_v26 = vmul.f32 0.03125, %v5409_v21 }
0x2fbf   :  { %v5430_v34 = vadd.f32 1e-05, %v5424_v22  ;;  %v5427_v35 = vadd.f32 1e-05, %v5421_v26 }
0x2fc0   :  { %v5415_v1 = vpop.xlane.xlu0 %5414 }
0x2fc1   :  { %10356 = vrsqrt.f32 %v5430_v34  ;;  %v5423_v51 = vmul.f32 0.03125, %v5415_v1 }
0x2fc2   :  { %10358 = vrsqrt.f32 %v5427_v35 }
0x2fc3   :  { %v5429_v52 = vadd.f32 1e-05, %v5423_v51 }
0x2fc4   :  { %v10351_v3 = vpop.eup %10350 }
0x2fc5   :  { %v5438_v4 = vmul.f32 %v10351_v3, %v12504_v2  ;;  %10360 = vrsqrt.f32 %v5429_v52 }
0x2fc6   :  { %v10353_v42 = vpop.eup %10352 }
0x2fc7   :  { %v5437_v50 = vmul.f32 %v10353_v42, %v12507_v8  ;;  %v5450_v31 = vmul.f32 %v8643_v41, %v5438_v4 }
0x2fc9   :  { %v5449_v36 = vmul.f32 %v8643_v41, %v5437_v50  ;;  %v5462_v12 = vadd.f32 %v8644_v62, %v5450_v31 }
0x2fca   :  { %v10355_v5 = vpop.eup %10354 }
0x2fcb   :  { %v5461_v9 = vadd.f32 %v8644_v62, %v5449_v36  ;;  %v5440_v16 = vmul.f32 %v10355_v5, %v12515_v40 }
0x2fcd   :  { %9699 = vmatprep.mubr.msk.f32.mxu1 %vm582_vm1, %v5461_v9  ;;  %v5452_v46 = vmul.f32 %v8643_v41, %v5440_v16 }
0x2fce   :  { %v10357_v27 = vpop.eup %10356  ;;  %9700 = vmatmul.mubr.msk.f32.vlgmr.msra.gmra.mxu1 %vm582_vm1, %v5462_v12 }
0x2fcf   :  { %v10359_v45 = vpop.eup %10358  ;;  %v5442_v8 = vmul.f32 %v10357_v27, %v12521_v24  ;;  %v5464_v30 = vadd.f32 %v8644_v62, %v5452_v46 }
0x2fd0   :  { %v5439_v2 = vmul.f32 %v10359_v45, %v12524_v6 }
0x2fd1   :  { %v5454_v40 = vmul.f32 %v8643_v41, %v5442_v8 }
0x2fd2   :  { %v10361_v60 = vpop.eup %10360  ;;  %v5451_v61 = vmul.f32 %v8643_v41, %v5439_v2 }
0x2fd3   :  { %v5441_v10 = vmul.f32 %v10361_v60, %v12532_v56  ;;  %v5466_v24 = vadd.f32 %v8644_v62, %v5454_v40  ;;  %v5651_v56 = vld [vmem:[%s13412_s27 + $0x60] sm:$0xff] }
0x2fd4   :  { %v5463_v18 = vadd.f32 %v8644_v62, %v5451_v61  ;;  %9714 = vmatprep.subr.mxu0 %v5651_v56 }
0x2fd5   :  { %v5453_v57 = vmul.f32 %v8643_v41, %v5441_v10  ;;  %9715 = vmatpush3.msra.mxu0 %v5651_v56 }
0x2fd6   :  { %9702 = vmatprep.mubr.msk.f32.mxu1 %vm582_vm1, %v5463_v18  ;;  %9716 = vmatprep.subr.mxu0 %v5650_v48 }
0x2fd7   :  { %9703 = vmatmul.mubr.msk.f32.gmra.mxu1 %vm582_vm1, %v5464_v30  ;;  %v5465_v6 = vadd.f32 %v8644_v62, %v5453_v57  ;;  %9717 = vmatpush3.msra.mxu0 %v5650_v48 }
0x2fd8   :  { %9718 = vmatprep.subr.mxu0 %v5649_v11 }
0x2fd9   :  { %9705 = vmatprep.mubr.msk.f32.mxu1 %vm582_vm1, %v5465_v6  ;;  %9719 = vmatpush3.msra.mxu0 %v5649_v11 }
0x2fda   :  { %9720 = vmatprep.subr.mxu0 %v5648_v20 }
0x2fdb   :  { %9706 = vmatmul.mubr.msk.f32.gmra.mxu1 %vm582_vm1, %v5466_v24  ;;  %9721 = vmatpush3.msra.mxu0 %v5648_v20 }
0x2fdc   :  { %9722 = vmatprep.subr.mxu0 %v5647_v55 }
0x2fdd   :  { %9723 = vmatpush3.msra.mxu0 %v5647_v55 }
0x2fde   :  { %9724 = vmatprep.subr.mxu0 %v5646_v44 }
0x2fdf   :  { %9725 = vmatpush3.msra.mxu0 %v5646_v44 }
0x2fe0   :  { %9726 = vmatprep.subr.mxu0 %v5645_v37 }
0x2fe1   :  { %9727 = vmatpush3.msra.mxu0 %v5645_v37  ;;  %v8658_v37 = vld [vmem:[#allocation14] ss:$0 sm:$0xff] }
0x2fe2   :  { %9728 = vmatprep.subr.mxu0 %v5644_v14 }
0x2fe3   :  { %9729 = vmatpush3.msra.mxu0 %v5644_v14 }
0x2fe4   :  { %9730 = vmatprep.subr.mxu0 %v5643_v15 }
0x2fe5   :  { %9731 = vmatpush3.msra.mxu0 %v5643_v15 }
0x2fe6   :  { %9732 = vmatprep.subr.mxu0 %v5642_v47 }
0x2fe7   :  { %9733 = vmatpush3.msra.mxu0 %v5642_v47 }
0x2fe8   :  { %9734 = vmatprep.subr.mxu0 %v5641_v58 }
0x2fe9   :  { %9735 = vmatpush3.msra.mxu0 %v5641_v58 }
0x2fea   :  { %9736 = vmatprep.subr.mxu0 %v5640_v49 }
0x2feb   :  { %9737 = vmatpush3.msra.mxu0 %v5640_v49 }
0x2fec   :  { %9738 = vmatprep.subr.mxu0 %v5639_v32 }
0x2fed   :  { %9739 = vmatpush3.msra.mxu0 %v5639_v32 }
0x308e   :  { %v9701_v38 = vpop.f32.mrf.mxu1 }
0x308f   :  { %v5568_v17 = vadd.f32 %v9701_v38, %v8645_v23 }
0x3090   :  { %v5562_v13 = vpop.f32.mrf.mxu1 }
0x3091   :  { %v8653_v43 = vmul.f32 -1.702, %v5568_v17  ;;  %v5563_v33 = vadd.f32 %v8645_v23, %v5562_v13 }
0x3093   :  { %v5605_v21 = vmul.f32 1.442695, %v8653_v43  ;;  %v8652_v22 = vmul.f32 -1.702, %v5563_v33 }
0x3095   :  { %10362 = vpow2.f32 %v5605_v21  ;;  %v5603_v26 = vmul.f32 1.442695, %v8652_v22 }
0x3097   :  { %10364 = vpow2.f32 %v5603_v26  ;;  %v9704_v34 = vpop.f32.mrf.mxu1 }
0x3098   :  { %v5578_v35 = vadd.f32 %v9704_v34, %v8645_v23 }
0x3099   :  { %v5572_v1 = vpop.f32.mrf.mxu1 }
0x309a   :  { %v8655_v51 = vmul.f32 -1.702, %v5578_v35  ;;  %v5573_v52 = vadd.f32 %v8645_v23, %v5572_v1 }
0x309b   :  { %v9707_v3 = vpop.f32.mrf.mxu1 }
0x309c   :  { %v5609_v4 = vmul.f32 1.442695, %v8655_v51  ;;  %v8654_v41 = vmul.f32 -1.702, %v5573_v52  ;;  %v5588_v42 = vadd.f32 %v9707_v3, %v8645_v23 }
0x309d   :  { %v5582_v50 = vpop.f32.mrf.mxu1 }
0x309e   :  { %10366 = vpow2.f32 %v5609_v4  ;;  %v5607_v31 = vmul.f32 1.442695, %v8654_v41  ;;  %v8657_v62 = vmul.f32 -1.702, %v5588_v42  ;;  %v5583_v36 = vadd.f32 %v8645_v23, %v5582_v50 }
0x30a0   :  { %10368 = vpow2.f32 %v5607_v31  ;;  %v5613_v5 = vmul.f32 1.442695, %v8657_v62  ;;  %v8656_v9 = vmul.f32 -1.702, %v5583_v36 }
0x30a2   :  { %v10363_v12 = vpop.eup %10362  ;;  %10370 = vpow2.f32 %v5613_v5  ;;  %v5611_v16 = vmul.f32 1.442695, %v8656_v9 }
0x30a3   :  { %v5616_v27 = vadd.f32 1.0, %v10363_v12 }
0x30a4   :  { %v10365_v45 = vpop.eup %10364  ;;  %10372 = vpow2.f32 %v5611_v16 }
0x30a5   :  { %v5615_v2 = vadd.f32 1.0, %v10365_v45  ;;  %10374 = vrcp.f32 %v5616_v27 }
0x30a7   :  { %10376 = vrcp.f32 %v5615_v2 }
0x30ab   :  { %v10367_v46 = vpop.eup %10366 }
0x30ac   :  { %v5618_v8 = vadd.f32 1.0, %v10367_v46 }
0x30ad   :  { %v10369_v60 = vpop.eup %10368 }
0x30ae   :  { %v5617_v61 = vadd.f32 1.0, %v10369_v60  ;;  %10378 = vrcp.f32 %v5618_v8 }
0x30af   :  { %v10371_v10 = vpop.eup %10370 }
0x30b0   :  { %10380 = vrcp.f32 %v5617_v61  ;;  %v5620_v18 = vadd.f32 1.0, %v10371_v10 }
0x30b1   :  { %v10373_v30 = vpop.eup %10372 }
0x30b2   :  { %v5619_v57 = vadd.f32 1.0, %v10373_v30  ;;  %v10375_v40 = vpop.eup %10374  ;;  %10382 = vrcp.f32 %v5620_v18 }
0x30b3   :  { %v5634_v29 = vmul.f32 %v10375_v40, %v5568_v17 }
0x30b4   :  { %v10377_v6 = vpop.eup %10376  ;;  %10384 = vrcp.f32 %v5619_v57 }
0x30b5   :  { %v5633_v24 = vmul.f32 %v10377_v6, %v5563_v33 }
0x30b7   :  { %9740 = vmatprep.mubr.f32.mxu0 %v5633_v24 }
0x30b8   :  { %9741 = vmatmul.mubr.f32.vlgmr.msra.gmra.mxu0 %v5634_v29 }
0x30bb   :  { %v10379_v28 = vpop.eup %10378 }
0x30bc   :  { %v5636_v48 = vmul.f32 %v10379_v28, %v5578_v35 }
0x30bd   :  { %v10381_v63 = vpop.eup %10380 }
0x30be   :  { %v5635_v56 = vmul.f32 %v10381_v63, %v5573_v52  ;;  %v5870_v63 = vld [vmem:[%s13413_s30 + $0x18] sm:$0xff] }
0x30bf   :  { %v10383_v11 = vpop.eup %10382  ;;  %9749 = vmatprep.subr.mxu1 %v5870_v63 }
0x30c0   :  { %9743 = vmatprep.mubr.f32.mxu0 %v5635_v56  ;;  %v5638_v44 = vmul.f32 %v10383_v11, %v5588_v42  ;;  %v5869_v56 = vld [vmem:[%s13413_s30 + $0x10] sm:$0xff]  ;;  %9750 = vmatpush3.msra.mxu1 %v5870_v63  ;;  %v5867_v11 = vld [vmem:[%s13413_s30] sm:$0xff] }
0x30c1   :  { %v10385_v20 = vpop.eup %10384  ;;  %9744 = vmatmul.mubr.f32.gmra.mxu0 %v5636_v48  ;;  %v5868_v48 = vld [vmem:[%s13413_s30 + $0x8] sm:$0xff]  ;;  %9751 = vmatprep.subr.mxu1 %v5869_v56 }
0x30c2   :  { %v5637_v55 = vmul.f32 %v10385_v20, %v5583_v36  ;;  %9752 = vmatpush3.msra.mxu1 %v5869_v56 }
0x30c3   :  { %9753 = vmatprep.subr.mxu1 %v5868_v48 }
0x30c4   :  { %9746 = vmatprep.mubr.f32.mxu0 %v5637_v55  ;;  %9754 = vmatpush3.msra.mxu1 %v5868_v48 }
0x30c5   :  { %9747 = vmatmul.mubr.f32.gmra.mxu0 %v5638_v44  ;;  %9755 = vmatprep.subr.mxu1 %v5867_v11 }
0x30c6   :  { %9756 = vmatpush3.msra.mxu1 %v5867_v11 }
0x3178   :  { %v9742_v14 = vpop.f32.mrf.mxu0 }
0x3179   :  { %v5734_v15 = vadd.f32 %v9742_v14, %v8658_v37 }
0x317a   :  { %v5728_v47 = vpop.f32.mrf.mxu0 }
0x317b   :  { %v12572_v58 = vadd.f32 %v5734_v15, %v12474_v19  ;;  %v5729_v49 = vadd.f32 %v8658_v37, %v5728_v47 }
0x317d   :  { %v12575_v32 = vadd.f32 %v5729_v49, %v12477_v39  ;;  %v5768_v23 = vsel %vm582_vm1, %v12572_v58, 0.0 }
0x317e   :  { %5769 = vadd.xlane.f32.xlu1 %v5768_v23 }
0x317f   :  { %v5765_v38 = vsel %vm582_vm1, %v12575_v32, 0.0 }
0x3180   :  { %5766 = vadd.xlane.f32.xlu0 %v5765_v38 }
0x3181   :  { %v9745_v17 = vpop.f32.mrf.mxu0 }
0x3182   :  { %v5744_v13 = vadd.f32 %v9745_v17, %v8658_v37 }
0x3183   :  { %v5738_v43 = vpop.f32.mrf.mxu0 }
0x3184   :  { %v12582_v33 = vadd.f32 %v5744_v13, %v12484_v59  ;;  %v5739_v19 = vadd.f32 %v8658_v37, %v5738_v43 }
0x3185   :  { %v9748_v21 = vpop.f32.mrf.mxu0 }
0x3186   :  { %v12585_v22 = vadd.f32 %v5739_v19, %v12487_v25  ;;  %v5754_v39 = vadd.f32 %v9748_v21, %v8658_v37  ;;  %v5774_v26 = vsel %vm582_vm1, %v12582_v33, 0.0 }
0x3187   :  { %5775 = vadd.xlane.f32.xlu1 %v5774_v26  ;;  %v5748_v34 = vpop.f32.mrf.mxu0 }
0x3188   :  { %v12590_v35 = vadd.f32 %v5754_v39, %v12492_v7  ;;  %v5749_v1 = vadd.f32 %v8658_v37, %v5748_v34  ;;  %v5771_v51 = vsel %vm582_vm1, %v12585_v22, 0.0 }
0x3189   :  { %5772 = vadd.xlane.f32.xlu0 %v5771_v51 }
0x318a   :  { %v12595_v59 = vadd.f32 %v5749_v1, %v12495_v53  ;;  %v5780_v25 = vsel %vm582_vm1, %v12590_v35, 0.0 }
0x318b   :  { %5781 = vadd.xlane.f32.xlu1 %v5780_v25  ;;  %v8659_v25 = vld [vmem:[#allocation15] ss:$0 sm:$0xff] }
0x318c   :  { %v5777_v52 = vsel %vm582_vm1, %v12595_v59, 0.0 }
0x318d   :  { %5778 = vadd.xlane.f32.xlu0 %v5777_v52 }
0x3207   :  { %v5770_v3 = vpop.xlane.xlu1 %5769 }
0x3208   :  { %v5784_v4 = vmul.f32 0.03125, %v5770_v3 }
0x3209   :  { %v5767_v7 = vpop.xlane.xlu0 %5766 }
0x320a   :  { %v12602_v41 = vsub.f32 %v12572_v58, %v5784_v4  ;;  %v5783_v42 = vmul.f32 0.03125, %v5767_v7  ;;  %v8660_v7 = vld [vmem:[#allocation17] ss:$0 sm:$0xff] }
0x320c   :  { %v12605_v50 = vsub.f32 %v12575_v32, %v5783_v42  ;;  %v5796_v53 = vmul.f32 %v12602_v41, %v12602_v41 }
0x320e   :  { %v5804_v31 = vsel %vm582_vm1, %v5796_v53, 0.0  ;;  %v5795_v62 = vmul.f32 %v12605_v50, %v12605_v50 }
0x320f   :  { %5805 = vadd.xlane.f32.xlu1 %v5804_v31 }
0x3210   :  { %v5776_v36 = vpop.xlane.xlu1 %5775  ;;  %v5801_v5 = vsel %vm582_vm1, %v5795_v62, 0.0 }
0x3211   :  { %v5786_v9 = vmul.f32 0.03125, %v5776_v36  ;;  %5802 = vadd.xlane.f32.xlu0 %v5801_v5 }
0x3212   :  { %v5773_v12 = vpop.xlane.xlu0 %5772 }
0x3213   :  { %v12614_v16 = vsub.f32 %v12582_v33, %v5786_v9  ;;  %v5785_v27 = vmul.f32 0.03125, %v5773_v12 }
0x3214   :  { %v5782_v45 = vpop.xlane.xlu1 %5781 }
0x3215   :  { %v12617_v2 = vsub.f32 %v12585_v22, %v5785_v27  ;;  %v5788_v46 = vmul.f32 0.03125, %v5782_v45  ;;  %v5798_v8 = vmul.f32 %v12614_v16, %v12614_v16 }
0x3216   :  { %v5779_v60 = vpop.xlane.xlu0 %5778 }
0x3217   :  { %v12622_v61 = vsub.f32 %v12590_v35, %v5788_v46  ;;  %v5787_v10 = vmul.f32 0.03125, %v5779_v60  ;;  %v5810_v18 = vsel %vm582_vm1, %v5798_v8, 0.0  ;;  %v5797_v30 = vmul.f32 %v12617_v2, %v12617_v2 }
0x3218   :  { %5811 = vadd.xlane.f32.xlu1 %v5810_v18 }
0x3219   :  { %v12628_v57 = vsub.f32 %v12595_v59, %v5787_v10  ;;  %v5807_v40 = vsel %vm582_vm1, %v5797_v30, 0.0  ;;  %v5800_v6 = vmul.f32 %v12622_v61, %v12622_v61 }
0x321a   :  { %5808 = vadd.xlane.f32.xlu0 %v5807_v40  ;;  %v8661_v40 = vld [vmem:[#allocation18] ss:$0 sm:$0xff] }
0x321b   :  { %v5816_v24 = vsel %vm582_vm1, %v5800_v6, 0.0  ;;  %v5799_v29 = vmul.f32 %v12628_v57, %v12628_v57 }
0x321c   :  { %5817 = vadd.xlane.f32.xlu1 %v5816_v24 }
0x321d   :  { %v5813_v28 = vsel %vm582_vm1, %v5799_v29, 0.0 }
0x321e   :  { %5814 = vadd.xlane.f32.xlu0 %v5813_v28 }
0x3298   :  { %v5806_v20 = vpop.xlane.xlu1 %5805 }
0x3299   :  { %v5820_v55 = vmul.f32 0.03125, %v5806_v20 }
0x329a   :  { %v5803_v44 = vpop.xlane.xlu0 %5802 }
0x329b   :  { %v5826_v37 = vadd.f32 1e-05, %v5820_v55  ;;  %v5819_v14 = vmul.f32 0.03125, %v5803_v44 }
0x329d   :  { %10386 = vrsqrt.f32 %v5826_v37  ;;  %v5825_v15 = vadd.f32 1e-05, %v5819_v14 }
0x329f   :  { %10388 = vrsqrt.f32 %v5825_v15 }
0x32a1   :  { %v5812_v47 = vpop.xlane.xlu1 %5811 }
0x32a2   :  { %v5822_v49 = vmul.f32 0.03125, %v5812_v47 }
0x32a3   :  { %v5809_v23 = vpop.xlane.xlu0 %5808 }
0x32a4   :  { %v5828_v38 = vadd.f32 1e-05, %v5822_v49  ;;  %v5821_v17 = vmul.f32 0.03125, %v5809_v23 }
0x32a5   :  { %v5818_v13 = vpop.xlane.xlu1 %5817 }
0x32a6   :  { %10390 = vrsqrt.f32 %v5828_v38  ;;  %v5827_v43 = vadd.f32 1e-05, %v5821_v17  ;;  %v5824_v19 = vmul.f32 0.03125, %v5818_v13 }
0x32a7   :  { %v5815_v21 = vpop.xlane.xlu0 %5814 }
0x32a8   :  { %10392 = vrsqrt.f32 %v5827_v43  ;;  %v5830_v39 = vadd.f32 1e-05, %v5824_v19  ;;  %v5823_v26 = vmul.f32 0.03125, %v5815_v21 }
0x32aa   :  { %v10387_v34 = vpop.eup %10386  ;;  %10394 = vrsqrt.f32 %v5830_v39  ;;  %v5829_v1 = vadd.f32 1e-05, %v5823_v26 }
0x32ab   :  { %v5838_v51 = vmul.f32 %v10387_v34, %v12602_v41  ;;  %v12722_v34 = vld [vmem:[%s11362_s21 + $0x8] sm:$0xff] }
0x32ac   :  { %v10389_v52 = vpop.eup %10388  ;;  %10396 = vrsqrt.f32 %v5829_v1 }
0x32ad   :  { %v5837_v3 = vmul.f32 %v10389_v52, %v12605_v50  ;;  %v5850_v4 = vmul.f32 %v8659_v25, %v5838_v51  ;;  %v12726_v52 = vld [vmem:[%s11362_s21] sm:$0xff] }
0x32af   :  { %v5849_v42 = vmul.f32 %v8659_v25, %v5837_v3  ;;  %v5862_v31 = vadd.f32 %v8660_v7, %v5850_v4 }
0x32b1   :  { %v5861_v53 = vadd.f32 %v8660_v7, %v5849_v42 }
0x32b3   :  { %v10391_v62 = vpop.eup %10390  ;;  %9757 = vmatprep.mubr.msk.f32.mxu1 %vm582_vm1, %v5861_v53  ;;  %v12731_v53 = vld [vmem:[%s11362_s21 + $0x18] sm:$0xff] }
0x32b4   :  { %9758 = vmatmul.mubr.msk.f32.vlgmr.msra.gmra.mxu1 %vm582_vm1, %v5862_v31  ;;  %v5840_v36 = vmul.f32 %v10391_v62, %v12614_v16 }
0x32b5   :  { %v10393_v5 = vpop.eup %10392 }
0x32b6   :  { %v5839_v41 = vmul.f32 %v10393_v5, %v12617_v2  ;;  %v5852_v12 = vmul.f32 %v8659_v25, %v5840_v36 }
0x32b7   :  { %v10395_v9 = vpop.eup %10394 }
0x32b8   :  { %v5851_v27 = vmul.f32 %v8659_v25, %v5839_v41  ;;  %v5842_v50 = vmul.f32 %v10395_v9, %v12622_v61  ;;  %v5864_v60 = vadd.f32 %v8660_v7, %v5852_v12  ;;  %v12736_v12 = vld [vmem:[%s11362_s21 + $0x10] sm:$0xff] }
0x32b9   :  { %v10397_v45 = vpop.eup %10396 }
0x32ba   :  { %v5863_v46 = vadd.f32 %v8660_v7, %v5851_v27  ;;  %v5841_v8 = vmul.f32 %v10397_v45, %v12628_v57  ;;  %v5854_v10 = vmul.f32 %v8659_v25, %v5842_v50  ;;  %v12740_v50 = vld [vmem:[%s11362_s21 + $0x28] sm:$0xff] }
0x32bc   :  { %9760 = vmatprep.mubr.msk.f32.mxu1 %vm582_vm1, %v5863_v46  ;;  %v5853_v18 = vmul.f32 %v8659_v25, %v5841_v8  ;;  %v5866_v30 = vadd.f32 %v8660_v7, %v5854_v10  ;;  %v12746_v10 = vld [vmem:[%s11362_s21 + $0x20] sm:$0xff]  ;;  %s13414_s21 = sld [smem:[#allocation83_spill]] }
0x32bd   :  { %9761 = vmatmul.mubr.msk.f32.gmra.mxu1 %vm582_vm1, %v5864_v60 }
0x32be   :  { %v5865_v16 = vadd.f32 %v8660_v7, %v5853_v18 }
0x32c0   :  { %9763 = vmatprep.mubr.msk.f32.mxu1 %vm582_vm1, %v5865_v16 }
0x32c1   :  { %9764 = vmatmul.mubr.msk.f32.gmra.mxu1 %vm582_vm1, %v5866_v30 }
0x3374   :  { %v9759_v2 = vpop.f32.mrf.mxu1 }
0x3375   :  { %v12663_v48 = vadd.f32 %v9759_v2, %v8661_v40 }
0x3376   :  { %v5962_v61 = vpop.f32.mrf.mxu1 }
0x3377   :  { %v12653_v6 = vadd.f32 %v8661_v40, %v5962_v61 }
0x3379   :  { %9778 = vmatprep.mubr.msk.f32.mxu1 %vm771_vm3, %v12653_v6 }
0x337d   :  { %v9762_v57 = vpop.f32.mrf.mxu1 }
0x337e   :  { %v12667_v11 = vadd.f32 %v9762_v57, %v8661_v40 }
0x337f   :  { %v5972_v24 = vpop.f32.mrf.mxu1 }
0x3380   :  { %v12673_v20 = vadd.f32 %v8661_v40, %v5972_v24 }
0x3381   :  { %v9765_v29 = vpop.f32.mrf.mxu1 }
0x3382   :  { %v12657_v28 = vadd.f32 %v9765_v29, %v8661_v40 }
0x3383   :  { %v5982_v63 = vpop.f32.mrf.mxu1 }
0x3384   :  { %v12659_v56 = vadd.f32 %v8661_v40, %v5982_v63  ;;  %6007 = vrot.lane.b32.xlu0 %v12657_v28, %s11018_s6 }
0x3386   :  { %6005 = vrot.lane.b32.xlu1 %v12659_v56, %s11018_s6 }
0x3388   :  { %5999 = vrot.lane.b32.xlu0 %v12663_v48, %s11018_s6 }
0x338a   :  { %6003 = vrot.lane.b32.xlu1 %v12667_v11, %s11018_s6 }
0x338c   :  { %6216 = vrot.lane.b32.xlu0 %v12657_v28, %s11019_s15 }
0x338e   :  { %6001 = vrot.lane.b32.xlu1 %v12673_v20, %s11018_s6 }
0x3390   :  { %6212 = vrot.lane.b32.xlu0 %v12667_v11, %s11019_s15 }
0x3392   :  { %5997 = vrot.lane.b32.xlu1 %v12653_v6, %s11018_s6  ;;  %s13415_s6 = sld [smem:[#allocation85_spill]] }
0x3394   :  { %6359 = vrot.lane.b32.xlu0 %v12657_v28, %s11020_s4 }
0x3396   :  { %6210 = vrot.lane.b32.xlu1 %v12673_v20, %s11019_s15 }
0x339a   :  { %6208 = vrot.lane.b32.xlu1 %v12663_v48, %s11019_s15 }
0x339e   :  { %6206 = vrot.lane.b32.xlu1 %v12653_v6, %s11019_s15 }
0x33a2   :  { %6214 = vrot.lane.b32.xlu1 %v12659_v56, %s11019_s15  ;;  %s13416_s15 = sld [smem:[#allocation86_spill]] }
0x33a6   :  { %6357 = vrot.lane.b32.xlu1 %v12659_v56, %s11020_s4 }
0x33f6   :  { %v6008_v55 = vpop.permute.xlu0 %6007 }
0x33f7   :  { %9766 = vmatprep.subr.msk.mxu1 %vm771_vm3, %v6008_v55 }
0x33f8   :  { %9767 = vmatpush3.xpose.msk.msra.mxu1 %vm771_vm3, %v6008_v55  ;;  %v6006_v44 = vpop.permute.xlu1 %6005 }
0x33f9   :  { %9768 = vmatprep.subr.msk.mxu1 %vm771_vm3, %v6006_v44 }
0x33fa   :  { %v6000_v37 = vpop.permute.xlu0 %5999 }
0x33fc   :  { %9769 = vmatpush3.xpose.msk.msra.mxu1 %vm771_vm3, %v6006_v44  ;;  %v6004_v14 = vpop.permute.xlu1 %6003 }
0x33fd   :  { %9770 = vmatprep.subr.msk.mxu1 %vm771_vm3, %v6004_v14 }
0x33fe   :  { %v6217_v15 = vpop.permute.xlu0 %6216 }
0x33ff   :  { %9787 = vmatprep.subr.mxu0 %v6217_v15 }
0x3400   :  { %9771 = vmatpush3.xpose.msk.msra.mxu1 %vm771_vm3, %v6004_v14  ;;  %9788 = vmatpush3.msra.mxu0 %v6217_v15  ;;  %v6002_v47 = vpop.permute.xlu1 %6001 }
0x3401   :  { %9772 = vmatprep.subr.msk.mxu1 %vm771_vm3, %v6002_v47 }
0x3402   :  { %v6213_v43 = vpop.permute.xlu0 %6212 }
0x3404   :  { %9773 = vmatpush3.xpose.msk.msra.mxu1 %vm771_vm3, %v6002_v47  ;;  %v5998_v49 = vpop.permute.xlu1 %5997 }
0x3405   :  { %9774 = vmatprep.subr.msk.mxu1 %vm771_vm3, %v6000_v37 }
0x3406   :  { %v12717_v19 = vpop.permute.xlu0 %6359 }
0x3408   :  { %9775 = vmatpush3.xpose.msk.msra.mxu1 %vm771_vm3, %v6000_v37  ;;  %v6211_v23 = vpop.permute.xlu1 %6210 }
0x3409   :  { %9776 = vmatprep.subr.msk.mxu1 %vm771_vm3, %v5998_v49 }
0x340c   :  { %9777 = vmatpush3.xpose.msk.msra.mxu1 %vm771_vm3, %v5998_v49  ;;  %v6209_v38 = vpop.permute.xlu1 %6208 }
0x340f   :  { %9779 = vmatmul.mubr.msk.f32.vlgmr.msra.gmra.mxu1 %vm771_vm3, %v12663_v48 }
0x3410   :  { %9781 = vmatprep.mubr.msk.f32.mxu1 %vm771_vm3, %v12673_v20  ;;  %v6207_v17 = vpop.permute.xlu1 %6206 }
0x3413   :  { %9782 = vmatmul.mubr.msk.f32.gmra.mxu1 %vm771_vm3, %v12667_v11 }
0x3414   :  { %9784 = vmatprep.mubr.msk.f32.mxu1 %vm771_vm3, %v12659_v56  ;;  %v6215_v13 = vpop.permute.xlu1 %6214 }
0x3415   :  { %9789 = vmatprep.subr.mxu0 %v6215_v13 }
0x3416   :  { %9790 = vmatpush3.msra.mxu0 %v6215_v13 }
0x3417   :  { %9785 = vmatmul.mubr.msk.f32.gmra.mxu1 %vm771_vm3, %v12657_v28  ;;  %9791 = vmatprep.subr.mxu0 %v6213_v43 }
0x3418   :  { %9792 = vmatpush3.msra.mxu0 %v6213_v43  ;;  %v12755_v2 = vpop.permute.xlu1 %6357 }
0x3419   :  { %9793 = vmatprep.subr.mxu0 %v6211_v23 }
0x341a   :  { %9794 = vmatpush3.msra.mxu0 %v6211_v23 }
0x341b   :  { %9795 = vmatprep.subr.mxu0 %v6209_v38 }
0x341c   :  { %9796 = vmatpush3.msra.mxu0 %v6209_v38 }
0x341d   :  { %9797 = vmatprep.subr.mxu0 %v6207_v17 }
0x341e   :  { %9798 = vmatpush3.msra.mxu0 %v6207_v17 }
0x341f   :  { %9808 = vmatprep.subr.msk.mxu0 %vm771_vm3, %v12717_v19 }
0x34cf   :  { %v9780_v21 = vpop.f32.mrf.mxu1 }
0x34d0   :  { %v6129_v39 = vmul.f32 0.35355338, %v9780_v21 }
0x34d1   :  { %v6099_v26 = vpop.f32.mrf.mxu1 }
0x34d2   :  { %v6135_v1 = vadd.f32 %v12722_v34, %v6129_v39  ;;  %v6128_v51 = vmul.f32 0.35355338, %v6099_v26 }
0x34d3   :  { %v9783_v25 = vpop.f32.mrf.mxu1 }
0x34d4   :  { %v6134_v3 = vadd.f32 %v12726_v52, %v6128_v51  ;;  %v6131_v4 = vmul.f32 0.35355338, %v9783_v25  ;;  %v6143_v7 = vsel %vm3883_vm10, %v6135_v1, -inf }
0x34d5   :  { %6144 = vmax.xlane.f32.xlu1 %v6143_v7  ;;  %v6109_v42 = vpop.f32.mrf.mxu1 }
0x34d6   :  { %v6137_v31 = vadd.f32 %v12731_v53, %v6131_v4  ;;  %v6130_v62 = vmul.f32 0.35355338, %v6109_v42  ;;  %v6140_v36 = vsel %vm3883_vm10, %v6134_v3, -inf }
0x34d7   :  { %6141 = vmax.xlane.f32.xlu0 %v6140_v36  ;;  %v9786_v5 = vpop.f32.mrf.mxu1 }
0x34d8   :  { %v6133_v41 = vmul.f32 0.35355338, %v9786_v5  ;;  %v6136_v27 = vadd.f32 %v12736_v12, %v6130_v62  ;;  %v6149_v8 = vsel %vm3883_vm10, %v6137_v31, -inf }
0x34d9   :  { %v6119_v9 = vpop.f32.mrf.mxu1 }
0x34da   :  { %v6139_v45 = vadd.f32 %v12740_v50, %v6133_v41  ;;  %v6132_v46 = vmul.f32 0.35355338, %v6119_v9  ;;  %v6146_v16 = vsel %vm3883_vm10, %v6136_v27, -inf }
0x34db   :  { %6150 = vmax.xlane.f32.xlu0 %v6149_v8 }
0x34dc   :  { %v6155_v60 = vsel %vm3883_vm10, %v6139_v45, -inf  ;;  %v6138_v18 = vadd.f32 %v12746_v10, %v6132_v46 }
0x34dd   :  { %6156 = vmax.xlane.f32.xlu1 %v6155_v60 }
0x34de   :  { %v6152_v30 = vsel %vm3883_vm10, %v6138_v18, -inf }
0x34df   :  { %6147 = vmax.xlane.f32.xlu0 %v6146_v16 }
0x34e3   :  { %6153 = vmax.xlane.f32.xlu0 %v6152_v30 }
0x34ee   :  { %6353 = vrot.lane.b32.xlu1 %v12673_v20, %s11020_s4 }
0x34f9   :  { %6355 = vrot.lane.b32.xlu0 %v12667_v11, %s11020_s4 }
0x355e   :  { %v6145_v40 = vpop.xlane.xlu1 %6144 }
0x355f   :  { %v6159_v61 = vsub.f32 %v6135_v1, %v6145_v40 }
0x3560   :  { %v6142_v57 = vpop.xlane.xlu0 %6141 }
0x3561   :  { %v6166_v24 = vmul.f32 1.442695, %v6159_v61  ;;  %v6158_v29 = vsub.f32 %v6134_v3, %v6142_v57 }
0x3563   :  { %10398 = vpow2.f32 %v6166_v24  ;;  %v6164_v63 = vmul.f32 1.442695, %v6158_v29 }
0x3564   :  { %v6151_v55 = vpop.xlane.xlu0 %6150 }
0x3565   :  { %10400 = vpow2.f32 %v6164_v63  ;;  %v6161_v44 = vsub.f32 %v6137_v31, %v6151_v55 }
0x3566   :  { %v6157_v51 = vpop.xlane.xlu1 %6156 }
0x3567   :  { %v6170_v37 = vmul.f32 1.442695, %v6161_v44  ;;  %v6163_v25 = vsub.f32 %v6139_v45, %v6157_v51 }
0x3568   :  { %v6148_v14 = vpop.xlane.xlu0 %6147 }
0x3569   :  { %10402 = vpow2.f32 %v6170_v37  ;;  %v6160_v15 = vsub.f32 %v6136_v27, %v6148_v14  ;;  %v6174_v4 = vmul.f32 1.442695, %v6163_v25 }
0x356a   :  { %v6354_v36 = vpop.permute.xlu1 %6353 }
0x356b   :  { %v6168_v47 = vmul.f32 1.442695, %v6160_v15 }
0x356c   :  { %v6154_v26 = vpop.xlane.xlu0 %6153 }
0x356d   :  { %10404 = vpow2.f32 %v6168_v47  ;;  %v6162_v1 = vsub.f32 %v6138_v18, %v6154_v26 }
0x356f   :  { %v6172_v3 = vmul.f32 1.442695, %v6162_v1 }
0x3570   :  { %v10399_v49 = vpop.eup %10398  ;;  %v6356_v5 = vpop.permute.xlu0 %6355 }
0x3571   :  { %v6179_v23 = vsel %vm3883_vm10, %v10399_v49, 0.0  ;;  %10406 = vpow2.f32 %v6172_v3 }
0x3572   :  { %v10401_v38 = vpop.eup %10400  ;;  %6180 = vadd.xlane.f32.xlu1 %v6179_v23  ;;  %10408 = vpow2.f32 %v6174_v4 }
0x3573   :  { %v6176_v17 = vsel %vm3883_vm10, %v10401_v38, 0.0 }
0x3574   :  { %6177 = vadd.xlane.f32.xlu0 %v6176_v17 }
0x3576   :  { %v10403_v13 = vpop.eup %10402 }
0x3577   :  { %v6185_v43 = vsel %vm3883_vm10, %v10403_v13, 0.0 }
0x3578   :  { %6186 = vadd.xlane.f32.xlu1 %v6185_v43 }
0x357a   :  { %v10405_v21 = vpop.eup %10404 }
0x357b   :  { %v6182_v39 = vsel %vm3883_vm10, %v10405_v21, 0.0 }
0x357c   :  { %6183 = vadd.xlane.f32.xlu0 %v6182_v39 }
0x357e   :  { %v12765_v7 = vpop.eup %10406 }
0x357f   :  { %v6188_v42 = vsel %vm3883_vm10, %v12765_v7, 0.0  ;;  %v12769_v31 = vpop.eup %10408 }
0x3580   :  { %v6191_v62 = vsel %vm3883_vm10, %v12769_v31, 0.0 }
0x3589   :  { %6349 = vrot.lane.b32.xlu1 %v12653_v6, %s11020_s4 }
0x3592   :  { %6351 = vrot.lane.b32.xlu0 %v12663_v48, %s11020_s4  ;;  %s13417_s4 = sld [smem:[#allocation89_spill]] }
0x35ad   :  { %6189 = vadd.xlane.f32.xlu1 %v6188_v42 }
0x35b1   :  { %6192 = vadd.xlane.f32.xlu0 %v6191_v62 }
0x35be   :  { %6339 = vrot.lane.b32.xlu1 %v12663_v48, %s11021_s14 }
0x35c2   :  { %6343 = vrot.lane.b32.xlu1 %v12667_v11, %s11021_s14 }
0x35c6   :  { %6347 = vrot.lane.b32.xlu1 %v12657_v28, %s11021_s14 }
0x35c7   :  { %6337 = vrot.lane.b32.xlu0 %v12653_v6, %s11021_s14 }
0x35ca   :  { %6566 = vrot.lane.b32.xlu1 %v12659_v56, %s11022_s20 }
0x35cb   :  { %6341 = vrot.lane.b32.xlu0 %v12673_v20, %s11021_s14 }
0x35ce   :  { %6562 = vrot.lane.b32.xlu1 %v12673_v20, %s11022_s20 }
0x35cf   :  { %6345 = vrot.lane.b32.xlu0 %v12659_v56, %s11021_s14 }
0x35d2   :  { %6560 = vrot.lane.b32.xlu1 %v12663_v48, %s11022_s20 }
0x35d3   :  { %6568 = vrot.lane.b32.xlu0 %v12657_v28, %s11022_s20 }
0x35d6   :  { %6558 = vrot.lane.b32.xlu1 %v12653_v6, %s11022_s20 }
0x35d7   :  { %6564 = vrot.lane.b32.xlu0 %v12667_v11, %s11022_s20 }
0x35da   :  { %6709 = vrot.lane.b32.xlu1 %v12659_v56, %s11023_s16 }
0x35db   :  { %6711 = vrot.lane.b32.xlu0 %v12657_v28, %s11023_s16 }
0x35fb   :  { %v6181_v41 = vpop.xlane.xlu1 %6180 }
0x35fc   :  { %10410 = vrcp.f32 %v6181_v41 }
0x35fd   :  { %v6178_v9 = vpop.xlane.xlu0 %6177 }
0x35fe   :  { %10412 = vrcp.f32 %v6178_v9 }
0x3601   :  { %v6187_v27 = vpop.xlane.xlu1 %6186 }
0x3602   :  { %10414 = vrcp.f32 %v6187_v27 }
0x3605   :  { %v6184_v45 = vpop.xlane.xlu0 %6183  ;;  %v6350_v57 = vpop.permute.xlu1 %6349 }
0x3606   :  { %10416 = vrcp.f32 %v6184_v45 }
0x3609   :  { %v10411_v46 = vpop.eup %10410 }
0x360a   :  { %v6197_v18 = vmul.f32 %v10411_v46, %v10399_v49 }
0x360b   :  { %v10413_v8 = vpop.eup %10412 }
0x360c   :  { %v6195_v60 = vmul.f32 %v10413_v8, %v10401_v38 }
0x360e   :  { %9799 = vmatprep.mubr.msk.f32.mxu0 %vm3883_vm10, %v6195_v60 }
0x360f   :  { %9800 = vmatmul.mubr.msk.f32.vlgmr.msra.gmra.mxu0 %vm3883_vm10, %v6197_v18  ;;  %v10415_v16 = vpop.eup %10414 }
0x3610   :  { %9809 = vmatpush3.xpose.msk.msra.mxu0 %vm771_vm3, %v12717_v19  ;;  %v6201_v61 = vmul.f32 %v10415_v16, %v10403_v13  ;;  %v6352_v19 = vpop.permute.xlu0 %6351 }
0x3611   :  { %9810 = vmatprep.subr.msk.mxu0 %vm771_vm3, %v12755_v2 }
0x3613   :  { %v10417_v30 = vpop.eup %10416 }
0x3614   :  { %9811 = vmatpush3.xpose.msk.msra.mxu0 %vm771_vm3, %v12755_v2  ;;  %v6199_v40 = vmul.f32 %v10417_v30, %v10405_v21 }
0x3615   :  { %9812 = vmatprep.subr.msk.mxu0 %vm771_vm3, %v6356_v5 }
0x3616   :  { %9802 = vmatprep.mubr.msk.f32.mxu0 %vm3883_vm10, %v6199_v40 }
0x3617   :  { %9803 = vmatmul.mubr.msk.f32.gmra.mxu0 %vm3883_vm10, %v6201_v61 }
0x3618   :  { %9813 = vmatpush3.xpose.msk.msra.mxu0 %vm771_vm3, %v6356_v5 }
0x3619   :  { %9814 = vmatprep.subr.msk.mxu0 %vm771_vm3, %v6354_v36 }
0x361c   :  { %9815 = vmatpush3.xpose.msk.msra.mxu0 %vm771_vm3, %v6354_v36 }
0x361d   :  { %9816 = vmatprep.subr.msk.mxu0 %vm771_vm3, %v6352_v19 }
0x3620   :  { %9817 = vmatpush3.xpose.msk.msra.mxu0 %vm771_vm3, %v6352_v19 }
0x3621   :  { %9818 = vmatprep.subr.msk.mxu0 %vm771_vm3, %v6350_v57 }
0x3624   :  { %9819 = vmatpush3.xpose.msk.msra.mxu0 %vm771_vm3, %v6350_v57 }
0x3636   :  { %v6190_v2 = vpop.xlane.xlu1 %6189 }
0x3637   :  { %10418 = vrcp.f32 %v6190_v2 }
0x363a   :  { %v6193_v24 = vpop.xlane.xlu0 %6192  ;;  %v6340_v29 = vpop.permute.xlu1 %6339 }
0x363b   :  { %10420 = vrcp.f32 %v6193_v24 }
0x363e   :  { %v6338_v63 = vpop.permute.xlu0 %6337  ;;  %v6344_v55 = vpop.permute.xlu1 %6343 }
0x3642   :  { %v6342_v44 = vpop.permute.xlu0 %6341  ;;  %v6348_v37 = vpop.permute.xlu1 %6347 }
0x3644   :  { %v10419_v14 = vpop.eup %10418 }
0x3645   :  { %v6203_v15 = vmul.f32 %v10419_v14, %v12765_v7 }
0x3646   :  { %v6346_v47 = vpop.permute.xlu0 %6345  ;;  %v6567_v49 = vpop.permute.xlu1 %6566 }
0x3647   :  { %9805 = vmatprep.mubr.msk.f32.mxu0 %vm3883_vm10, %v6203_v15 }
0x3648   :  { %v10421_v23 = vpop.eup %10420 }
0x3649   :  { %v6205_v38 = vmul.f32 %v10421_v23, %v12769_v31 }
0x364a   :  { %v6569_v17 = vpop.permute.xlu0 %6568  ;;  %v6563_v13 = vpop.permute.xlu1 %6562 }
0x364b   :  { %9806 = vmatmul.mubr.msk.f32.gmra.mxu0 %vm3883_vm10, %v6205_v38  ;;  %9829 = vmatprep.subr.mxu1 %v6569_v17 }
0x364c   :  { %9820 = vmatprep.mubr.msk.f32.mxu0 %vm771_vm3, %v6338_v63  ;;  %9830 = vmatpush3.msra.mxu1 %v6569_v17 }
0x364d   :  { %9831 = vmatprep.subr.mxu1 %v6567_v49 }
0x364e   :  { %v6565_v43 = vpop.permute.xlu0 %6564  ;;  %9832 = vmatpush3.msra.mxu1 %v6567_v49  ;;  %v6561_v21 = vpop.permute.xlu1 %6560 }
0x364f   :  { %9821 = vmatmul.mubr.msk.f32.vlgmr.msra.gmra.mxu0 %vm771_vm3, %v6340_v29  ;;  %9833 = vmatprep.subr.mxu1 %v6565_v43 }
0x3650   :  { %9823 = vmatprep.mubr.msk.f32.mxu0 %vm771_vm3, %v6342_v44  ;;  %9834 = vmatpush3.msra.mxu1 %v6565_v43 }
0x3651   :  { %9835 = vmatprep.subr.mxu1 %v6563_v13 }
0x3652   :  { %9836 = vmatpush3.msra.mxu1 %v6563_v13  ;;  %v6559_v39 = vpop.permute.xlu1 %6558  ;;  %v12828_v26 = vpop.permute.xlu0 %6711 }
0x3653   :  { %9824 = vmatmul.mubr.msk.f32.gmra.mxu0 %vm771_vm3, %v6344_v55  ;;  %9837 = vmatprep.subr.mxu1 %v6561_v21 }
0x3654   :  { %9826 = vmatprep.mubr.msk.f32.mxu0 %vm771_vm3, %v6346_v47  ;;  %9838 = vmatpush3.msra.mxu1 %v6561_v21 }
0x3655   :  { %9839 = vmatprep.subr.mxu1 %v6559_v39 }
0x3656   :  { %9840 = vmatpush3.msra.mxu1 %v6559_v39  ;;  %v12861_v44 = vpop.permute.xlu1 %6709 }
0x3657   :  { %9827 = vmatmul.mubr.msk.f32.gmra.mxu0 %vm771_vm3, %v6348_v37  ;;  %9850 = vmatprep.subr.msk.mxu1 %vm771_vm3, %v12828_v26 }
0x36cf   :  { %v12833_v1 = vpop.f32.mrf.mxu0 }
0x36d1   :  { %v12835_v51 = vpop.f32.mrf.mxu0 }
0x36d7   :  { %v12837_v25 = vpop.f32.mrf.mxu0 }
0x36d9   :  { %v12839_v3 = vpop.f32.mrf.mxu0 }
0x370b   :  { %v12841_v4 = vpop.f32.mrf.mxu0 }
0x370d   :  { %v12843_v7 = vpop.f32.mrf.mxu0 }
0x370f   :  { %v9822_v42 = vpop.f32.mrf.mxu0 }
0x3710   :  { %v6481_v31 = vmul.f32 0.35355338, %v9822_v42 }
0x3711   :  { %v6451_v62 = vpop.f32.mrf.mxu0 }
0x3712   :  { %v6487_v36 = vadd.f32 %v12722_v34, %v6481_v31  ;;  %v6480_v5 = vmul.f32 0.35355338, %v6451_v62 }
0x3713   :  { %v9825_v41 = vpop.f32.mrf.mxu0 }
0x3714   :  { %v6486_v9 = vadd.f32 %v12726_v52, %v6480_v5  ;;  %v6483_v27 = vmul.f32 0.35355338, %v9825_v41  ;;  %v6495_v45 = vsel %vm3883_vm10, %v6487_v36, -inf }
0x3715   :  { %6496 = vmax.xlane.f32.xlu1 %v6495_v45  ;;  %v6461_v46 = vpop.f32.mrf.mxu0 }
0x3716   :  { %v6489_v8 = vadd.f32 %v12731_v53, %v6483_v27  ;;  %v6482_v60 = vmul.f32 0.35355338, %v6461_v46  ;;  %v6492_v18 = vsel %vm3883_vm10, %v6486_v9, -inf }
0x3717   :  { %6493 = vmax.xlane.f32.xlu0 %v6492_v18  ;;  %v9828_v16 = vpop.f32.mrf.mxu0 }
0x3718   :  { %v6485_v30 = vmul.f32 0.35355338, %v9828_v16  ;;  %v6488_v61 = vadd.f32 %v12736_v12, %v6482_v60  ;;  %v6501_v2 = vsel %vm3883_vm10, %v6489_v8, -inf }
0x3719   :  { %v6471_v40 = vpop.f32.mrf.mxu0 }
0x371a   :  { %v6491_v19 = vadd.f32 %v12740_v50, %v6485_v30  ;;  %v6484_v57 = vmul.f32 0.35355338, %v6471_v40  ;;  %v6498_v63 = vsel %vm3883_vm10, %v6488_v61, -inf }
0x371b   :  { %6502 = vmax.xlane.f32.xlu0 %v6501_v2 }
0x371c   :  { %v6507_v24 = vsel %vm3883_vm10, %v6491_v19, -inf  ;;  %v6490_v29 = vadd.f32 %v12746_v10, %v6484_v57 }
0x371d   :  { %6508 = vmax.xlane.f32.xlu1 %v6507_v24 }
0x371e   :  { %v6504_v55 = vsel %vm3883_vm10, %v6490_v29, -inf }
0x371f   :  { %6499 = vmax.xlane.f32.xlu0 %v6498_v63 }
0x3723   :  { %6505 = vmax.xlane.f32.xlu0 %v6504_v55 }
0x372e   :  { %6705 = vrot.lane.b32.xlu1 %v12673_v20, %s11023_s16 }
0x3739   :  { %6707 = vrot.lane.b32.xlu0 %v12667_v11, %s11023_s16 }
0x379e   :  { %v6497_v37 = vpop.xlane.xlu1 %6496 }
0x379f   :  { %v6511_v14 = vsub.f32 %v6487_v36, %v6497_v37 }
0x37a0   :  { %v6494_v15 = vpop.xlane.xlu0 %6493 }
0x37a1   :  { %v6518_v47 = vmul.f32 1.442695, %v6511_v14  ;;  %v6510_v49 = vsub.f32 %v6486_v9, %v6494_v15 }
0x37a3   :  { %10422 = vpow2.f32 %v6518_v47  ;;  %v6516_v23 = vmul.f32 1.442695, %v6510_v49 }
0x37a4   :  { %v6503_v38 = vpop.xlane.xlu0 %6502 }
0x37a5   :  { %10424 = vpow2.f32 %v6516_v23  ;;  %v6513_v17 = vsub.f32 %v6489_v8, %v6503_v38 }
0x37a6   :  { %v6509_v8 = vpop.xlane.xlu1 %6508 }
0x37a7   :  { %v6522_v13 = vmul.f32 1.442695, %v6513_v17  ;;  %v6515_v60 = vsub.f32 %v6491_v19, %v6509_v8 }
0x37a8   :  { %v6500_v43 = vpop.xlane.xlu0 %6499 }
0x37a9   :  { %10426 = vpow2.f32 %v6522_v13  ;;  %v6512_v21 = vsub.f32 %v6488_v61, %v6500_v43  ;;  %v6526_v16 = vmul.f32 1.442695, %v6515_v60 }
0x37aa   :  { %v6706_v19 = vpop.permute.xlu1 %6705 }
0x37ab   :  { %v6520_v39 = vmul.f32 1.442695, %v6512_v21 }
0x37ac   :  { %v6506_v45 = vpop.xlane.xlu0 %6505 }
0x37ad   :  { %10428 = vpow2.f32 %v6520_v39  ;;  %v6514_v46 = vsub.f32 %v6490_v29, %v6506_v45 }
0x37af   :  { %v6524_v18 = vmul.f32 1.442695, %v6514_v46 }
0x37b0   :  { %v10423_v42 = vpop.eup %10422  ;;  %v6708_v2 = vpop.permute.xlu0 %6707 }
0x37b1   :  { %v6531_v31 = vsel %vm3883_vm10, %v10423_v42, 0.0  ;;  %10430 = vpow2.f32 %v6524_v18 }
0x37b2   :  { %v10425_v62 = vpop.eup %10424  ;;  %6532 = vadd.xlane.f32.xlu1 %v6531_v31  ;;  %10432 = vpow2.f32 %v6526_v16 }
0x37b3   :  { %v6528_v36 = vsel %vm3883_vm10, %v10425_v62, 0.0 }
0x37b4   :  { %6529 = vadd.xlane.f32.xlu0 %v6528_v36 }
0x37b6   :  { %v10427_v5 = vpop.eup %10426 }
0x37b7   :  { %v6537_v41 = vsel %vm3883_vm10, %v10427_v5, 0.0 }
0x37b8   :  { %6538 = vadd.xlane.f32.xlu1 %v6537_v41 }
0x37ba   :  { %v10429_v9 = vpop.eup %10428 }
0x37bb   :  { %v6534_v27 = vsel %vm3883_vm10, %v10429_v9, 0.0 }
0x37bc   :  { %6535 = vadd.xlane.f32.xlu0 %v6534_v27 }
0x37be   :  { %v12871_v30 = vpop.eup %10430 }
0x37bf   :  { %v6540_v40 = vsel %vm3883_vm10, %v12871_v30, 0.0  ;;  %v12875_v61 = vpop.eup %10432 }
0x37c0   :  { %v6543_v57 = vsel %vm3883_vm10, %v12875_v61, 0.0 }
0x37c9   :  { %6701 = vrot.lane.b32.xlu1 %v12653_v6, %s11023_s16 }
0x37d2   :  { %6703 = vrot.lane.b32.xlu0 %v12663_v48, %s11023_s16 }
0x37ed   :  { %6541 = vadd.xlane.f32.xlu1 %v6540_v40 }
0x37f1   :  { %6544 = vadd.xlane.f32.xlu0 %v6543_v57 }
0x37fe   :  { %6691 = vrot.lane.b32.xlu1 %v12663_v48, %s11024_s12 }
0x3802   :  { %6695 = vrot.lane.b32.xlu1 %v12667_v11, %s11024_s12 }
0x3806   :  { %6699 = vrot.lane.b32.xlu1 %v12657_v28, %s11024_s12 }
0x3807   :  { %6689 = vrot.lane.b32.xlu0 %v12653_v6, %s11024_s12 }
0x380a   :  { %6918 = vrot.lane.b32.xlu1 %v12659_v56, %s11025_s18 }
0x380b   :  { %6693 = vrot.lane.b32.xlu0 %v12673_v20, %s11024_s12 }
0x380e   :  { %6914 = vrot.lane.b32.xlu1 %v12673_v20, %s11025_s18 }
0x380f   :  { %6697 = vrot.lane.b32.xlu0 %v12659_v56, %s11024_s12 }
0x3812   :  { %6912 = vrot.lane.b32.xlu1 %v12663_v48, %s11025_s18 }
0x3813   :  { %6920 = vrot.lane.b32.xlu0 %v12657_v28, %s11025_s18 }
0x3816   :  { %6910 = vrot.lane.b32.xlu1 %v12653_v6, %s11025_s18 }
0x3817   :  { %6916 = vrot.lane.b32.xlu0 %v12667_v11, %s11025_s18 }
0x381a   :  { %7061 = vrot.lane.b32.xlu1 %v12659_v56, %s11026_s8 }
0x381b   :  { %7063 = vrot.lane.b32.xlu0 %v12657_v28, %s11026_s8 }
0x383b   :  { %v6533_v24 = vpop.xlane.xlu1 %6532 }
0x383c   :  { %10434 = vrcp.f32 %v6533_v24 }
0x383d   :  { %v6530_v29 = vpop.xlane.xlu0 %6529 }
0x383e   :  { %10436 = vrcp.f32 %v6530_v29 }
0x3841   :  { %v6539_v63 = vpop.xlane.xlu1 %6538 }
0x3842   :  { %10438 = vrcp.f32 %v6539_v63 }
0x3845   :  { %v6536_v55 = vpop.xlane.xlu0 %6535  ;;  %v6702_v13 = vpop.permute.xlu1 %6701 }
0x3846   :  { %10440 = vrcp.f32 %v6536_v55 }
0x3849   :  { %v10435_v37 = vpop.eup %10434 }
0x384a   :  { %v6549_v47 = vmul.f32 %v10435_v37, %v10423_v42 }
0x384b   :  { %v10437_v14 = vpop.eup %10436 }
0x384c   :  { %v6547_v15 = vmul.f32 %v10437_v14, %v10425_v62 }
0x384e   :  { %9841 = vmatprep.mubr.msk.f32.mxu1 %vm3883_vm10, %v6547_v15 }
0x384f   :  { %9842 = vmatmul.mubr.msk.f32.vlgmr.msra.gmra.mxu1 %vm3883_vm10, %v6549_v47  ;;  %v10439_v49 = vpop.eup %10438 }
0x3850   :  { %9851 = vmatpush3.xpose.msk.msra.mxu1 %vm771_vm3, %v12828_v26  ;;  %v6553_v17 = vmul.f32 %v10439_v49, %v10427_v5  ;;  %v6704_v26 = vpop.permute.xlu0 %6703 }
0x3851   :  { %9852 = vmatprep.subr.msk.mxu1 %vm771_vm3, %v12861_v44 }
0x3853   :  { %v10441_v23 = vpop.eup %10440 }
0x3854   :  { %9853 = vmatpush3.xpose.msk.msra.mxu1 %vm771_vm3, %v12861_v44  ;;  %v6551_v38 = vmul.f32 %v10441_v23, %v10429_v9 }
0x3855   :  { %9854 = vmatprep.subr.msk.mxu1 %vm771_vm3, %v6708_v2 }
0x3856   :  { %9844 = vmatprep.mubr.msk.f32.mxu1 %vm3883_vm10, %v6551_v38 }
0x3857   :  { %9845 = vmatmul.mubr.msk.f32.gmra.mxu1 %vm3883_vm10, %v6553_v17 }
0x3858   :  { %9855 = vmatpush3.xpose.msk.msra.mxu1 %vm771_vm3, %v6708_v2 }
0x3859   :  { %9856 = vmatprep.subr.msk.mxu1 %vm771_vm3, %v6706_v19 }
0x385c   :  { %9857 = vmatpush3.xpose.msk.msra.mxu1 %vm771_vm3, %v6706_v19 }
0x385d   :  { %9858 = vmatprep.subr.msk.mxu1 %vm771_vm3, %v6704_v26 }
0x3860   :  { %9859 = vmatpush3.xpose.msk.msra.mxu1 %vm771_vm3, %v6704_v26 }
0x3861   :  { %9860 = vmatprep.subr.msk.mxu1 %vm771_vm3, %v6702_v13 }
0x3864   :  { %9861 = vmatpush3.xpose.msk.msra.mxu1 %vm771_vm3, %v6702_v13 }
0x3876   :  { %v6542_v44 = vpop.xlane.xlu1 %6541 }
0x3877   :  { %10442 = vrcp.f32 %v6542_v44 }
0x387a   :  { %v6545_v43 = vpop.xlane.xlu0 %6544  ;;  %v6692_v21 = vpop.permute.xlu1 %6691 }
0x387b   :  { %10444 = vrcp.f32 %v6545_v43 }
0x387e   :  { %v6690_v39 = vpop.permute.xlu0 %6689  ;;  %v6696_v42 = vpop.permute.xlu1 %6695 }
0x3882   :  { %v6694_v31 = vpop.permute.xlu0 %6693  ;;  %v6700_v62 = vpop.permute.xlu1 %6699 }
0x3884   :  { %v10443_v36 = vpop.eup %10442 }
0x3885   :  { %v6555_v5 = vmul.f32 %v10443_v36, %v12871_v30 }
0x3886   :  { %v6698_v41 = vpop.permute.xlu0 %6697  ;;  %v6919_v9 = vpop.permute.xlu1 %6918 }
0x3887   :  { %9847 = vmatprep.mubr.msk.f32.mxu1 %vm3883_vm10, %v6555_v5 }
0x3888   :  { %v10445_v27 = vpop.eup %10444 }
0x3889   :  { %v6557_v45 = vmul.f32 %v10445_v27, %v12875_v61 }
0x388a   :  { %v6921_v46 = vpop.permute.xlu0 %6920  ;;  %v6915_v8 = vpop.permute.xlu1 %6914 }
0x388b   :  { %9848 = vmatmul.mubr.msk.f32.gmra.mxu1 %vm3883_vm10, %v6557_v45  ;;  %9871 = vmatprep.subr.mxu0 %v6921_v46 }
0x388c   :  { %9862 = vmatprep.mubr.msk.f32.mxu1 %vm771_vm3, %v6690_v39  ;;  %9872 = vmatpush3.msra.mxu0 %v6921_v46 }
0x388d   :  { %9873 = vmatprep.subr.mxu0 %v6919_v9 }
0x388e   :  { %v6917_v60 = vpop.permute.xlu0 %6916  ;;  %9874 = vmatpush3.msra.mxu0 %v6919_v9  ;;  %v6913_v18 = vpop.permute.xlu1 %6912 }
0x388f   :  { %9863 = vmatmul.mubr.msk.f32.vlgmr.msra.gmra.mxu1 %vm771_vm3, %v6692_v21  ;;  %9875 = vmatprep.subr.mxu0 %v6917_v60 }
0x3890   :  { %9865 = vmatprep.mubr.msk.f32.mxu1 %vm771_vm3, %v6694_v31  ;;  %9876 = vmatpush3.msra.mxu0 %v6917_v60 }
0x3891   :  { %9877 = vmatprep.subr.mxu0 %v6915_v8 }
0x3892   :  { %9878 = vmatpush3.msra.mxu0 %v6915_v8  ;;  %v6911_v16 = vpop.permute.xlu1 %6910  ;;  %v12934_v30 = vpop.permute.xlu0 %7063 }
0x3893   :  { %9866 = vmatmul.mubr.msk.f32.gmra.mxu1 %vm771_vm3, %v6696_v42  ;;  %9879 = vmatprep.subr.mxu0 %v6913_v18 }
0x3894   :  { %9868 = vmatprep.mubr.msk.f32.mxu1 %vm771_vm3, %v6698_v41  ;;  %9880 = vmatpush3.msra.mxu0 %v6913_v18 }
0x3895   :  { %9881 = vmatprep.subr.mxu0 %v6911_v16 }
0x3896   :  { %9882 = vmatpush3.msra.mxu0 %v6911_v16  ;;  %v12967_v27 = vpop.permute.xlu1 %7061 }
0x3897   :  { %9869 = vmatmul.mubr.msk.f32.gmra.mxu1 %vm771_vm3, %v6700_v62  ;;  %9892 = vmatprep.subr.msk.mxu0 %vm771_vm3, %v12934_v30 }
0x390f   :  { %v12939_v40 = vpop.f32.mrf.mxu1 }
0x3911   :  { %v12941_v61 = vpop.f32.mrf.mxu1 }
0x3917   :  { %v12943_v57 = vpop.f32.mrf.mxu1 }
0x3919   :  { %v12945_v19 = vpop.f32.mrf.mxu1 }
0x394b   :  { %v12947_v2 = vpop.f32.mrf.mxu1 }
0x394d   :  { %v12949_v24 = vpop.f32.mrf.mxu1 }
0x394f   :  { %v9864_v29 = vpop.f32.mrf.mxu1 }
0x3950   :  { %v6833_v63 = vmul.f32 0.35355338, %v9864_v29 }
0x3951   :  { %v6803_v55 = vpop.f32.mrf.mxu1 }
0x3952   :  { %v6839_v37 = vadd.f32 %v12722_v34, %v6833_v63  ;;  %v6832_v14 = vmul.f32 0.35355338, %v6803_v55 }
0x3953   :  { %v9867_v15 = vpop.f32.mrf.mxu1 }
0x3954   :  { %v6838_v47 = vadd.f32 %v12726_v52, %v6832_v14  ;;  %v6835_v49 = vmul.f32 0.35355338, %v9867_v15  ;;  %v6847_v23 = vsel %vm3883_vm10, %v6839_v37, -inf }
0x3955   :  { %6848 = vmax.xlane.f32.xlu1 %v6847_v23  ;;  %v6813_v38 = vpop.f32.mrf.mxu1 }
0x3956   :  { %v6841_v17 = vadd.f32 %v12731_v53, %v6835_v49  ;;  %v6834_v26 = vmul.f32 0.35355338, %v6813_v38  ;;  %v6844_v13 = vsel %vm3883_vm10, %v6838_v47, -inf }
0x3957   :  { %6845 = vmax.xlane.f32.xlu0 %v6844_v13  ;;  %v9870_v44 = vpop.f32.mrf.mxu1 }
0x3958   :  { %v6837_v43 = vmul.f32 0.35355338, %v9870_v44  ;;  %v6840_v39 = vadd.f32 %v12736_v12, %v6834_v26  ;;  %v6853_v62 = vsel %vm3883_vm10, %v6841_v17, -inf }
0x3959   :  { %v6823_v21 = vpop.f32.mrf.mxu1 }
0x395a   :  { %v6843_v42 = vadd.f32 %v12740_v50, %v6837_v43  ;;  %v6836_v31 = vmul.f32 0.35355338, %v6823_v21  ;;  %v6850_v41 = vsel %vm3883_vm10, %v6840_v39, -inf }
0x395b   :  { %6854 = vmax.xlane.f32.xlu0 %v6853_v62 }
0x395c   :  { %v6859_v36 = vsel %vm3883_vm10, %v6843_v42, -inf  ;;  %v6842_v5 = vadd.f32 %v12746_v10, %v6836_v31 }
0x395d   :  { %6860 = vmax.xlane.f32.xlu1 %v6859_v36 }
0x395e   :  { %v6856_v9 = vsel %vm3883_vm10, %v6842_v5, -inf }
0x395f   :  { %6851 = vmax.xlane.f32.xlu0 %v6850_v41 }
0x3963   :  { %6857 = vmax.xlane.f32.xlu0 %v6856_v9 }
0x396e   :  { %7057 = vrot.lane.b32.xlu1 %v12673_v20, %s11026_s8 }
0x3979   :  { %7059 = vrot.lane.b32.xlu0 %v12667_v11, %s11026_s8 }
0x39de   :  { %v6849_v45 = vpop.xlane.xlu1 %6848 }
0x39df   :  { %v6863_v46 = vsub.f32 %v6839_v37, %v6849_v45 }
0x39e0   :  { %v6846_v8 = vpop.xlane.xlu0 %6845 }
0x39e1   :  { %v6870_v60 = vmul.f32 1.442695, %v6863_v46  ;;  %v6862_v18 = vsub.f32 %v6838_v47, %v6846_v8 }
0x39e3   :  { %10446 = vpow2.f32 %v6870_v60  ;;  %v6868_v16 = vmul.f32 1.442695, %v6862_v18 }
0x39e4   :  { %v6855_v29 = vpop.xlane.xlu0 %6854 }
0x39e5   :  { %10448 = vpow2.f32 %v6868_v16  ;;  %v6865_v63 = vsub.f32 %v6841_v17, %v6855_v29 }
0x39e7   :  { %v6874_v55 = vmul.f32 1.442695, %v6865_v63 }
0x39e8   :  { %v6852_v14 = vpop.xlane.xlu0 %6851 }
0x39e9   :  { %10450 = vpow2.f32 %v6874_v55  ;;  %v6864_v15 = vsub.f32 %v6840_v39, %v6852_v14  ;;  %v6861_v39 = vpop.xlane.xlu1 %6860 }
0x39ea   :  { %v6867_v31 = vsub.f32 %v6843_v42, %v6861_v39 }
0x39eb   :  { %v6872_v49 = vmul.f32 1.442695, %v6864_v15 }
0x39ec   :  { %v6858_v43 = vpop.xlane.xlu0 %6857  ;;  %v6878_v36 = vmul.f32 1.442695, %v6867_v31 }
0x39ed   :  { %10452 = vpow2.f32 %v6872_v49  ;;  %v6866_v21 = vsub.f32 %v6842_v5, %v6858_v43  ;;  %v7058_v42 = vpop.permute.xlu1 %7057 }
0x39ef   :  { %v6876_v62 = vmul.f32 1.442695, %v6866_v21 }
0x39f0   :  { %v10447_v23 = vpop.eup %10446  ;;  %v7060_v5 = vpop.permute.xlu0 %7059 }
0x39f1   :  { %v6883_v38 = vsel %vm3883_vm10, %v10447_v23, 0.0  ;;  %10454 = vpow2.f32 %v6876_v62 }
0x39f2   :  { %v10449_v26 = vpop.eup %10448  ;;  %6884 = vadd.xlane.f32.xlu1 %v6883_v38  ;;  %10456 = vpow2.f32 %v6878_v36 }
0x39f3   :  { %v6880_v37 = vsel %vm3883_vm10, %v10449_v26, 0.0 }
0x39f4   :  { %6881 = vadd.xlane.f32.xlu0 %v6880_v37 }
0x39f6   :  { %v10451_v47 = vpop.eup %10450 }
0x39f7   :  { %v6889_v13 = vsel %vm3883_vm10, %v10451_v47, 0.0 }
0x39f8   :  { %6890 = vadd.xlane.f32.xlu1 %v6889_v13 }
0x39fa   :  { %v10453_v44 = vpop.eup %10452 }
0x39fb   :  { %v6886_v17 = vsel %vm3883_vm10, %v10453_v44, 0.0 }
0x39fc   :  { %6887 = vadd.xlane.f32.xlu0 %v6886_v17 }
0x39fe   :  { %v10455_v41 = vpop.eup %10454 }
0x39ff   :  { %v6892_v9 = vsel %vm3883_vm10, %v10455_v41, 0.0  ;;  %v10457_v45 = vpop.eup %10456 }
0x3a00   :  { %v6895_v46 = vsel %vm3883_vm10, %v10457_v45, 0.0 }
0x3a09   :  { %7053 = vrot.lane.b32.xlu1 %v12653_v6, %s11026_s8 }
0x3a12   :  { %7055 = vrot.lane.b32.xlu0 %v12663_v48, %s11026_s8 }
0x3a2d   :  { %6893 = vadd.xlane.f32.xlu1 %v6892_v9 }
0x3a31   :  { %6896 = vadd.xlane.f32.xlu0 %v6895_v46 }
0x3a3e   :  { %7043 = vrot.lane.b32.xlu1 %v12663_v48, %s11027_s22 }
0x3a42   :  { %7047 = vrot.lane.b32.xlu1 %v12667_v11, %s11027_s22 }
0x3a46   :  { %7051 = vrot.lane.b32.xlu1 %v12657_v28, %s11027_s22 }
0x3a47   :  { %7041 = vrot.lane.b32.xlu0 %v12653_v6, %s11027_s22 }
0x3a4b   :  { %7045 = vrot.lane.b32.xlu0 %v12673_v20, %s11027_s22 }
0x3a4f   :  { %7049 = vrot.lane.b32.xlu0 %v12659_v56, %s11027_s22 }
0x3a7b   :  { %v6885_v8 = vpop.xlane.xlu1 %6884 }
0x3a7c   :  { %10458 = vrcp.f32 %v6885_v8 }
0x3a7d   :  { %v6882_v60 = vpop.xlane.xlu0 %6881 }
0x3a7e   :  { %10460 = vrcp.f32 %v6882_v60 }
0x3a81   :  { %v6891_v18 = vpop.xlane.xlu1 %6890 }
0x3a82   :  { %10462 = vrcp.f32 %v6891_v18 }
0x3a85   :  { %v6888_v16 = vpop.xlane.xlu0 %6887 }
0x3a86   :  { %10464 = vrcp.f32 %v6888_v16 }
0x3a89   :  { %v10459_v29 = vpop.eup %10458 }
0x3a8a   :  { %v6901_v14 = vmul.f32 %v10459_v29, %v10447_v23  ;;  %v7054_v23 = vpop.permute.xlu1 %7053 }
0x3a8b   :  { %v10461_v63 = vpop.eup %10460 }
0x3a8c   :  { %v6899_v55 = vmul.f32 %v10461_v63, %v10449_v26 }
0x3a8e   :  { %9883 = vmatprep.mubr.msk.f32.mxu0 %vm3883_vm10, %v6899_v55 }
0x3a8f   :  { %9884 = vmatmul.mubr.msk.f32.vlgmr.msra.gmra.mxu0 %vm3883_vm10, %v6901_v14  ;;  %v10463_v15 = vpop.eup %10462 }
0x3a90   :  { %9893 = vmatpush3.xpose.msk.msra.mxu0 %vm771_vm3, %v12934_v30  ;;  %v6905_v26 = vmul.f32 %v10463_v15, %v10451_v47  ;;  %v7056_v30 = vpop.permute.xlu0 %7055 }
0x3a91   :  { %9894 = vmatprep.subr.msk.mxu0 %vm771_vm3, %v12967_v27 }
0x3a93   :  { %v10465_v49 = vpop.eup %10464 }
0x3a94   :  { %9895 = vmatpush3.xpose.msk.msra.mxu0 %vm771_vm3, %v12967_v27  ;;  %v6903_v38 = vmul.f32 %v10465_v49, %v10453_v44 }
0x3a95   :  { %9896 = vmatprep.subr.msk.mxu0 %vm771_vm3, %v7060_v5 }
0x3a96   :  { %9886 = vmatprep.mubr.msk.f32.mxu0 %vm3883_vm10, %v6903_v38 }
0x3a97   :  { %9887 = vmatmul.mubr.msk.f32.gmra.mxu0 %vm3883_vm10, %v6905_v26 }
0x3a98   :  { %9897 = vmatpush3.xpose.msk.msra.mxu0 %vm771_vm3, %v7060_v5 }
0x3a99   :  { %9898 = vmatprep.subr.msk.mxu0 %vm771_vm3, %v7058_v42 }
0x3a9c   :  { %9899 = vmatpush3.xpose.msk.msra.mxu0 %vm771_vm3, %v7058_v42 }
0x3a9d   :  { %9900 = vmatprep.subr.msk.mxu0 %vm771_vm3, %v7056_v30 }
0x3aa0   :  { %9901 = vmatpush3.xpose.msk.msra.mxu0 %vm771_vm3, %v7056_v30 }
0x3aa1   :  { %9902 = vmatprep.subr.msk.mxu0 %vm771_vm3, %v7054_v23 }
0x3aa4   :  { %9903 = vmatpush3.xpose.msk.msra.mxu0 %vm771_vm3, %v7054_v23 }
0x3ab6   :  { %v6894_v27 = vpop.xlane.xlu1 %6893 }
0x3ab7   :  { %10466 = vrcp.f32 %v6894_v27 }
0x3aba   :  { %v6897_v37 = vpop.xlane.xlu0 %6896  ;;  %v7044_v21 = vpop.permute.xlu1 %7043 }
0x3abb   :  { %10468 = vrcp.f32 %v6897_v37 }
0x3abe   :  { %v7042_v44 = vpop.permute.xlu0 %7041  ;;  %v7048_v31 = vpop.permute.xlu1 %7047 }
0x3ac2   :  { %v7046_v39 = vpop.permute.xlu0 %7045  ;;  %v7052_v36 = vpop.permute.xlu1 %7051 }
0x3ac4   :  { %v10467_v47 = vpop.eup %10466 }
0x3ac5   :  { %v6907_v13 = vmul.f32 %v10467_v47, %v10455_v41 }
0x3ac6   :  { %v7050_v62 = vpop.permute.xlu0 %7049 }
0x3ac7   :  { %9889 = vmatprep.mubr.msk.f32.mxu0 %vm3883_vm10, %v6907_v13 }
0x3ac8   :  { %v10469_v17 = vpop.eup %10468 }
0x3ac9   :  { %v6909_v43 = vmul.f32 %v10469_v17, %v10457_v45 }
0x3acb   :  { %9890 = vmatmul.mubr.msk.f32.gmra.mxu0 %vm3883_vm10, %v6909_v43 }
0x3acc   :  { %9904 = vmatprep.mubr.msk.f32.mxu0 %vm771_vm3, %v7042_v44 }
0x3acf   :  { %9905 = vmatmul.mubr.msk.f32.vlgmr.msra.gmra.mxu0 %vm771_vm3, %v7044_v21 }
0x3ad0   :  { %9907 = vmatprep.mubr.msk.f32.mxu0 %vm771_vm3, %v7046_v39 }
0x3ad3   :  { %9908 = vmatmul.mubr.msk.f32.gmra.mxu0 %vm771_vm3, %v7048_v31 }
0x3ad4   :  { %9910 = vmatprep.mubr.msk.f32.mxu0 %vm771_vm3, %v7050_v62 }
0x3ad7   :  { %9911 = vmatmul.mubr.msk.f32.gmra.mxu0 %vm771_vm3, %v7052_v36 }
0x3b4f   :  { %v13017_v41 = vpop.f32.mrf.mxu0 }
0x3b51   :  { %v13019_v9 = vpop.f32.mrf.mxu0 }
0x3b57   :  { %v13021_v45 = vpop.f32.mrf.mxu0 }
0x3b59   :  { %v13023_v46 = vpop.f32.mrf.mxu0 }
0x3b8b   :  { %v13025_v42 = vpop.f32.mrf.mxu0 }
0x3b8d   :  { %v13027_v5 = vpop.f32.mrf.mxu0 }
0x3b8f   :  { %v9906_v8 = vpop.f32.mrf.mxu0 }
0x3b90   :  { %v7185_v60 = vmul.f32 0.35355338, %v9906_v8 }
0x3b91   :  { %v7155_v18 = vpop.f32.mrf.mxu0 }
0x3b92   :  { %v7191_v16 = vadd.f32 %v12722_v34, %v7185_v60  ;;  %v7184_v29 = vmul.f32 0.35355338, %v7155_v18 }
0x3b93   :  { %v9909_v63 = vpop.f32.mrf.mxu0 }
0x3b94   :  { %v7190_v55 = vadd.f32 %v12726_v52, %v7184_v29  ;;  %v7187_v14 = vmul.f32 0.35355338, %v9909_v63  ;;  %v7199_v15 = vsel %vm3883_vm10, %v7191_v16, -inf }
0x3b95   :  { %7200 = vmax.xlane.f32.xlu1 %v7199_v15  ;;  %v7165_v49 = vpop.f32.mrf.mxu0 }
0x3b96   :  { %v7193_v38 = vadd.f32 %v12731_v53, %v7187_v14  ;;  %v7186_v26 = vmul.f32 0.35355338, %v7165_v49  ;;  %v7196_v30 = vsel %vm3883_vm10, %v7190_v55, -inf }
0x3b97   :  { %7197 = vmax.xlane.f32.xlu0 %v7196_v30  ;;  %v9912_v23 = vpop.f32.mrf.mxu0 }
0x3b98   :  { %v7189_v27 = vmul.f32 0.35355338, %v9912_v23  ;;  %v7192_v34 = vadd.f32 %v12736_v12, %v7186_v26  ;;  %v7205_v52 = vsel %vm3883_vm10, %v7193_v38, -inf }
0x3b99   :  { %v7175_v37 = vpop.f32.mrf.mxu0 }
0x3b9a   :  { %v7195_v47 = vadd.f32 %v12740_v50, %v7189_v27  ;;  %v7188_v13 = vmul.f32 0.35355338, %v7175_v37  ;;  %v7202_v17 = vsel %vm3883_vm10, %v7192_v34, -inf }
0x3b9b   :  { %7206 = vmax.xlane.f32.xlu0 %v7205_v52 }
0x3b9c   :  { %v7211_v44 = vsel %vm3883_vm10, %v7195_v47, -inf  ;;  %v7194_v53 = vadd.f32 %v12746_v10, %v7188_v13 }
0x3b9d   :  { %7212 = vmax.xlane.f32.xlu1 %v7211_v44 }
0x3b9e   :  { %v7208_v43 = vsel %vm3883_vm10, %v7194_v53, -inf }
0x3b9f   :  { %7203 = vmax.xlane.f32.xlu0 %v7202_v17 }
0x3ba3   :  { %7209 = vmax.xlane.f32.xlu0 %v7208_v43 }
0x3bae   :  { %7270 = vrot.lane.b32.xlu1 %v12659_v56, %s11028_s17 }
0x3bb2   :  { %7268 = vrot.lane.b32.xlu1 %v12667_v11, %s11028_s17 }
0x3bb6   :  { %7266 = vrot.lane.b32.xlu1 %v12673_v20, %s11028_s17 }
0x3bb9   :  { %7272 = vrot.lane.b32.xlu0 %v12657_v28, %s11028_s17 }
0x3c1e   :  { %v7201_v12 = vpop.xlane.xlu1 %7200 }
0x3c1f   :  { %v7215_v50 = vsub.f32 %v7191_v16, %v7201_v12 }
0x3c20   :  { %v7198_v10 = vpop.xlane.xlu0 %7197 }
0x3c21   :  { %v7222_v21 = vmul.f32 1.442695, %v7215_v50  ;;  %v7214_v39 = vsub.f32 %v7190_v55, %v7198_v10 }
0x3c23   :  { %10470 = vpow2.f32 %v7222_v21  ;;  %v7220_v31 = vmul.f32 1.442695, %v7214_v39  ;;  %v7486_v39 = vld [vmem:[%s13414_s21 + $0x18] sm:$0xff] }
0x3c24   :  { %v7207_v62 = vpop.xlane.xlu0 %7206 }
0x3c25   :  { %10472 = vpow2.f32 %v7220_v31  ;;  %v7217_v36 = vsub.f32 %v7193_v38, %v7207_v62  ;;  %v7485_v31 = vld [vmem:[%s13414_s21 + $0x10] sm:$0xff]  ;;  %v7484_v62 = vld [vmem:[%s13414_s21 + $0x8] sm:$0xff] }
0x3c26   :  { %v7213_v56 = vpop.xlane.xlu1 %7212 }
0x3c27   :  { %v7226_v8 = vmul.f32 1.442695, %v7217_v36  ;;  %v7219_v60 = vsub.f32 %v7195_v47, %v7213_v56  ;;  %v7483_v36 = vld [vmem:[%s13414_s21] sm:$0xff] }
0x3c28   :  { %v7204_v11 = vpop.xlane.xlu0 %7203 }
0x3c29   :  { %10474 = vpow2.f32 %v7226_v8  ;;  %v7230_v18 = vmul.f32 1.442695, %v7219_v60  ;;  %v7216_v20 = vsub.f32 %v7192_v34, %v7204_v11 }
0x3c2a   :  { %v7271_v29 = vpop.permute.xlu1 %7270 }
0x3c2b   :  { %10476 = vpow2.f32 %v7230_v18  ;;  %v7224_v28 = vmul.f32 1.442695, %v7216_v20 }
0x3c2c   :  { %v7210_v63 = vpop.xlane.xlu0 %7209 }
0x3c2d   :  { %10478 = vpow2.f32 %v7224_v28  ;;  %v7218_v16 = vsub.f32 %v7194_v53, %v7210_v63 }
0x3c2e   :  { %v7269_v15 = vpop.permute.xlu1 %7268 }
0x3c2f   :  { %v7228_v14 = vmul.f32 1.442695, %v7218_v16 }
0x3c30   :  { %v13049_v55 = vpop.eup %10470  ;;  %v7273_v49 = vpop.permute.xlu0 %7272 }
0x3c31   :  { %10480 = vpow2.f32 %v7228_v14  ;;  %9913 = vmatprep.subr.mxu1 %v7273_v49  ;;  %v7235_v38 = vsel %vm3883_vm10, %v13049_v55, 0.0 }
0x3c32   :  { %v10473_v26 = vpop.eup %10472  ;;  %9914 = vmatpush3.msra.mxu1 %v7273_v49  ;;  %7236 = vadd.xlane.f32.xlu1 %v7235_v38  ;;  %v7267_v27 = vpop.permute.xlu1 %7266 }
0x3c33   :  { %9915 = vmatprep.subr.mxu1 %v7271_v29  ;;  %v7232_v30 = vsel %vm3883_vm10, %v10473_v26, 0.0 }
0x3c34   :  { %7233 = vadd.xlane.f32.xlu0 %v7232_v30  ;;  %9916 = vmatpush3.msra.mxu1 %v7271_v29 }
0x3c35   :  { %9917 = vmatprep.subr.mxu1 %v7269_v15 }
0x3c36   :  { %v10475_v23 = vpop.eup %10474  ;;  %9918 = vmatpush3.msra.mxu1 %v7269_v15 }
0x3c37   :  { %9919 = vmatprep.subr.mxu1 %v7267_v27  ;;  %v7241_v37 = vsel %vm3883_vm10, %v10475_v23, 0.0 }
0x3c38   :  { %v10477_v34 = vpop.eup %10476  ;;  %7242 = vadd.xlane.f32.xlu1 %v7241_v37  ;;  %9920 = vmatpush3.msra.mxu1 %v7267_v27 }
0x3c39   :  { %v7247_v52 = vsel %vm3883_vm10, %v10477_v34, 0.0 }
0x3c3a   :  { %v10479_v47 = vpop.eup %10478 }
0x3c3b   :  { %v7238_v13 = vsel %vm3883_vm10, %v10479_v47, 0.0 }
0x3c3c   :  { %7239 = vadd.xlane.f32.xlu0 %v7238_v13  ;;  %7248 = vadd.xlane.f32.xlu1 %v7247_v52 }
0x3c3e   :  { %v10481_v44 = vpop.eup %10480 }
0x3c3f   :  { %v7244_v53 = vsel %vm3883_vm10, %v10481_v44, 0.0 }
0x3c40   :  { %7245 = vadd.xlane.f32.xlu0 %v7244_v53 }
0x3c4d   :  { %7262 = vrot.lane.b32.xlu1 %v12653_v6, %s11028_s17 }
0x3c51   :  { %7401 = vrot.lane.b32.xlu1 %v12939_v40, %s11029_s3 }
0x3c55   :  { %7425 = vrot.lane.b32.xlu1 %v13017_v41, %s11030_s23 }
0x3c56   :  { %7264 = vrot.lane.b32.xlu0 %v12663_v48, %s11028_s17 }
0x3c59   :  { %7405 = vrot.lane.b32.xlu1 %v12943_v57, %s11029_s3 }
0x3c5a   :  { %7399 = vrot.lane.b32.xlu0 %v12941_v61, %s11029_s3 }
0x3c5d   :  { %7429 = vrot.lane.b32.xlu1 %v13021_v45, %s11030_s23 }
0x3c5e   :  { %7423 = vrot.lane.b32.xlu0 %v13019_v9, %s11030_s23 }
0x3c61   :  { %7409 = vrot.lane.b32.xlu1 %v12947_v2, %s11029_s3 }
0x3c62   :  { %7403 = vrot.lane.b32.xlu0 %v12945_v19, %s11029_s3 }
0x3c65   :  { %7433 = vrot.lane.b32.xlu1 %v13025_v42, %s11030_s23 }
0x3c66   :  { %7427 = vrot.lane.b32.xlu0 %v13023_v46, %s11030_s23 }
0x3c6a   :  { %7407 = vrot.lane.b32.xlu0 %v12949_v24, %s11029_s3 }
0x3c6e   :  { %7431 = vrot.lane.b32.xlu0 %v13027_v5, %s11030_s23 }
0x3cbb   :  { %v7237_v6 = vpop.xlane.xlu1 %7236 }
0x3cbd   :  { %v7234_v48 = vpop.xlane.xlu0 %7233 }
0x3cbe   :  { %10482 = vrcp.f32 %v7234_v48 }
0x3cbf   :  { %10484 = vrcp.f32 %v7237_v6 }
0x3cc1   :  { %v7243_v40 = vpop.xlane.xlu1 %7242 }
0x3cc2   :  { %10486 = vrcp.f32 %v7243_v40 }
0x3cc5   :  { %v7240_v61 = vpop.xlane.xlu0 %7239  ;;  %v7249_v57 = vpop.xlane.xlu1 %7248 }
0x3cc6   :  { %10488 = vrcp.f32 %v7240_v61 }
0x3cc7   :  { %10490 = vrcp.f32 %v7249_v57 }
0x3cc9   :  { %v7246_v19 = vpop.xlane.xlu0 %7245  ;;  %v7263_v24 = vpop.permute.xlu1 %7262 }
0x3cca   :  { %10492 = vrcp.f32 %v7246_v19 }
0x3ccb   :  { %v10483_v2 = vpop.eup %10482 }
0x3ccc   :  { %v7251_v41 = vmul.f32 %v10483_v2, %v10473_v26  ;;  %v10485_v9 = vpop.eup %10484 }
0x3ccd   :  { %v7265_v45 = vpop.permute.xlu0 %7264  ;;  %v7253_v46 = vmul.f32 %v10485_v9, %v13049_v55  ;;  %v7402_v29 = vpop.permute.xlu1 %7401 }
0x3cce   :  { %9921 = vmatprep.subr.mxu1 %v7265_v45  ;;  %9925 = vmatprep.mubr.msk.f32.mxu1 %vm3883_vm10, %v7251_v41 }
0x3ccf   :  { %9922 = vmatpush3.msra.mxu1 %v7265_v45  ;;  %v10487_v42 = vpop.eup %10486 }
0x3cd0   :  { %9923 = vmatprep.subr.mxu1 %v7263_v24  ;;  %v7257_v43 = vmul.f32 %v10487_v42, %v10475_v23  ;;  %v8746_v42 = vld [vmem:[#allocation20] ss:$0 sm:$0xff] }
0x3cd1   :  { %9924 = vmatpush3.msra.mxu1 %v7263_v24  ;;  %v7400_v28 = vpop.permute.xlu0 %7399  ;;  %v7426_v63 = vpop.permute.xlu1 %7425 }
0x3cd2   :  { %9926 = vmatmul.mubr.msk.f32.vlgmr.msra.gmra.mxu1 %vm3883_vm10, %v7253_v46  ;;  %9934 = vmatprep.subr.mxu1 %v7486_v39  ;;  %v7465_v37 = vsel %vm771_vm3, %v12835_v51, %v7400_v28 }
0x3cd3   :  { %v10489_v5 = vpop.eup %10488  ;;  %9935 = vmatpush3.msra.mxu1 %v7486_v39 }
0x3cd4   :  { %v7255_v17 = vmul.f32 %v10489_v5, %v10479_v47  ;;  %v10491_v12 = vpop.eup %10490  ;;  %9936 = vmatprep.subr.mxu1 %v7485_v31 }
0x3cd5   :  { %v7261_v21 = vmul.f32 %v10491_v12, %v10477_v34  ;;  %9937 = vmatpush3.msra.mxu1 %v7485_v31  ;;  %v7424_v16 = vpop.permute.xlu0 %7423  ;;  %v7406_v14 = vpop.permute.xlu1 %7405  ;;  %v7466_v34 = vsel %vm771_vm3, %v12833_v1, %v7402_v29 }
0x3cd6   :  { %9928 = vmatprep.mubr.msk.f32.mxu1 %vm3883_vm10, %v7255_v17  ;;  %9938 = vmatprep.subr.mxu1 %v7484_v62  ;;  %v7471_v47 = vsel %vm1613_vm7, %v7465_v37, %v7424_v16  ;;  %v7472_v52 = vsel %vm1613_vm7, %v7466_v34, %v7426_v63  ;;  %v7468_v1 = vsel %vm771_vm3, %v12837_v25, %v7406_v14 }
0x3cd7   :  { %v10493_v50 = vpop.eup %10492  ;;  %9929 = vmatmul.mubr.msk.f32.gmra.mxu1 %vm3883_vm10, %v7257_v43 }
0x3cd8   :  { %v7259_v10 = vmul.f32 %v10493_v50, %v10481_v44  ;;  %9939 = vmatpush3.msra.mxu1 %v7484_v62 }
0x3cd9   :  { %9940 = vmatprep.subr.mxu1 %v7483_v36  ;;  %v7404_v55 = vpop.permute.xlu0 %7403  ;;  %v7430_v15 = vpop.permute.xlu1 %7429 }
0x3cda   :  { %9931 = vmatprep.mubr.msk.f32.mxu1 %vm3883_vm10, %v7259_v10  ;;  %9941 = vmatpush3.msra.mxu1 %v7483_v36  ;;  %v7467_v51 = vsel %vm771_vm3, %v12839_v3, %v7404_v55  ;;  %v7474_v61 = vsel %vm1613_vm7, %v7468_v1, %v7430_v15 }
0x3cdb   :  { %9932 = vmatmul.mubr.msk.f32.gmra.mxu1 %vm3883_vm10, %v7261_v21 }
0x3cdd   :  { %v7428_v49 = vpop.permute.xlu0 %7427  ;;  %v7410_v38 = vpop.permute.xlu1 %7409 }
0x3cde   :  { %v7473_v48 = vsel %vm1613_vm7, %v7467_v51, %v7428_v49  ;;  %v7470_v25 = vsel %vm771_vm3, %v12841_v4, %v7410_v38 }
0x3ce1   :  { %v7408_v26 = vpop.permute.xlu0 %7407  ;;  %v7434_v30 = vpop.permute.xlu1 %7433 }
0x3ce2   :  { %v7469_v2 = vsel %vm771_vm3, %v12843_v7, %v7408_v26  ;;  %v7476_v45 = vsel %vm1613_vm7, %v7470_v25, %v7434_v30  ;;  %v7725_v25 = vld [vmem:[%s13415_s6 + $0x10] sm:$0xff] }
0x3ce5   :  { %v7432_v23 = vpop.permute.xlu0 %7431 }
0x3ce6   :  { %v7475_v3 = vsel %vm1613_vm7, %v7469_v2, %v7432_v23 }
0x3d92   :  { %v9927_v56 = vpop.f32.mrf.mxu1 }
0x3d93   :  { %7449 = vrot.lane.b32.xlu1 %v9927_v56, %s11031_s0 }
0x3d94   :  { %v7364_v8 = vpop.f32.mrf.mxu1 }
0x3d95   :  { %7447 = vrot.lane.b32.xlu0 %v7364_v8, %s11031_s0 }
0x3d97   :  { %v9930_v60 = vpop.f32.mrf.mxu1 }
0x3d98   :  { %7453 = vrot.lane.b32.xlu1 %v9930_v60, %s11031_s0 }
0x3d99   :  { %v7374_v11 = vpop.f32.mrf.mxu1 }
0x3d9a   :  { %7451 = vrot.lane.b32.xlu0 %v7374_v11, %s11031_s0 }
0x3d9b   :  { %v9933_v18 = vpop.f32.mrf.mxu1 }
0x3d9c   :  { %7457 = vrot.lane.b32.xlu1 %v9933_v18, %s11031_s0 }
0x3d9d   :  { %v7384_v20 = vpop.f32.mrf.mxu1 }
0x3d9e   :  { %7455 = vrot.lane.b32.xlu0 %v7384_v20, %s11031_s0 }
0x3e05   :  { %v7450_v27 = vpop.permute.xlu1 %7449 }
0x3e06   :  { %v7478_v53 = vsel %vm1616_vm8, %v7472_v52, %v7450_v27 }
0x3e07   :  { %v7448_v13 = vpop.permute.xlu0 %7447 }
0x3e08   :  { %v7477_v44 = vsel %vm1616_vm8, %v7471_v47, %v7448_v13 }
0x3e09   :  { %9942 = vmatprep.mubr.msk.f32.mxu1 %vm582_vm1, %v7477_v44 }
0x3e0a   :  { %9943 = vmatmul.mubr.msk.f32.vlgmr.msra.gmra.mxu1 %vm582_vm1, %v7478_v53  ;;  %v7454_v6 = vpop.permute.xlu1 %7453 }
0x3e0b   :  { %v7480_v19 = vsel %vm1616_vm8, %v7474_v61, %v7454_v6 }
0x3e0c   :  { %v7452_v40 = vpop.permute.xlu0 %7451 }
0x3e0d   :  { %v7479_v57 = vsel %vm1616_vm8, %v7473_v48, %v7452_v40 }
0x3e0e   :  { %9945 = vmatprep.mubr.msk.f32.mxu1 %vm582_vm1, %v7479_v57  ;;  %v7458_v41 = vpop.permute.xlu1 %7457 }
0x3e0f   :  { %9946 = vmatmul.mubr.msk.f32.gmra.mxu1 %vm582_vm1, %v7480_v19  ;;  %v7482_v46 = vsel %vm1616_vm8, %v7476_v45, %v7458_v41  ;;  %v7726_v41 = vld [vmem:[%s13415_s6 + $0x18] sm:$0xff] }
0x3e10   :  { %v7456_v9 = vpop.permute.xlu0 %7455  ;;  %9951 = vmatprep.subr.mxu0 %v7726_v41 }
0x3e11   :  { %v7481_v24 = vsel %vm1616_vm8, %v7475_v3, %v7456_v9  ;;  %9952 = vmatpush3.msra.mxu0 %v7726_v41  ;;  %v7724_v3 = vld [vmem:[%s13415_s6 + $0x8] sm:$0xff]  ;;  %v7723_v9 = vld [vmem:[%s13415_s6] sm:$0xff]  ;;  %v7902_v41 = vld [vmem:[%s13416_s15 + $0x38] sm:$0xff] }
0x3e12   :  { %9948 = vmatprep.mubr.msk.f32.mxu1 %vm582_vm1, %v7481_v24  ;;  %9953 = vmatprep.subr.mxu0 %v7725_v25 }
0x3e13   :  { %9949 = vmatmul.mubr.msk.f32.gmra.mxu1 %vm582_vm1, %v7482_v46  ;;  %9954 = vmatpush3.msra.mxu0 %v7725_v25  ;;  %v7901_v25 = vld [vmem:[%s13416_s15 + $0x30] sm:$0xff] }
0x3e14   :  { %9955 = vmatprep.subr.mxu0 %v7724_v3 }
0x3e15   :  { %9956 = vmatpush3.msra.mxu0 %v7724_v3  ;;  %v7900_v3 = vld [vmem:[%s13416_s15 + $0x28] sm:$0xff] }
0x3e16   :  { %9957 = vmatprep.subr.mxu0 %v7723_v9 }
0x3e17   :  { %9958 = vmatpush3.msra.mxu0 %v7723_v9  ;;  %v7899_v9 = vld [vmem:[%s13416_s15 + $0x20] sm:$0xff] }
0x3e18   :  { %10009 = vmatprep.subr.mxu0 %v11017_v0 }
0x3eca   :  { %v9944_v7 = vpop.f32.mrf.mxu1 }
0x3ecb   :  { %v7601_v5 = vadd.f32 %v9944_v7, %v12572_v58 }
0x3ecc   :  { %v7571_v17 = vpop.f32.mrf.mxu1 }
0x3ecd   :  { %v13134_v43 = vadd.f32 %v8746_v42, %v7601_v5  ;;  %v7600_v4 = vadd.f32 %v7571_v17, %v12575_v32 }
0x3ecf   :  { %v13137_v12 = vadd.f32 %v8746_v42, %v7600_v4  ;;  %v9947_v50 = vpop.f32.mrf.mxu1  ;;  %v7624_v10 = vsel %vm582_vm1, %v13134_v43, 0.0 }
0x3ed0   :  { %v7603_v21 = vadd.f32 %v9947_v50, %v12582_v33  ;;  %7625 = vadd.xlane.f32.xlu1 %v7624_v10 }
0x3ed1   :  { %v7581_v39 = vpop.f32.mrf.mxu1  ;;  %v7621_v31 = vsel %vm582_vm1, %v13137_v12, 0.0 }
0x3ed2   :  { %v13144_v62 = vadd.f32 %v8746_v42, %v7603_v21  ;;  %v7602_v58 = vadd.f32 %v7581_v39, %v12585_v22  ;;  %7622 = vadd.xlane.f32.xlu0 %v7621_v31 }
0x3ed3   :  { %v9950_v36 = vpop.f32.mrf.mxu1 }
0x3ed4   :  { %v7605_v32 = vadd.f32 %v9950_v36, %v12590_v35  ;;  %v7630_v56 = vsel %vm582_vm1, %v13144_v62, 0.0  ;;  %v13150_v8 = vadd.f32 %v8746_v42, %v7602_v58 }
0x3ed5   :  { %v7591_v60 = vpop.f32.mrf.mxu1 }
0x3ed6   :  { %v13152_v33 = vadd.f32 %v8746_v42, %v7605_v32  ;;  %v7604_v11 = vadd.f32 %v7591_v60, %v12595_v59  ;;  %7631 = vadd.xlane.f32.xlu0 %v7630_v56  ;;  %v7627_v22 = vsel %vm582_vm1, %v13150_v8, 0.0 }
0x3ed8   :  { %v7636_v18 = vsel %vm582_vm1, %v13152_v33, 0.0  ;;  %v13157_v20 = vadd.f32 %v8746_v42, %v7604_v11 }
0x3ed9   :  { %7637 = vadd.xlane.f32.xlu1 %v7636_v18  ;;  %v8747_v18 = vld [vmem:[#allocation21] ss:$0 sm:$0xff] }
0x3eda   :  { %7628 = vadd.xlane.f32.xlu0 %v7627_v22  ;;  %v7633_v35 = vsel %vm582_vm1, %v13157_v20, 0.0 }
0x3ede   :  { %7634 = vadd.xlane.f32.xlu0 %v7633_v35 }
0x3f59   :  { %v7626_v29 = vpop.xlane.xlu1 %7625 }
0x3f5a   :  { %v7640_v28 = vmul.f32 0.03125, %v7626_v29 }
0x3f5b   :  { %v7623_v63 = vpop.xlane.xlu0 %7622 }
0x3f5c   :  { %v13164_v59 = vsub.f32 %v13134_v43, %v7640_v28  ;;  %v7639_v16 = vmul.f32 0.03125, %v7623_v63  ;;  %v8748_v63 = vld [vmem:[#allocation23] ss:$0 sm:$0xff] }
0x3f5e   :  { %v13167_v14 = vsub.f32 %v13137_v12, %v7639_v16  ;;  %v7652_v55 = vmul.f32 %v13164_v59, %v13164_v59 }
0x3f5f   :  { %v7632_v15 = vpop.xlane.xlu0 %7631 }
0x3f60   :  { %v7642_v49 = vmul.f32 0.03125, %v7632_v15  ;;  %v7660_v38 = vsel %vm582_vm1, %v7652_v55, 0.0  ;;  %v7651_v26 = vmul.f32 %v13167_v14, %v13167_v14 }
0x3f61   :  { %7661 = vadd.xlane.f32.xlu1 %v7660_v38 }
0x3f62   :  { %v13175_v30 = vsub.f32 %v13144_v62, %v7642_v49  ;;  %v7638_v23 = vpop.xlane.xlu1 %7637  ;;  %v7657_v27 = vsel %vm582_vm1, %v7651_v26, 0.0 }
0x3f63   :  { %v7644_v37 = vmul.f32 0.03125, %v7638_v23  ;;  %v7629_v34 = vpop.xlane.xlu0 %7628  ;;  %7658 = vadd.xlane.f32.xlu0 %v7657_v27 }
0x3f64   :  { %v7641_v47 = vmul.f32 0.03125, %v7629_v34  ;;  %v7654_v13 = vmul.f32 %v13175_v30, %v13175_v30 }
0x3f65   :  { %v13181_v52 = vsub.f32 %v13152_v33, %v7644_v37 }
0x3f66   :  { %v13184_v44 = vsub.f32 %v13150_v8, %v7641_v47  ;;  %v7666_v53 = vsel %vm582_vm1, %v7654_v13, 0.0 }
0x3f67   :  { %v7635_v6 = vpop.xlane.xlu0 %7634  ;;  %7667 = vadd.xlane.f32.xlu1 %v7666_v53  ;;  %v7656_v51 = vmul.f32 %v13181_v52, %v13181_v52 }
0x3f68   :  { %v7643_v1 = vmul.f32 0.03125, %v7635_v6  ;;  %v7653_v48 = vmul.f32 %v13184_v44, %v13184_v44 }
0x3f69   :  { %v7672_v40 = vsel %vm582_vm1, %v7656_v51, 0.0 }
0x3f6a   :  { %v13193_v61 = vsub.f32 %v13157_v20, %v7643_v1  ;;  %v7663_v57 = vsel %vm582_vm1, %v7653_v48, 0.0  ;;  %v7909_v1 = vld [vmem:[%s13416_s15 + $0x70] sm:$0xff]  ;;  %v7908_v48 = vld [vmem:[%s13416_s15 + $0x68] sm:$0xff] }
0x3f6b   :  { %7664 = vadd.xlane.f32.xlu0 %v7663_v57  ;;  %7673 = vadd.xlane.f32.xlu1 %v7672_v40  ;;  %v7907_v40 = vld [vmem:[%s13416_s15 + $0x60] sm:$0xff]  ;;  %v7905_v57 = vld [vmem:[%s13416_s15 + $0x50] sm:$0xff] }
0x3f6c   :  { %v7655_v19 = vmul.f32 %v13193_v61, %v13193_v61 }
0x3f6e   :  { %v7669_v2 = vsel %vm582_vm1, %v7655_v19, 0.0  ;;  %v7904_v19 = vld [vmem:[%s13416_s15 + $0x48] sm:$0xff] }
0x3f6f   :  { %7670 = vadd.xlane.f32.xlu0 %v7669_v2  ;;  %v7903_v2 = vld [vmem:[%s13416_s15 + $0x40] sm:$0xff] }
0x3fea   :  { %v7662_v45 = vpop.xlane.xlu1 %7661 }
0x3feb   :  { %v7676_v24 = vmul.f32 0.03125, %v7662_v45  ;;  %v7898_v45 = vld [vmem:[%s13416_s15 + $0x18] sm:$0xff] }
0x3fec   :  { %v7659_v46 = vpop.xlane.xlu0 %7658 }
0x3fed   :  { %v7682_v7 = vadd.f32 1e-05, %v7676_v24  ;;  %v7675_v42 = vmul.f32 0.03125, %v7659_v46  ;;  %v7897_v24 = vld [vmem:[%s13416_s15 + $0x10] sm:$0xff]  ;;  %v7896_v46 = vld [vmem:[%s13416_s15 + $0x8] sm:$0xff] }
0x3fef   :  { %10494 = vrsqrt.f32 %v7682_v7  ;;  %v7681_v5 = vadd.f32 1e-05, %v7675_v42  ;;  %v7895_v7 = vld [vmem:[%s13416_s15] sm:$0xff]  ;;  %v8749_v42 = vld [vmem:[#allocation24] ss:$0 sm:$0xff] }
0x3ff0   :  { %v7668_v17 = vpop.xlane.xlu1 %7667 }
0x3ff1   :  { %10496 = vrsqrt.f32 %v7681_v5  ;;  %v7678_v4 = vmul.f32 0.03125, %v7668_v17 }
0x3ff3   :  { %v7684_v50 = vadd.f32 1e-05, %v7678_v4 }
0x3ff4   :  { %v7665_v10 = vpop.xlane.xlu0 %7664  ;;  %v7674_v21 = vpop.xlane.xlu1 %7673 }
0x3ff5   :  { %10498 = vrsqrt.f32 %v7684_v50  ;;  %v7677_v39 = vmul.f32 0.03125, %v7665_v10  ;;  %v7680_v31 = vmul.f32 0.03125, %v7674_v21 }
0x3ff7   :  { %v7683_v58 = vadd.f32 1e-05, %v7677_v39  ;;  %v7686_v36 = vadd.f32 1e-05, %v7680_v31 }
0x3ff8   :  { %v7671_v32 = vpop.xlane.xlu0 %7670 }
0x3ff9   :  { %10500 = vrsqrt.f32 %v7683_v58  ;;  %v7679_v56 = vmul.f32 0.03125, %v7671_v32 }
0x3ffa   :  { %10502 = vrsqrt.f32 %v7686_v36 }
0x3ffb   :  { %v7685_v60 = vadd.f32 1e-05, %v7679_v56 }
0x3ffc   :  { %v10495_v11 = vpop.eup %10494 }
0x3ffd   :  { %v7694_v22 = vmul.f32 %v10495_v11, %v13164_v59  ;;  %10504 = vrsqrt.f32 %v7685_v60 }
0x3ffe   :  { %v10497_v35 = vpop.eup %10496 }
0x3fff   :  { %v7693_v29 = vmul.f32 %v10497_v35, %v13167_v14  ;;  %v7706_v28 = vmul.f32 %v8747_v18, %v7694_v22 }
0x4001   :  { %v7705_v16 = vmul.f32 %v8747_v18, %v7693_v29  ;;  %v7718_v49 = vadd.f32 %v8748_v63, %v7706_v28 }
0x4002   :  { %v10499_v55 = vpop.eup %10498 }
0x4003   :  { %v7717_v15 = vadd.f32 %v8748_v63, %v7705_v16  ;;  %v7696_v38 = vmul.f32 %v10499_v55, %v13175_v30 }
0x4005   :  { %9959 = vmatprep.mubr.msk.f32.mxu0 %vm582_vm1, %v7717_v15  ;;  %v7708_v27 = vmul.f32 %v8747_v18, %v7696_v38 }
0x4006   :  { %v10501_v26 = vpop.eup %10500  ;;  %9960 = vmatmul.mubr.msk.f32.vlgmr.msra.gmra.mxu0 %vm582_vm1, %v7718_v49 }
0x4007   :  { %v10503_v23 = vpop.eup %10502  ;;  %v7695_v59 = vmul.f32 %v10501_v26, %v13184_v44  ;;  %v7720_v53 = vadd.f32 %v8748_v63, %v7708_v27 }
0x4008   :  { %v7698_v14 = vmul.f32 %v10503_v23, %v13181_v52  ;;  %v7910_v52 = vld [vmem:[%s13416_s15 + $0x78] sm:$0xff] }
0x4009   :  { %v7707_v37 = vmul.f32 %v8747_v18, %v7695_v59  ;;  %9968 = vmatprep.subr.mxu1 %v7910_v52 }
0x400a   :  { %v10505_v34 = vpop.eup %10504  ;;  %v7710_v30 = vmul.f32 %v8747_v18, %v7698_v14  ;;  %9969 = vmatpush3.msra.mxu1 %v7910_v52 }
0x400b   :  { %v7719_v47 = vadd.f32 %v8748_v63, %v7707_v37  ;;  %v7697_v13 = vmul.f32 %v10505_v34, %v13193_v61  ;;  %9970 = vmatprep.subr.mxu1 %v7909_v1  ;;  %v7906_v61 = vld [vmem:[%s13416_s15 + $0x58] sm:$0xff] }
0x400c   :  { %v7722_v51 = vadd.f32 %v8748_v63, %v7710_v30  ;;  %9971 = vmatpush3.msra.mxu1 %v7909_v1 }
0x400d   :  { %9962 = vmatprep.mubr.msk.f32.mxu0 %vm582_vm1, %v7719_v47  ;;  %v7709_v6 = vmul.f32 %v8747_v18, %v7697_v13  ;;  %9972 = vmatprep.subr.mxu1 %v7908_v48 }
0x400e   :  { %9963 = vmatmul.mubr.msk.f32.gmra.mxu0 %vm582_vm1, %v7720_v53  ;;  %9973 = vmatpush3.msra.mxu1 %v7908_v48 }
0x400f   :  { %v7721_v44 = vadd.f32 %v8748_v63, %v7709_v6  ;;  %9974 = vmatprep.subr.mxu1 %v7907_v40 }
0x4010   :  { %9975 = vmatpush3.msra.mxu1 %v7907_v40 }
0x4011   :  { %9965 = vmatprep.mubr.msk.f32.mxu0 %vm582_vm1, %v7721_v44  ;;  %9976 = vmatprep.subr.mxu1 %v7906_v61 }
0x4012   :  { %9966 = vmatmul.mubr.msk.f32.gmra.mxu0 %vm582_vm1, %v7722_v51  ;;  %9977 = vmatpush3.msra.mxu1 %v7906_v61 }
0x4013   :  { %10021 = vmatprep.mubr.msk.f32.mxu0 %vm11032_vm9, %v11017_v0  ;;  %9978 = vmatprep.subr.mxu1 %v7905_v57 }
0x4014   :  { %9979 = vmatpush3.msra.mxu1 %v7905_v57 }
0x4015   :  { %9980 = vmatprep.subr.mxu1 %v7904_v19 }
0x4016   :  { %9981 = vmatpush3.msra.mxu1 %v7904_v19 }
0x4017   :  { %9982 = vmatprep.subr.mxu1 %v7903_v2 }
0x4018   :  { %9983 = vmatpush3.msra.mxu1 %v7903_v2 }
0x4019   :  { %9984 = vmatprep.subr.mxu1 %v7902_v41 }
0x401a   :  { %9985 = vmatpush3.msra.mxu1 %v7902_v41 }
0x401b   :  { %9986 = vmatprep.subr.mxu1 %v7901_v25 }
0x401c   :  { %9987 = vmatpush3.msra.mxu1 %v7901_v25 }
0x401d   :  { %9988 = vmatprep.subr.mxu1 %v7900_v3 }
0x401e   :  { %9989 = vmatpush3.msra.mxu1 %v7900_v3 }
0x401f   :  { %9990 = vmatprep.subr.mxu1 %v7899_v9 }
0x4020   :  { %9991 = vmatpush3.msra.mxu1 %v7899_v9 }
0x4021   :  { %9992 = vmatprep.subr.mxu1 %v7898_v45 }
0x4022   :  { %9993 = vmatpush3.msra.mxu1 %v7898_v45 }
0x4023   :  { %9994 = vmatprep.subr.mxu1 %v7897_v24 }
0x4024   :  { %9995 = vmatpush3.msra.mxu1 %v7897_v24  ;;  %v8762_v24 = vld [vmem:[#allocation26] ss:$0 sm:$0xff] }
0x4025   :  { %9996 = vmatprep.subr.mxu1 %v7896_v46 }
0x4026   :  { %9997 = vmatpush3.msra.mxu1 %v7896_v46 }
0x4027   :  { %9998 = vmatprep.subr.mxu1 %v7895_v7 }
0x4028   :  { %9999 = vmatpush3.msra.mxu1 %v7895_v7 }
0x40c6   :  { %v9961_v5 = vpop.f32.mrf.mxu0 }
0x40c7   :  { %v7824_v17 = vadd.f32 %v9961_v5, %v8749_v42 }
0x40c8   :  { %v7818_v4 = vpop.f32.mrf.mxu0 }
0x40c9   :  { %v8757_v50 = vmul.f32 -1.702, %v7824_v17  ;;  %v7819_v10 = vadd.f32 %v8749_v42, %v7818_v4 }
0x40cb   :  { %v7861_v21 = vmul.f32 1.442695, %v8757_v50  ;;  %v8756_v39 = vmul.f32 -1.702, %v7819_v10 }
0x40cd   :  { %10506 = vpow2.f32 %v7861_v21  ;;  %v7859_v31 = vmul.f32 1.442695, %v8756_v39 }
0x40ce   :  { %v9964_v58 = vpop.f32.mrf.mxu0 }
0x40cf   :  { %10508 = vpow2.f32 %v7859_v31  ;;  %v7834_v36 = vadd.f32 %v9964_v58, %v8749_v42 }
0x40d0   :  { %v7828_v32 = vpop.f32.mrf.mxu0 }
0x40d1   :  { %v8759_v56 = vmul.f32 -1.702, %v7834_v36  ;;  %v7829_v60 = vadd.f32 %v8749_v42, %v7828_v32 }
0x40d2   :  { %v9967_v11 = vpop.f32.mrf.mxu0 }
0x40d3   :  { %v7865_v18 = vmul.f32 1.442695, %v8759_v56  ;;  %v8758_v22 = vmul.f32 -1.702, %v7829_v60  ;;  %v7844_v35 = vadd.f32 %v9967_v11, %v8749_v42 }
0x40d4   :  { %v7838_v29 = vpop.f32.mrf.mxu0 }
0x40d5   :  { %10510 = vpow2.f32 %v7865_v18  ;;  %v7863_v28 = vmul.f32 1.442695, %v8758_v22  ;;  %v8761_v63 = vmul.f32 -1.702, %v7844_v35  ;;  %v7839_v16 = vadd.f32 %v8749_v42, %v7838_v29 }
0x40d7   :  { %10512 = vpow2.f32 %v7863_v28  ;;  %v7869_v55 = vmul.f32 1.442695, %v8761_v63  ;;  %v8760_v15 = vmul.f32 -1.702, %v7839_v16 }
0x40d9   :  { %10514 = vpow2.f32 %v7869_v55  ;;  %v7867_v49 = vmul.f32 1.442695, %v8760_v15 }
0x40da   :  { %v10507_v38 = vpop.eup %10506 }
0x40db   :  { %v7872_v26 = vadd.f32 1.0, %v10507_v38  ;;  %10516 = vpow2.f32 %v7867_v49 }
0x40dc   :  { %v10509_v23 = vpop.eup %10508 }
0x40dd   :  { %v7871_v59 = vadd.f32 1.0, %v10509_v23  ;;  %10518 = vrcp.f32 %v7872_v26 }
0x40df   :  { %10520 = vrcp.f32 %v7871_v59 }
0x40e2   :  { %v10511_v27 = vpop.eup %10510 }
0x40e3   :  { %v7874_v14 = vadd.f32 1.0, %v10511_v27 }
0x40e4   :  { %v10513_v37 = vpop.eup %10512 }
0x40e5   :  { %v7873_v34 = vadd.f32 1.0, %v10513_v37  ;;  %10522 = vrcp.f32 %v7874_v14 }
0x40e6   :  { %v10515_v47 = vpop.eup %10514 }
0x40e7   :  { %10524 = vrcp.f32 %v7873_v34  ;;  %v7876_v13 = vadd.f32 1.0, %v10515_v47 }
0x40e8   :  { %v10517_v53 = vpop.eup %10516 }
0x40e9   :  { %v7875_v30 = vadd.f32 1.0, %v10517_v53  ;;  %10526 = vrcp.f32 %v7876_v13 }
0x40ea   :  { %v10519_v6 = vpop.eup %10518 }
0x40eb   :  { %10528 = vrcp.f32 %v7875_v30  ;;  %v7890_v52 = vmul.f32 %v10519_v6, %v7824_v17 }
0x40ec   :  { %v10521_v44 = vpop.eup %10520 }
0x40ed   :  { %v7889_v51 = vmul.f32 %v10521_v44, %v7819_v10 }
0x40ef   :  { %10000 = vmatprep.mubr.f32.mxu1 %v7889_v51 }
0x40f0   :  { %10001 = vmatmul.mubr.f32.vlgmr.msra.gmra.mxu1 %v7890_v52 }
0x40f2   :  { %v10523_v1 = vpop.eup %10522 }
0x40f3   :  { %v7892_v61 = vmul.f32 %v10523_v1, %v7834_v36  ;;  %v8274_v1 = vmul.f32 %v11991_v54, %v11991_v54 }
0x40f4   :  { %v10525_v48 = vpop.eup %10524 }
0x40f5   :  { %v7891_v40 = vmul.f32 %v10525_v48, %v7829_v60 }
0x40f6   :  { %v10527_v57 = vpop.eup %10526 }
0x40f7   :  { %10003 = vmatprep.mubr.f32.mxu1 %v7891_v40  ;;  %v7894_v41 = vmul.f32 %v10527_v57, %v7844_v35  ;;  %v8275_v40 = vsel %vm586_vm2, %v8274_v1, 0.0 }
0x40f8   :  { %v10529_v19 = vpop.eup %10528  ;;  %10004 = vmatmul.mubr.f32.gmra.mxu1 %v7892_v61 }
0x40f9   :  { %v7893_v2 = vmul.f32 %v10529_v19, %v7839_v16 }
0x40fb   :  { %10006 = vmatprep.mubr.f32.mxu1 %v7893_v2 }
0x40fc   :  { %10007 = vmatmul.mubr.f32.gmra.mxu1 %v7894_v41 }
0x41b0   :  { %v10002_v25 = vpop.f32.mrf.mxu1 }
0x41b1   :  { %v7990_v10 = vadd.f32 %v10002_v25, %v8762_v24 }
0x41b2   :  { %v7984_v3 = vpop.f32.mrf.mxu1 }
0x41b3   :  { %v7985_v58 = vadd.f32 %v8762_v24, %v7984_v3  ;;  %v8014_v56 = vadd.f32 %v7990_v10, %v13134_v43 }
0x41b8   :  { %v10005_v9 = vpop.f32.mrf.mxu1 }
0x41b9   :  { %v8000_v7 = vadd.f32 %v10005_v9, %v8762_v24 }
0x41ba   :  { %v7994_v45 = vpop.f32.mrf.mxu1 }
0x41bb   :  { %v7995_v17 = vadd.f32 %v8762_v24, %v7994_v45  ;;  %v8016_v21 = vadd.f32 %v8000_v7, %v13144_v62 }
0x41bc   :  { %v10008_v46 = vpop.f32.mrf.mxu1 }
0x41bd   :  { %v8010_v42 = vadd.f32 %v10008_v46, %v8762_v24  ;;  %v8015_v36 = vadd.f32 %v7995_v17, %v13150_v8  ;;  %v8030_v60 = vsel %vm582_vm1, %v8016_v21, 0.0 }
0x41be   :  { %v8004_v5 = vpop.f32.mrf.mxu1 }
0x41bf   :  { %v8018_v4 = vadd.f32 %v8010_v42, %v13152_v33  ;;  %v8005_v50 = vadd.f32 %v8762_v24, %v8004_v5  ;;  %v8013_v33 = vadd.f32 %v7985_v58, %v13137_v12  ;;  %v8027_v62 = vsel %vm582_vm1, %v8015_v36, 0.0 }
0x41c1   :  { %v8017_v39 = vadd.f32 %v8005_v50, %v13157_v20  ;;  %v8036_v31 = vsel %vm582_vm1, %v8018_v4, 0.0  ;;  %v8024_v20 = vsel %vm582_vm1, %v8014_v56, 0.0  ;;  %v8021_v11 = vsel %vm582_vm1, %v8013_v33, 0.0 }
0x41c2   :  { %8037 = vadd.xlane.f32.xlu0 %v8036_v31 }
0x41c3   :  { %v8033_v32 = vsel %vm582_vm1, %v8017_v39, 0.0 }
0x41c4   :  { %8034 = vadd.xlane.f32.xlu1 %v8033_v32 }
0x41c6   :  { %8031 = vadd.xlane.f32.xlu0 %v8030_v60 }
0x41c8   :  { %8028 = vadd.xlane.f32.xlu1 %v8027_v62 }
0x41ca   :  { %8025 = vadd.xlane.f32.xlu0 %v8024_v20 }
0x41cc   :  { %8022 = vadd.xlane.f32.xlu1 %v8021_v11 }
0x424b   :  { %v8038_v8 = vpop.xlane.xlu0 %8037 }
0x424c   :  { %v8044_v18 = vmul.f32 0.03125, %v8038_v8 }
0x424d   :  { %v8035_v22 = vpop.xlane.xlu1 %8034 }
0x424e   :  { %v8050_v35 = vsub.f32 %v8018_v4, %v8044_v18  ;;  %v8043_v29 = vmul.f32 0.03125, %v8035_v22 }
0x424f   :  { %v8032_v43 = vpop.xlane.xlu0 %8031 }
0x4250   :  { %v13246_v28 = vsub.f32 %v8017_v39, %v8043_v29  ;;  %v8042_v63 = vmul.f32 0.03125, %v8032_v43  ;;  %v8056_v16 = vmul.f32 %v8050_v35, %v8050_v35  ;;  %v8763_v39 = vld [vmem:[#allocation27] ss:$0 sm:$0xff] }
0x4251   :  { %v8029_v12 = vpop.xlane.xlu1 %8028 }
0x4252   :  { %v13248_v55 = vsub.f32 %v8016_v21, %v8042_v63  ;;  %v8041_v15 = vmul.f32 0.03125, %v8029_v12  ;;  %v8072_v49 = vsel %vm582_vm1, %v8056_v16, 0.0  ;;  %v8055_v38 = vmul.f32 %v13246_v28, %v13246_v28 }
0x4253   :  { %8073 = vadd.xlane.f32.xlu0 %v8072_v49  ;;  %v8026_v26 = vpop.xlane.xlu0 %8025 }
0x4254   :  { %v8047_v23 = vsub.f32 %v8015_v36, %v8041_v15  ;;  %v8040_v59 = vmul.f32 0.03125, %v8026_v26  ;;  %v8069_v27 = vsel %vm582_vm1, %v8055_v38, 0.0  ;;  %v8054_v14 = vmul.f32 %v13248_v55, %v13248_v55  ;;  %v8764_v36 = vld [vmem:[#allocation29] ss:$0 sm:$0xff] }
0x4255   :  { %8070 = vadd.xlane.f32.xlu1 %v8069_v27  ;;  %v8023_v37 = vpop.xlane.xlu1 %8022  ;;  %v8123_v26 = vld [vmem:[%s13417_s4] sm:$0x7]  ;;  %v8198_v27 = vld [vmem:[%s11357_s5 + $0x8] sm:$0xff] }
0x4256   :  { %v8046_v34 = vsub.f32 %v8014_v56, %v8040_v59  ;;  %v8039_v47 = vmul.f32 0.03125, %v8023_v37  ;;  %v8066_v13 = vsel %vm582_vm1, %v8054_v14, 0.0  ;;  %v8053_v53 = vmul.f32 %v8047_v23, %v8047_v23  ;;  %v8199_v59 = vld [vmem:[%s11357_s5 + $0x10] sm:$0xff]  ;;  %v8197_v14 = vld [vmem:[%s11357_s5] sm:$0xff] }
0x4257   :  { %8067 = vadd.xlane.f32.xlu0 %v8066_v13 }
0x4258   :  { %v13257_v30 = vsub.f32 %v8013_v33, %v8039_v47  ;;  %v8063_v6 = vsel %vm582_vm1, %v8053_v53, 0.0  ;;  %v8052_v44 = vmul.f32 %v8046_v34, %v8046_v34 }
0x4259   :  { %8064 = vadd.xlane.f32.xlu1 %v8063_v6 }
0x425a   :  { %v8060_v51 = vsel %vm582_vm1, %v8052_v44, 0.0  ;;  %v8051_v52 = vmul.f32 %v13257_v30, %v13257_v30 }
0x425b   :  { %8061 = vadd.xlane.f32.xlu0 %v8060_v51 }
0x425c   :  { %v8057_v48 = vsel %vm582_vm1, %v8051_v52, 0.0 }
0x425d   :  { %8058 = vadd.xlane.f32.xlu1 %v8057_v48 }
0x4261   :  { %8276 = vadd.xlane.f32.xlu1 %v8275_v40 }
0x42dc   :  { %v8074_v61 = vpop.xlane.xlu0 %8073 }
0x42dd   :  { %v8080_v57 = vmul.f32 0.03125, %v8074_v61 }
0x42de   :  { %v8071_v19 = vpop.xlane.xlu1 %8070 }
0x42df   :  { %v8086_v2 = vadd.f32 1e-05, %v8080_v57  ;;  %v8079_v41 = vmul.f32 0.03125, %v8071_v19 }
0x42e0   :  { %v8068_v25 = vpop.xlane.xlu0 %8067 }
0x42e1   :  { %10530 = vrsqrt.f32 %v8086_v2  ;;  %v8085_v3 = vadd.f32 1e-05, %v8079_v41  ;;  %v8078_v9 = vmul.f32 0.03125, %v8068_v25 }
0x42e2   :  { %v8065_v45 = vpop.xlane.xlu1 %8064 }
0x42e3   :  { %10532 = vrsqrt.f32 %v8085_v3  ;;  %v8084_v24 = vadd.f32 1e-05, %v8078_v9  ;;  %v8077_v46 = vmul.f32 0.03125, %v8065_v45 }
0x42e4   :  { %v8062_v7 = vpop.xlane.xlu0 %8061 }
0x42e5   :  { %10534 = vrsqrt.f32 %v8084_v24  ;;  %v8083_v42 = vadd.f32 1e-05, %v8077_v46  ;;  %v8076_v5 = vmul.f32 0.03125, %v8062_v7 }
0x42e6   :  { %v8059_v17 = vpop.xlane.xlu1 %8058 }
0x42e7   :  { %10536 = vrsqrt.f32 %v8083_v42  ;;  %v8082_v4 = vadd.f32 1e-05, %v8076_v5  ;;  %v8075_v50 = vmul.f32 0.03125, %v8059_v17 }
0x42e9   :  { %10538 = vrsqrt.f32 %v8082_v4  ;;  %v8081_v10 = vadd.f32 1e-05, %v8075_v50 }
0x42ea   :  { %v8277_v6 = vpop.xlane.xlu1 %8276 }
0x42eb   :  { %10540 = vrsqrt.f32 %v8081_v10 }
0x42ee   :  { %v10531_v21 = vpop.eup %10530 }
0x42ef   :  { %v8098_v31 = vmul.f32 %v10531_v21, %v8050_v35 }
0x42f0   :  { %v10533_v58 = vpop.eup %10532 }
0x42f1   :  { %v8110_v32 = vmul.f32 %v8763_v39, %v8098_v31  ;;  %v8097_v56 = vmul.f32 %v10533_v58, %v13246_v28 }
0x42f2   :  { %v10535_v60 = vpop.eup %10534 }
0x42f3   :  { %v8122_v33 = vadd.f32 %v8764_v36, %v8110_v32  ;;  %v8109_v62 = vmul.f32 %v8763_v39, %v8097_v56  ;;  %v8096_v20 = vmul.f32 %v10535_v60, %v13248_v55 }
0x42f4   :  { %v10537_v11 = vpop.eup %10536 }
0x42f5   :  { %10010 = vmatpush3.msra.mxu0 %v8122_v33  ;;  %v8121_v8 = vadd.f32 %v8764_v36, %v8109_v62  ;;  %v8108_v18 = vmul.f32 %v8763_v39, %v8096_v20  ;;  %v8095_v22 = vmul.f32 %v10537_v11, %v8047_v23  ;;  %v8200_v23 = vld [vmem:[%s11357_s5 + $0x18] sm:$0xff]  ;;  %s11033_s5 = smov [#allocation30]  }
0x42f6   :  { %v10539_v29 = vpop.eup %10538  ;;  %10011 = vmatprep.subr.mxu0 %v11017_v0  ;;  %s8375_s14 = sshll.u32 %s11033_s5, 4  ;;  %s8376_s14 = int_to_ptr.vmem [resolvable:$true] %s8375_s14 }
0x42f7   :  { %10012 = vmatpush3.msra.mxu0 %v8121_v8  ;;  %v8120_v35 = vadd.f32 %v8764_v36, %v8108_v18  ;;  %v8107_v43 = vmul.f32 %v8763_v39, %v8095_v22  ;;  %v8094_v63 = vmul.f32 %v10539_v29, %v8046_v34  ;;  %s10894_s20 = scalar_lea.vmem %s8376_s14, 32  ;;  %p10899_p2 = scmp.lt.s32.totalorder %s8376_s14, %s8376_s14 }
0x42f8   :  { %v10541_v28 = vpop.eup %10540  ;;  %10013 = vmatprep.subr.mxu0 %v11017_v0  ;;  %p10895_p1 = scmp.ne.s32.totalorder %s8376_s14, %s10894_s20  ;;  %p10900_p3 = scmp.lt.s32.totalorder %s10894_s20, %s10894_s20 }
0x42f9   :  { %10014 = vmatpush3.msra.mxu0 %v8120_v35  ;;  %v8119_v16 = vadd.f32 %v8764_v36, %v8107_v43  ;;  %v8106_v12 = vmul.f32 %v8763_v39, %v8094_v63  ;;  %v8093_v55 = vmul.f32 %v10541_v28, %v13257_v30 }
0x42fa   :  { %10015 = vmatprep.subr.mxu0 %v11017_v0  ;;  %p10901_p4 = por %p10900_p3, %p10899_p2 }
0x42fb   :  { %10016 = vmatpush3.msra.mxu0 %v8119_v16  ;;  %v8118_v15 = vadd.f32 %v8764_v36, %v8106_v12  ;;  %v8105_v49 = vmul.f32 %v8763_v39, %v8093_v55 }
0x42fc   :  { %10017 = vmatprep.subr.mxu0 %v11017_v0  ;;  %p10902_p5 = pnand %p10901_p4, %p10895_p1 }
0x42fd   :  { %10018 = vmatpush3.msra.mxu0 %v8118_v15  ;;  %v8117_v38 = vadd.f32 %v8764_v36, %v8105_v49 }
0x42fe   :  { %10019 = vmatprep.subr.mxu0 %v11017_v0 }
0x42ff   :  { %10020 = vmatpush3.msra.mxu0 %v8117_v38 }
0x4300   :  { %10022 = vmatmul.mubr.msk.f32.vlgmr.msra.gmra.mxu0 %vm3883_vm10, %v8123_v26  ;;  %10024 = vmatprep.subr.mxu0 %v11017_v0 }
0x4301   :  { %10025 = vmatpush3.msra.mxu0 %v8200_v23  ;;  %10032 = vmatprep.mubr.msk.f32.mxu0 %vm11032_vm9, %v11017_v0 }
0x4302   :  { %10026 = vmatprep.subr.mxu0 %v11017_v0 }
0x4303   :  { %10027 = vmatpush3.msra.mxu0 %v8199_v59 }
0x4304   :  { %10028 = vmatprep.subr.mxu0 %v11017_v0 }
0x4305   :  { %10029 = vmatpush3.msra.mxu0 %v8198_v27 }
0x4306   :  { %10030 = vmatprep.subr.mxu0 %v11017_v0 }
0x4307   :  { %10031 = vmatpush3.msra.mxu0 %v8197_v14 }
0x4308   :  { %10035 = vmatprep.subr.mxu0 %v11017_v0 }
0x43c0   :  { %v8193_v37 = vpop.f32.mrf.mxu0 }
0x43c1   :  { %10033 = vmatmul.mubr.msk.f32.vlgmr.msra.gmra.mxu0 %vm582_vm1, %v8193_v37 }
0x43c2   :  { %v10023_v34 = vpop.f32.mrf.mxu0  ;;  %10037 = vmatprep.mubr.msk.f32.mxu0 %vm11032_vm9, %v11017_v0  ;;  %v8364_v0 = vstv %s11367_s9 }
0x4481   :  { %v8270_v47 = vpop.f32.mrf.mxu0 }
0x4482   :  { %v8280_v13 = vmul.f32 %v8270_v47, %v8270_v47 }
0x4483   :  { %v10034_v53 = vpop.f32.mrf.mxu0 }
0x4484   :  { %v8282_v30 = vsel %vm8281_vm11, %v8280_v13, 0.0 }
0x4485   :  { %8283 = vadd.xlane.f32.xlu0 %v8282_v30 }
0x450e   :  { %v8284_v44 = vpop.xlane.xlu0 %8283 }
0x450f   :  { %10542 = vrsqrt.f32 %v8284_v44 }
0x4510   :  { %10544 = vrsqrt.f32 %v8277_v6 }
0x451c   :  { %v10543_v51 = vpop.eup %10542 }
0x451d   :  { %v10545_v52 = vpop.eup %10544  ;;  %v8286_v1 = vmul.f32 %v10543_v51, %v8270_v47 }
0x451e   :  { %v8279_v48 = vmul.f32 %v10545_v52, %v11991_v54 }
0x451f   :  { %10036 = vmatpush3.xpose.msk.msra.mxu0 %vm582_vm1, %v8286_v1 }
0x4522   :  { %10038 = vmatmul.mubr.msk.f32.vlgmr.msra.gmra.mxu0 %vm582_vm1, %v8279_v48 }
0x45e2   :  { %v8360_v40 = vpop.f32.mrf.mxu0 }
0x45e3   :  { %v8365_v61 = vmul.f32 %v8364_v0, %v8360_v40 }
0x45e4   :  { %v10039_v57 = vpop.f32.mrf.mxu0 }
0x45e5   :  { %v8367_v19 = vsel %vm8366_vm12, %v8365_v61, 0.0 }
0x45e6   :  { %8368 = vst [vmem:[#allocation30] sm:$0x3] %v8367_v19 }
0x45e7   :  { %10905 = shalt.err (!%p10902_p5)
}
0x45e8   :  { %8378 = dma.vmem_to_hbm [thread:$0]  %s8376_s14, 32, %s11372_s13, [#allocation5]  }
0x45e9   :  { %10932 = dma.done.wait [#allocation5], 32  }
0x45ea   :  { %10933 = vsyncadd [#allocation5], 4294967264 }
0x45eb   :  { %8382 = vsyncpa [#allocation4], 1 }
0x45ec   :  { %8383 = vsyncpa [#allocation7], 1 }
0x45ed   :  { %8384 = vsyncpa [#allocation10], 1 }
0x45ee   :  { %8385 = vsyncpa [#allocation13], 1 }
0x45ef   :  { %8386 = vsyncpa [#allocation16], 1 }
0x45f0   :  { %8387 = vsyncpa [#allocation19], 1 }
0x45f1   :  { %8388 = vsyncpa [#allocation22], 1 }
0x45f2   :  { %8389 = vsyncpa [#allocation25], 1 }
0x45f3   :  { %8390 = vsyncpa [#allocation28], 1 }
0x45f4   :  { %8391 = vsyncpa [#allocation5], 1 }

</bundles_post_ra>
